<compile_context>
chip_gen: v6e
topology: v6e:2x2x1
jax: 0.10.0
libtpu: 0.0.40
codegen_flags: <defaults>
</compile_context>

<pallas_src>
import jax
import jax.numpy as jnp
from jax import lax
from jax.experimental import pallas as pl
from jax.experimental.pallas import tpu as pltpu


def _round_up(x, m):
    return (x + m - 1) // m * m


_TAPS = tuple((dy, dx) for dy in range(3) for dx in range(3))


def _double_conv_kernel(x_ref, w1_ref, s1_ref, t1_ref, w2_ref, s2_ref, t2_ref,
                        o_ref, xpad_ref, mid_ref, col1_ref, col2_ref):
    # x_ref   : (1, H, W, Cinp)    bf16 un-padded input tile (one batch element)
    # w1_ref  : (9*Cinp, Coutp)    bf16 conv1 weights, taps stacked on K
    # s1/t1   : (1, Coutp)         f32 folded BN1 scale / shift (incl. conv bias)
    # w2_ref  : (9*Coutp, Coutp)   bf16 conv2 weights
    # s2/t2   : (1, Coutp)         f32 folded BN2 scale / shift
    # o_ref   : (1, H, W, Coutp)   f32 output tile
    # xpad_ref: (H+2, W+2, Cinp)   f32 scratch — zero halo + input interior
    # mid_ref : (H+2, W+2, Coutp)  f32 scratch — zero halo + conv1 output
    # col1_ref: (H*W, 9*Cinp)      bf16 im2col buffer for conv1
    # col2_ref: (H*W, 9*Coutp)     bf16 im2col buffer for conv2
    _, H, W, Coutp = o_ref.shape
    Cinp = x_ref.shape[-1]
    Hp, Wp = H + 2, W + 2

    def zero_halo(ref, c):
        # Only the 1-pixel border; the interior is fully overwritten below.
        ref[0:1, :, :] = jnp.zeros((1, Wp, c), ref.dtype)
        ref[Hp - 1:Hp, :, :] = jnp.zeros((1, Wp, c), ref.dtype)
        ref[:, 0:1, :] = jnp.zeros((Hp, 1, c), ref.dtype)
        ref[:, Wp - 1:Wp, :] = jnp.zeros((Hp, 1, c), ref.dtype)

    zero_halo(xpad_ref, Cinp)
    zero_halo(mid_ref, Coutp)

    # In-VMEM zero pad of this batch element (no padded HBM copy).
    xpad_ref[1:H + 1, 1:W + 1, :] = x_ref[0].astype(jnp.float32)

    # ---- conv1: im2col then a single K = 9*Cinp MXU matmul ----
    for t, (dy, dx) in enumerate(_TAPS):
        col1_ref[:, t * Cinp:(t + 1) * Cinp] = (
            xpad_ref[dy:dy + H, dx:dx + W, :]
            .reshape(H * W, Cinp).astype(jnp.bfloat16))
    acc1 = jnp.dot(col1_ref[...], w1_ref[...],
                   preferred_element_type=jnp.float32)
    y1 = jnp.maximum(acc1 * s1_ref[0] + t1_ref[0], 0.0)   # folded bias+BN, ReLU
    mid_ref[1:H + 1, 1:W + 1, :] = y1.reshape(H, W, Coutp)

    # ---- conv2: same structure, K = 9*Coutp ----
    for t, (dy, dx) in enumerate(_TAPS):
        col2_ref[:, t * Coutp:(t + 1) * Coutp] = (
            mid_ref[dy:dy + H, dx:dx + W, :]
            .reshape(H * W, Coutp).astype(jnp.bfloat16))
    acc2 = jnp.dot(col2_ref[...], w2_ref[...],
                   preferred_element_type=jnp.float32)
    y2 = jnp.maximum(acc2 * s2_ref[0] + t2_ref[0], 0.0)
    o_ref[0] = y2.reshape(H, W, Coutp).astype(o_ref.dtype)


def double_conv_pallas(x_nchw, params):
    """Forward pass of DoubleConv. x_nchw: (N, Cin, H, W) float32."""
    (w1, b1, g1, be1, m1, v1, w2, b2, g2, be2, m2, v2) = params
    eps = 1e-5
    N, Cin, H, W = x_nchw.shape
    Cout = w1.shape[0]
    Hp, Wp = H + 2, W + 2

    # Lane-dense channel counts.
    Cinp = _round_up(Cin, 128)
    Coutp = _round_up(Cout, 128)

    # Fold conv bias + BatchNorm (inference) into per-channel scale/shift:
    #   gamma*(conv + b - mean)/sqrt(var+eps) + beta = conv*s + (b*s + beta - mean*s)
    s1 = (g1 / jnp.sqrt(v1 + eps)).astype(jnp.float32)
    t1 = (b1 * s1 + be1 - m1 * s1).astype(jnp.float32)
    s2 = (g2 / jnp.sqrt(v2 + eps)).astype(jnp.float32)
    t2 = (b2 * s2 + be2 - m2 * s2).astype(jnp.float32)

    def pad_last(v, c):
        return jnp.pad(v, [(0, 0)] * (v.ndim - 1) + [(0, c - v.shape[-1])])

    # Weights: PyTorch OIHW -> HWIO -> zero-pad channels -> (9*Cp, Coutp) bf16
    # (tap-major / channel-minor K layout, matching the kernel's im2col).
    w1_hwio = jnp.transpose(w1, (2, 3, 1, 0))
    w1_p = jnp.pad(w1_hwio, ((0, 0), (0, 0), (0, Cinp - Cin), (0, Coutp - Cout)))
    w1_k = w1_p.reshape(9 * Cinp, Coutp).astype(jnp.bfloat16)
    w2_hwio = jnp.transpose(w2, (2, 3, 1, 0))
    w2_p = jnp.pad(w2_hwio, ((0, 0), (0, 0), (0, Coutp - Cout), (0, Coutp - Cout)))
    w2_k = w2_p.reshape(9 * Coutp, Coutp).astype(jnp.bfloat16)

    s1p = pad_last(s1, Coutp).reshape(1, Coutp)
    t1p = pad_last(t1, Coutp).reshape(1, Coutp)
    s2p = pad_last(s2, Coutp).reshape(1, Coutp)
    t2p = pad_last(t2, Coutp).reshape(1, Coutp)

    # NCHW -> NHWC (channels on the lane axis), bf16 feed (halves input DMA),
    # channel pad to 128 lanes. No spatial pad in HBM — done in-kernel.
    x_nhwc = jnp.transpose(x_nchw, (0, 2, 3, 1)).astype(jnp.bfloat16)
    x_p = jnp.pad(x_nhwc, ((0, 0), (0, 0), (0, 0), (0, Cinp - Cin)))

    # Rough per-step VMEM need (double-buffered blocks + scratches); raise the
    # scoped limit when it would exceed the default, cap at v7x-physical 64 MiB.
    est = (2 * (H * W * Cinp * 2 + H * W * Coutp * 4)
           + 2 * ((9 * Cinp + 9 * Coutp) * Coutp * 2 + 4 * Coutp * 4)
           + Hp * Wp * (Cinp + Coutp) * 4
           + H * W * 9 * (Cinp + Coutp) * 2)
    vmem_limit = min(64 * 1024 * 1024, max(32 * 1024 * 1024, int(1.5 * est)))

    out_nhwc = pl.pallas_call(
        _double_conv_kernel,
        out_shape=jax.ShapeDtypeStruct((N, H, W, Coutp), jnp.float32),
        grid_spec=pltpu.PrefetchScalarGridSpec(
            num_scalar_prefetch=0,
            grid=(N,),
            in_specs=[
                pl.BlockSpec((1, H, W, Cinp), lambda n: (n, 0, 0, 0)),
                pl.BlockSpec((9 * Cinp, Coutp), lambda n: (0, 0)),
                pl.BlockSpec((1, Coutp), lambda n: (0, 0)),
                pl.BlockSpec((1, Coutp), lambda n: (0, 0)),
                pl.BlockSpec((9 * Coutp, Coutp), lambda n: (0, 0)),
                pl.BlockSpec((1, Coutp), lambda n: (0, 0)),
                pl.BlockSpec((1, Coutp), lambda n: (0, 0)),
            ],
            out_specs=pl.BlockSpec((1, H, W, Coutp), lambda n: (n, 0, 0, 0)),
            scratch_shapes=[
                pltpu.VMEM((Hp, Wp, Cinp), jnp.float32),
                pltpu.VMEM((Hp, Wp, Coutp), jnp.float32),
                pltpu.VMEM((H * W, 9 * Cinp), jnp.bfloat16),
                pltpu.VMEM((H * W, 9 * Coutp), jnp.bfloat16),
            ],
        ),
        compiler_params=pltpu.CompilerParams(
            dimension_semantics=("parallel",),
            vmem_limit_bytes=vmem_limit),
    )(x_p, w1_k, s1p, t1p, w2_k, s2p, t2p)

    out = out_nhwc[..., :Cout]                     # drop padded channels
    return jnp.transpose(out, (0, 3, 1, 2))        # back to NCHW


def _reference(x_nchw, params):
    """Pure-JAX reference with the same mixed-precision (bf16 in, f32 acc) and
    inference-mode BN semantics as the kernel."""
    (w1, b1, g1, be1, m1, v1, w2, b2, g2, be2, m2, v2) = params
    eps = 1e-5
    x = jnp.transpose(x_nchw, (0, 2, 3, 1)).astype(jnp.bfloat16)
    w1h = jnp.transpose(w1, (2, 3, 1, 0)).astype(jnp.bfloat16)
    w2h = jnp.transpose(w2, (2, 3, 1, 0)).astype(jnp.bfloat16)
    dn = ('NHWC', 'HWIO', 'NHWC')
    y = lax.conv_general_dilated(x, w1h, (1, 1), 'SAME', dimension_numbers=dn,
                                 preferred_element_type=jnp.float32) + b1
    y = g1 * (y - m1) / jnp.sqrt(v1 + eps) + be1
    y = jnp.maximum(y, 0.0)
    y = lax.conv_general_dilated(y.astype(jnp.bfloat16), w2h, (1, 1), 'SAME',
                                 dimension_numbers=dn,
                                 preferred_element_type=jnp.float32) + b2
    y = g2 * (y - m2) / jnp.sqrt(v2 + eps) + be2
    y = jnp.maximum(y, 0.0)
    return jnp.transpose(y, (0, 3, 1, 2))


if __name__ == "__main__":
    key = jax.random.PRNGKey(0)
    N, Cin, Cout, H, W = 2, 4, 8, 16, 16

    ks = jax.random.split(key, 13)
    x = jax.random.normal(ks[0], (N, Cin, H, W), jnp.float32)

    # Deterministic synthetic parameters (shapes match nn.Conv2d / nn.BatchNorm2d).
    w1 = 0.1 * jax.random.normal(ks[1], (Cout, Cin, 3, 3), jnp.float32)
    b1 = 0.1 * jax.random.normal(ks[2], (Cout,), jnp.float32)
    g1 = 1.0 + 0.1 * jax.random.normal(ks[3], (Cout,), jnp.float32)
    be1 = 0.1 * jax.random.normal(ks[4], (Cout,), jnp.float32)
    m1 = 0.1 * jax.random.normal(ks[5], (Cout,), jnp.float32)
    v1 = 0.5 + jnp.abs(jax.random.normal(ks[6], (Cout,), jnp.float32))

    w2 = 0.1 * jax.random.normal(ks[7], (Cout, Cout, 3, 3), jnp.float32)
    b2 = 0.1 * jax.random.normal(ks[8], (Cout,), jnp.float32)
    g2 = 1.0 + 0.1 * jax.random.normal(ks[9], (Cout,), jnp.float32)
    be2 = 0.1 * jax.random.normal(ks[10], (Cout,), jnp.float32)
    m2 = 0.1 * jax.random.normal(ks[11], (Cout,), jnp.float32)
    v2 = 0.5 + jnp.abs(jax.random.normal(ks[12], (Cout,), jnp.float32))

    params = (w1, b1, g1, be1, m1, v1, w2, b2, g2, be2, m2, v2)

    out = double_conv_pallas(x, params)
    out = jax.block_until_ready(out)

    ref = jax.block_until_ready(_reference(x, params))
    assert out.shape == (N, Cout, H, W), out.shape
    max_err = float(jnp.max(jnp.abs(out - ref)))
    assert jnp.allclose(out, ref, atol=1e-2, rtol=1e-2), max_err

    print("KERNEL_OK")
</pallas_src>

<mosaic_0001>
module attributes {stable_mosaic.version = 11 : i64} {
  func.func @_double_conv_kernel(%arg0: i32, %arg1: memref<1x16x16x128xbf16, #tpu.memory_space<vmem>>, %arg2: memref<1152x128xbf16, #tpu.memory_space<vmem>>, %arg3: memref<1x128xf32, #tpu.memory_space<vmem>>, %arg4: memref<1x128xf32, #tpu.memory_space<vmem>>, %arg5: memref<1152x128xbf16, #tpu.memory_space<vmem>>, %arg6: memref<1x128xf32, #tpu.memory_space<vmem>>, %arg7: memref<1x128xf32, #tpu.memory_space<vmem>>, %arg8: memref<1x16x16x128xf32, #tpu.memory_space<vmem>>, %arg9: memref<18x18x128xf32, #tpu.memory_space<vmem>>, %arg10: memref<18x18x128xf32, #tpu.memory_space<vmem>>, %arg11: memref<256x1152xbf16, #tpu.memory_space<vmem>>, %arg12: memref<256x1152xbf16, #tpu.memory_space<vmem>>) attributes {dimension_semantics = [#tpu.dimension_semantics<parallel>], iteration_bounds = array<i64: 2>, scalar_prefetch = 0 : i64, scratch_operands = 4 : i64, tpu.core_type = #tpu.core_type<tc>, window_params = [{transform_indices = @transform_0, window_bounds = array<i64: 1, 16, 16, 128>}, {pipeline_mode = #tpu.pipeline_mode<synchronous>, transform_indices = @transform_1, window_bounds = array<i64: 1152, 128>}, {pipeline_mode = #tpu.pipeline_mode<synchronous>, transform_indices = @transform_2, window_bounds = array<i64: 1, 128>}, {pipeline_mode = #tpu.pipeline_mode<synchronous>, transform_indices = @transform_3, window_bounds = array<i64: 1, 128>}, {pipeline_mode = #tpu.pipeline_mode<synchronous>, transform_indices = @transform_4, window_bounds = array<i64: 1152, 128>}, {pipeline_mode = #tpu.pipeline_mode<synchronous>, transform_indices = @transform_5, window_bounds = array<i64: 1, 128>}, {pipeline_mode = #tpu.pipeline_mode<synchronous>, transform_indices = @transform_6, window_bounds = array<i64: 1, 128>}, {transform_indices = @transform_7, window_bounds = array<i64: 1, 16, 16, 128>}]} {
    %cst = arith.constant 0.000000e+00 : f32
    %0 = vector.broadcast %cst : f32 to vector<1x18x128xf32>
    %c0 = arith.constant 0 : index
    %c0_0 = arith.constant 0 : index
    %c0_1 = arith.constant 0 : index
    %1 = vector.load %arg9[%c0, %c0_0, %c0_1] : memref<18x18x128xf32, #tpu.memory_space<vmem>>, vector<1x18x128xf32>
    tpu.vector_store %arg9[%c0, %c0_0, %c0_1], %0 {strides = array<i32>} : memref<18x18x128xf32, #tpu.memory_space<vmem>>, vector<1x18x128xf32>,
    %cst_2 = arith.constant 0.000000e+00 : f32
    %2 = vector.broadcast %cst_2 : f32 to vector<1x18x128xf32>
    %c17 = arith.constant 17 : index
    %c0_3 = arith.constant 0 : index
    %c0_4 = arith.constant 0 : index
    %3 = vector.load %arg9[%c17, %c0_3, %c0_4] : memref<18x18x128xf32, #tpu.memory_space<vmem>>, vector<1x18x128xf32>
    tpu.vector_store %arg9[%c17, %c0_3, %c0_4], %2 {strides = array<i32>} : memref<18x18x128xf32, #tpu.memory_space<vmem>>, vector<1x18x128xf32>,
    %cst_5 = arith.constant 0.000000e+00 : f32
    %4 = vector.broadcast %cst_5 : f32 to vector<18x1x128xf32>
    %c0_6 = arith.constant 0 : index
    %c0_7 = arith.constant 0 : index
    %c0_8 = arith.constant 0 : index
    %5 = vector.load %arg9[%c0_6, %c0_7, %c0_8] : memref<18x18x128xf32, #tpu.memory_space<vmem>>, vector<18x1x128xf32>
    tpu.vector_store %arg9[%c0_6, %c0_7, %c0_8], %4 {strides = array<i32>} : memref<18x18x128xf32, #tpu.memory_space<vmem>>, vector<18x1x128xf32>,
    %cst_9 = arith.constant 0.000000e+00 : f32
    %6 = vector.broadcast %cst_9 : f32 to vector<18x1x128xf32>
    %c0_10 = arith.constant 0 : index
    %c17_11 = arith.constant 17 : index
    %c0_12 = arith.constant 0 : index
    %7 = vector.load %arg9[%c0_10, %c17_11, %c0_12] : memref<18x18x128xf32, #tpu.memory_space<vmem>>, vector<18x1x128xf32>
    tpu.vector_store %arg9[%c0_10, %c17_11, %c0_12], %6 {strides = array<i32>} : memref<18x18x128xf32, #tpu.memory_space<vmem>>, vector<18x1x128xf32>,
    %cst_13 = arith.constant 0.000000e+00 : f32
    %8 = vector.broadcast %cst_13 : f32 to vector<1x18x128xf32>
    %c0_14 = arith.constant 0 : index
    %c0_15 = arith.constant 0 : index
    %c0_16 = arith.constant 0 : index
    %9 = vector.load %arg10[%c0_14, %c0_15, %c0_16] : memref<18x18x128xf32, #tpu.memory_space<vmem>>, vector<1x18x128xf32>
    tpu.vector_store %arg10[%c0_14, %c0_15, %c0_16], %8 {strides = array<i32>} : memref<18x18x128xf32, #tpu.memory_space<vmem>>, vector<1x18x128xf32>,
    %cst_17 = arith.constant 0.000000e+00 : f32
    %10 = vector.broadcast %cst_17 : f32 to vector<1x18x128xf32>
    %c17_18 = arith.constant 17 : index
    %c0_19 = arith.constant 0 : index
    %c0_20 = arith.constant 0 : index
    %11 = vector.load %arg10[%c17_18, %c0_19, %c0_20] : memref<18x18x128xf32, #tpu.memory_space<vmem>>, vector<1x18x128xf32>
    tpu.vector_store %arg10[%c17_18, %c0_19, %c0_20], %10 {strides = array<i32>} : memref<18x18x128xf32, #tpu.memory_space<vmem>>, vector<1x18x128xf32>,
    %cst_21 = arith.constant 0.000000e+00 : f32
    %12 = vector.broadcast %cst_21 : f32 to vector<18x1x128xf32>
    %c0_22 = arith.constant 0 : index
    %c0_23 = arith.constant 0 : index
    %c0_24 = arith.constant 0 : index
    %13 = vector.load %arg10[%c0_22, %c0_23, %c0_24] : memref<18x18x128xf32, #tpu.memory_space<vmem>>, vector<18x1x128xf32>
    tpu.vector_store %arg10[%c0_22, %c0_23, %c0_24], %12 {strides = array<i32>} : memref<18x18x128xf32, #tpu.memory_space<vmem>>, vector<18x1x128xf32>,
    %cst_25 = arith.constant 0.000000e+00 : f32
    %14 = vector.broadcast %cst_25 : f32 to vector<18x1x128xf32>
    %c0_26 = arith.constant 0 : index
    %c17_27 = arith.constant 17 : index
    %c0_28 = arith.constant 0 : index
    %15 = vector.load %arg10[%c0_26, %c17_27, %c0_28] : memref<18x18x128xf32, #tpu.memory_space<vmem>>, vector<18x1x128xf32>
    tpu.vector_store %arg10[%c0_26, %c17_27, %c0_28], %14 {strides = array<i32>} : memref<18x18x128xf32, #tpu.memory_space<vmem>>, vector<18x1x128xf32>,
    %c0_29 = arith.constant 0 : index
    %c0_30 = arith.constant 0 : index
    %c0_31 = arith.constant 0 : index
    %c0_32 = arith.constant 0 : index
    %16 = vector.load %arg1[%c0_29, %c0_30, %c0_31, %c0_32] : memref<1x16x16x128xbf16, #tpu.memory_space<vmem>>, vector<1x16x16x128xbf16>
    %17 = vector.shape_cast %16 : vector<1x16x16x128xbf16> to vector<16x16x128xbf16>
    %18 = arith.extf %17 : vector<16x16x128xbf16> to vector<16x16x128xf32>
    %c1 = arith.constant 1 : index
    %c1_33 = arith.constant 1 : index
    %c0_34 = arith.constant 0 : index
    %19 = vector.load %arg9[%c1, %c1_33, %c0_34] : memref<18x18x128xf32, #tpu.memory_space<vmem>>, vector<16x16x128xf32>
    tpu.vector_store %arg9[%c1, %c1_33, %c0_34], %18 {strides = array<i32>} : memref<18x18x128xf32, #tpu.memory_space<vmem>>, vector<16x16x128xf32>,
    %c0_35 = arith.constant 0 : index
    %c0_36 = arith.constant 0 : index
    %c0_37 = arith.constant 0 : index
    %20 = vector.load %arg9[%c0_35, %c0_36, %c0_37] : memref<18x18x128xf32, #tpu.memory_space<vmem>>, vector<16x16x128xf32>
    %21 = vector.shape_cast %20 : vector<16x16x128xf32> to vector<256x128xf32>
    %22 = arith.truncf %21 : vector<256x128xf32> to vector<256x128xbf16>
    %c0_38 = arith.constant 0 : index
    %c0_39 = arith.constant 0 : index
    %23 = vector.load %arg11[%c0_38, %c0_39] : memref<256x1152xbf16, #tpu.memory_space<vmem>>, vector<256x128xbf16>
    tpu.vector_store %arg11[%c0_38, %c0_39], %22 {strides = array<i32>} : memref<256x1152xbf16, #tpu.memory_space<vmem>>, vector<256x128xbf16>,
    %c0_40 = arith.constant 0 : index
    %c1_41 = arith.constant 1 : index
    %c0_42 = arith.constant 0 : index
    %24 = vector.load %arg9[%c0_40, %c1_41, %c0_42] : memref<18x18x128xf32, #tpu.memory_space<vmem>>, vector<16x16x128xf32>
    %25 = vector.shape_cast %24 : vector<16x16x128xf32> to vector<256x128xf32>
    %26 = arith.truncf %25 : vector<256x128xf32> to vector<256x128xbf16>
    %c0_43 = arith.constant 0 : index
    %c128 = arith.constant 128 : index
    %27 = vector.load %arg11[%c0_43, %c128] : memref<256x1152xbf16, #tpu.memory_space<vmem>>, vector<256x128xbf16>
    tpu.vector_store %arg11[%c0_43, %c128], %26 {strides = array<i32>} : memref<256x1152xbf16, #tpu.memory_space<vmem>>, vector<256x128xbf16>,
    %c0_44 = arith.constant 0 : index
    %c2 = arith.constant 2 : index
    %c0_45 = arith.constant 0 : index
    %28 = vector.load %arg9[%c0_44, %c2, %c0_45] : memref<18x18x128xf32, #tpu.memory_space<vmem>>, vector<16x16x128xf32>
    %29 = vector.shape_cast %28 : vector<16x16x128xf32> to vector<256x128xf32>
    %30 = arith.truncf %29 : vector<256x128xf32> to vector<256x128xbf16>
    %c0_46 = arith.constant 0 : index
    %c256 = arith.constant 256 : index
    %31 = vector.load %arg11[%c0_46, %c256] : memref<256x1152xbf16, #tpu.memory_space<vmem>>, vector<256x128xbf16>
    tpu.vector_store %arg11[%c0_46, %c256], %30 {strides = array<i32>} : memref<256x1152xbf16, #tpu.memory_space<vmem>>, vector<256x128xbf16>,
    %c1_47 = arith.constant 1 : index
    %c0_48 = arith.constant 0 : index
    %c0_49 = arith.constant 0 : index
    %32 = vector.load %arg9[%c1_47, %c0_48, %c0_49] : memref<18x18x128xf32, #tpu.memory_space<vmem>>, vector<16x16x128xf32>
    %33 = vector.shape_cast %32 : vector<16x16x128xf32> to vector<256x128xf32>
    %34 = arith.truncf %33 : vector<256x128xf32> to vector<256x128xbf16>
    %c0_50 = arith.constant 0 : index
    %c384 = arith.constant 384 : index
    %35 = vector.load %arg11[%c0_50, %c384] : memref<256x1152xbf16, #tpu.memory_space<vmem>>, vector<256x128xbf16>
    tpu.vector_store %arg11[%c0_50, %c384], %34 {strides = array<i32>} : memref<256x1152xbf16, #tpu.memory_space<vmem>>, vector<256x128xbf16>,
    %c1_51 = arith.constant 1 : index
    %c1_52 = arith.constant 1 : index
    %c0_53 = arith.constant 0 : index
    %36 = vector.load %arg9[%c1_51, %c1_52, %c0_53] : memref<18x18x128xf32, #tpu.memory_space<vmem>>, vector<16x16x128xf32>
    %37 = vector.shape_cast %36 : vector<16x16x128xf32> to vector<256x128xf32>
    %38 = arith.truncf %37 : vector<256x128xf32> to vector<256x128xbf16>
    %c0_54 = arith.constant 0 : index
    %c512 = arith.constant 512 : index
    %39 = vector.load %arg11[%c0_54, %c512] : memref<256x1152xbf16, #tpu.memory_space<vmem>>, vector<256x128xbf16>
    tpu.vector_store %arg11[%c0_54, %c512], %38 {strides = array<i32>} : memref<256x1152xbf16, #tpu.memory_space<vmem>>, vector<256x128xbf16>,
    %c1_55 = arith.constant 1 : index
    %c2_56 = arith.constant 2 : index
    %c0_57 = arith.constant 0 : index
    %40 = vector.load %arg9[%c1_55, %c2_56, %c0_57] : memref<18x18x128xf32, #tpu.memory_space<vmem>>, vector<16x16x128xf32>
    %41 = vector.shape_cast %40 : vector<16x16x128xf32> to vector<256x128xf32>
    %42 = arith.truncf %41 : vector<256x128xf32> to vector<256x128xbf16>
    %c0_58 = arith.constant 0 : index
    %c640 = arith.constant 640 : index
    %43 = vector.load %arg11[%c0_58, %c640] : memref<256x1152xbf16, #tpu.memory_space<vmem>>, vector<256x128xbf16>
    tpu.vector_store %arg11[%c0_58, %c640], %42 {strides = array<i32>} : memref<256x1152xbf16, #tpu.memory_space<vmem>>, vector<256x128xbf16>,
    %c2_59 = arith.constant 2 : index
    %c0_60 = arith.constant 0 : index
    %c0_61 = arith.constant 0 : index
    %44 = vector.load %arg9[%c2_59, %c0_60, %c0_61] : memref<18x18x128xf32, #tpu.memory_space<vmem>>, vector<16x16x128xf32>
    %45 = vector.shape_cast %44 : vector<16x16x128xf32> to vector<256x128xf32>
    %46 = arith.truncf %45 : vector<256x128xf32> to vector<256x128xbf16>
    %c0_62 = arith.constant 0 : index
    %c768 = arith.constant 768 : index
    %47 = vector.load %arg11[%c0_62, %c768] : memref<256x1152xbf16, #tpu.memory_space<vmem>>, vector<256x128xbf16>
    tpu.vector_store %arg11[%c0_62, %c768], %46 {strides = array<i32>} : memref<256x1152xbf16, #tpu.memory_space<vmem>>, vector<256x128xbf16>,
    %c2_63 = arith.constant 2 : index
    %c1_64 = arith.constant 1 : index
    %c0_65 = arith.constant 0 : index
    %48 = vector.load %arg9[%c2_63, %c1_64, %c0_65] : memref<18x18x128xf32, #tpu.memory_space<vmem>>, vector<16x16x128xf32>
    %49 = vector.shape_cast %48 : vector<16x16x128xf32> to vector<256x128xf32>
    %50 = arith.truncf %49 : vector<256x128xf32> to vector<256x128xbf16>
    %c0_66 = arith.constant 0 : index
    %c896 = arith.constant 896 : index
    %51 = vector.load %arg11[%c0_66, %c896] : memref<256x1152xbf16, #tpu.memory_space<vmem>>, vector<256x128xbf16>
    tpu.vector_store %arg11[%c0_66, %c896], %50 {strides = array<i32>} : memref<256x1152xbf16, #tpu.memory_space<vmem>>, vector<256x128xbf16>,
    %c2_67 = arith.constant 2 : index
    %c2_68 = arith.constant 2 : index
    %c0_69 = arith.constant 0 : index
    %52 = vector.load %arg9[%c2_67, %c2_68, %c0_69] : memref<18x18x128xf32, #tpu.memory_space<vmem>>, vector<16x16x128xf32>
    %53 = vector.shape_cast %52 : vector<16x16x128xf32> to vector<256x128xf32>
    %54 = arith.truncf %53 : vector<256x128xf32> to vector<256x128xbf16>
    %c0_70 = arith.constant 0 : index
    %c1024 = arith.constant 1024 : index
    %55 = vector.load %arg11[%c0_70, %c1024] : memref<256x1152xbf16, #tpu.memory_space<vmem>>, vector<256x128xbf16>
    tpu.vector_store %arg11[%c0_70, %c1024], %54 {strides = array<i32>} : memref<256x1152xbf16, #tpu.memory_space<vmem>>, vector<256x128xbf16>,
    %c0_71 = arith.constant 0 : index
    %c0_72 = arith.constant 0 : index
    %56 = vector.load %arg11[%c0_71, %c0_72] : memref<256x1152xbf16, #tpu.memory_space<vmem>>, vector<256x1152xbf16>
    %c0_73 = arith.constant 0 : index
    %c0_74 = arith.constant 0 : index
    %57 = vector.load %arg2[%c0_73, %c0_74] : memref<1152x128xbf16, #tpu.memory_space<vmem>>, vector<1152x128xbf16>
    %cst_75 = arith.constant dense<0.000000e+00> : vector<256x128xf32>
    %58 = tpu.matmul %56, %57, %cst_75 {dimension_numbers = #tpu.dot_dimension_numbers<[1], [0], [0], [1], [0, 0, 1, 1], [], []>} : vector<256x1152xbf16>, vector<1152x128xbf16>, vector<256x128xf32> -> vector<256x128xf32>
    %c0_76 = arith.constant 0 : index
    %c0_77 = arith.constant 0 : index
    %59 = vector.load %arg3[%c0_76, %c0_77] : memref<1x128xf32, #tpu.memory_space<vmem>>, vector<1x128xf32>
    %60 = vector.shape_cast %59 : vector<1x128xf32> to vector<128xf32>
    %61 = vector.shape_cast %60 : vector<128xf32> to vector<1x128xf32>
    %62 = vector.broadcast %61 : vector<1x128xf32> to vector<256x128xf32>
    %63 = arith.mulf %58, %62 : vector<256x128xf32>
    %c0_78 = arith.constant 0 : index
    %c0_79 = arith.constant 0 : index
    %64 = vector.load %arg4[%c0_78, %c0_79] : memref<1x128xf32, #tpu.memory_space<vmem>>, vector<1x128xf32>
    %65 = vector.shape_cast %64 : vector<1x128xf32> to vector<128xf32>
    %66 = vector.shape_cast %65 : vector<128xf32> to vector<1x128xf32>
    %67 = vector.broadcast %66 : vector<1x128xf32> to vector<256x128xf32>
    %68 = arith.addf %63, %67 : vector<256x128xf32>
    %cst_80 = arith.constant 0.000000e+00 : f32
    %69 = vector.broadcast %cst_80 : f32 to vector<256x128xf32>
    %70 = arith.maximumf %68, %69 : vector<256x128xf32>
    %71 = vector.shape_cast %70 : vector<256x128xf32> to vector<16x16x128xf32>
    %c1_81 = arith.constant 1 : index
    %c1_82 = arith.constant 1 : index
    %c0_83 = arith.constant 0 : index
    %72 = vector.load %arg10[%c1_81, %c1_82, %c0_83] : memref<18x18x128xf32, #tpu.memory_space<vmem>>, vector<16x16x128xf32>
    tpu.vector_store %arg10[%c1_81, %c1_82, %c0_83], %71 {strides = array<i32>} : memref<18x18x128xf32, #tpu.memory_space<vmem>>, vector<16x16x128xf32>,
    %c0_84 = arith.constant 0 : index
    %c0_85 = arith.constant 0 : index
    %c0_86 = arith.constant 0 : index
    %73 = vector.load %arg10[%c0_84, %c0_85, %c0_86] : memref<18x18x128xf32, #tpu.memory_space<vmem>>, vector<16x16x128xf32>
    %74 = vector.shape_cast %73 : vector<16x16x128xf32> to vector<256x128xf32>
    %75 = arith.truncf %74 : vector<256x128xf32> to vector<256x128xbf16>
    %c0_87 = arith.constant 0 : index
    %c0_88 = arith.constant 0 : index
    %76 = vector.load %arg12[%c0_87, %c0_88] : memref<256x1152xbf16, #tpu.memory_space<vmem>>, vector<256x128xbf16>
    tpu.vector_store %arg12[%c0_87, %c0_88], %75 {strides = array<i32>} : memref<256x1152xbf16, #tpu.memory_space<vmem>>, vector<256x128xbf16>,
    %c0_89 = arith.constant 0 : index
    %c1_90 = arith.constant 1 : index
    %c0_91 = arith.constant 0 : index
    %77 = vector.load %arg10[%c0_89, %c1_90, %c0_91] : memref<18x18x128xf32, #tpu.memory_space<vmem>>, vector<16x16x128xf32>
    %78 = vector.shape_cast %77 : vector<16x16x128xf32> to vector<256x128xf32>
    %79 = arith.truncf %78 : vector<256x128xf32> to vector<256x128xbf16>
    %c0_92 = arith.constant 0 : index
    %c128_93 = arith.constant 128 : index
    %80 = vector.load %arg12[%c0_92, %c128_93] : memref<256x1152xbf16, #tpu.memory_space<vmem>>, vector<256x128xbf16>
    tpu.vector_store %arg12[%c0_92, %c128_93], %79 {strides = array<i32>} : memref<256x1152xbf16, #tpu.memory_space<vmem>>, vector<256x128xbf16>,
    %c0_94 = arith.constant 0 : index
    %c2_95 = arith.constant 2 : index
    %c0_96 = arith.constant 0 : index
    %81 = vector.load %arg10[%c0_94, %c2_95, %c0_96] : memref<18x18x128xf32, #tpu.memory_space<vmem>>, vector<16x16x128xf32>
    %82 = vector.shape_cast %81 : vector<16x16x128xf32> to vector<256x128xf32>
    %83 = arith.truncf %82 : vector<256x128xf32> to vector<256x128xbf16>
    %c0_97 = arith.constant 0 : index
    %c256_98 = arith.constant 256 : index
    %84 = vector.load %arg12[%c0_97, %c256_98] : memref<256x1152xbf16, #tpu.memory_space<vmem>>, vector<256x128xbf16>
    tpu.vector_store %arg12[%c0_97, %c256_98], %83 {strides = array<i32>} : memref<256x1152xbf16, #tpu.memory_space<vmem>>, vector<256x128xbf16>,
    %c1_99 = arith.constant 1 : index
    %c0_100 = arith.constant 0 : index
    %c0_101 = arith.constant 0 : index
    %85 = vector.load %arg10[%c1_99, %c0_100, %c0_101] : memref<18x18x128xf32, #tpu.memory_space<vmem>>, vector<16x16x128xf32>
    %86 = vector.shape_cast %85 : vector<16x16x128xf32> to vector<256x128xf32>
    %87 = arith.truncf %86 : vector<256x128xf32> to vector<256x128xbf16>
    %c0_102 = arith.constant 0 : index
    %c384_103 = arith.constant 384 : index
    %88 = vector.load %arg12[%c0_102, %c384_103] : memref<256x1152xbf16, #tpu.memory_space<vmem>>, vector<256x128xbf16>
    tpu.vector_store %arg12[%c0_102, %c384_103], %87 {strides = array<i32>} : memref<256x1152xbf16, #tpu.memory_space<vmem>>, vector<256x128xbf16>,
    %c1_104 = arith.constant 1 : index
    %c1_105 = arith.constant 1 : index
    %c0_106 = arith.constant 0 : index
    %89 = vector.load %arg10[%c1_104, %c1_105, %c0_106] : memref<18x18x128xf32, #tpu.memory_space<vmem>>, vector<16x16x128xf32>
    %90 = vector.shape_cast %89 : vector<16x16x128xf32> to vector<256x128xf32>
    %91 = arith.truncf %90 : vector<256x128xf32> to vector<256x128xbf16>
    %c0_107 = arith.constant 0 : index
    %c512_108 = arith.constant 512 : index
    %92 = vector.load %arg12[%c0_107, %c512_108] : memref<256x1152xbf16, #tpu.memory_space<vmem>>, vector<256x128xbf16>
    tpu.vector_store %arg12[%c0_107, %c512_108], %91 {strides = array<i32>} : memref<256x1152xbf16, #tpu.memory_space<vmem>>, vector<256x128xbf16>,
    %c1_109 = arith.constant 1 : index
    %c2_110 = arith.constant 2 : index
    %c0_111 = arith.constant 0 : index
    %93 = vector.load %arg10[%c1_109, %c2_110, %c0_111] : memref<18x18x128xf32, #tpu.memory_space<vmem>>, vector<16x16x128xf32>
    %94 = vector.shape_cast %93 : vector<16x16x128xf32> to vector<256x128xf32>
    %95 = arith.truncf %94 : vector<256x128xf32> to vector<256x128xbf16>
    %c0_112 = arith.constant 0 : index
    %c640_113 = arith.constant 640 : index
    %96 = vector.load %arg12[%c0_112, %c640_113] : memref<256x1152xbf16, #tpu.memory_space<vmem>>, vector<256x128xbf16>
    tpu.vector_store %arg12[%c0_112, %c640_113], %95 {strides = array<i32>} : memref<256x1152xbf16, #tpu.memory_space<vmem>>, vector<256x128xbf16>,
    %c2_114 = arith.constant 2 : index
    %c0_115 = arith.constant 0 : index
    %c0_116 = arith.constant 0 : index
    %97 = vector.load %arg10[%c2_114, %c0_115, %c0_116] : memref<18x18x128xf32, #tpu.memory_space<vmem>>, vector<16x16x128xf32>
    %98 = vector.shape_cast %97 : vector<16x16x128xf32> to vector<256x128xf32>
    %99 = arith.truncf %98 : vector<256x128xf32> to vector<256x128xbf16>
    %c0_117 = arith.constant 0 : index
    %c768_118 = arith.constant 768 : index
    %100 = vector.load %arg12[%c0_117, %c768_118] : memref<256x1152xbf16, #tpu.memory_space<vmem>>, vector<256x128xbf16>
    tpu.vector_store %arg12[%c0_117, %c768_118], %99 {strides = array<i32>} : memref<256x1152xbf16, #tpu.memory_space<vmem>>, vector<256x128xbf16>,
    %c2_119 = arith.constant 2 : index
    %c1_120 = arith.constant 1 : index
    %c0_121 = arith.constant 0 : index
    %101 = vector.load %arg10[%c2_119, %c1_120, %c0_121] : memref<18x18x128xf32, #tpu.memory_space<vmem>>, vector<16x16x128xf32>
    %102 = vector.shape_cast %101 : vector<16x16x128xf32> to vector<256x128xf32>
    %103 = arith.truncf %102 : vector<256x128xf32> to vector<256x128xbf16>
    %c0_122 = arith.constant 0 : index
    %c896_123 = arith.constant 896 : index
    %104 = vector.load %arg12[%c0_122, %c896_123] : memref<256x1152xbf16, #tpu.memory_space<vmem>>, vector<256x128xbf16>
    tpu.vector_store %arg12[%c0_122, %c896_123], %103 {strides = array<i32>} : memref<256x1152xbf16, #tpu.memory_space<vmem>>, vector<256x128xbf16>,
    %c2_124 = arith.constant 2 : index
    %c2_125 = arith.constant 2 : index
    %c0_126 = arith.constant 0 : index
    %105 = vector.load %arg10[%c2_124, %c2_125, %c0_126] : memref<18x18x128xf32, #tpu.memory_space<vmem>>, vector<16x16x128xf32>
    %106 = vector.shape_cast %105 : vector<16x16x128xf32> to vector<256x128xf32>
    %107 = arith.truncf %106 : vector<256x128xf32> to vector<256x128xbf16>
    %c0_127 = arith.constant 0 : index
    %c1024_128 = arith.constant 1024 : index
    %108 = vector.load %arg12[%c0_127, %c1024_128] : memref<256x1152xbf16, #tpu.memory_space<vmem>>, vector<256x128xbf16>
    tpu.vector_store %arg12[%c0_127, %c1024_128], %107 {strides = array<i32>} : memref<256x1152xbf16, #tpu.memory_space<vmem>>, vector<256x128xbf16>,
    %c0_129 = arith.constant 0 : index
    %c0_130 = arith.constant 0 : index
    %109 = vector.load %arg12[%c0_129, %c0_130] : memref<256x1152xbf16, #tpu.memory_space<vmem>>, vector<256x1152xbf16>
    %c0_131 = arith.constant 0 : index
    %c0_132 = arith.constant 0 : index
    %110 = vector.load %arg5[%c0_131, %c0_132] : memref<1152x128xbf16, #tpu.memory_space<vmem>>, vector<1152x128xbf16>
    %cst_133 = arith.constant dense<0.000000e+00> : vector<256x128xf32>
    %111 = tpu.matmul %109, %110, %cst_133 {dimension_numbers = #tpu.dot_dimension_numbers<[1], [0], [0], [1], [0, 0, 1, 1], [], []>} : vector<256x1152xbf16>, vector<1152x128xbf16>, vector<256x128xf32> -> vector<256x128xf32>
    %c0_134 = arith.constant 0 : index
    %c0_135 = arith.constant 0 : index
    %112 = vector.load %arg6[%c0_134, %c0_135] : memref<1x128xf32, #tpu.memory_space<vmem>>, vector<1x128xf32>
    %113 = vector.shape_cast %112 : vector<1x128xf32> to vector<128xf32>
    %114 = vector.shape_cast %113 : vector<128xf32> to vector<1x128xf32>
    %115 = vector.broadcast %114 : vector<1x128xf32> to vector<256x128xf32>
    %116 = arith.mulf %111, %115 : vector<256x128xf32>
    %c0_136 = arith.constant 0 : index
    %c0_137 = arith.constant 0 : index
    %117 = vector.load %arg7[%c0_136, %c0_137] : memref<1x128xf32, #tpu.memory_space<vmem>>, vector<1x128xf32>
    %118 = vector.shape_cast %117 : vector<1x128xf32> to vector<128xf32>
    %119 = vector.shape_cast %118 : vector<128xf32> to vector<1x128xf32>
    %120 = vector.broadcast %119 : vector<1x128xf32> to vector<256x128xf32>
    %121 = arith.addf %116, %120 : vector<256x128xf32>
    %cst_138 = arith.constant 0.000000e+00 : f32
    %122 = vector.broadcast %cst_138 : f32 to vector<256x128xf32>
    %123 = arith.maximumf %121, %122 : vector<256x128xf32>
    %124 = vector.shape_cast %123 : vector<256x128xf32> to vector<16x16x128xf32>
    %c0_139 = arith.constant 0 : index
    %c0_140 = arith.constant 0 : index
    %c0_141 = arith.constant 0 : index
    %c0_142 = arith.constant 0 : index
    %125 = vector.load %arg8[%c0_139, %c0_140, %c0_141, %c0_142] : memref<1x16x16x128xf32, #tpu.memory_space<vmem>>, vector<1x16x16x128xf32>
    %126 = vector.shape_cast %125 : vector<1x16x16x128xf32> to vector<16x16x128xf32>
    %127 = vector.shape_cast %124 : vector<16x16x128xf32> to vector<1x16x16x128xf32>
    tpu.vector_store %arg8[%c0_139, %c0_140, %c0_141, %c0_142], %127 {strides = array<i32>} : memref<1x16x16x128xf32, #tpu.memory_space<vmem>>, vector<1x16x16x128xf32>,
    return
  }
  func.func @transform_0(%arg0: i32) -> (i32, i32, i32, i32) {
    %c0_i32 = arith.constant 0 : i32
    %c0_i32_0 = arith.constant 0 : i32
    %c0_i32_1 = arith.constant 0 : i32
    %c0_i32_2 = arith.constant 0 : i32
    return %arg0, %c0_i32, %c0_i32_0, %c0_i32_1 : i32, i32, i32, i32
  }
  func.func @transform_1(%arg0: i32) -> (i32, i32) {
    %c0_i32 = arith.constant 0 : i32
    %c0_i32_0 = arith.constant 0 : i32
    %c0_i32_1 = arith.constant 0 : i32
    return %c0_i32, %c0_i32_0 : i32, i32
  }
  func.func @transform_2(%arg0: i32) -> (i32, i32) {
    %c0_i32 = arith.constant 0 : i32
    %c0_i32_0 = arith.constant 0 : i32
    %c0_i32_1 = arith.constant 0 : i32
    return %c0_i32, %c0_i32_0 : i32, i32
  }
  func.func @transform_3(%arg0: i32) -> (i32, i32) {
    %c0_i32 = arith.constant 0 : i32
    %c0_i32_0 = arith.constant 0 : i32
    %c0_i32_1 = arith.constant 0 : i32
    return %c0_i32, %c0_i32_0 : i32, i32
  }
  func.func @transform_4(%arg0: i32) -> (i32, i32) {
    %c0_i32 = arith.constant 0 : i32
    %c0_i32_0 = arith.constant 0 : i32
    %c0_i32_1 = arith.constant 0 : i32
    return %c0_i32, %c0_i32_0 : i32, i32
  }
  func.func @transform_5(%arg0: i32) -> (i32, i32) {
    %c0_i32 = arith.constant 0 : i32
    %c0_i32_0 = arith.constant 0 : i32
    %c0_i32_1 = arith.constant 0 : i32
    return %c0_i32, %c0_i32_0 : i32, i32
  }
  func.func @transform_6(%arg0: i32) -> (i32, i32) {
    %c0_i32 = arith.constant 0 : i32
    %c0_i32_0 = arith.constant 0 : i32
    %c0_i32_1 = arith.constant 0 : i32
    return %c0_i32, %c0_i32_0 : i32, i32
  }
  func.func @transform_7(%arg0: i32) -> (i32, i32, i32, i32) {
    %c0_i32 = arith.constant 0 : i32
    %c0_i32_0 = arith.constant 0 : i32
    %c0_i32_1 = arith.constant 0 : i32
    %c0_i32_2 = arith.constant 0 : i32
    return %arg0, %c0_i32, %c0_i32_0, %c0_i32_1 : i32, i32, i32, i32
  }
}

</mosaic_0001>

<bundles_post_ra>
// kernel: tpu_custom_call.1
= control target key start
LH: loop header
LB: loop body
LE: loop exit
PB: predicated region body
PF: predicated region fallthrough
CT: control target
= control target key end

     0   :  { %s14127_s0 = inlined_call_operand.hbm [shape: bf16[2,16,16,128], index: 0, kind: input, shape index: {}]   ;;  %s14128_s1 = inlined_call_operand.hbm [shape: bf16[1152,128], index: 1, kind: input, shape index: {}]   ;;  %s14129_s2 = inlined_call_operand.vmem [shape: f32[1,128], index: 2, kind: input, shape index: {}]   ;;  %s14130_s3 = inlined_call_operand.vmem [shape: f32[1,128], index: 3, kind: input, shape index: {}]   ;;  %s14131_s4 = inlined_call_operand.hbm [shape: bf16[1152,128], index: 4, kind: input, shape index: {}]   ;;  %s14132_s5 = inlined_call_operand.vmem [shape: f32[1,128], index: 5, kind: input, shape index: {}]   ;;  %s14133_s6 = inlined_call_operand.vmem [shape: f32[1,128], index: 6, kind: input, shape index: {}]   ;;  %s14134_s7 = inlined_call_operand.hbm [shape: f32[2,16,16,128], index: 7, kind: output, shape index: {}]  }
   0x1   :  { %14141 = sst [smem:[#allocation47_spill]] %s14128_s1 }
   0x2   :  { %12 = vsyncpa [#allocation7], 0 }
   0x3   :  { %14 = vsyncpa [#allocation7 + $0x1], 0 }
   0x4   :  { %15 = vsyncpa [#allocation10], 0 }
   0x5   :  { %16 = vsyncpa [#allocation8], 0 }
   0x6   :  { %18 = vsyncpa [#allocation8 + $0x1], 0  ;;  %s12499_s24 = smov 0   ;;  %s12501_s25 = smov 0  }
   0x7   :  { %s12503_s26 = smov 0   ;;  %s12505_s27 = smov 0  }
   0x8 LB: > { %s12520_s28 = sadd.s32 4294967295, %s12447_s27   ;;  %s8913_s29 = sadd.s32 4294967294, %s12447_s27   ;;  %s12447_s27 = sphi %s12505_s27, %s14285_s27   ;;  %s12443_s26 = sphi %s12503_s26, %s14284_s26   ;;  %s12439_s25 = sphi %s12501_s25, %s14283_s25   ;;  %s12435_s24 = sphi %s12499_s24, %s14282_s24  }
   0x9   : > { %p44_p0 = scmp.ne.s32.totalorder %s12439_s25, %s12435_s24  ;;  %p14136_p1 = scmp.eq.s32.totalorder %s12520_s28, 0 }
   0xa   : > { %p194_p2 = scmp.eq.s32.totalorder %s12520_s28, 1  ;;  %p200_p3 = scmp.eq.s32.totalorder %s8913_s29, 1 }
   0xb   : > { %p12529_p4 = por %p14136_p1, %p44_p0  ;;  %p8914_p5 = scmp.ge.s32.totalorder %s12447_s27, 1 }
   0xc   : > { %p12534_p6 = por %p200_p3, %p44_p0  ;;  %p207_p7 = scmp.lt.s32.totalorder %s12447_s27, 3 }
   0xd   : > { %s14142_s30 = scalar_select %p12529_p4, 1, 0 }
   0xe   : > { %s14143_s8 = scalar_select %p12534_p6, 1, 0 }
   0xf   : > { %p12539_p8 = pnand %p8914_p5, %p207_p7  ;;  %s12449_s10 = smov [#allocation9]  }
  0x10   : > { %s219_s11 = sshll.u32 %s12449_s10, 4  ;;  %s12450_s13 = smov [#allocation11]   ;;  %s220_s11 = int_to_ptr.vmem [resolvable:$true] %s219_s11 }
  0x11   : > { %s14144_s9 = scalar_select %p12539_p8, 1, 0 }
  0x12   : > { %p11652_p9 = pneg %p12539_p8  ;;  %s238_s14 = sshll.u32 %s12450_s13, 4  ;;  %s239_s14 = int_to_ptr.vmem [resolvable:$true] %s238_s14 }
  0x13   : > { %s12310_s15 = scalar_lea.vmem %s220_s11, 9216  ;;  %p12318_p5 = scmp.lt.s32.totalorder %s220_s11, %s220_s11 }
  0x14   : > { %p12548_p11 = pnand %p11652_p9, %p14136_p1  ;;  %p12311_p13 = scmp.ne.s32.totalorder %s220_s11, %s12310_s15 }
  0x15   : > { %p12319_p7 = scmp.lt.s32.totalorder %s12310_s15, %s12310_s15 }
  0x16   : > { %p12301_p12 = pneg %p12548_p11 }
  0x17   : > { %p12320_p10 = por %p12319_p7, %p12318_p5 }
  0x18   : > { %p12313_p0 = pnand %p12311_p13, %p12301_p12 }
  0x1a   : > { %p12314_p3 = pneg %p12313_p0 }
  0x1c   : > { %p12321_p9 = pnand %p12320_p10, %p12314_p3 }
  0x1e   : > { %12324 = shalt.err (!%p12321_p9)
}
  0x1f   : > { %s14135_s16 = smov 64   ;;  %s14137_s17 = smov 4  }
  0x20   : > { %s14146_s1 = sld [smem:[#allocation47_spill]]  ;;  %s12336_s20 = scalar_lea.vmem %s239_s14, 9216 }
  0x21   : > { %p12337_p13 = scmp.ne.s32.totalorder %s239_s14, %s12336_s20  ;;  %p12344_p10 = scmp.lt.s32.totalorder %s239_s14, %s239_s14 }
  0x22   : > { %p12345_p3 = scmp.lt.s32.totalorder %s12336_s20, %s12336_s20 }
  0x23   : > { %p12339_p0 = pnand %p12337_p13, %p12301_p12 }
  0x24   : > { %p12346_p7 = por %p12345_p3, %p12344_p10 }
  0x25   : > { %p12340_p5 = pneg %p12339_p0 }
  0x26   : > { %11655 = dma.hbm_to_vmem [thread:$0]  (!%p12548_p11), %s14146_s1, 9216, %s220_s11, [#allocation10], %s14135_s16, %s14135_s16, %s14137_s17  }
  0x27   : > { %p12347_p9 = pnand %p12346_p7, %p12340_p5 }
  0x29   : > { %12350 = shalt.err (!%p12347_p9)
}
  0x2a   : > { %11658 = dma.hbm_to_vmem [thread:$0]  (!%p12548_p11), %s14131_s4, 9216, %s239_s14, [#allocation10], %s14135_s16, %s14135_s16, %s14137_s17  }
  0x2b   : > { %s12577_s23 = sadd.s32 1, %s12447_s27   ;;  %s31_s29 = sadd.s32 1, %s12443_s26 }
  0x2c   : > { %s28_s10 = ssub.s32 %s12447_s27, %s12577_s23  ;;  %p38_p12 = scmp.ne.s32.totalorder %s12443_s26, %s12439_s25 }
  0x2d   : > { %p29_p13 = scmp.eq.s32.totalorder %s28_s10, 0  ;;  %p39_p0 = scmp.eq.s32.totalorder %s12447_s27, 0 }
  0x2e   : > { %p12587_p5 = por %p194_p2, %p38_p12  ;;  %p11669_p10 = scmp.lt.s32.totalorder %s12447_s27, 2 }
  0x2f   : > { %s12593_s12 = scalar_select %p29_p13, %s12443_s26, %s31_s29  }
  0x30   : > { %s14147_s11 = scalar_select %p12587_p5, 1, 0 }
  0x31   : > { %p40_p3 = por %p39_p0, %p38_p12  ;;  %s258_s13 = sand.u32 1, %s12443_s26  }
  0x32   : > { %s8918_s15 = sshll.u32 %s258_s13, 7  ;;  %s9943_s14 = sshll.u32 %s12447_s27, 11 }
  0x33   : > { %s12600_s20 = scalar_lea.hbm %s14127_s0, %s9943_s14  ;;  %s262_s21 = scalar_lea.vmem [#allocation6], %s8918_s15 }
  0x34   : > { %s269_s22 = sshll.u32 %s262_s21, 4  ;;  %p12604_p2 = pnand %p11669_p10, %p40_p3  ;;  %s12602_s22 = int_to_ptr.vmem [resolvable:$true] %s269_s22 }
  0x35   : > { %s12608_s29 = scalar_lea.sflag [#allocation7], %s258_s13  ;;  %s12351_s16 = scalar_lea.hbm %s12600_s20, 2048 }
  0x36   : > { %p12352_p11 = scmp.ne.s32.totalorder %s12600_s20, %s12351_s16  ;;  %p12353_p7 = pneg %p12604_p2 }
  0x37   : > { %s12356_s15 = scalar_lea.hbm %s14127_s0, 4096  ;;  %p12357_p13 = scmp.lt.s32.totalorder %s12600_s20, %s14127_s0 }
  0x38   : > { %p12354_p9 = pnand %p12353_p7, %p12352_p11  ;;  %p12358_p0 = scmp.lt.s32.totalorder %s12356_s15, %s12351_s16 }
  0x3a   : > { %p12355_p12 = pneg %p12354_p9  ;;  %p12359_p10 = por %p12358_p0, %p12357_p13 }
  0x3c   : > { %p12360_p3 = pnand %p12359_p10, %p12355_p12 }
  0x3e   : > { %12363 = shalt.err (!%p12360_p3)
}
  0x3f   : > { %s12364_s13 = scalar_lea.vmem %s12602_s22, 2048  ;;  %s12453_s17 = smov [#allocation6]  }
  0x40   : > { %p12365_p1 = scmp.ne.s32.totalorder %s12602_s22, %s12364_s13  ;;  %s12369_s1 = sshll.u32 %s12453_s17, 4  ;;  %s12370_s1 = int_to_ptr.vmem [resolvable:$false] %s12369_s1 }
  0x41   : > { %s12371_s14 = scalar_lea.vmem %s12370_s1, 4096  ;;  %p12372_p9 = scmp.lt.s32.totalorder %s12602_s22, %s12370_s1 }
  0x42   : > { %p12367_p6 = pnand %p12365_p1, %p12353_p7  ;;  %p12373_p5 = scmp.lt.s32.totalorder %s12371_s14, %s12364_s13 }
  0x44   : > { %p12368_p11 = pneg %p12367_p6  ;;  %p12374_p4 = por %p12373_p5, %p12372_p9 }
  0x46   : > { %p12375_p8 = pnand %p12374_p4, %p12368_p11 }
  0x48   : > { %12378 = shalt.err (!%p12375_p8)
}
  0x49   : > { %s14149_s16 = smov 4   ;;  %s14150_s18 = smov 64  }
  0x4a   : > { %11662 = dma.hbm_to_vmem [thread:$0]  (!%p12604_p2), %s12600_s20, 2048, %s12602_s22, %s12608_s29, %s14150_s18, %s14150_s18, %s14149_s16  }
  0x4b   : > { %p14151_p1 = scmp.ne.s32.totalorder %s14144_s9, 0 }
  0x4d   : > { %281 = sbr.rel (%p14151_p1) target bundleno = 1209 (0x4b9), region = 48 }
  0x52   : > { %s12635_s17 = sand.u32 1, %s12439_s25   ;;  %p14152_p4 = scmp.ne.s32.totalorder %s14142_s30, 0 }
  0x53   : > { %s8922_s1 = sshll.u32 %s12635_s17, 7  ;;  %s284_s15 = scalar_lea.sflag [#allocation7], %s12635_s17 }
  0x54   : > { %s12639_s19 = scalar_lea.vmem [#allocation6], %s8922_s1 }
  0x55   : > { %12422 = dma.done.wait (%p14152_p4), %s284_s15, 2048  }
  0x56   : > { %12424 = vsyncadd (%p14152_p4), %s284_s15, 4294965248  ;;  %p14153_p6 = scmp.eq.s32.totalorder %s12520_s28, 0 }
  0x58   : > { %12426 = dma.done.wait (%p14153_p6), [#allocation10], 18432   ;;  %p14154_p8 = pmov %p14153_p6 }
  0x59   : > { %v12454_v0 = vmov 0.0   ;;  %v12455_v1 = vmov 0.0|0.0   ;;  %v11712_v2 = vld [vmem:[#allocation9 + $0x78] sm:$0xff]   ;;  %v11716_v6 = vld [vmem:[#allocation9 + $0x70] sm:$0xff]   ;;  %v11720_v10 = vld [vmem:[#allocation9 + $0x68] sm:$0xff]   ;;  %s8925_s15 = sshll.u32 %s12635_s17, 8 }
  0x5a   : > { %12428 = vsyncadd (%p14154_p8), [#allocation10], 4294948864  ;;  %327 = vst [vmem:[#allocation2] sm:$0xff] %v12454_v0  ;;  %v11713_v3 = vld [vmem:[#allocation9 + $0xf8] sm:$0xff]   ;;  %10600 = vmatprep.subr.bf16.mxu0 %v11712_v2  ;;  %v11717_v7 = vld [vmem:[#allocation9 + $0xf0] sm:$0xff]   ;;  %s10520_s30 = sshll.u32 %s12520_s28, 12 }
  0x5b   : > { %328 = vst [vmem:[#allocation2 + $0x8] sm:$0xff] %v12454_v0  ;;  %329 = vst [vmem:[#allocation2 + $0x10] sm:$0x3] %v12454_v0  ;;  %v11714_v4 = vld [vmem:[#allocation9 + $0x38] sm:$0xff]   ;;  %10712 = vmatprep.subr.bf16.mxu1 %v11713_v3  ;;  %v11718_v8 = vld [vmem:[#allocation9 + $0x30] sm:$0xff]   ;;  %s14080_s10 = scalar_lea.hbm %s14134_s7, %s10520_s30  ;;  %s8808_s29 = scalar_lea.sflag [#allocation8], %s12635_s17 }
  0x5c   : > { %331 = vst [vmem:[#allocation2 + $0x198] sm:$0xff] %v12454_v0  ;;  %332 = vst [vmem:[#allocation2 + $0x1a0] sm:$0xff] %v12454_v0  ;;  %v11715_v5 = vld [vmem:[#allocation9 + $0xb8] sm:$0xff]   ;;  %10601 = vmatpush3.bf16.msra.mxu0 %v11714_v4  ;;  %v11719_v9 = vld [vmem:[#allocation9 + $0xb0] sm:$0xff]   ;;  %p14279_p2 = scmp.ne.s32.totalorder %s14147_s11, 0  ;;  %s12456_s21 = smov [#allocation12]  }
  0x5d   : > { %333 = vst [vmem:[#allocation2 + $0x1a8] sm:$0x3] %v12454_v0  ;;  %335 = vst [vmem:[#allocation2 + $0x18] sm:$0x1] %v12454_v0  ;;  %10713 = vmatpush3.bf16.msra.mxu1 %v11715_v5  ;;  %10602 = vmatprep.subr.bf16.mxu0 %v11716_v6  ;;  %v11721_v11 = vld [vmem:[#allocation9 + $0xe8] sm:$0xff]   ;;  %v11724_v14 = vld [vmem:[#allocation9 + $0x60] sm:$0xff]  }
  0x5e   : > { %336 = vst [vmem:[#allocation2 + $0x30] sm:$0x1] %v12454_v0  ;;  %337 = vst [vmem:[#allocation2 + $0x48] sm:$0x1] %v12454_v0  ;;  %10714 = vmatprep.subr.bf16.mxu1 %v11717_v7  ;;  %v11722_v12 = vld [vmem:[#allocation9 + $0x28] sm:$0xff]   ;;  %v11725_v15 = vld [vmem:[#allocation9 + $0xe0] sm:$0xff]  }
  0x5f   : > { %338 = vst [vmem:[#allocation2 + $0x60] sm:$0x1] %v12454_v0  ;;  %339 = vst [vmem:[#allocation2 + $0x78] sm:$0x1] %v12454_v0  ;;  %v11723_v13 = vld [vmem:[#allocation9 + $0xa8] sm:$0xff]   ;;  %v11726_v16 = vld [vmem:[#allocation9 + $0x20] sm:$0xff]  }
  0x60   : > { %340 = vst [vmem:[#allocation2 + $0x90] sm:$0x1] %v12454_v0  ;;  %341 = vst [vmem:[#allocation2 + $0xa8] sm:$0x1] %v12454_v0  ;;  %10603 = vmatpush3.bf16.msra.mxu0 %v11718_v8  ;;  %v11727_v17 = vld [vmem:[#allocation9 + $0xa0] sm:$0xff]   ;;  %v11728_v18 = vld [vmem:[#allocation9 + $0x58] sm:$0xff]  }
  0x61   : > { %342 = vst [vmem:[#allocation2 + $0xc0] sm:$0x1] %v12454_v0  ;;  %343 = vst [vmem:[#allocation2 + $0xd8] sm:$0x1] %v12454_v0  ;;  %10715 = vmatpush3.bf16.msra.mxu1 %v11719_v9  ;;  %10604 = vmatprep.subr.bf16.mxu0 %v11720_v10  ;;  %v11729_v19 = vld [vmem:[#allocation9 + $0xd8] sm:$0xff]   ;;  %v11732_v22 = vld [vmem:[#allocation9 + $0x50] sm:$0xff]  }
  0x62   : > { %344 = vst [vmem:[#allocation2 + $0xf0] sm:$0x1] %v12454_v0  ;;  %345 = vst [vmem:[#allocation2 + $0x108] sm:$0x1] %v12454_v0  ;;  %10716 = vmatprep.subr.bf16.mxu1 %v11721_v11  ;;  %v11730_v20 = vld [vmem:[#allocation9 + $0x18] sm:$0xff]   ;;  %v11733_v23 = vld [vmem:[#allocation9 + $0xd0] sm:$0xff]  }
  0x63   : > { %346 = vst [vmem:[#allocation2 + $0x120] sm:$0x1] %v12454_v0  ;;  %347 = vst [vmem:[#allocation2 + $0x138] sm:$0x1] %v12454_v0  ;;  %v11731_v21 = vld [vmem:[#allocation9 + $0x98] sm:$0xff]   ;;  %v11734_v24 = vld [vmem:[#allocation9 + $0x10] sm:$0xff]  }
  0x64   : > { %348 = vst [vmem:[#allocation2 + $0x150] sm:$0x1] %v12454_v0  ;;  %349 = vst [vmem:[#allocation2 + $0x168] sm:$0x1] %v12454_v0  ;;  %10605 = vmatpush3.bf16.msra.mxu0 %v11722_v12  ;;  %v11735_v25 = vld [vmem:[#allocation9 + $0x90] sm:$0xff]   ;;  %v11736_v26 = vld [vmem:[#allocation9 + $0x48] sm:$0xff]  }
  0x65   : > { %350 = vst [vmem:[#allocation2 + $0x180] sm:$0x1] %v12454_v0  ;;  %353 = vst [vmem:[#allocation2 + $0x29] sm:$0x1] %v12454_v0  ;;  %10717 = vmatpush3.bf16.msra.mxu1 %v11723_v13  ;;  %10606 = vmatprep.subr.bf16.mxu0 %v11724_v14  ;;  %v11737_v27 = vld [vmem:[#allocation9 + $0xc8] sm:$0xff]   ;;  %v11740_v30 = vld [vmem:[#allocation9 + $0x40] sm:$0xff]  }
  0x66   : > { %354 = vst [vmem:[#allocation2 + $0x41] sm:$0x1] %v12454_v0  ;;  %355 = vst [vmem:[#allocation2 + $0x59] sm:$0x1] %v12454_v0  ;;  %10718 = vmatprep.subr.bf16.mxu1 %v11725_v15  ;;  %v11738_v28 = vld [vmem:[#allocation9 + $0x8] sm:$0xff]   ;;  %v11741_v31 = vld [vmem:[#allocation9 + $0xc0] sm:$0xff]  }
  0x67   : > { %356 = vst [vmem:[#allocation2 + $0x71] sm:$0x1] %v12454_v0  ;;  %357 = vst [vmem:[#allocation2 + $0x89] sm:$0x1] %v12454_v0  ;;  %v11739_v29 = vld [vmem:[#allocation9 + $0x88] sm:$0xff]   ;;  %v11742_v32 = vld [vmem:[#allocation9] sm:$0xff]  }
  0x68   : > { %358 = vst [vmem:[#allocation2 + $0xa1] sm:$0x1] %v12454_v0  ;;  %359 = vst [vmem:[#allocation2 + $0xb9] sm:$0x1] %v12454_v0  ;;  %10607 = vmatpush3.bf16.msra.mxu0 %v11726_v16  ;;  %v11743_v33 = vld [vmem:[#allocation9 + $0x80] sm:$0xff]   ;;  %v703_v36 = vld [vmem:[#allocation2 + $0x9] sm:$0xff] }
  0x69   : > { %360 = vst [vmem:[#allocation2 + $0xd1] sm:$0x1] %v12454_v0  ;;  %361 = vst [vmem:[#allocation2 + $0xe9] sm:$0x1] %v12454_v0  ;;  %10719 = vmatpush3.bf16.msra.mxu1 %v11727_v17  ;;  %10608 = vmatprep.subr.bf16.mxu0 %v11728_v18  ;;  %v702_v35 = vld [vmem:[#allocation2 + $0x1] sm:$0xff]  ;;  %v9977_v39 = vpack.c.bf16 %v703_v36, %v703_v36  ;;  %v11750_v47 = vld [vmem:[#allocation9 + $0x178] sm:$0xff]  }
  0x6a   : > { %362 = vst [vmem:[#allocation2 + $0x101] sm:$0x1] %v12454_v0  ;;  %363 = vst [vmem:[#allocation2 + $0x119] sm:$0x1] %v12454_v0  ;;  %10720 = vmatprep.subr.bf16.mxu1 %v11729_v19  ;;  %v9976_v38 = vpack.c.bf16 %v702_v35, %v702_v35  ;;  %v10522_v40 = vld [vmem:[%s12639_s19] sm:$0xff]   ;;  %v10585_v50 = vld [vmem:[%s12639_s19 + $0x8] sm:$0xff]  }
  0x6b   : > { %364 = vst [vmem:[#allocation2 + $0x131] sm:$0x1] %v12454_v0  ;;  %365 = vst [vmem:[#allocation2 + $0x149] sm:$0x1] %v12454_v0  ;;  %v894_v41 = vld [vmem:[#allocation2 + $0x2] sm:$0xff]  ;;  %v10523_v43 = vunpack.c.l.bf16 %v10522_v40  ;;  %v10524_v44 = vunpack.c.h.bf16 %v10522_v40  ;;  %v10527_v51 = vunpack.c.l.bf16 %v10585_v50  ;;  %v10528_v52 = vunpack.c.h.bf16 %v10585_v50  ;;  %v10586_v55 = vld [vmem:[%s12639_s19 + $0x10] sm:$0xff]  }
  0x6c   : > { %366 = vst [vmem:[#allocation2 + $0x161] sm:$0x1] %v12454_v0  ;;  %367 = vst [vmem:[#allocation2 + $0x179] sm:$0x1] %v12454_v0  ;;  %10609 = vmatpush3.bf16.msra.mxu0 %v11730_v20  ;;  %v10008_v45 = vpack.c.bf16 %v894_v41, %v894_v41  ;;  %v11752_v48 = vld [vmem:[%s12639_s19] ss:$0 sps:$4 sm:$0xff]   ;;  %v10531_v56 = vunpack.c.l.bf16 %v10586_v55  ;;  %v10532_v57 = vunpack.c.h.bf16 %v10586_v55 }
  0x6d   : > { %368 = vst [vmem:[#allocation2 + $0x191] sm:$0x1] %v12454_v0  ;;  %370 = vst [vmem:[#allocation3] sm:$0xff] %v12454_v0  ;;  %10721 = vmatpush3.bf16.msra.mxu1 %v11731_v21  ;;  %10610 = vmatprep.subr.bf16.mxu0 %v11732_v22  ;;  %v11753_v49 = vld [vmem:[%s12639_s19 + $0x4] ss:$0 sps:$4 sm:$0xff]   ;;  %v10587_v60 = vld [vmem:[%s12639_s19 + $0x18] sm:$0xff]  }
  0x6e   : > { %371 = vst [vmem:[#allocation3 + $0x8] sm:$0xff] %v12454_v0  ;;  %372 = vst [vmem:[#allocation3 + $0x10] sm:$0x3] %v12454_v0  ;;  %10722 = vmatprep.subr.bf16.mxu1 %v11733_v23  ;;  %v11759_v53 = vld [vmem:[%s12639_s19 + $0x8] ss:$0 sps:$4 sm:$0xff]   ;;  %v11751_v61 = vld [vmem:[#allocation9 + $0x138] sm:$0xff]   ;;  %v10535_v62 = vunpack.c.l.bf16 %v10587_v60  ;;  %v10536_v63 = vunpack.c.h.bf16 %v10587_v60 }
  0x6f   : > { %374 = vst [vmem:[#allocation3 + $0x198] sm:$0xff] %v12454_v0  ;;  %375 = vst [vmem:[#allocation3 + $0x1a0] sm:$0xff] %v12454_v0  ;;  %v11760_v54 = vld [vmem:[%s12639_s19 + $0xc] ss:$0 sps:$4 sm:$0xff]   ;;  %v11768_v58 = vld [vmem:[%s12639_s19 + $0x10] ss:$0 sps:$4 sm:$0xff]  }
  0x70   : > { %376 = vst [vmem:[#allocation3 + $0x1a8] sm:$0x3] %v12454_v0  ;;  %378 = vst [vmem:[#allocation3 + $0x18] sm:$0x1] %v12454_v0  ;;  %10611 = vmatpush3.bf16.msra.mxu0 %v11734_v24  ;;  %v11769_v59 = vld [vmem:[%s12639_s19 + $0x14] ss:$0 sps:$4 sm:$0xff]  }
  0x71   : > { %379 = vst [vmem:[#allocation3 + $0x30] sm:$0x1] %v12454_v0  ;;  %380 = vst [vmem:[#allocation3 + $0x48] sm:$0x1] %v12454_v0  ;;  %10723 = vmatpush3.bf16.msra.mxu1 %v11735_v25  ;;  %10612 = vmatprep.subr.bf16.mxu0 %v11736_v26  ;;  %v10588_v2 = vld [vmem:[%s12639_s19 + $0x20] sm:$0xff]   ;;  %v11766_v4 = vld [vmem:[#allocation9 + $0x170] sm:$0xff]  }
  0x72   : > { %381 = vst [vmem:[#allocation3 + $0x60] sm:$0x1] %v12454_v0  ;;  %382 = vst [vmem:[#allocation3 + $0x78] sm:$0x1] %v12454_v0  ;;  %10724 = vmatprep.subr.bf16.mxu1 %v11737_v27  ;;  %v10539_v5 = vunpack.c.l.bf16 %v10588_v2  ;;  %v10540_v6 = vunpack.c.h.bf16 %v10588_v2  ;;  %v11767_v16 = vld [vmem:[#allocation9 + $0x130] sm:$0xff]   ;;  %v11782_v20 = vld [vmem:[#allocation9 + $0x168] sm:$0xff]  }
  0x73   : > { %383 = vst [vmem:[#allocation3 + $0x90] sm:$0x1] %v12454_v0  ;;  %384 = vst [vmem:[#allocation3 + $0xa8] sm:$0x1] %v12454_v0  ;;  %v11784_v35 = vld [vmem:[%s12639_s19 + $0x20] ss:$0 sps:$4 sm:$0xff]  }
  0x74   : > { %385 = vst [vmem:[#allocation3 + $0xc0] sm:$0x1] %v12454_v0  ;;  %386 = vst [vmem:[#allocation3 + $0xd8] sm:$0x1] %v12454_v0  ;;  %10613 = vmatpush3.bf16.msra.mxu0 %v11738_v28  ;;  %v11785_v36 = vld [vmem:[%s12639_s19 + $0x24] ss:$0 sps:$4 sm:$0xff]  }
  0x75   : > { %387 = vst [vmem:[#allocation3 + $0xf0] sm:$0x1] %v12454_v0  ;;  %388 = vst [vmem:[#allocation3 + $0x108] sm:$0x1] %v12454_v0  ;;  %10725 = vmatpush3.bf16.msra.mxu1 %v11739_v29  ;;  %10614 = vmatprep.subr.bf16.mxu0 %v11740_v30  ;;  %s12383_s13 = sshll.u32 %s12456_s21, 4  ;;  %s12384_s13 = int_to_ptr.vmem [resolvable:$false] %s12383_s13 }
  0x76   : > { %389 = vst [vmem:[#allocation3 + $0x120] sm:$0x1] %v12454_v0  ;;  %390 = vst [vmem:[#allocation3 + $0x138] sm:$0x1] %v12454_v0  ;;  %10726 = vmatprep.subr.bf16.mxu1 %v11741_v31  ;;  %s12385_s14 = scalar_lea.vmem %s12384_s13, 8192 }
  0x77   : > { %391 = vst [vmem:[#allocation3 + $0x150] sm:$0x1] %v12454_v0  ;;  %392 = vst [vmem:[#allocation3 + $0x168] sm:$0x1] %v12454_v0 }
  0x78   : > { %393 = vst [vmem:[#allocation3 + $0x180] sm:$0x1] %v12454_v0  ;;  %396 = vst [vmem:[#allocation3 + $0x29] sm:$0x1] %v12454_v0  ;;  %10615 = vmatpush3.bf16.msra.mxu0 %v11742_v32 }
  0x79   : > { %397 = vst [vmem:[#allocation3 + $0x41] sm:$0x1] %v12454_v0  ;;  %398 = vst [vmem:[#allocation3 + $0x59] sm:$0x1] %v12454_v0  ;;  %10727 = vmatpush3.bf16.msra.mxu1 %v11743_v33  ;;  %10824 = vmatprep.subr.bf16.mxu0 %v11750_v47 }
  0x7a   : > { %399 = vst [vmem:[#allocation3 + $0x71] sm:$0x1] %v12454_v0  ;;  %400 = vst [vmem:[#allocation3 + $0x89] sm:$0x1] %v12454_v0 }
  0x7b   : > { %401 = vst [vmem:[#allocation3 + $0xa1] sm:$0x1] %v12454_v0  ;;  %402 = vst [vmem:[#allocation3 + $0xb9] sm:$0x1] %v12454_v0 }
  0x7c   : > { %403 = vst [vmem:[#allocation3 + $0xd1] sm:$0x1] %v12454_v0  ;;  %404 = vst [vmem:[#allocation3 + $0xe9] sm:$0x1] %v12454_v0 }
  0x7d   : > { %405 = vst [vmem:[#allocation3 + $0x101] sm:$0x1] %v12454_v0  ;;  %406 = vst [vmem:[#allocation3 + $0x119] sm:$0x1] %v12454_v0 }
  0x7e   : > { %407 = vst [vmem:[#allocation3 + $0x131] sm:$0x1] %v12454_v0  ;;  %408 = vst [vmem:[#allocation3 + $0x149] sm:$0x1] %v12454_v0 }
  0x7f   : > { %409 = vst [vmem:[#allocation3 + $0x161] sm:$0x1] %v12454_v0  ;;  %410 = vst [vmem:[#allocation3 + $0x179] sm:$0x1] %v12454_v0 }
  0x80   : > { %411 = vst [vmem:[#allocation3 + $0x191] sm:$0x1] %v12454_v0  ;;  %334 = vst [vmem:[#allocation2] sm:$0x1] %v12454_v0 }
  0x81   : > { %352 = vst [vmem:[#allocation2 + $0x11] sm:$0x1] %v12454_v0  ;;  %351 = vst [vmem:[#allocation2 + $0x198] sm:$0x1] %v12454_v0 }
  0x82   : > { %369 = vst [vmem:[#allocation2 + $0x1a9] sm:$0x1] %v12454_v0  ;;  %377 = vst [vmem:[#allocation3] sm:$0x1] %v12454_v0 }
  0x83   : > { %394 = vst [vmem:[#allocation3 + $0x198] sm:$0x1] %v12454_v0  ;;  %395 = vst [vmem:[#allocation3 + $0x11] sm:$0x1] %v12454_v0 }
  0x84   : > { %412 = vst [vmem:[#allocation3 + $0x1a9] sm:$0x1] %v12454_v0  ;;  %671 = vst [vmem:[#allocation4 + $0x24] sm:$0xf] %v12455_v1  ;;  %v11775_v0 = vld [vmem:[%s12639_s19 + $0x18] ss:$0 sps:$4 sm:$0xff]  }
  0x85   : > { %862 = vst [vmem:[#allocation4 + $0x4] sm:$0xf] %v9976_v38  ;;  %863 = vst [vmem:[#allocation4 + $0x28] sm:$0xf] %v9977_v39  ;;  %v11776_v1 = vld [vmem:[%s12639_s19 + $0x1c] ss:$0 sps:$4 sm:$0xff]  }
  0x86   : > { %478 = vst [vmem:[#allocation2 + $0x19] sm:$0xff] %v10523_v43  ;;  %479 = vst [vmem:[#allocation2 + $0x21] sm:$0xff] %v10524_v44 }
  0x87   : > { %v510_v34 = vld [vmem:[#allocation2] sm:$0xff]  ;;  %1054 = vst [vmem:[#allocation4 + $0x8] sm:$0xf] %v10008_v45  ;;  %864 = vst [vmem:[#allocation4 + $0x4c] sm:$0xf] %v11752_v48 }
  0x88   : > { %v9944_v37 = vpack.c.bf16 %v510_v34, %v510_v34  ;;  %v895_v42 = vld [vmem:[#allocation2 + $0xa] sm:$0xff]  ;;  %865 = vst [vmem:[#allocation4 + $0x70] sm:$0xf] %v11753_v49  ;;  %480 = vst [vmem:[#allocation2 + $0x31] sm:$0xff] %v10527_v51 }
  0x89   : > { %v10009_v46 = vpack.c.bf16 %v895_v42, %v895_v42  ;;  %481 = vst [vmem:[#allocation2 + $0x39] sm:$0xff] %v10528_v52  ;;  %866 = vst [vmem:[#allocation4 + $0x94] sm:$0xf] %v11759_v53  ;;  %v11783_v34 = vld [vmem:[#allocation9 + $0x128] sm:$0xff]  }
  0x8a   : > { %670 = vst [vmem:[#allocation4] sm:$0xf] %v9944_v37  ;;  %867 = vst [vmem:[#allocation4 + $0xb8] sm:$0xf] %v11760_v54  ;;  %v10589_v49 = vld [vmem:[%s12639_s19 + $0x28] sm:$0xff]  }
  0x8b   : > { %1055 = vst [vmem:[#allocation4 + $0x2c] sm:$0xf] %v10009_v46  ;;  %482 = vst [vmem:[#allocation2 + $0x49] sm:$0xff] %v10531_v56  ;;  %v10543_v53 = vunpack.c.l.bf16 %v10589_v49  ;;  %v10544_v54 = vunpack.c.h.bf16 %v10589_v49 }
  0x8c   : > { %483 = vst [vmem:[#allocation2 + $0x51] sm:$0xff] %v10532_v57  ;;  %868 = vst [vmem:[#allocation4 + $0xdc] sm:$0xf] %v11768_v58  ;;  %v11746_v7 = vld [vmem:[#allocation4 + $0x4] ss:$36 sps:$4 sm:$0xff]  }
  0x8d   : > { %869 = vst [vmem:[#allocation4 + $0x100] sm:$0xf] %v11769_v59  ;;  %v1086_v8 = vld [vmem:[#allocation2 + $0x18] sm:$0xff]  ;;  %v1087_v9 = vld [vmem:[#allocation2 + $0x20] sm:$0xff]  ;;  %484 = vst [vmem:[#allocation2 + $0x61] sm:$0xff] %v10535_v62  ;;  %3743 = vmatprep.mubr.bf16.mxu0 %v11746_v7 }
  0x8e   : > { %485 = vst [vmem:[#allocation2 + $0x69] sm:$0xff] %v10536_v63  ;;  %870 = vst [vmem:[#allocation4 + $0x124] sm:$0xf] %v11775_v0  ;;  %v10040_v10 = vpack.c.bf16 %v1086_v8, %v1086_v8  ;;  %v10041_v11 = vpack.c.bf16 %v1087_v9, %v1087_v9  ;;  %v896_v12 = vld [vmem:[#allocation2 + $0x1a] sm:$0xff]  ;;  %v897_v13 = vld [vmem:[#allocation2 + $0x22] sm:$0xff] }
  0x8f   : > { %871 = vst [vmem:[#allocation4 + $0x148] sm:$0xf] %v11776_v1  ;;  %486 = vst [vmem:[#allocation2 + $0x79] sm:$0xff] %v10539_v5  ;;  %v10010_v14 = vpack.c.bf16 %v896_v12, %v896_v12  ;;  %v10011_v15 = vpack.c.bf16 %v897_v13, %v897_v13  ;;  %v1088_v17 = vld [vmem:[#allocation2 + $0x30] sm:$0xff]  ;;  %v11791_v62 = vld [vmem:[%s12639_s19 + $0x28] ss:$0 sps:$4 sm:$0xff]  }
  0x90   : > { %487 = vst [vmem:[#allocation2 + $0x81] sm:$0xff] %v10540_v6  ;;  %1246 = vst [vmem:[#allocation4 + $0xc] sm:$0xf] %v10040_v10  ;;  %v1089_v18 = vld [vmem:[#allocation2 + $0x38] sm:$0xff]  ;;  %v10042_v21 = vpack.c.bf16 %v1088_v17, %v1088_v17  ;;  %v11754_v60 = vld [vmem:[#allocation4 + $0x4c] ss:$36 sps:$4 sm:$0xff]  }
  0x91   : > { %v11744_v3 = vld [vmem:[#allocation4] ss:$36 sps:$4 sm:$0xff]   ;;  %1247 = vst [vmem:[#allocation4 + $0x30] sm:$0xf] %v10041_v11  ;;  %672 = vst [vmem:[#allocation4 + $0x48] sm:$0xf] %v10040_v10  ;;  %v10043_v22 = vpack.c.bf16 %v1089_v18, %v1089_v18 }
  0x92   : > { %3744 = vmatmul.mubr.bf16.vlgmr.msra.gmra.mxu0 %v11744_v3  ;;  %673 = vst [vmem:[#allocation4 + $0x6c] sm:$0xf] %v10041_v11  ;;  %v898_v19 = vld [vmem:[#allocation2 + $0x32] sm:$0xff]  ;;  %1056 = vst [vmem:[#allocation4 + $0x50] sm:$0xf] %v10010_v14  ;;  %v899_v23 = vld [vmem:[#allocation2 + $0x3a] sm:$0xff] }
  0x93   : > { %10825 = vmatpush3.bf16.msra.mxu0 %v11751_v61  ;;  %1057 = vst [vmem:[#allocation4 + $0x74] sm:$0xf] %v10011_v15  ;;  %v10012_v24 = vpack.c.bf16 %v898_v19, %v898_v19  ;;  %v1090_v25 = vld [vmem:[#allocation2 + $0x48] sm:$0xff]  ;;  %v1091_v26 = vld [vmem:[#allocation2 + $0x50] sm:$0xff]  ;;  %v10013_v27 = vpack.c.bf16 %v899_v23, %v899_v23  ;;  %1248 = vst [vmem:[#allocation4 + $0x54] sm:$0xf] %v10042_v21  ;;  %3751 = vmatprep.mubr.bf16.mxu0 %v11754_v60 }
  0x94   : > { %v10044_v28 = vpack.c.bf16 %v1090_v25, %v1090_v25  ;;  %v10045_v29 = vpack.c.bf16 %v1091_v26, %v1091_v26  ;;  %10826 = vmatprep.subr.bf16.mxu0 %v11766_v4  ;;  %v900_v30 = vld [vmem:[#allocation2 + $0x4a] sm:$0xff]  ;;  %v901_v31 = vld [vmem:[#allocation2 + $0x52] sm:$0xff]  ;;  %1249 = vst [vmem:[#allocation4 + $0x78] sm:$0xf] %v10043_v22  ;;  %674 = vst [vmem:[#allocation4 + $0x90] sm:$0xf] %v10042_v21 }
  0x95   : > { %675 = vst [vmem:[#allocation4 + $0xb4] sm:$0xf] %v10043_v22  ;;  %1058 = vst [vmem:[#allocation4 + $0x98] sm:$0xf] %v10012_v24  ;;  %v10014_v32 = vpack.c.bf16 %v900_v30, %v900_v30  ;;  %v10015_v33 = vpack.c.bf16 %v901_v31, %v901_v31  ;;  %v1092_v37 = vld [vmem:[#allocation2 + $0x60] sm:$0xff]  ;;  %v1093_v38 = vld [vmem:[#allocation2 + $0x68] sm:$0xff] }
  0x96   : > { %1059 = vst [vmem:[#allocation4 + $0xbc] sm:$0xf] %v10013_v27  ;;  %1250 = vst [vmem:[#allocation4 + $0x9c] sm:$0xf] %v10044_v28  ;;  %v902_v39 = vld [vmem:[#allocation2 + $0x62] sm:$0xff]  ;;  %v10046_v40 = vpack.c.bf16 %v1092_v37, %v1092_v37  ;;  %v10047_v41 = vpack.c.bf16 %v1093_v38, %v1093_v38  ;;  %v903_v42 = vld [vmem:[#allocation2 + $0x6a] sm:$0xff] }
  0x97   : > { %1251 = vst [vmem:[#allocation4 + $0xc0] sm:$0xf] %v10045_v29  ;;  %676 = vst [vmem:[#allocation4 + $0xd8] sm:$0xf] %v10044_v28  ;;  %10827 = vmatpush3.bf16.msra.mxu0 %v11767_v16  ;;  %v10016_v43 = vpack.c.bf16 %v902_v39, %v902_v39  ;;  %v1094_v44 = vld [vmem:[#allocation2 + $0x78] sm:$0xff]  ;;  %v1095_v45 = vld [vmem:[#allocation2 + $0x80] sm:$0xff]  ;;  %v10017_v46 = vpack.c.bf16 %v903_v42, %v903_v42 }
  0x98   : > { %677 = vst [vmem:[#allocation4 + $0xfc] sm:$0xf] %v10045_v29  ;;  %1060 = vst [vmem:[#allocation4 + $0xe0] sm:$0xf] %v10014_v32  ;;  %v10048_v47 = vpack.c.bf16 %v1094_v44, %v1094_v44  ;;  %v10049_v48 = vpack.c.bf16 %v1095_v45, %v1095_v45  ;;  %10828 = vmatprep.subr.bf16.mxu0 %v11782_v20  ;;  %v904_v50 = vld [vmem:[#allocation2 + $0x7a] sm:$0xff]  ;;  %v905_v51 = vld [vmem:[#allocation2 + $0x82] sm:$0xff] }
  0x99   : > { %1061 = vst [vmem:[#allocation4 + $0x104] sm:$0xf] %v10015_v33  ;;  %872 = vst [vmem:[#allocation4 + $0x16c] sm:$0xf] %v11784_v35  ;;  %v11747_v52 = vld [vmem:[#allocation4 + $0x8] ss:$36 sps:$4 sm:$0xff]   ;;  %v10018_v55 = vpack.c.bf16 %v904_v50, %v904_v50  ;;  %v10019_v56 = vpack.c.bf16 %v905_v51, %v905_v51 }
  0x9a   : > { %873 = vst [vmem:[#allocation4 + $0x190] sm:$0xf] %v11785_v36  ;;  %1252 = vst [vmem:[#allocation4 + $0xe4] sm:$0xf] %v10046_v40  ;;  %v11749_v57 = vld [vmem:[#allocation4 + $0xc] ss:$36 sps:$4 sm:$0xff]  }
  0x9b   : > { %1253 = vst [vmem:[#allocation4 + $0x108] sm:$0xf] %v10047_v41  ;;  %678 = vst [vmem:[#allocation4 + $0x120] sm:$0xf] %v10046_v40  ;;  %v2249_v58 = vld [vmem:[#allocation4 + $0x48] sm:$0xff]  ;;  %10829 = vmatpush3.bf16.msra.mxu0 %v11783_v34  ;;  %3904 = vmatprep.mubr.bf16.mxu1 %v11749_v57  ;;  %v2259_v2 = vld [vmem:[#allocation4 + $0x90] sm:$0xff] }
  0x9c   : > { %679 = vst [vmem:[#allocation4 + $0x144] sm:$0xf] %v10047_v41  ;;  %1062 = vst [vmem:[#allocation4 + $0x128] sm:$0xf] %v10016_v43  ;;  %v2254_v59 = vld [vmem:[#allocation4 + $0x6c] sm:$0xff]  ;;  %3905 = vmatmul.mubr.bf16.vlgmr.msra.gmra.mxu1 %v11747_v52  ;;  %v2264_v3 = vld [vmem:[#allocation4 + $0xb4] sm:$0xff] }
  0x9d   : > { %1063 = vst [vmem:[#allocation4 + $0x14c] sm:$0xf] %v10017_v46  ;;  %1254 = vst [vmem:[#allocation4 + $0x12c] sm:$0xf] %v10048_v47  ;;  %v9223_v61 = vcombine.low %v2249_v58, %v2254_v59  ;;  %v11792_v63 = vld [vmem:[%s12639_s19 + $0x2c] ss:$0 sps:$4 sm:$0xff]   ;;  %v9232_v6 = vcombine.low %v2259_v2, %v2264_v3 }
  0x9e   : > { %1255 = vst [vmem:[#allocation4 + $0x150] sm:$0xf] %v10049_v48  ;;  %680 = vst [vmem:[#allocation4 + $0x168] sm:$0xf] %v10048_v47  ;;  %v11756_v0 = vld [vmem:[#allocation4 + $0x54] ss:$36 sps:$4 sm:$0xff]  }
  0x9f   : > { %681 = vst [vmem:[#allocation4 + $0x18c] sm:$0xf] %v10049_v48  ;;  %488 = vst [vmem:[#allocation2 + $0x91] sm:$0xff] %v10543_v53  ;;  %3912 = vmatprep.mubr.bf16.mxu1 %v11756_v0  ;;  %3752 = vmatmul.mubr.bf16.gmra.mxu0 %v9223_v61  ;;  %v11761_v1 = vld [vmem:[#allocation4 + $0x94] ss:$36 sps:$4 sm:$0xff]   ;;  %v2274_v9 = vld [vmem:[#allocation4 + $0xfc] sm:$0xff] }
  0xa0   : > { %489 = vst [vmem:[#allocation2 + $0x99] sm:$0xff] %v10544_v54  ;;  %1064 = vst [vmem:[#allocation4 + $0x170] sm:$0xf] %v10018_v55  ;;  %3759 = vmatprep.mubr.bf16.mxu0 %v11761_v1  ;;  %v11758_v4 = vld [vmem:[#allocation4 + $0x50] ss:$36 sps:$4 sm:$0xff]   ;;  %v2269_v8 = vld [vmem:[#allocation4 + $0xd8] sm:$0xff] }
  0xa1   : > { %1065 = vst [vmem:[#allocation4 + $0x194] sm:$0xf] %v10019_v56  ;;  %874 = vst [vmem:[#allocation4 + $0x1b4] sm:$0xf] %v11791_v62  ;;  %v11763_v5 = vld [vmem:[#allocation4 + $0x9c] ss:$36 sps:$4 sm:$0xff]   ;;  %v9241_v29 = vcombine.low %v2269_v8, %v2274_v9 }
  0xa2   : > { %875 = vst [vmem:[#allocation4 + $0x1d8] sm:$0xf] %v11792_v63  ;;  %v11770_v7 = vld [vmem:[#allocation4 + $0xdc] ss:$36 sps:$4 sm:$0xff]   ;;  %v10590_v14 = vld [vmem:[%s12639_s19 + $0x30] sm:$0xff]   ;;  %v10593_v42 = vld [vmem:[%s12639_s19 + $0x48] sm:$0xff]  }
  0xa3   : > { %v11765_v17 = vld [vmem:[#allocation4 + $0x98] ss:$36 sps:$4 sm:$0xff]   ;;  %v10547_v18 = vunpack.c.l.bf16 %v10590_v14  ;;  %v10548_v19 = vunpack.c.h.bf16 %v10590_v14  ;;  %v11798_v22 = vld [vmem:[#allocation9 + $0x160] sm:$0xff]   ;;  %v11800_v26 = vld [vmem:[%s12639_s19 + $0x30] ss:$0 sps:$4 sm:$0xff]   ;;  %v10559_v43 = vunpack.c.l.bf16 %v10593_v42  ;;  %v10560_v44 = vunpack.c.h.bf16 %v10593_v42 }
  0xa4   : > { %3913 = vmatmul.mubr.bf16.gmra.mxu1 %v11758_v4  ;;  %v11772_v23 = vld [vmem:[#allocation4 + $0xe4] ss:$36 sps:$4 sm:$0xff]   ;;  %10830 = vmatprep.subr.bf16.mxu0 %v11798_v22  ;;  %v11801_v27 = vld [vmem:[%s12639_s19 + $0x34] ss:$0 sps:$4 sm:$0xff]   ;;  %v10591_v28 = vld [vmem:[%s12639_s19 + $0x38] sm:$0xff]  }
  0xa5   : > { %3920 = vmatprep.mubr.bf16.mxu1 %v11763_v5  ;;  %v11799_v24 = vld [vmem:[#allocation9 + $0x120] sm:$0xff]   ;;  %490 = vst [vmem:[#allocation2 + $0xa9] sm:$0xff] %v10547_v18  ;;  %491 = vst [vmem:[#allocation2 + $0xb1] sm:$0xff] %v10548_v19  ;;  %v10551_v30 = vunpack.c.l.bf16 %v10591_v28  ;;  %v10552_v31 = vunpack.c.h.bf16 %v10591_v28  ;;  %v11807_v32 = vld [vmem:[%s12639_s19 + $0x38] ss:$0 sps:$4 sm:$0xff]  }
  0xa6   : > { %v1096_v10 = vld [vmem:[#allocation2 + $0x90] sm:$0xff]  ;;  %v11777_v25 = vld [vmem:[#allocation4 + $0x124] ss:$36 sps:$4 sm:$0xff]   ;;  %10831 = vmatpush3.bf16.msra.mxu0 %v11799_v24  ;;  %v11808_v33 = vld [vmem:[%s12639_s19 + $0x3c] ss:$0 sps:$4 sm:$0xff]   ;;  %496 = vst [vmem:[#allocation2 + $0xf1] sm:$0xff] %v10559_v43 }
  0xa7   : > { %v1097_v11 = vld [vmem:[#allocation2 + $0x98] sm:$0xff]  ;;  %3760 = vmatmul.mubr.bf16.gmra.mxu0 %v9232_v6  ;;  %v10050_v12 = vpack.c.bf16 %v1096_v10, %v1096_v10  ;;  %v10592_v34 = vld [vmem:[%s12639_s19 + $0x40] sm:$0xff]   ;;  %876 = vst [vmem:[#allocation4 + $0x1fc] sm:$0xf] %v11800_v26  ;;  %877 = vst [vmem:[#allocation4 + $0x220] sm:$0xf] %v11801_v27 }
  0xa8   : > { %v10051_v13 = vpack.c.bf16 %v1097_v11, %v1097_v11  ;;  %v906_v15 = vld [vmem:[#allocation2 + $0x92] sm:$0xff]  ;;  %v907_v16 = vld [vmem:[#allocation2 + $0x9a] sm:$0xff]  ;;  %3767 = vmatprep.mubr.bf16.mxu0 %v11770_v7  ;;  %v10555_v35 = vunpack.c.l.bf16 %v10592_v34  ;;  %v10556_v36 = vunpack.c.h.bf16 %v10592_v34  ;;  %492 = vst [vmem:[#allocation2 + $0xc1] sm:$0xff] %v10551_v30  ;;  %493 = vst [vmem:[#allocation2 + $0xc9] sm:$0xff] %v10552_v31 }
  0xa9   : > { %v10020_v20 = vpack.c.bf16 %v906_v15, %v906_v15  ;;  %v10021_v21 = vpack.c.bf16 %v907_v16, %v907_v16  ;;  %1256 = vst [vmem:[#allocation4 + $0x174] sm:$0xf] %v10050_v12  ;;  %682 = vst [vmem:[#allocation4 + $0x1b0] sm:$0xf] %v10050_v12  ;;  %v11814_v37 = vld [vmem:[#allocation9 + $0x158] sm:$0xff]   ;;  %v12758_v39 = vld [vmem:[#allocation4 + $0x120] sm:$0xff] }
  0xaa   : > { %1257 = vst [vmem:[#allocation4 + $0x198] sm:$0xf] %v10051_v13  ;;  %683 = vst [vmem:[#allocation4 + $0x1d4] sm:$0xf] %v10051_v13  ;;  %v11815_v38 = vld [vmem:[#allocation9 + $0x118] sm:$0xff]   ;;  %10832 = vmatprep.subr.bf16.mxu0 %v11814_v37  ;;  %v10594_v47 = vld [vmem:[%s12639_s19 + $0x50] sm:$0xff]  }
  0xab   : > { %1066 = vst [vmem:[#allocation4 + $0x1b8] sm:$0xf] %v10020_v20  ;;  %1067 = vst [vmem:[#allocation4 + $0x1dc] sm:$0xf] %v10021_v21  ;;  %v11816_v40 = vld [vmem:[%s12639_s19 + $0x40] ss:$0 sps:$4 sm:$0xff]   ;;  %10833 = vmatpush3.bf16.msra.mxu0 %v11815_v38  ;;  %v10563_v49 = vunpack.c.l.bf16 %v10594_v47  ;;  %v10564_v50 = vunpack.c.h.bf16 %v10594_v47 }
  0xac   : > { %878 = vst [vmem:[#allocation4 + $0x244] sm:$0xf] %v11807_v32  ;;  %879 = vst [vmem:[#allocation4 + $0x268] sm:$0xf] %v11808_v33  ;;  %3921 = vmatmul.mubr.bf16.gmra.mxu1 %v11765_v17  ;;  %v11817_v41 = vld [vmem:[%s12639_s19 + $0x44] ss:$0 sps:$4 sm:$0xff]  }
  0xad   : > { %494 = vst [vmem:[#allocation2 + $0xd9] sm:$0xff] %v10555_v35  ;;  %495 = vst [vmem:[#allocation2 + $0xe1] sm:$0xff] %v10556_v36  ;;  %3928 = vmatprep.mubr.bf16.mxu1 %v11772_v23  ;;  %v11823_v45 = vld [vmem:[%s12639_s19 + $0x48] ss:$0 sps:$4 sm:$0xff]   ;;  %v11824_v46 = vld [vmem:[%s12639_s19 + $0x4c] ss:$0 sps:$4 sm:$0xff]  }
  0xae   : > { %v2284_v48 = vld [vmem:[#allocation4 + $0x144] sm:$0xff]  ;;  %880 = vst [vmem:[#allocation4 + $0x28c] sm:$0xf] %v11816_v40  ;;  %881 = vst [vmem:[#allocation4 + $0x2b0] sm:$0xf] %v11817_v41  ;;  %v1099_v55 = vld [vmem:[#allocation2 + $0xb0] sm:$0xff] }
  0xaf   : > { %3768 = vmatmul.mubr.bf16.gmra.mxu0 %v9241_v29  ;;  %v11774_v51 = vld [vmem:[#allocation4 + $0xe0] ss:$36 sps:$4 sm:$0xff]   ;;  %v11779_v52 = vld [vmem:[#allocation4 + $0x12c] ss:$36 sps:$4 sm:$0xff]   ;;  %497 = vst [vmem:[#allocation2 + $0xf9] sm:$0xff] %v10560_v44  ;;  %498 = vst [vmem:[#allocation2 + $0x109] sm:$0xff] %v10563_v49  ;;  %v9250_v56 = vcombine.low %v12758_v39, %v2284_v48  ;;  %v10053_v58 = vpack.c.bf16 %v1099_v55, %v1099_v55 }
  0xb0   : > { %3775 = vmatprep.mubr.bf16.mxu0 %v11777_v25  ;;  %882 = vst [vmem:[#allocation4 + $0x2d4] sm:$0xf] %v11823_v45  ;;  %883 = vst [vmem:[#allocation4 + $0x2f8] sm:$0xf] %v11824_v46  ;;  %v11786_v53 = vld [vmem:[#allocation4 + $0x16c] ss:$36 sps:$4 sm:$0xff]  }
  0xb1   : > { %v1098_v54 = vld [vmem:[#allocation2 + $0xa8] sm:$0xff]  ;;  %499 = vst [vmem:[#allocation2 + $0x111] sm:$0xff] %v10564_v50  ;;  %v909_v60 = vld [vmem:[#allocation2 + $0xb2] sm:$0xff]  ;;  %v1100_v63 = vld [vmem:[#allocation2 + $0xc0] sm:$0xff] }
  0xb2   : > { %v10052_v57 = vpack.c.bf16 %v1098_v54, %v1098_v54  ;;  %v908_v59 = vld [vmem:[#allocation2 + $0xaa] sm:$0xff]  ;;  %v10023_v62 = vpack.c.bf16 %v909_v60, %v909_v60  ;;  %v910_v1 = vld [vmem:[#allocation2 + $0xc2] sm:$0xff]  ;;  %1259 = vst [vmem:[#allocation4 + $0x1e0] sm:$0xf] %v10053_v58  ;;  %685 = vst [vmem:[#allocation4 + $0x21c] sm:$0xf] %v10053_v58  ;;  %v10054_v2 = vpack.c.bf16 %v1100_v63, %v1100_v63 }
  0xb3   : > { %v10022_v61 = vpack.c.bf16 %v908_v59, %v908_v59  ;;  %v1101_v0 = vld [vmem:[#allocation2 + $0xc8] sm:$0xff]  ;;  %v10024_v5 = vpack.c.bf16 %v910_v1, %v910_v1  ;;  %v11830_v17 = vld [vmem:[#allocation9 + $0x150] sm:$0xff]   ;;  %v10595_v36 = vld [vmem:[%s12639_s19 + $0x58] sm:$0xff]  }
  0xb4   : > { %1258 = vst [vmem:[#allocation4 + $0x1bc] sm:$0xf] %v10052_v57  ;;  %684 = vst [vmem:[#allocation4 + $0x1f8] sm:$0xf] %v10052_v57  ;;  %v10055_v3 = vpack.c.bf16 %v1101_v0, %v1101_v0  ;;  %v911_v4 = vld [vmem:[#allocation2 + $0xca] sm:$0xff]  ;;  %v1102_v6 = vld [vmem:[#allocation2 + $0xd8] sm:$0xff]  ;;  %3929 = vmatmul.mubr.bf16.gmra.mxu1 %v11774_v51  ;;  %10834 = vmatprep.subr.bf16.mxu0 %v11830_v17  ;;  %v10567_v40 = vunpack.c.l.bf16 %v10595_v36  ;;  %v10568_v41 = vunpack.c.h.bf16 %v10595_v36 }
  0xb5   : > { %v1103_v7 = vld [vmem:[#allocation2 + $0xe0] sm:$0xff]  ;;  %v12767_v8 = vld [vmem:[#allocation4 + $0x168] sm:$0xff]  ;;  %1068 = vst [vmem:[#allocation4 + $0x200] sm:$0xf] %v10022_v61  ;;  %1069 = vst [vmem:[#allocation4 + $0x224] sm:$0xf] %v10023_v62  ;;  %v10025_v10 = vpack.c.bf16 %v911_v4, %v911_v4  ;;  %v10056_v11 = vpack.c.bf16 %v1102_v6, %v1102_v6  ;;  %3936 = vmatprep.mubr.bf16.mxu1 %v11779_v52 }
  0xb6   : > { %v12769_v9 = vld [vmem:[#allocation4 + $0x18c] sm:$0xff]  ;;  %v10057_v12 = vpack.c.bf16 %v1103_v7, %v1103_v7  ;;  %v912_v13 = vld [vmem:[#allocation2 + $0xda] sm:$0xff]  ;;  %v913_v14 = vld [vmem:[#allocation2 + $0xe2] sm:$0xff]  ;;  %1260 = vst [vmem:[#allocation4 + $0x204] sm:$0xf] %v10054_v2 }
  0xb7   : > { %3776 = vmatmul.mubr.bf16.gmra.mxu0 %v9250_v56  ;;  %1261 = vst [vmem:[#allocation4 + $0x228] sm:$0xf] %v10055_v3  ;;  %686 = vst [vmem:[#allocation4 + $0x240] sm:$0xf] %v10054_v2  ;;  %v10026_v15 = vpack.c.bf16 %v912_v13, %v912_v13  ;;  %v10027_v16 = vpack.c.bf16 %v913_v14, %v913_v14  ;;  %v11781_v18 = vld [vmem:[#allocation4 + $0x128] ss:$36 sps:$4 sm:$0xff]   ;;  %v9259_v35 = vcombine.low %v12767_v8, %v12769_v9 }
  0xb8   : > { %687 = vst [vmem:[#allocation4 + $0x264] sm:$0xf] %v10055_v3  ;;  %1070 = vst [vmem:[#allocation4 + $0x248] sm:$0xf] %v10024_v5  ;;  %3783 = vmatprep.mubr.bf16.mxu0 %v11786_v53  ;;  %v1104_v19 = vld [vmem:[#allocation2 + $0xf0] sm:$0xff]  ;;  %v1105_v20 = vld [vmem:[#allocation2 + $0xf8] sm:$0xff] }
  0xb9   : > { %1071 = vst [vmem:[#allocation4 + $0x26c] sm:$0xf] %v10025_v10  ;;  %1262 = vst [vmem:[#allocation4 + $0x24c] sm:$0xf] %v10056_v11  ;;  %v914_v21 = vld [vmem:[#allocation2 + $0xf2] sm:$0xff]  ;;  %v10058_v23 = vpack.c.bf16 %v1104_v19, %v1104_v19  ;;  %v10059_v24 = vpack.c.bf16 %v1105_v20, %v1105_v20  ;;  %v915_v25 = vld [vmem:[#allocation2 + $0xfa] sm:$0xff] }
  0xba   : > { %1263 = vst [vmem:[#allocation4 + $0x270] sm:$0xf] %v10057_v12  ;;  %688 = vst [vmem:[#allocation4 + $0x288] sm:$0xf] %v10056_v11  ;;  %v11788_v22 = vld [vmem:[#allocation4 + $0x174] ss:$36 sps:$4 sm:$0xff]   ;;  %v10028_v26 = vpack.c.bf16 %v914_v21, %v914_v21  ;;  %v10029_v29 = vpack.c.bf16 %v915_v25, %v915_v25 }
  0xbb   : > { %689 = vst [vmem:[#allocation4 + $0x2ac] sm:$0xf] %v10057_v12  ;;  %1072 = vst [vmem:[#allocation4 + $0x290] sm:$0xf] %v10026_v15  ;;  %v1106_v27 = vld [vmem:[#allocation2 + $0x108] sm:$0xff]  ;;  %v1107_v28 = vld [vmem:[#allocation2 + $0x110] sm:$0xff] }
  0xbc   : > { %1073 = vst [vmem:[#allocation4 + $0x2b4] sm:$0xf] %v10027_v16  ;;  %v10060_v30 = vpack.c.bf16 %v1106_v27, %v1106_v27  ;;  %v10061_v31 = vpack.c.bf16 %v1107_v28, %v1107_v28  ;;  %v11831_v32 = vld [vmem:[#allocation9 + $0x110] sm:$0xff]   ;;  %1264 = vst [vmem:[#allocation4 + $0x294] sm:$0xf] %v10058_v23  ;;  %3937 = vmatmul.mubr.bf16.gmra.mxu1 %v11781_v18  ;;  %v2309_v50 = vld [vmem:[#allocation4 + $0x1f8] sm:$0xff] }
  0xbd   : > { %v11832_v33 = vld [vmem:[%s12639_s19 + $0x50] ss:$0 sps:$4 sm:$0xff]   ;;  %v11833_v34 = vld [vmem:[%s12639_s19 + $0x54] ss:$0 sps:$4 sm:$0xff]   ;;  %1265 = vst [vmem:[#allocation4 + $0x2b8] sm:$0xf] %v10059_v24  ;;  %10835 = vmatpush3.bf16.msra.mxu0 %v11831_v32  ;;  %3944 = vmatprep.mubr.bf16.mxu1 %v11788_v22 }
  0xbe   : > { %690 = vst [vmem:[#allocation4 + $0x2d0] sm:$0xf] %v10058_v23  ;;  %691 = vst [vmem:[#allocation4 + $0x2f4] sm:$0xf] %v10059_v24  ;;  %v916_v37 = vld [vmem:[#allocation2 + $0x10a] sm:$0xff]  ;;  %v917_v38 = vld [vmem:[#allocation2 + $0x112] sm:$0xff] }
  0xbf   : > { %1074 = vst [vmem:[#allocation4 + $0x2d8] sm:$0xf] %v10028_v26  ;;  %v11793_v39 = vld [vmem:[#allocation4 + $0x1b4] ss:$36 sps:$4 sm:$0xff]   ;;  %1075 = vst [vmem:[#allocation4 + $0x2fc] sm:$0xf] %v10029_v29  ;;  %v10030_v42 = vpack.c.bf16 %v916_v37, %v916_v37  ;;  %v10031_v43 = vpack.c.bf16 %v917_v38, %v917_v38  ;;  %3784 = vmatmul.mubr.bf16.gmra.mxu0 %v9259_v35 }
  0xc0   : > { %1266 = vst [vmem:[#allocation4 + $0x2dc] sm:$0xf] %v10060_v30  ;;  %1267 = vst [vmem:[#allocation4 + $0x300] sm:$0xf] %v10061_v31  ;;  %v2299_v44 = vld [vmem:[#allocation4 + $0x1b0] sm:$0xff]  ;;  %3791 = vmatprep.mubr.bf16.mxu0 %v11793_v39  ;;  %v2314_v51 = vld [vmem:[#allocation4 + $0x21c] sm:$0xff] }
  0xc1   : > { %692 = vst [vmem:[#allocation4 + $0x318] sm:$0xf] %v10060_v30  ;;  %693 = vst [vmem:[#allocation4 + $0x33c] sm:$0xf] %v10061_v31  ;;  %v2304_v45 = vld [vmem:[#allocation4 + $0x1d4] sm:$0xff]  ;;  %v10596_v60 = vld [vmem:[%s12639_s19 + $0x60] sm:$0xff]   ;;  %v9277_v5 = vcombine.low %v2309_v50, %v2314_v51 }
  0xc2   : > { %884 = vst [vmem:[#allocation4 + $0x31c] sm:$0xf] %v11832_v33  ;;  %885 = vst [vmem:[#allocation4 + $0x340] sm:$0xf] %v11833_v34  ;;  %v11790_v46 = vld [vmem:[#allocation4 + $0x170] ss:$36 sps:$4 sm:$0xff]   ;;  %v9268_v48 = vcombine.low %v2299_v44, %v2304_v45  ;;  %v10571_v0 = vunpack.c.l.bf16 %v10596_v60  ;;  %v10572_v1 = vunpack.c.h.bf16 %v10596_v60 }
  0xc3   : > { %500 = vst [vmem:[#allocation2 + $0x121] sm:$0xff] %v10567_v40  ;;  %501 = vst [vmem:[#allocation2 + $0x129] sm:$0xff] %v10568_v41  ;;  %v11795_v47 = vld [vmem:[#allocation4 + $0x1bc] ss:$36 sps:$4 sm:$0xff]   ;;  %v11839_v56 = vld [vmem:[%s12639_s19 + $0x58] ss:$0 sps:$4 sm:$0xff]  }
  0xc4   : > { %1076 = vst [vmem:[#allocation4 + $0x320] sm:$0xf] %v10030_v42  ;;  %1077 = vst [vmem:[#allocation4 + $0x344] sm:$0xf] %v10031_v43  ;;  %v11802_v49 = vld [vmem:[#allocation4 + $0x1fc] ss:$36 sps:$4 sm:$0xff]   ;;  %3945 = vmatmul.mubr.bf16.gmra.mxu1 %v11790_v46 }
  0xc5   : > { %3952 = vmatprep.mubr.bf16.mxu1 %v11795_v47  ;;  %v11797_v53 = vld [vmem:[#allocation4 + $0x1b8] ss:$36 sps:$4 sm:$0xff]   ;;  %v11804_v58 = vld [vmem:[#allocation4 + $0x204] ss:$36 sps:$4 sm:$0xff]   ;;  %886 = vst [vmem:[#allocation4 + $0x364] sm:$0xf] %v11839_v56 }
  0xc6   : > { %v11840_v57 = vld [vmem:[%s12639_s19 + $0x5c] ss:$0 sps:$4 sm:$0xff]   ;;  %v11809_v63 = vld [vmem:[#allocation4 + $0x244] ss:$36 sps:$4 sm:$0xff]   ;;  %502 = vst [vmem:[#allocation2 + $0x139] sm:$0xff] %v10571_v0  ;;  %503 = vst [vmem:[#allocation2 + $0x141] sm:$0xff] %v10572_v1 }
  0xc7   : > { %3792 = vmatmul.mubr.bf16.gmra.mxu0 %v9268_v48  ;;  %887 = vst [vmem:[#allocation4 + $0x388] sm:$0xf] %v11840_v57  ;;  %v11846_v4 = vld [vmem:[#allocation9 + $0x148] sm:$0xff]   ;;  %v11848_v7 = vld [vmem:[#allocation9 + $0x1f8] sm:$0xff]   ;;  %v2319_v9 = vld [vmem:[#allocation4 + $0x240] sm:$0xff] }
  0xc8   : > { %3799 = vmatprep.mubr.bf16.mxu0 %v11802_v49  ;;  %v11847_v6 = vld [vmem:[#allocation9 + $0x108] sm:$0xff]   ;;  %10836 = vmatprep.subr.bf16.mxu0 %v11846_v4  ;;  %v11849_v8 = vld [vmem:[#allocation9 + $0x1b8] sm:$0xff]   ;;  %v11850_v11 = vld [vmem:[#allocation9 + $0x1f0] sm:$0xff]  }
  0xc9   : > { %10837 = vmatpush3.bf16.msra.mxu0 %v11847_v6  ;;  %v2324_v10 = vld [vmem:[#allocation4 + $0x264] sm:$0xff]  ;;  %10936 = vmatprep.subr.bf16.mxu1 %v11848_v7  ;;  %v11851_v12 = vld [vmem:[%s12639_s19 + $0x60] ss:$0 sps:$4 sm:$0xff]   ;;  %v11857_v17 = vld [vmem:[#allocation9 + $0x1b0] sm:$0xff]  }
  0xca   : > { %v1108_v52 = vld [vmem:[#allocation2 + $0x120] sm:$0xff]  ;;  %v1109_v54 = vld [vmem:[#allocation2 + $0x128] sm:$0xff]  ;;  %10937 = vmatpush3.bf16.msra.mxu1 %v11849_v8  ;;  %888 = vst [vmem:[#allocation4 + $0x3ac] sm:$0xf] %v11851_v12  ;;  %v9286_v20 = vcombine.low %v2319_v9, %v2324_v10  ;;  %v10598_v38 = vld [vmem:[%s12639_s19 + $0x70] sm:$0xff]  }
  0xcb   : > { %v10062_v55 = vpack.c.bf16 %v1108_v52, %v1108_v52  ;;  %v10063_v59 = vpack.c.bf16 %v1109_v54, %v1109_v54  ;;  %v918_v61 = vld [vmem:[#allocation2 + $0x122] sm:$0xff]  ;;  %v919_v62 = vld [vmem:[#allocation2 + $0x12a] sm:$0xff]  ;;  %10938 = vmatprep.subr.bf16.mxu1 %v11850_v11  ;;  %v11820_v39 = vld [vmem:[#allocation4 + $0x294] ss:$36 sps:$4 sm:$0xff]   ;;  %v10579_v42 = vunpack.c.l.bf16 %v10598_v38  ;;  %v10580_v43 = vunpack.c.h.bf16 %v10598_v38 }
  0xcc   : > { %v10032_v2 = vpack.c.bf16 %v918_v61, %v918_v61  ;;  %v10033_v3 = vpack.c.bf16 %v919_v62, %v919_v62  ;;  %3953 = vmatmul.mubr.bf16.gmra.mxu1 %v11797_v53  ;;  %v11852_v13 = vld [vmem:[%s12639_s19 + $0x64] ss:$0 sps:$4 sm:$0xff]   ;;  %v10597_v14 = vld [vmem:[%s12639_s19 + $0x68] sm:$0xff]   ;;  %v11825_v45 = vld [vmem:[#allocation4 + $0x2d4] ss:$36 sps:$4 sm:$0xff]  }
  0xcd   : > { %1268 = vst [vmem:[#allocation4 + $0x324] sm:$0xf] %v10062_v55  ;;  %694 = vst [vmem:[#allocation4 + $0x360] sm:$0xf] %v10062_v55  ;;  %3960 = vmatprep.mubr.bf16.mxu1 %v11804_v58  ;;  %v10575_v15 = vunpack.c.l.bf16 %v10597_v14  ;;  %v10576_v16 = vunpack.c.h.bf16 %v10597_v14  ;;  %v11806_v18 = vld [vmem:[#allocation4 + $0x200] ss:$36 sps:$4 sm:$0xff]  }
  0xce   : > { %1269 = vst [vmem:[#allocation4 + $0x348] sm:$0xf] %v10063_v59  ;;  %695 = vst [vmem:[#allocation4 + $0x384] sm:$0xf] %v10063_v59  ;;  %v11811_v19 = vld [vmem:[#allocation4 + $0x24c] ss:$36 sps:$4 sm:$0xff]   ;;  %10939 = vmatpush3.bf16.msra.mxu1 %v11857_v17 }
  0xcf   : > { %1078 = vst [vmem:[#allocation4 + $0x368] sm:$0xf] %v10032_v2  ;;  %1079 = vst [vmem:[#allocation4 + $0x38c] sm:$0xf] %v10033_v3  ;;  %3800 = vmatmul.mubr.bf16.gmra.mxu0 %v9277_v5  ;;  %v11818_v21 = vld [vmem:[#allocation4 + $0x28c] ss:$36 sps:$4 sm:$0xff]  }
  0xd0   : > { %3807 = vmatprep.mubr.bf16.mxu0 %v11809_v63  ;;  %889 = vst [vmem:[#allocation4 + $0x3d0] sm:$0xf] %v11852_v13  ;;  %504 = vst [vmem:[#allocation2 + $0x151] sm:$0xff] %v10575_v15  ;;  %v1110_v22 = vld [vmem:[#allocation2 + $0x138] sm:$0xff]  ;;  %v1111_v23 = vld [vmem:[#allocation2 + $0x140] sm:$0xff] }
  0xd1   : > { %505 = vst [vmem:[#allocation2 + $0x159] sm:$0xff] %v10576_v16  ;;  %v10064_v24 = vpack.c.bf16 %v1110_v22, %v1110_v22  ;;  %v920_v25 = vld [vmem:[#allocation2 + $0x13a] sm:$0xff]  ;;  %v921_v26 = vld [vmem:[#allocation2 + $0x142] sm:$0xff]  ;;  %v10065_v27 = vpack.c.bf16 %v1111_v23, %v1111_v23  ;;  %v2334_v32 = vld [vmem:[#allocation4 + $0x2ac] sm:$0xff] }
  0xd2   : > { %v10034_v28 = vpack.c.bf16 %v920_v25, %v920_v25  ;;  %v10035_v29 = vpack.c.bf16 %v921_v26, %v921_v26  ;;  %v11859_v30 = vld [vmem:[#allocation9 + $0x1e8] sm:$0xff]   ;;  %v11861_v34 = vld [vmem:[#allocation9 + $0x1e0] sm:$0xff]   ;;  %506 = vst [vmem:[#allocation2 + $0x169] sm:$0xff] %v10579_v42  ;;  %507 = vst [vmem:[#allocation2 + $0x171] sm:$0xff] %v10580_v43 }
  0xd3   : > { %v2329_v31 = vld [vmem:[#allocation4 + $0x288] sm:$0xff]  ;;  %1270 = vst [vmem:[#allocation4 + $0x36c] sm:$0xf] %v10064_v24  ;;  %696 = vst [vmem:[#allocation4 + $0x3a8] sm:$0xf] %v10064_v24  ;;  %10940 = vmatprep.subr.bf16.mxu1 %v11859_v30  ;;  %v11868_v50 = vld [vmem:[#allocation9 + $0x1a0] sm:$0xff]  }
  0xd4   : > { %3961 = vmatmul.mubr.bf16.gmra.mxu1 %v11806_v18  ;;  %v11860_v33 = vld [vmem:[#allocation9 + $0x1a8] sm:$0xff]   ;;  %1271 = vst [vmem:[#allocation4 + $0x390] sm:$0xf] %v10065_v27  ;;  %697 = vst [vmem:[#allocation4 + $0x3cc] sm:$0xf] %v10065_v27  ;;  %v9295_v51 = vcombine.low %v2329_v31, %v2334_v32  ;;  %v11870_v53 = vld [vmem:[#allocation9 + $0x140] sm:$0xff]  }
  0xd5   : > { %3968 = vmatprep.mubr.bf16.mxu1 %v11811_v19  ;;  %1080 = vst [vmem:[#allocation4 + $0x3b0] sm:$0xf] %v10034_v28  ;;  %1081 = vst [vmem:[#allocation4 + $0x3d4] sm:$0xf] %v10035_v29  ;;  %v11862_v35 = vld [vmem:[%s12639_s19 + $0x68] ss:$0 sps:$4 sm:$0xff]   ;;  %10941 = vmatpush3.bf16.msra.mxu1 %v11860_v33 }
  0xd6   : > { %v11813_v36 = vld [vmem:[#allocation4 + $0x248] ss:$36 sps:$4 sm:$0xff]   ;;  %890 = vst [vmem:[#allocation4 + $0x3f4] sm:$0xf] %v11862_v35  ;;  %10942 = vmatprep.subr.bf16.mxu1 %v11861_v34  ;;  %v11871_v54 = vld [vmem:[#allocation9 + $0x100] sm:$0xff]   ;;  %10838 = vmatprep.subr.bf16.mxu0 %v11870_v53  ;;  %v2339_v55 = vld [vmem:[#allocation4 + $0x2d0] sm:$0xff] }
  0xd7   : > { %3808 = vmatmul.mubr.bf16.gmra.mxu0 %v9286_v20  ;;  %v11863_v37 = vld [vmem:[%s12639_s19 + $0x6c] ss:$0 sps:$4 sm:$0xff]   ;;  %v1112_v40 = vld [vmem:[#allocation2 + $0x150] sm:$0xff]  ;;  %v11872_v58 = vld [vmem:[#allocation9 + $0x1d8] sm:$0xff]  }
  0xd8   : > { %3815 = vmatprep.mubr.bf16.mxu0 %v11818_v21  ;;  %v1113_v41 = vld [vmem:[#allocation2 + $0x158] sm:$0xff]  ;;  %v10066_v46 = vpack.c.bf16 %v1112_v40, %v1112_v40  ;;  %891 = vst [vmem:[#allocation4 + $0x418] sm:$0xf] %v11863_v37  ;;  %10839 = vmatpush3.bf16.msra.mxu0 %v11871_v54  ;;  %v11822_v57 = vld [vmem:[#allocation4 + $0x290] ss:$36 sps:$4 sm:$0xff]   ;;  %v11883_v17 = vld [vmem:[#allocation9 + $0x1c8] sm:$0xff]  }
  0xd9   : > { %v922_v44 = vld [vmem:[#allocation2 + $0x152] sm:$0xff]  ;;  %v10067_v47 = vpack.c.bf16 %v1113_v41, %v1113_v41  ;;  %v923_v48 = vld [vmem:[#allocation2 + $0x15a] sm:$0xff]  ;;  %10943 = vmatpush3.bf16.msra.mxu1 %v11868_v50  ;;  %v1114_v60 = vld [vmem:[#allocation2 + $0x168] sm:$0xff] }
  0xda   : > { %v10036_v49 = vpack.c.bf16 %v922_v44, %v922_v44  ;;  %v10037_v52 = vpack.c.bf16 %v923_v48, %v923_v48  ;;  %1272 = vst [vmem:[#allocation4 + $0x3b4] sm:$0xf] %v10066_v46  ;;  %698 = vst [vmem:[#allocation4 + $0x3f0] sm:$0xf] %v10066_v46  ;;  %v2344_v56 = vld [vmem:[#allocation4 + $0x2f4] sm:$0xff]  ;;  %10944 = vmatprep.subr.bf16.mxu1 %v11872_v58  ;;  %v10068_v1 = vpack.c.bf16 %v1114_v60, %v1114_v60  ;;  %v2354_v7 = vld [vmem:[#allocation4 + $0x33c] sm:$0xff] }
  0xdb   : > { %1273 = vst [vmem:[#allocation4 + $0x3d8] sm:$0xf] %v10067_v47  ;;  %699 = vst [vmem:[#allocation4 + $0x414] sm:$0xf] %v10067_v47  ;;  %v11873_v59 = vld [vmem:[#allocation9 + $0x198] sm:$0xff]   ;;  %v1115_v61 = vld [vmem:[#allocation2 + $0x170] sm:$0xff]  ;;  %v9304_v0 = vcombine.low %v2339_v55, %v2344_v56 }
  0xdc   : > { %1082 = vst [vmem:[#allocation4 + $0x3f8] sm:$0xf] %v10036_v49  ;;  %1083 = vst [vmem:[#allocation4 + $0x41c] sm:$0xf] %v10037_v52  ;;  %3969 = vmatmul.mubr.bf16.gmra.mxu1 %v11813_v36  ;;  %v11874_v62 = vld [vmem:[#allocation9 + $0x1d0] sm:$0xff]   ;;  %v10069_v2 = vpack.c.bf16 %v1115_v61, %v1115_v61  ;;  %v2349_v6 = vld [vmem:[#allocation4 + $0x318] sm:$0xff] }
  0xdd   : > { %3976 = vmatprep.mubr.bf16.mxu1 %v11820_v39  ;;  %v11827_v63 = vld [vmem:[#allocation4 + $0x2dc] ss:$36 sps:$4 sm:$0xff]   ;;  %10945 = vmatpush3.bf16.msra.mxu1 %v11873_v59  ;;  %1274 = vst [vmem:[#allocation4 + $0x3fc] sm:$0xf] %v10068_v1  ;;  %700 = vst [vmem:[#allocation4 + $0x438] sm:$0xf] %v10068_v1  ;;  %v9313_v21 = vcombine.low %v2349_v6, %v2354_v7 }
  0xde   : > { %v11834_v3 = vld [vmem:[#allocation4 + $0x31c] ss:$36 sps:$4 sm:$0xff]   ;;  %10946 = vmatprep.subr.bf16.mxu1 %v11874_v62  ;;  %1275 = vst [vmem:[#allocation4 + $0x420] sm:$0xf] %v10069_v2  ;;  %701 = vst [vmem:[#allocation4 + $0x45c] sm:$0xf] %v10069_v2 }
  0xdf   : > { %3816 = vmatmul.mubr.bf16.gmra.mxu0 %v9295_v51  ;;  %v11875_v4 = vld [vmem:[%s12639_s19 + $0x70] ss:$0 sps:$4 sm:$0xff]   ;;  %v11876_v5 = vld [vmem:[%s12639_s19 + $0x74] ss:$0 sps:$4 sm:$0xff]   ;;  %v10599_v8 = vld [vmem:[%s12639_s19 + $0x78] sm:$0xff]   ;;  %s13896_s19 = scalar_lea.vmem [#allocation12], %s8925_s15 }
  0xe0   : > { %3823 = vmatprep.mubr.bf16.mxu0 %v11825_v45  ;;  %v924_v9 = vld [vmem:[#allocation2 + $0x16a] sm:$0xff]  ;;  %v925_v10 = vld [vmem:[#allocation2 + $0x172] sm:$0xff]  ;;  %892 = vst [vmem:[#allocation4 + $0x43c] sm:$0xf] %v11875_v4  ;;  %893 = vst [vmem:[#allocation4 + $0x460] sm:$0xf] %v11876_v5  ;;  %v10583_v11 = vunpack.c.l.bf16 %v10599_v8  ;;  %v10584_v12 = vunpack.c.h.bf16 %v10599_v8 }
  0xe1   : > { %v10038_v13 = vpack.c.bf16 %v924_v9, %v924_v9  ;;  %v10039_v14 = vpack.c.bf16 %v925_v10, %v925_v10  ;;  %v11881_v15 = vld [vmem:[#allocation9 + $0x190] sm:$0xff]   ;;  %v11829_v16 = vld [vmem:[#allocation4 + $0x2d8] ss:$36 sps:$4 sm:$0xff]   ;;  %v11836_v18 = vld [vmem:[#allocation4 + $0x324] ss:$36 sps:$4 sm:$0xff]   ;;  %s8821_s9 = sshll.u32 %s13896_s19, 4  ;;  %s14082_s9 = int_to_ptr.vmem [resolvable:$true] %s8821_s9 }
  0xe2   : > { %508 = vst [vmem:[#allocation2 + $0x181] sm:$0xff] %v10583_v11  ;;  %509 = vst [vmem:[#allocation2 + $0x189] sm:$0xff] %v10584_v12  ;;  %10947 = vmatpush3.bf16.msra.mxu1 %v11881_v15  ;;  %v11884_v19 = vld [vmem:[#allocation9 + $0x188] sm:$0xff]   ;;  %v11885_v20 = vld [vmem:[#allocation9 + $0x1c0] sm:$0xff]   ;;  %s12379_s28 = scalar_lea.vmem %s14082_s9, 4096  ;;  %p12386_p13 = scmp.lt.s32.totalorder %s14082_s9, %s12384_s13 }
  0xe3   : > { %1084 = vst [vmem:[#allocation4 + $0x440] sm:$0xf] %v10038_v13  ;;  %1085 = vst [vmem:[#allocation4 + $0x464] sm:$0xf] %v10039_v14  ;;  %10948 = vmatprep.subr.bf16.mxu1 %v11883_v17  ;;  %v1278_v22 = vld [vmem:[#allocation2 + $0x19] sm:$0xff]  ;;  %v1279_v23 = vld [vmem:[#allocation2 + $0x21] sm:$0xff]  ;;  %p12380_p5 = scmp.ne.s32.totalorder %s14082_s9, %s12379_s28  ;;  %p12387_p0 = scmp.lt.s32.totalorder %s12385_s14, %s12379_s28 }
  0xe4   : > { %3977 = vmatmul.mubr.bf16.gmra.mxu1 %v11822_v57  ;;  %v1470_v24 = vld [vmem:[#allocation2 + $0x1a] sm:$0xff]  ;;  %v11841_v25 = vld [vmem:[#allocation4 + $0x364] ss:$36 sps:$4 sm:$0xff]   ;;  %v10072_v26 = vpack.c.bf16 %v1278_v22, %v1278_v22  ;;  %v10073_v27 = vpack.c.bf16 %v1279_v23, %v1279_v23  ;;  %v11843_v37 = vld [vmem:[#allocation4 + $0x36c] ss:$36 sps:$4 sm:$0xff]  }
  0xe5   : > { %3984 = vmatprep.mubr.bf16.mxu1 %v11827_v63  ;;  %v10104_v28 = vpack.c.bf16 %v1470_v24, %v1470_v24  ;;  %v1471_v29 = vld [vmem:[#allocation2 + $0x22] sm:$0xff]  ;;  %v12788_v40 = vld [vmem:[#allocation9 + $0x238] sm:$0xff]   ;;  %v1663_v41 = vld [vmem:[#allocation2 + $0x30] sm:$0xff]  ;;  %p12381_p7 = pnand %p12380_p5, %p14279_p2  ;;  %p12388_p10 = por %p12387_p0, %p12386_p13 }
  0xe6   : > { %10949 = vmatpush3.bf16.msra.mxu1 %v11884_v19  ;;  %v2359_v30 = vld [vmem:[#allocation4 + $0x360] sm:$0xff]  ;;  %1438 = vst [vmem:[#allocation4 + $0x10] sm:$0xf] %v10072_v26  ;;  %1439 = vst [vmem:[#allocation4 + $0x34] sm:$0xf] %v10073_v27  ;;  %v10105_v32 = vpack.c.bf16 %v1471_v29, %v1471_v29  ;;  %v1664_v42 = vld [vmem:[#allocation2 + $0x38] sm:$0xff]  ;;  %v10136_v44 = vpack.c.bf16 %v1663_v41, %v1663_v41  ;;  %11544 = vmatprep.subr.bf16.mxu0 %v12788_v40 }
  0xe7   : > { %3824 = vmatmul.mubr.bf16.gmra.mxu0 %v9304_v0  ;;  %v2364_v31 = vld [vmem:[#allocation4 + $0x384] sm:$0xff]  ;;  %10950 = vmatprep.subr.bf16.mxu1 %v11885_v20  ;;  %1630 = vst [vmem:[#allocation4 + $0x14] sm:$0xf] %v10104_v28  ;;  %v11853_v43 = vld [vmem:[#allocation4 + $0x3ac] ss:$36 sps:$4 sm:$0xff]   ;;  %v10137_v45 = vpack.c.bf16 %v1664_v42, %v1664_v42  ;;  %v1856_v47 = vld [vmem:[#allocation2 + $0x39] sm:$0xff]  ;;  %p12382_p12 = pneg %p12381_p7 }
  0xe8   : > { %3831 = vmatprep.mubr.bf16.mxu0 %v11834_v3  ;;  %v11889_v33 = vld [vmem:[#allocation9 + $0x180] sm:$0xff]   ;;  %1631 = vst [vmem:[#allocation4 + $0x38] sm:$0xf] %v10105_v32  ;;  %v1855_v46 = vld [vmem:[#allocation2 + $0x31] sm:$0xff]  ;;  %v9322_v49 = vcombine.low %v2359_v30, %v2364_v31  ;;  %v10169_v51 = vpack.c.bf16 %v1856_v47, %v1856_v47  ;;  %v1665_v54 = vld [vmem:[#allocation2 + $0x48] sm:$0xff] }
  0xe9   : > { %v11838_v34 = vld [vmem:[#allocation4 + $0x320] ss:$36 sps:$4 sm:$0xff]   ;;  %v1117_v36 = vld [vmem:[#allocation2 + $0x188] sm:$0xff]  ;;  %v1472_v48 = vld [vmem:[#allocation2 + $0x32] sm:$0xff]  ;;  %v10168_v50 = vpack.c.bf16 %v1855_v46, %v1855_v46  ;;  %1823 = vst [vmem:[#allocation4 + $0x18] sm:$0xf] %v10136_v44  ;;  %v10138_v57 = vpack.c.bf16 %v1665_v54, %v1665_v54  ;;  %p12389_p3 = pnand %p12388_p10, %p12382_p12 }
  0xea   : > { %v1116_v35 = vld [vmem:[#allocation2 + $0x180] sm:$0xff]  ;;  %v10071_v39 = vpack.c.bf16 %v1117_v36, %v1117_v36  ;;  %10951 = vmatpush3.bf16.msra.mxu1 %v11889_v33  ;;  %v10106_v53 = vpack.c.bf16 %v1472_v48, %v1472_v48  ;;  %v1666_v55 = vld [vmem:[#allocation2 + $0x50] sm:$0xff]  ;;  %1824 = vst [vmem:[#allocation4 + $0x3c] sm:$0xf] %v10137_v45  ;;  %2016 = vst [vmem:[#allocation4 + $0x40] sm:$0xf] %v10169_v51 }
  0xeb   : > { %v10070_v38 = vpack.c.bf16 %v1116_v35, %v1116_v35  ;;  %v1473_v52 = vld [vmem:[#allocation2 + $0x3a] sm:$0xff]  ;;  %v10139_v58 = vpack.c.bf16 %v1666_v55, %v1666_v55  ;;  %v1857_v59 = vld [vmem:[#allocation2 + $0x49] sm:$0xff]  ;;  %v1858_v60 = vld [vmem:[#allocation2 + $0x51] sm:$0xff]  ;;  %2015 = vst [vmem:[#allocation4 + $0x1c] sm:$0xf] %v10168_v50 }
  0xec   : > { %3985 = vmatmul.mubr.bf16.gmra.mxu1 %v11829_v16  ;;  %1277 = vst [vmem:[#allocation4 + $0x468] sm:$0xf] %v10071_v39  ;;  %v10107_v56 = vpack.c.bf16 %v1473_v52, %v1473_v52  ;;  %v1474_v61 = vld [vmem:[#allocation2 + $0x4a] sm:$0xff]  ;;  %1440 = vst [vmem:[#allocation4 + $0x58] sm:$0xf] %v10168_v50  ;;  %v10170_v62 = vpack.c.bf16 %v1857_v59, %v1857_v59  ;;  %v10171_v63 = vpack.c.bf16 %v1858_v60, %v1858_v60  ;;  %v1475_v0 = vld [vmem:[#allocation2 + $0x52] sm:$0xff] }
  0xed   : > { %3992 = vmatprep.mubr.bf16.mxu1 %v11836_v18  ;;  %1276 = vst [vmem:[#allocation4 + $0x444] sm:$0xf] %v10070_v38  ;;  %1441 = vst [vmem:[#allocation4 + $0x7c] sm:$0xf] %v10169_v51  ;;  %v10108_v1 = vpack.c.bf16 %v1474_v61, %v1474_v61  ;;  %v10109_v2 = vpack.c.bf16 %v1475_v0, %v1475_v0  ;;  %v1667_v3 = vld [vmem:[#allocation2 + $0x60] sm:$0xff]  ;;  %v2369_v4 = vld [vmem:[#allocation4 + $0x3a8] sm:$0xff] }
  0xee   : > { %1632 = vst [vmem:[#allocation4 + $0x5c] sm:$0xf] %v10106_v53  ;;  %1633 = vst [vmem:[#allocation4 + $0x80] sm:$0xf] %v10107_v56  ;;  %v2374_v5 = vld [vmem:[#allocation4 + $0x3cc] sm:$0xff]  ;;  %v10140_v6 = vpack.c.bf16 %v1667_v3, %v1667_v3  ;;  %v1859_v8 = vld [vmem:[#allocation2 + $0x61] sm:$0xff] }
  0xef   : > { %3832 = vmatmul.mubr.bf16.gmra.mxu0 %v9313_v21  ;;  %1825 = vst [vmem:[#allocation4 + $0x60] sm:$0xf] %v10138_v57  ;;  %1826 = vst [vmem:[#allocation4 + $0x84] sm:$0xf] %v10139_v58  ;;  %v1668_v7 = vld [vmem:[#allocation2 + $0x68] sm:$0xff]  ;;  %v10172_v11 = vpack.c.bf16 %v1859_v8, %v1859_v8  ;;  %v1669_v15 = vld [vmem:[#allocation2 + $0x78] sm:$0xff]  ;;  %v9331_v21 = vcombine.low %v2369_v4, %v2374_v5 }
  0xf0   : > { %3839 = vmatprep.mubr.bf16.mxu0 %v11841_v25  ;;  %2017 = vst [vmem:[#allocation4 + $0x64] sm:$0xf] %v10170_v62  ;;  %2018 = vst [vmem:[#allocation4 + $0x88] sm:$0xf] %v10171_v63  ;;  %v1860_v9 = vld [vmem:[#allocation2 + $0x69] sm:$0xff]  ;;  %v10141_v10 = vpack.c.bf16 %v1668_v7, %v1668_v7  ;;  %v10142_v19 = vpack.c.bf16 %v1669_v15, %v1669_v15  ;;  %v1670_v22 = vld [vmem:[#allocation2 + $0x80] sm:$0xff] }
  0xf1   : > { %1442 = vst [vmem:[#allocation4 + $0xa0] sm:$0xf] %v10170_v62  ;;  %1443 = vst [vmem:[#allocation4 + $0xc4] sm:$0xf] %v10171_v63  ;;  %v10173_v12 = vpack.c.bf16 %v1860_v9, %v1860_v9  ;;  %v1476_v13 = vld [vmem:[#allocation2 + $0x62] sm:$0xff]  ;;  %v1477_v14 = vld [vmem:[#allocation2 + $0x6a] sm:$0xff]  ;;  %v10143_v25 = vpack.c.bf16 %v1670_v22, %v1670_v22 }
  0xf2   : > { %1634 = vst [vmem:[#allocation4 + $0xa4] sm:$0xf] %v10108_v1  ;;  %1635 = vst [vmem:[#allocation4 + $0xc8] sm:$0xf] %v10109_v2  ;;  %v11845_v16 = vld [vmem:[#allocation4 + $0x368] ss:$36 sps:$4 sm:$0xff]   ;;  %v10110_v17 = vpack.c.bf16 %v1476_v13, %v1476_v13  ;;  %v10111_v18 = vpack.c.bf16 %v1477_v14, %v1477_v14 }
  0xf3   : > { %1827 = vst [vmem:[#allocation4 + $0xa8] sm:$0xf] %v10140_v6  ;;  %v11855_v20 = vld [vmem:[#allocation4 + $0x3b4] ss:$36 sps:$4 sm:$0xff]   ;;  %1828 = vst [vmem:[#allocation4 + $0xcc] sm:$0xf] %v10141_v10 }
  0xf4   : > { %3993 = vmatmul.mubr.bf16.gmra.mxu1 %v11838_v34  ;;  %2019 = vst [vmem:[#allocation4 + $0xac] sm:$0xf] %v10172_v11  ;;  %2020 = vst [vmem:[#allocation4 + $0xd0] sm:$0xf] %v10173_v12  ;;  %v1861_v23 = vld [vmem:[#allocation2 + $0x79] sm:$0xff]  ;;  %v2379_v27 = vld [vmem:[#allocation4 + $0x3f0] sm:$0xff] }
  0xf5   : > { %4000 = vmatprep.mubr.bf16.mxu1 %v11843_v37  ;;  %1444 = vst [vmem:[#allocation4 + $0xe8] sm:$0xf] %v10172_v11  ;;  %1445 = vst [vmem:[#allocation4 + $0x10c] sm:$0xf] %v10173_v12  ;;  %v11864_v24 = vld [vmem:[#allocation4 + $0x3f4] ss:$36 sps:$4 sm:$0xff]   ;;  %v10174_v26 = vpack.c.bf16 %v1861_v23, %v1861_v23 }
  0xf6   : > { %1636 = vst [vmem:[#allocation4 + $0xec] sm:$0xf] %v10110_v17  ;;  %1637 = vst [vmem:[#allocation4 + $0x110] sm:$0xf] %v10111_v18  ;;  %v2384_v28 = vld [vmem:[#allocation4 + $0x414] sm:$0xff]  ;;  %v1862_v29 = vld [vmem:[#allocation2 + $0x81] sm:$0xff] }
  0xf7   : > { %3840 = vmatmul.mubr.bf16.gmra.mxu0 %v9322_v49  ;;  %1829 = vst [vmem:[#allocation4 + $0xf0] sm:$0xf] %v10142_v19  ;;  %1830 = vst [vmem:[#allocation4 + $0x114] sm:$0xf] %v10143_v25  ;;  %v1478_v30 = vld [vmem:[#allocation2 + $0x7a] sm:$0xff]  ;;  %v10175_v32 = vpack.c.bf16 %v1862_v29, %v1862_v29  ;;  %v9340_v35 = vcombine.low %v2379_v27, %v2384_v28  ;;  %v1479_v37 = vld [vmem:[#allocation2 + $0x82] sm:$0xff] }
  0xf8   : > { %3847 = vmatprep.mubr.bf16.mxu0 %v11853_v43  ;;  %2021 = vst [vmem:[#allocation4 + $0xf4] sm:$0xf] %v10174_v26  ;;  %1446 = vst [vmem:[#allocation4 + $0x130] sm:$0xf] %v10174_v26  ;;  %v11858_v31 = vld [vmem:[#allocation4 + $0x3b0] ss:$36 sps:$4 sm:$0xff]   ;;  %v10112_v33 = vpack.c.bf16 %v1478_v30, %v1478_v30  ;;  %v10113_v38 = vpack.c.bf16 %v1479_v37, %v1479_v37 }
  0xf9   : > { %v11866_v34 = vld [vmem:[#allocation4 + $0x3fc] ss:$36 sps:$4 sm:$0xff]   ;;  %2022 = vst [vmem:[#allocation4 + $0x118] sm:$0xf] %v10175_v32  ;;  %1447 = vst [vmem:[#allocation4 + $0x154] sm:$0xf] %v10175_v32 }
  0xfa   : > { %v11877_v36 = vld [vmem:[#allocation4 + $0x43c] ss:$36 sps:$4 sm:$0xff]   ;;  %1638 = vst [vmem:[#allocation4 + $0x134] sm:$0xf] %v10112_v33  ;;  %v1671_v42 = vld [vmem:[#allocation2 + $0x90] sm:$0xff]  ;;  %v1673_v54 = vld [vmem:[#allocation2 + $0xa8] sm:$0xff] }
  0xfb   : > { %v12791_v39 = vld [vmem:[#allocation4 + $0x438] sm:$0xff]  ;;  %1639 = vst [vmem:[#allocation4 + $0x158] sm:$0xf] %v10113_v38  ;;  %v10144_v44 = vpack.c.bf16 %v1671_v42, %v1671_v42  ;;  %v1674_v55 = vld [vmem:[#allocation2 + $0xb0] sm:$0xff]  ;;  %v10146_v57 = vpack.c.bf16 %v1673_v54, %v1673_v54  ;;  %v11879_v2 = vld [vmem:[#allocation4 + $0x444] ss:$36 sps:$4 sm:$0xff]  }
  0xfc   : > { %4001 = vmatmul.mubr.bf16.gmra.mxu1 %v11845_v16  ;;  %v2394_v41 = vld [vmem:[#allocation4 + $0x45c] sm:$0xff]  ;;  %v1863_v46 = vld [vmem:[#allocation2 + $0x91] sm:$0xff]  ;;  %v10147_v58 = vpack.c.bf16 %v1674_v55, %v1674_v55  ;;  %v1865_v59 = vld [vmem:[#allocation2 + $0xa9] sm:$0xff] }
  0xfd   : > { %4008 = vmatprep.mubr.bf16.mxu1 %v11855_v20  ;;  %v1672_v43 = vld [vmem:[#allocation2 + $0x98] sm:$0xff]  ;;  %v10176_v50 = vpack.c.bf16 %v1863_v46, %v1863_v46  ;;  %1831 = vst [vmem:[#allocation4 + $0x138] sm:$0xf] %v10144_v44  ;;  %v1482_v61 = vld [vmem:[#allocation2 + $0xaa] sm:$0xff]  ;;  %v10178_v62 = vpack.c.bf16 %v1865_v59, %v1865_v59  ;;  %v9349_v3 = vcombine.low %v12791_v39, %v2394_v41  ;;  %1833 = vst [vmem:[#allocation4 + $0x180] sm:$0xf] %v10146_v57 }
  0xfe   : > { %v10145_v45 = vpack.c.bf16 %v1672_v43, %v1672_v43  ;;  %v1864_v47 = vld [vmem:[#allocation2 + $0x99] sm:$0xff]  ;;  %v1866_v60 = vld [vmem:[#allocation2 + $0xb1] sm:$0xff]  ;;  %v10116_v1 = vpack.c.bf16 %v1482_v61, %v1482_v61  ;;  %1834 = vst [vmem:[#allocation4 + $0x1a4] sm:$0xf] %v10147_v58  ;;  %v12287_v7 = vld [vmem:[#allocation2 + $0x8] sm:$0xff] }
  0xff   : > { %3848 = vmatmul.mubr.bf16.gmra.mxu0 %v9331_v21  ;;  %v1480_v48 = vld [vmem:[#allocation2 + $0x92] sm:$0xff]  ;;  %v10177_v51 = vpack.c.bf16 %v1864_v47, %v1864_v47  ;;  %v1481_v52 = vld [vmem:[#allocation2 + $0x9a] sm:$0xff]  ;;  %2023 = vst [vmem:[#allocation4 + $0x13c] sm:$0xf] %v10176_v50  ;;  %1448 = vst [vmem:[#allocation4 + $0x178] sm:$0xf] %v10176_v50  ;;  %v10179_v63 = vpack.c.bf16 %v1866_v60, %v1866_v60  ;;  %v10167_v8 = vpack.c.bf16 %v12287_v7, %v12287_v7 }
 0x100   : > { %3855 = vmatprep.mubr.bf16.mxu0 %v11864_v24  ;;  %v11869_v49 = vld [vmem:[#allocation4 + $0x3f8] ss:$36 sps:$4 sm:$0xff]   ;;  %v10114_v53 = vpack.c.bf16 %v1480_v48, %v1480_v48  ;;  %1832 = vst [vmem:[#allocation4 + $0x15c] sm:$0xf] %v10145_v45  ;;  %v10115_v56 = vpack.c.bf16 %v1481_v52, %v1481_v52  ;;  %2025 = vst [vmem:[#allocation4 + $0x184] sm:$0xf] %v10178_v62 }
 0x101   : > { %2024 = vst [vmem:[#allocation4 + $0x160] sm:$0xf] %v10177_v51  ;;  %1449 = vst [vmem:[#allocation4 + $0x19c] sm:$0xf] %v10177_v51  ;;  %v1483_v0 = vld [vmem:[#allocation2 + $0xb2] sm:$0xff]  ;;  %v1675_v6 = vld [vmem:[#allocation2 + $0xc0] sm:$0xff] }
 0x102   : > { %1640 = vst [vmem:[#allocation4 + $0x17c] sm:$0xf] %v10114_v53  ;;  %1641 = vst [vmem:[#allocation4 + $0x1a0] sm:$0xf] %v10115_v56  ;;  %v10117_v4 = vpack.c.bf16 %v1483_v0, %v1483_v0  ;;  %v11888_v5 = vld [vmem:[#allocation4 + $0x14] ss:$36 sps:$4 sm:$0xff]   ;;  %v10148_v10 = vpack.c.bf16 %v1675_v6, %v1675_v6 }
 0x103   : > { %2026 = vst [vmem:[#allocation4 + $0x1a8] sm:$0xf] %v10179_v63  ;;  %1450 = vst [vmem:[#allocation4 + $0x1c0] sm:$0xf] %v10178_v62  ;;  %v1676_v9 = vld [vmem:[#allocation2 + $0xc8] sm:$0xff]  ;;  %v1677_v18 = vld [vmem:[#allocation2 + $0xd8] sm:$0xff] }
 0x104   : > { %4009 = vmatmul.mubr.bf16.gmra.mxu1 %v11858_v31  ;;  %1451 = vst [vmem:[#allocation4 + $0x1e4] sm:$0xf] %v10179_v63  ;;  %1642 = vst [vmem:[#allocation4 + $0x1c4] sm:$0xf] %v10116_v1  ;;  %v1867_v11 = vld [vmem:[#allocation2 + $0xc1] sm:$0xff]  ;;  %v1868_v12 = vld [vmem:[#allocation2 + $0xc9] sm:$0xff]  ;;  %v10149_v13 = vpack.c.bf16 %v1676_v9, %v1676_v9  ;;  %v10150_v22 = vpack.c.bf16 %v1677_v18, %v1677_v18 }
 0x105   : > { %4016 = vmatprep.mubr.bf16.mxu1 %v11866_v34  ;;  %1643 = vst [vmem:[#allocation4 + $0x1e8] sm:$0xf] %v10117_v4  ;;  %v10180_v14 = vpack.c.bf16 %v1867_v11, %v1867_v11  ;;  %v10181_v15 = vpack.c.bf16 %v1868_v12, %v1868_v12  ;;  %1854 = vst [vmem:[#allocation4 + $0x474] sm:$0xf] %v10167_v8  ;;  %v1484_v16 = vld [vmem:[#allocation2 + $0xc2] sm:$0xff]  ;;  %v1485_v17 = vld [vmem:[#allocation2 + $0xca] sm:$0xff] }
 0x106   : > { %1835 = vst [vmem:[#allocation4 + $0x1c8] sm:$0xf] %v10148_v10  ;;  %1836 = vst [vmem:[#allocation4 + $0x1ec] sm:$0xf] %v10149_v13  ;;  %v10118_v19 = vpack.c.bf16 %v1484_v16, %v1484_v16  ;;  %v10119_v20 = vpack.c.bf16 %v1485_v17, %v1485_v17  ;;  %v1678_v21 = vld [vmem:[#allocation2 + $0xe0] sm:$0xff]  ;;  %v11903_v32 = vld [vmem:[#allocation9 + $0x230] sm:$0xff]  }
 0x107   : > { %3856 = vmatmul.mubr.bf16.gmra.mxu0 %v9340_v35  ;;  %2027 = vst [vmem:[#allocation4 + $0x1cc] sm:$0xf] %v10180_v14  ;;  %2028 = vst [vmem:[#allocation4 + $0x1f0] sm:$0xf] %v10181_v15  ;;  %v1869_v23 = vld [vmem:[#allocation2 + $0xd9] sm:$0xff]  ;;  %v1870_v24 = vld [vmem:[#allocation2 + $0xe1] sm:$0xff]  ;;  %v10151_v25 = vpack.c.bf16 %v1678_v21, %v1678_v21 }
 0x108   : > { %3863 = vmatprep.mubr.bf16.mxu0 %v11877_v36  ;;  %1452 = vst [vmem:[#allocation4 + $0x208] sm:$0xf] %v10180_v14  ;;  %1453 = vst [vmem:[#allocation4 + $0x22c] sm:$0xf] %v10181_v15  ;;  %v10182_v26 = vpack.c.bf16 %v1869_v23, %v1869_v23  ;;  %v10183_v27 = vpack.c.bf16 %v1870_v24, %v1870_v24  ;;  %v11882_v28 = vld [vmem:[#allocation4 + $0x440] ss:$36 sps:$4 sm:$0xff]  }
 0x109   : > { %1644 = vst [vmem:[#allocation4 + $0x20c] sm:$0xf] %v10118_v19  ;;  %1645 = vst [vmem:[#allocation4 + $0x230] sm:$0xf] %v10119_v20  ;;  %v11886_v29 = vld [vmem:[#allocation4 + $0x10] ss:$36 sps:$4 sm:$0xff]  }
 0x10a   : > { %1837 = vst [vmem:[#allocation4 + $0x210] sm:$0xf] %v10150_v22  ;;  %v11893_v30 = vld [vmem:[#allocation4 + $0x1c] ss:$36 sps:$4 sm:$0xff]   ;;  %1838 = vst [vmem:[#allocation4 + $0x234] sm:$0xf] %v10151_v25 }
 0x10b   : > { %2029 = vst [vmem:[#allocation4 + $0x214] sm:$0xf] %v10182_v26  ;;  %2030 = vst [vmem:[#allocation4 + $0x238] sm:$0xf] %v10183_v27  ;;  %v11894_v31 = vld [vmem:[#allocation4 + $0x5c] ss:$36 sps:$4 sm:$0xff]  }
 0x10c   : > { %4017 = vmatmul.mubr.bf16.gmra.mxu1 %v11869_v49  ;;  %1454 = vst [vmem:[#allocation4 + $0x250] sm:$0xf] %v10182_v26  ;;  %1455 = vst [vmem:[#allocation4 + $0x274] sm:$0xf] %v10183_v27  ;;  %v1486_v33 = vld [vmem:[#allocation2 + $0xda] sm:$0xff]  ;;  %v1487_v34 = vld [vmem:[#allocation2 + $0xe2] sm:$0xff] }
 0x10d   : > { %4024 = vmatprep.mubr.bf16.mxu1 %v11879_v2  ;;  %v10120_v35 = vpack.c.bf16 %v1486_v33, %v1486_v33  ;;  %v10121_v36 = vpack.c.bf16 %v1487_v34, %v1487_v34  ;;  %v11891_v37 = vld [vmem:[#allocation4 + $0x18] ss:$36 sps:$4 sm:$0xff]   ;;  %v11916_v38 = vld [vmem:[#allocation9 + $0x228] sm:$0xff]   ;;  %v12795_v43 = vld [vmem:[#allocation9 + $0x220] sm:$0xff]  }
 0x10e   : > { %v11896_v39 = vld [vmem:[#allocation4 + $0x58] ss:$36 sps:$4 sm:$0xff]   ;;  %v11897_v41 = vld [vmem:[#allocation4 + $0x64] ss:$36 sps:$4 sm:$0xff]   ;;  %v1679_v44 = vld [vmem:[#allocation2 + $0xf0] sm:$0xff] }
 0x10f   : > { %3864 = vmatmul.mubr.bf16.gmra.mxu0 %v9349_v3  ;;  %1646 = vst [vmem:[#allocation4 + $0x254] sm:$0xf] %v10120_v35  ;;  %1647 = vst [vmem:[#allocation4 + $0x278] sm:$0xf] %v10121_v36  ;;  %v11900_v42 = vld [vmem:[#allocation4 + $0xa4] ss:$36 sps:$4 sm:$0xff]   ;;  %v10152_v47 = vpack.c.bf16 %v1679_v44, %v1679_v44 }
 0x110   : > { %4065 = vmatprep.mubr.bf16.mxu0 %v11888_v5  ;;  %v1680_v45 = vld [vmem:[#allocation2 + $0xf8] sm:$0xff]  ;;  %v1681_v55 = vld [vmem:[#allocation2 + $0x108] sm:$0xff]  ;;  %v1682_v56 = vld [vmem:[#allocation2 + $0x110] sm:$0xff] }
 0x111   : > { %v1871_v46 = vld [vmem:[#allocation2 + $0xf1] sm:$0xff]  ;;  %v10153_v48 = vpack.c.bf16 %v1680_v45, %v1680_v45  ;;  %v1872_v49 = vld [vmem:[#allocation2 + $0xf9] sm:$0xff]  ;;  %v1873_v57 = vld [vmem:[#allocation2 + $0x109] sm:$0xff]  ;;  %1839 = vst [vmem:[#allocation4 + $0x258] sm:$0xf] %v10152_v47  ;;  %v10154_v58 = vpack.c.bf16 %v1681_v55, %v1681_v55  ;;  %v10155_v59 = vpack.c.bf16 %v1682_v56, %v1682_v56 }
 0x112   : > { %v10184_v50 = vpack.c.bf16 %v1871_v46, %v1871_v46  ;;  %v1489_v51 = vld [vmem:[#allocation2 + $0xfa] sm:$0xff]  ;;  %v10185_v52 = vpack.c.bf16 %v1872_v49, %v1872_v49  ;;  %v1874_v60 = vld [vmem:[#allocation2 + $0x111] sm:$0xff]  ;;  %v10186_v61 = vpack.c.bf16 %v1873_v57, %v1873_v57  ;;  %v1684_v9 = vld [vmem:[#allocation2 + $0x128] sm:$0xff] }
 0x113   : > { %v10123_v54 = vpack.c.bf16 %v1489_v51, %v1489_v51  ;;  %1840 = vst [vmem:[#allocation4 + $0x27c] sm:$0xf] %v10153_v48  ;;  %v1490_v62 = vld [vmem:[#allocation2 + $0x10a] sm:$0xff]  ;;  %v1491_v63 = vld [vmem:[#allocation2 + $0x112] sm:$0xff]  ;;  %v11899_v0 = vld [vmem:[#allocation4 + $0x60] ss:$36 sps:$4 sm:$0xff]   ;;  %v10187_v1 = vpack.c.bf16 %v1874_v60, %v1874_v60  ;;  %v10157_v12 = vpack.c.bf16 %v1684_v9, %v1684_v9 }
 0x114   : > { %4025 = vmatmul.mubr.bf16.gmra.mxu1 %v11882_v28  ;;  %2031 = vst [vmem:[#allocation4 + $0x25c] sm:$0xf] %v10184_v50  ;;  %1456 = vst [vmem:[#allocation4 + $0x298] sm:$0xf] %v10184_v50  ;;  %v10124_v2 = vpack.c.bf16 %v1490_v62, %v1490_v62  ;;  %v10125_v3 = vpack.c.bf16 %v1491_v63, %v1491_v63  ;;  %v11902_v4 = vld [vmem:[#allocation4 + $0xa0] ss:$36 sps:$4 sm:$0xff]  }
 0x115   : > { %4226 = vmatprep.mubr.bf16.mxu1 %v11893_v30  ;;  %2032 = vst [vmem:[#allocation4 + $0x280] sm:$0xf] %v10185_v52  ;;  %1457 = vst [vmem:[#allocation4 + $0x2bc] sm:$0xf] %v10185_v52  ;;  %v11904_v5 = vld [vmem:[#allocation4 + $0xac] ss:$36 sps:$4 sm:$0xff]  }
 0x116   : > { %1649 = vst [vmem:[#allocation4 + $0x2c0] sm:$0xf] %v10123_v54  ;;  %2224 = vst [vmem:[#allocation4 + $0x284] sm:$0xf] %v10123_v54  ;;  %v11942_v6 = vld [vmem:[#allocation9 + $0x218] sm:$0xff]   ;;  %v1683_v8 = vld [vmem:[#allocation2 + $0x120] sm:$0xff] }
 0x117   : > { %4066 = vmatmul.mubr.bf16.vlgmr.msra.gmra.mxu0 %v11886_v29  ;;  %1841 = vst [vmem:[#allocation4 + $0x2a0] sm:$0xf] %v10154_v58  ;;  %1842 = vst [vmem:[#allocation4 + $0x2c4] sm:$0xf] %v10155_v59  ;;  %v11907_v7 = vld [vmem:[#allocation4 + $0xec] ss:$36 sps:$4 sm:$0xff]   ;;  %v10156_v11 = vpack.c.bf16 %v1683_v8, %v1683_v8 }
 0x118   : > { %11545 = vmatpush3.bf16.msra.mxu0 %v12788_v40  ;;  %4073 = vmatprep.mubr.bf16.mxu0 %v11894_v31  ;;  %v1488_v40 = vld [vmem:[#allocation2 + $0xf2] sm:$0xff]  ;;  %2033 = vst [vmem:[#allocation4 + $0x2a4] sm:$0xf] %v10186_v61  ;;  %1458 = vst [vmem:[#allocation4 + $0x2e0] sm:$0xf] %v10186_v61  ;;  %v1875_v13 = vld [vmem:[#allocation2 + $0x121] sm:$0xff] }
 0x119   : > { %11546 = vmatprep.subr.bf16.mxu0 %v11903_v32  ;;  %v10122_v53 = vpack.c.bf16 %v1488_v40, %v1488_v40  ;;  %2034 = vst [vmem:[#allocation4 + $0x2c8] sm:$0xf] %v10187_v1  ;;  %1459 = vst [vmem:[#allocation4 + $0x304] sm:$0xf] %v10187_v1  ;;  %v11955_v10 = vld [vmem:[#allocation9 + $0x210] sm:$0xff]   ;;  %v1492_v15 = vld [vmem:[#allocation2 + $0x122] sm:$0xff]  ;;  %v10188_v16 = vpack.c.bf16 %v1875_v13, %v1875_v13 }
 0x11a   : > { %1650 = vst [vmem:[#allocation4 + $0x2e4] sm:$0xf] %v10124_v2  ;;  %1651 = vst [vmem:[#allocation4 + $0x308] sm:$0xf] %v10125_v3  ;;  %v1876_v14 = vld [vmem:[#allocation2 + $0x129] sm:$0xff]  ;;  %v10126_v19 = vpack.c.bf16 %v1492_v15, %v1492_v15  ;;  %v1685_v20 = vld [vmem:[#allocation2 + $0x138] sm:$0xff] }
 0x11b   : > { %1648 = vst [vmem:[#allocation4 + $0x29c] sm:$0xf] %v10122_v53  ;;  %2223 = vst [vmem:[#allocation4 + $0x260] sm:$0xf] %v10122_v53  ;;  %v10189_v17 = vpack.c.bf16 %v1876_v14, %v1876_v14  ;;  %v1493_v18 = vld [vmem:[#allocation2 + $0x12a] sm:$0xff]  ;;  %v1686_v21 = vld [vmem:[#allocation2 + $0x140] sm:$0xff]  ;;  %v10158_v23 = vpack.c.bf16 %v1685_v20, %v1685_v20 }
 0x11c   : > { %11547 = vmatpush3.bf16.msra.mxu0 %v11903_v32  ;;  %4227 = vmatmul.mubr.bf16.vlgmr.msra.gmra.mxu1 %v11891_v37  ;;  %2225 = vst [vmem:[#allocation4 + $0x2a8] sm:$0xf] %v10124_v2  ;;  %2226 = vst [vmem:[#allocation4 + $0x2cc] sm:$0xf] %v10125_v3  ;;  %v10127_v22 = vpack.c.bf16 %v1493_v18, %v1493_v18  ;;  %v10159_v24 = vpack.c.bf16 %v1686_v21, %v1686_v21  ;;  %v1877_v25 = vld [vmem:[#allocation2 + $0x139] sm:$0xff]  ;;  %v1878_v26 = vld [vmem:[#allocation2 + $0x141] sm:$0xff] }
 0x11d   : > { %11548 = vmatprep.subr.bf16.mxu0 %v11916_v38  ;;  %4234 = vmatprep.mubr.bf16.mxu1 %v11897_v41  ;;  %1843 = vst [vmem:[#allocation4 + $0x2e8] sm:$0xf] %v10156_v11  ;;  %1844 = vst [vmem:[#allocation4 + $0x30c] sm:$0xf] %v10157_v12  ;;  %v1494_v27 = vld [vmem:[#allocation2 + $0x13a] sm:$0xff]  ;;  %v10190_v28 = vpack.c.bf16 %v1877_v25, %v1877_v25  ;;  %v10191_v29 = vpack.c.bf16 %v1878_v26, %v1878_v26  ;;  %v1495_v30 = vld [vmem:[#allocation2 + $0x142] sm:$0xff] }
 0x11e   : > { %2035 = vst [vmem:[#allocation4 + $0x2ec] sm:$0xf] %v10188_v16  ;;  %2036 = vst [vmem:[#allocation4 + $0x310] sm:$0xf] %v10189_v17  ;;  %v10128_v31 = vpack.c.bf16 %v1494_v27, %v1494_v27  ;;  %v10129_v32 = vpack.c.bf16 %v1495_v30, %v1495_v30  ;;  %v11906_v33 = vld [vmem:[#allocation4 + $0xa8] ss:$36 sps:$4 sm:$0xff]  }
 0x11f   : > { %4074 = vmatmul.mubr.bf16.gmra.mxu0 %v11896_v39  ;;  %1460 = vst [vmem:[#allocation4 + $0x328] sm:$0xf] %v10188_v16  ;;  %1461 = vst [vmem:[#allocation4 + $0x34c] sm:$0xf] %v10189_v17  ;;  %v11909_v34 = vld [vmem:[#allocation4 + $0xe8] ss:$36 sps:$4 sm:$0xff]  }
 0x120   : > { %4081 = vmatprep.mubr.bf16.mxu0 %v11900_v42  ;;  %11549 = vmatpush3.bf16.msra.mxu0 %v11916_v38  ;;  %1652 = vst [vmem:[#allocation4 + $0x32c] sm:$0xf] %v10126_v19  ;;  %2227 = vst [vmem:[#allocation4 + $0x2f0] sm:$0xf] %v10126_v19  ;;  %v11910_v35 = vld [vmem:[#allocation4 + $0xf4] ss:$36 sps:$4 sm:$0xff]  }
 0x121   : > { %11550 = vmatprep.subr.bf16.mxu0 %v12795_v43  ;;  %1653 = vst [vmem:[#allocation4 + $0x350] sm:$0xf] %v10127_v22  ;;  %1845 = vst [vmem:[#allocation4 + $0x330] sm:$0xf] %v10158_v23  ;;  %v11913_v36 = vld [vmem:[#allocation4 + $0x134] ss:$36 sps:$4 sm:$0xff]  }
 0x122   : > { %1846 = vst [vmem:[#allocation4 + $0x354] sm:$0xf] %v10159_v24  ;;  %2228 = vst [vmem:[#allocation4 + $0x314] sm:$0xf] %v10127_v22  ;;  %v11968_v37 = vld [vmem:[#allocation9 + $0x208] sm:$0xff]   ;;  %v1687_v38 = vld [vmem:[#allocation2 + $0x150] sm:$0xff] }
 0x123   : > { %2037 = vst [vmem:[#allocation4 + $0x334] sm:$0xf] %v10190_v28  ;;  %2038 = vst [vmem:[#allocation4 + $0x358] sm:$0xf] %v10191_v29  ;;  %v10160_v39 = vpack.c.bf16 %v1687_v38, %v1687_v38  ;;  %v11912_v41 = vld [vmem:[#allocation4 + $0xf0] ss:$36 sps:$4 sm:$0xff]  }
 0x124   : > { %11551 = vmatpush3.bf16.msra.mxu0 %v12795_v43  ;;  %4235 = vmatmul.mubr.bf16.gmra.mxu1 %v11899_v0  ;;  %1462 = vst [vmem:[#allocation4 + $0x370] sm:$0xf] %v10190_v28  ;;  %1463 = vst [vmem:[#allocation4 + $0x394] sm:$0xf] %v10191_v29  ;;  %v11915_v42 = vld [vmem:[#allocation4 + $0x130] ss:$36 sps:$4 sm:$0xff]  }
 0x125   : > { %11552 = vmatprep.subr.bf16.mxu0 %v11942_v6  ;;  %4242 = vmatprep.mubr.bf16.mxu1 %v11904_v5  ;;  %1654 = vst [vmem:[#allocation4 + $0x374] sm:$0xf] %v10128_v31  ;;  %2229 = vst [vmem:[#allocation4 + $0x338] sm:$0xf] %v10128_v31  ;;  %v11917_v43 = vld [vmem:[#allocation4 + $0x13c] ss:$36 sps:$4 sm:$0xff]  }
 0x126   : > { %1655 = vst [vmem:[#allocation4 + $0x398] sm:$0xf] %v10129_v32  ;;  %2230 = vst [vmem:[#allocation4 + $0x35c] sm:$0xf] %v10129_v32  ;;  %v11920_v44 = vld [vmem:[#allocation4 + $0x17c] ss:$36 sps:$4 sm:$0xff]  }
 0x127   : > { %4082 = vmatmul.mubr.bf16.gmra.mxu0 %v11902_v4  ;;  %1847 = vst [vmem:[#allocation4 + $0x378] sm:$0xf] %v10160_v39  ;;  %v1688_v45 = vld [vmem:[#allocation2 + $0x158] sm:$0xff]  ;;  %v1689_v54 = vld [vmem:[#allocation2 + $0x168] sm:$0xff]  ;;  %v1690_v55 = vld [vmem:[#allocation2 + $0x170] sm:$0xff] }
 0x128   : > { %4089 = vmatprep.mubr.bf16.mxu0 %v11907_v7  ;;  %11553 = vmatpush3.bf16.msra.mxu0 %v11942_v6  ;;  %v1879_v46 = vld [vmem:[#allocation2 + $0x151] sm:$0xff]  ;;  %v10161_v47 = vpack.c.bf16 %v1688_v45, %v1688_v45  ;;  %v1880_v48 = vld [vmem:[#allocation2 + $0x159] sm:$0xff]  ;;  %v1881_v56 = vld [vmem:[#allocation2 + $0x169] sm:$0xff]  ;;  %v10162_v57 = vpack.c.bf16 %v1689_v54, %v1689_v54  ;;  %v10163_v58 = vpack.c.bf16 %v1690_v55, %v1690_v55 }
 0x129   : > { %11554 = vmatprep.subr.bf16.mxu0 %v11955_v10  ;;  %v10192_v49 = vpack.c.bf16 %v1879_v46, %v1879_v46  ;;  %v1496_v50 = vld [vmem:[#allocation2 + $0x152] sm:$0xff]  ;;  %v1497_v40 = vld [vmem:[#allocation2 + $0x15a] sm:$0xff]  ;;  %v10193_v51 = vpack.c.bf16 %v1880_v48, %v1880_v48  ;;  %v10194_v60 = vpack.c.bf16 %v1881_v56, %v1881_v56  ;;  %v1498_v61 = vld [vmem:[#allocation2 + $0x16a] sm:$0xff] }
 0x12a   : > { %v10130_v52 = vpack.c.bf16 %v1496_v50, %v1496_v50  ;;  %v10131_v53 = vpack.c.bf16 %v1497_v40, %v1497_v40  ;;  %1848 = vst [vmem:[#allocation4 + $0x39c] sm:$0xf] %v10161_v47  ;;  %v1882_v59 = vld [vmem:[#allocation2 + $0x171] sm:$0xff]  ;;  %v10132_v0 = vpack.c.bf16 %v1498_v61, %v1498_v61  ;;  %v11981_v2 = vld [vmem:[#allocation9 + $0x200] sm:$0xff]   ;;  %1849 = vst [vmem:[#allocation4 + $0x3c0] sm:$0xf] %v10162_v57 }
 0x12b   : > { %2039 = vst [vmem:[#allocation4 + $0x37c] sm:$0xf] %v10192_v49  ;;  %1464 = vst [vmem:[#allocation4 + $0x3b8] sm:$0xf] %v10192_v49  ;;  %v1499_v62 = vld [vmem:[#allocation2 + $0x172] sm:$0xff]  ;;  %v10195_v63 = vpack.c.bf16 %v1882_v59, %v1882_v59  ;;  %v1691_v3 = vld [vmem:[#allocation2 + $0x180] sm:$0xff] }
 0x12c   : > { %11555 = vmatpush3.bf16.msra.mxu0 %v11955_v10  ;;  %4243 = vmatmul.mubr.bf16.gmra.mxu1 %v11906_v33  ;;  %2040 = vst [vmem:[#allocation4 + $0x3a0] sm:$0xf] %v10193_v51  ;;  %1465 = vst [vmem:[#allocation4 + $0x3dc] sm:$0xf] %v10193_v51  ;;  %v10133_v1 = vpack.c.bf16 %v1499_v62, %v1499_v62  ;;  %v1692_v4 = vld [vmem:[#allocation2 + $0x188] sm:$0xff]  ;;  %v10164_v7 = vpack.c.bf16 %v1691_v3, %v1691_v3  ;;  %v1693_v18 = vld [vmem:[#allocation2 + $0x198] sm:$0xff] }
 0x12d   : > { %11556 = vmatprep.subr.bf16.mxu0 %v11968_v37  ;;  %4250 = vmatprep.mubr.bf16.mxu1 %v11910_v35  ;;  %1656 = vst [vmem:[#allocation4 + $0x3bc] sm:$0xf] %v10130_v52  ;;  %1657 = vst [vmem:[#allocation4 + $0x3e0] sm:$0xf] %v10131_v53  ;;  %v1883_v5 = vld [vmem:[#allocation2 + $0x181] sm:$0xff]  ;;  %v10165_v8 = vpack.c.bf16 %v1692_v4, %v1692_v4  ;;  %v1884_v9 = vld [vmem:[#allocation2 + $0x189] sm:$0xff]  ;;  %v10166_v22 = vpack.c.bf16 %v1693_v18, %v1693_v18 }
 0x12e   : > { %2231 = vst [vmem:[#allocation4 + $0x380] sm:$0xf] %v10130_v52  ;;  %2232 = vst [vmem:[#allocation4 + $0x3a4] sm:$0xf] %v10131_v53  ;;  %v11919_v6 = vld [vmem:[#allocation4 + $0x138] ss:$36 sps:$4 sm:$0xff]   ;;  %v10196_v10 = vpack.c.bf16 %v1883_v5, %v1883_v5  ;;  %v10197_v15 = vpack.c.bf16 %v1884_v9, %v1884_v9 }
 0x12f   : > { %4090 = vmatmul.mubr.bf16.gmra.mxu0 %v11909_v34  ;;  %1850 = vst [vmem:[#allocation4 + $0x3e4] sm:$0xf] %v10163_v58  ;;  %2041 = vst [vmem:[#allocation4 + $0x3c4] sm:$0xf] %v10194_v60  ;;  %v1500_v11 = vld [vmem:[#allocation2 + $0x182] sm:$0xff]  ;;  %v1501_v12 = vld [vmem:[#allocation2 + $0x18a] sm:$0xff] }
 0x130   : > { %4097 = vmatprep.mubr.bf16.mxu0 %v11913_v36  ;;  %11557 = vmatpush3.bf16.msra.mxu0 %v11968_v37  ;;  %1466 = vst [vmem:[#allocation4 + $0x400] sm:$0xf] %v10194_v60  ;;  %2042 = vst [vmem:[#allocation4 + $0x3e8] sm:$0xf] %v10195_v63  ;;  %v11922_v13 = vld [vmem:[#allocation4 + $0x178] ss:$36 sps:$4 sm:$0xff]   ;;  %v10134_v16 = vpack.c.bf16 %v1500_v11, %v1500_v11  ;;  %v10135_v17 = vpack.c.bf16 %v1501_v12, %v1501_v12 }
 0x131   : > { %1467 = vst [vmem:[#allocation4 + $0x424] sm:$0xf] %v10195_v63  ;;  %1658 = vst [vmem:[#allocation4 + $0x404] sm:$0xf] %v10132_v0  ;;  %11558 = vmatprep.subr.bf16.mxu0 %v11981_v2  ;;  %v11923_v14 = vld [vmem:[#allocation4 + $0x184] ss:$36 sps:$4 sm:$0xff]  }
 0x132   : > { %1659 = vst [vmem:[#allocation4 + $0x428] sm:$0xf] %v10133_v1  ;;  %2233 = vst [vmem:[#allocation4 + $0x3c8] sm:$0xf] %v10132_v0  ;;  %v1885_v19 = vld [vmem:[#allocation2 + $0x199] sm:$0xff]  ;;  %v1886_v20 = vld [vmem:[#allocation2 + $0x1a1] sm:$0xff] }
 0x133   : > { %2234 = vst [vmem:[#allocation4 + $0x3ec] sm:$0xf] %v10133_v1  ;;  %v11926_v21 = vld [vmem:[#allocation4 + $0x1c4] ss:$36 sps:$4 sm:$0xff]   ;;  %1851 = vst [vmem:[#allocation4 + $0x408] sm:$0xf] %v10164_v7  ;;  %v10198_v23 = vpack.c.bf16 %v1885_v19, %v1885_v19  ;;  %v10199_v24 = vpack.c.bf16 %v1886_v20, %v1886_v20 }
 0x134   : > { %4251 = vmatmul.mubr.bf16.gmra.mxu1 %v11912_v41  ;;  %11559 = vmatpush3.bf16.msra.mxu0 %v11981_v2  ;;  %1852 = vst [vmem:[#allocation4 + $0x42c] sm:$0xf] %v10165_v8  ;;  %2043 = vst [vmem:[#allocation4 + $0x40c] sm:$0xf] %v10196_v10  ;;  %v2047_v25 = vld [vmem:[#allocation2 + $0x32] sm:$0xff]  ;;  %v2048_v26 = vld [vmem:[#allocation2 + $0x3a] sm:$0xff] }
 0x135   : > { %4258 = vmatprep.mubr.bf16.mxu1 %v11917_v43  ;;  %1468 = vst [vmem:[#allocation4 + $0x448] sm:$0xf] %v10196_v10  ;;  %v2049_v27 = vld [vmem:[#allocation2 + $0x4a] sm:$0xff]  ;;  %2044 = vst [vmem:[#allocation4 + $0x430] sm:$0xf] %v10197_v15  ;;  %v10200_v28 = vpack.c.bf16 %v2047_v25, %v2047_v25  ;;  %v10201_v29 = vpack.c.bf16 %v2048_v26, %v2048_v26  ;;  %v2050_v30 = vld [vmem:[#allocation2 + $0x52] sm:$0xff] }
 0x136   : > { %1469 = vst [vmem:[#allocation4 + $0x46c] sm:$0xf] %v10197_v15  ;;  %1660 = vst [vmem:[#allocation4 + $0x44c] sm:$0xf] %v10134_v16  ;;  %v10202_v31 = vpack.c.bf16 %v2049_v27, %v2049_v27  ;;  %v2051_v32 = vld [vmem:[#allocation2 + $0x62] sm:$0xff]  ;;  %v2052_v33 = vld [vmem:[#allocation2 + $0x6a] sm:$0xff]  ;;  %v10203_v34 = vpack.c.bf16 %v2050_v30, %v2050_v30 }
 0x137   : > { %4098 = vmatmul.mubr.bf16.gmra.mxu0 %v11915_v42  ;;  %1661 = vst [vmem:[#allocation4 + $0x470] sm:$0xf] %v10135_v17  ;;  %2235 = vst [vmem:[#allocation4 + $0x410] sm:$0xf] %v10134_v16  ;;  %v10204_v35 = vpack.c.bf16 %v2051_v32, %v2051_v32  ;;  %v10205_v36 = vpack.c.bf16 %v2052_v33, %v2052_v33  ;;  %v2053_v37 = vld [vmem:[#allocation2 + $0x7a] sm:$0xff]  ;;  %v2054_v38 = vld [vmem:[#allocation2 + $0x82] sm:$0xff] }
 0x138   : > { %4105 = vmatprep.mubr.bf16.mxu0 %v11920_v44  ;;  %2236 = vst [vmem:[#allocation4 + $0x434] sm:$0xf] %v10135_v17  ;;  %1853 = vst [vmem:[#allocation4 + $0x450] sm:$0xf] %v10166_v22  ;;  %v10206_v39 = vpack.c.bf16 %v2053_v37, %v2053_v37  ;;  %v10207_v41 = vpack.c.bf16 %v2054_v38, %v2054_v38  ;;  %v11925_v42 = vld [vmem:[#allocation4 + $0x180] ss:$36 sps:$4 sm:$0xff]  }
 0x139   : > { %2045 = vst [vmem:[#allocation4 + $0x454] sm:$0xf] %v10198_v23  ;;  %2046 = vst [vmem:[#allocation4 + $0x478] sm:$0xf] %v10199_v24  ;;  %v11928_v43 = vld [vmem:[#allocation4 + $0x1c0] ss:$36 sps:$4 sm:$0xff]  }
 0x13a   : > { %2207 = vst [vmem:[#allocation4 + $0x20] sm:$0xf] %v10200_v28  ;;  %2208 = vst [vmem:[#allocation4 + $0x44] sm:$0xf] %v10201_v29  ;;  %v11930_v44 = vld [vmem:[#allocation4 + $0x1cc] ss:$36 sps:$4 sm:$0xff]  }
 0x13b   : > { %2209 = vst [vmem:[#allocation4 + $0x68] sm:$0xf] %v10202_v31  ;;  %2210 = vst [vmem:[#allocation4 + $0x8c] sm:$0xf] %v10203_v34  ;;  %v11933_v45 = vld [vmem:[#allocation4 + $0x20c] ss:$36 sps:$4 sm:$0xff]  }
 0x13c   : > { %4259 = vmatmul.mubr.bf16.gmra.mxu1 %v11919_v6  ;;  %2211 = vst [vmem:[#allocation4 + $0xb0] sm:$0xf] %v10204_v35  ;;  %2212 = vst [vmem:[#allocation4 + $0xd4] sm:$0xf] %v10205_v36  ;;  %v11932_v46 = vld [vmem:[#allocation4 + $0x1c8] ss:$36 sps:$4 sm:$0xff]  }
 0x13d   : > { %4266 = vmatprep.mubr.bf16.mxu1 %v11923_v14  ;;  %2213 = vst [vmem:[#allocation4 + $0xf8] sm:$0xf] %v10206_v39  ;;  %2214 = vst [vmem:[#allocation4 + $0x11c] sm:$0xf] %v10207_v41  ;;  %v11935_v47 = vld [vmem:[#allocation4 + $0x208] ss:$36 sps:$4 sm:$0xff]  }
 0x13e   : > { %v11936_v48 = vld [vmem:[#allocation4 + $0x214] ss:$36 sps:$4 sm:$0xff]   ;;  %v2057_v51 = vld [vmem:[#allocation2 + $0xaa] sm:$0xff]  ;;  %v2059_v56 = vld [vmem:[#allocation2 + $0xc2] sm:$0xff] }
 0x13f   : > { %4106 = vmatmul.mubr.bf16.gmra.mxu0 %v11922_v13  ;;  %v11939_v49 = vld [vmem:[#allocation4 + $0x254] ss:$36 sps:$4 sm:$0xff]   ;;  %v10210_v55 = vpack.c.bf16 %v2057_v51, %v2057_v51  ;;  %v2060_v57 = vld [vmem:[#allocation2 + $0xca] sm:$0xff]  ;;  %v10212_v59 = vpack.c.bf16 %v2059_v56, %v2059_v56  ;;  %v2062_v62 = vld [vmem:[#allocation2 + $0xe2] sm:$0xff] }
 0x140   : > { %4113 = vmatprep.mubr.bf16.mxu0 %v11926_v21  ;;  %v2055_v50 = vld [vmem:[#allocation2 + $0x92] sm:$0xff]  ;;  %v2056_v40 = vld [vmem:[#allocation2 + $0x9a] sm:$0xff]  ;;  %v10213_v60 = vpack.c.bf16 %v2060_v57, %v2060_v57  ;;  %v10215_v0 = vpack.c.bf16 %v2062_v62, %v2062_v62  ;;  %v2078_v12 = vld [vmem:[#allocation2 + $0x1a2] sm:$0xff] }
 0x141   : > { %v10208_v52 = vpack.c.bf16 %v2055_v50, %v2055_v50  ;;  %v10209_v53 = vpack.c.bf16 %v2056_v40, %v2056_v40  ;;  %v2058_v54 = vld [vmem:[#allocation2 + $0xb2] sm:$0xff]  ;;  %v2061_v61 = vld [vmem:[#allocation2 + $0xda] sm:$0xff]  ;;  %2217 = vst [vmem:[#allocation4 + $0x188] sm:$0xf] %v10210_v55  ;;  %2219 = vst [vmem:[#allocation4 + $0x1d0] sm:$0xf] %v10212_v59  ;;  %v10231_v16 = vpack.c.bf16 %v2078_v12, %v2078_v12 }
 0x142   : > { %v10211_v58 = vpack.c.bf16 %v2058_v54, %v2058_v54  ;;  %v10214_v63 = vpack.c.bf16 %v2061_v61, %v2061_v61  ;;  %2220 = vst [vmem:[#allocation4 + $0x1f4] sm:$0xf] %v10213_v60  ;;  %2222 = vst [vmem:[#allocation4 + $0x23c] sm:$0xf] %v10215_v0  ;;  %v11938_v1 = vld [vmem:[#allocation4 + $0x210] ss:$36 sps:$4 sm:$0xff]  }
 0x143   : > { %2215 = vst [vmem:[#allocation4 + $0x140] sm:$0xf] %v10208_v52  ;;  %2216 = vst [vmem:[#allocation4 + $0x164] sm:$0xf] %v10209_v53  ;;  %v11941_v2 = vld [vmem:[#allocation4 + $0x250] ss:$36 sps:$4 sm:$0xff]  }
 0x144   : > { %4267 = vmatmul.mubr.bf16.gmra.mxu1 %v11925_v42  ;;  %2218 = vst [vmem:[#allocation4 + $0x1ac] sm:$0xf] %v10211_v58  ;;  %2221 = vst [vmem:[#allocation4 + $0x218] sm:$0xf] %v10214_v63  ;;  %v11943_v4 = vld [vmem:[#allocation4 + $0x25c] ss:$36 sps:$4 sm:$0xff]  }
 0x145   : > { %4274 = vmatprep.mubr.bf16.mxu1 %v11930_v44  ;;  %v2077_v5 = vld [vmem:[#allocation2 + $0x19a] sm:$0xff]  ;;  %v11949_v15 = vld [vmem:[#allocation4 + $0x2a4] ss:$36 sps:$4 sm:$0xff]   ;;  %2238 = vst [vmem:[#allocation4 + $0x47c] sm:$0xf] %v10231_v16 }
 0x146   : > { %v11946_v6 = vld [vmem:[#allocation4 + $0x29c] ss:$36 sps:$4 sm:$0xff]   ;;  %v10230_v7 = vpack.c.bf16 %v2077_v5, %v2077_v5  ;;  %v11952_v18 = vld [vmem:[#allocation4 + $0x2e4] ss:$36 sps:$4 sm:$0xff]   ;;  %v11956_v26 = vld [vmem:[#allocation4 + $0x2ec] ss:$36 sps:$4 sm:$0xff]  }
 0x147   : > { %4114 = vmatmul.mubr.bf16.gmra.mxu0 %v11928_v43  ;;  %v11945_v11 = vld [vmem:[#allocation4 + $0x258] ss:$36 sps:$4 sm:$0xff]   ;;  %v11951_v22 = vld [vmem:[#allocation4 + $0x2a0] ss:$36 sps:$4 sm:$0xff]   ;;  %v11959_v29 = vld [vmem:[#allocation4 + $0x32c] ss:$36 sps:$4 sm:$0xff]  }
 0x148   : > { %4121 = vmatprep.mubr.bf16.mxu0 %v11933_v45  ;;  %2237 = vst [vmem:[#allocation4 + $0x458] sm:$0xf] %v10230_v7  ;;  %v11948_v14 = vld [vmem:[#allocation4 + $0x298] ss:$36 sps:$4 sm:$0xff]   ;;  %v11954_v25 = vld [vmem:[#allocation4 + $0x2e0] ss:$36 sps:$4 sm:$0xff]  }
 0x149   : > { %v11958_v41 = vld [vmem:[#allocation4 + $0x2e8] ss:$36 sps:$4 sm:$0xff]   ;;  %v11962_v45 = vld [vmem:[#allocation4 + $0x334] ss:$36 sps:$4 sm:$0xff]   ;;  %v11971_v62 = vld [vmem:[#allocation4 + $0x37c] ss:$36 sps:$4 sm:$0xff]  }
 0x14a   : > { %v11961_v44 = vld [vmem:[#allocation4 + $0x328] ss:$36 sps:$4 sm:$0xff]   ;;  %v11964_v58 = vld [vmem:[#allocation4 + $0x330] ss:$36 sps:$4 sm:$0xff]   ;;  %v11969_v12 = vld [vmem:[#allocation4 + $0x378] ss:$36 sps:$4 sm:$0xff]  }
 0x14b   : > { %v11965_v61 = vld [vmem:[#allocation4 + $0x370] ss:$36 sps:$4 sm:$0xff]   ;;  %v11977_v16 = vld [vmem:[#allocation4 + $0x3c4] ss:$36 sps:$4 sm:$0xff]  }
 0x14c   : > { %4275 = vmatmul.mubr.bf16.gmra.mxu1 %v11932_v46 }
 0x14d   : > { %4282 = vmatprep.mubr.bf16.mxu1 %v11936_v48  ;;  %v11967_v48 = vld [vmem:[#allocation4 + $0x374] ss:$36 sps:$4 sm:$0xff]  }
 0x14f   : > { %4122 = vmatmul.mubr.bf16.gmra.mxu0 %v11935_v47 }
 0x150   : > { %4129 = vmatprep.mubr.bf16.mxu0 %v11939_v49 }
 0x152   : > { %v10616_v3 = vpop.f32.mrf.mxu0 }
 0x154   : > { %v10617_v8 = vpop.f32.mrf.mxu0  ;;  %4283 = vmatmul.mubr.bf16.gmra.mxu1 %v11938_v1  ;;  %v11974_v1 = vld [vmem:[#allocation4 + $0x3bc] ss:$36 sps:$4 sm:$0xff]  }
 0x155   : > { %v10618_v9 = vadd.f32 %v10617_v8, %v10616_v3  ;;  %4290 = vmatprep.mubr.bf16.mxu1 %v11943_v4 }
 0x156   : > { %v10619_v10 = vpop.f32.mrf.mxu0 }
 0x157   : > { %4130 = vmatmul.mubr.bf16.gmra.mxu0 %v11941_v2 }
 0x158   : > { %4137 = vmatprep.mubr.bf16.mxu0 %v11946_v6  ;;  %v10620_v13 = vpop.f32.mrf.mxu0 }
 0x159   : > { %v10621_v17 = vadd.f32 %v10620_v13, %v10619_v10 }
 0x15c   : > { %v10728_v19 = vpop.f32.mrf.mxu1  ;;  %4291 = vmatmul.mubr.bf16.gmra.mxu1 %v11945_v11 }
 0x15d   : > { %4298 = vmatprep.mubr.bf16.mxu1 %v11949_v15  ;;  %v11972_v15 = vld [vmem:[#allocation4 + $0x3b8] ss:$36 sps:$4 sm:$0xff]  }
 0x15e   : > { %v10729_v21 = vpop.f32.mrf.mxu1 }
 0x15f   : > { %v10622_v20 = vpop.f32.mrf.mxu0  ;;  %4138 = vmatmul.mubr.bf16.gmra.mxu0 %v11948_v14  ;;  %v10730_v23 = vadd.f32 %v10729_v21, %v10728_v19  ;;  %v11980_v21 = vld [vmem:[#allocation4 + $0x404] ss:$36 sps:$4 sm:$0xff]  }
 0x160   : > { %4145 = vmatprep.mubr.bf16.mxu0 %v11952_v18  ;;  %v10731_v27 = vpop.f32.mrf.mxu1  ;;  %v12008_v18 = vld [vmem:[#allocation11 + $0x38] sm:$0xff]  }
 0x161   : > { %v10623_v24 = vpop.f32.mrf.mxu0  ;;  %v12799_v30 = vadd.f32 %v10730_v23, %v10618_v9 }
 0x162   : > { %v10624_v28 = vadd.f32 %v10623_v24, %v10622_v20  ;;  %v10732_v32 = vpop.f32.mrf.mxu1 }
 0x163   : > { %v10625_v31 = vpop.f32.mrf.mxu0  ;;  %v10733_v33 = vadd.f32 %v10732_v32, %v10731_v27 }
 0x164   : > { %v10734_v35 = vpop.f32.mrf.mxu1  ;;  %4299 = vmatmul.mubr.bf16.gmra.mxu1 %v11951_v22 }
 0x165   : > { %v10626_v34 = vpop.f32.mrf.mxu0  ;;  %v12801_v37 = vadd.f32 %v10733_v33, %v10621_v17  ;;  %4306 = vmatprep.mubr.bf16.mxu1 %v11956_v26  ;;  %v12007_v17 = vld [vmem:[#allocation11 + $0x78] sm:$0xff]   ;;  %v11975_v33 = vld [vmem:[#allocation4 + $0x3c0] ss:$36 sps:$4 sm:$0xff]  }
 0x166   : > { %v10627_v36 = vadd.f32 %v10626_v34, %v10625_v31  ;;  %v10735_v39 = vpop.f32.mrf.mxu1  ;;  %11072 = vmatprep.subr.bf16.mxu1 %v12007_v17 }
 0x167   : > { %v10628_v38 = vpop.f32.mrf.mxu0  ;;  %4146 = vmatmul.mubr.bf16.gmra.mxu0 %v11954_v25  ;;  %v10736_v42 = vadd.f32 %v10735_v39, %v10734_v35  ;;  %11073 = vmatpush3.bf16.msra.mxu1 %v12008_v18 }
 0x168   : > { %4153 = vmatprep.mubr.bf16.mxu0 %v11959_v29  ;;  %v10737_v46 = vpop.f32.mrf.mxu1 }
 0x169   : > { %v10629_v43 = vpop.f32.mrf.mxu0  ;;  %v12803_v49 = vadd.f32 %v10736_v42, %v10624_v28  ;;  %v11987_v42 = vld [vmem:[#allocation4 + $0x44c] ss:$36 sps:$4 sm:$0xff]  }
 0x16a   : > { %v10630_v47 = vadd.f32 %v10629_v43, %v10628_v38  ;;  %v10738_v40 = vpop.f32.mrf.mxu1  ;;  %v11984_v38 = vld [vmem:[#allocation4 + $0x40c] ss:$36 sps:$4 sm:$0xff]  }
 0x16b   : > { %v10631_v50 = vpop.f32.mrf.mxu0  ;;  %v10739_v51 = vadd.f32 %v10738_v40, %v10737_v46 }
 0x16c   : > { %v10740_v53 = vpop.f32.mrf.mxu1  ;;  %4307 = vmatmul.mubr.bf16.gmra.mxu1 %v11958_v41 }
 0x16d   : > { %v10632_v52 = vpop.f32.mrf.mxu0  ;;  %v12805_v55 = vadd.f32 %v10739_v51, %v10627_v36  ;;  %4314 = vmatprep.mubr.bf16.mxu1 %v11962_v45  ;;  %v11978_v36 = vld [vmem:[#allocation4 + $0x400] ss:$36 sps:$4 sm:$0xff]  }
 0x16e   : > { %v10633_v54 = vadd.f32 %v10632_v52, %v10631_v50  ;;  %v10741_v57 = vpop.f32.mrf.mxu1 }
 0x16f   : > { %v10634_v56 = vpop.f32.mrf.mxu0  ;;  %4154 = vmatmul.mubr.bf16.gmra.mxu0 %v11961_v44  ;;  %v10742_v59 = vadd.f32 %v10741_v57, %v10740_v53  ;;  %v12010_v57 = vld [vmem:[#allocation11 + $0x30] sm:$0xff]  }
 0x170   : > { %4161 = vmatprep.mubr.bf16.mxu0 %v11967_v48  ;;  %v10743_v63 = vpop.f32.mrf.mxu1 }
 0x171   : > { %v10635_v60 = vpop.f32.mrf.mxu0  ;;  %v12807_v2 = vadd.f32 %v10742_v59, %v10630_v47  ;;  %v11982_v59 = vld [vmem:[#allocation4 + $0x408] ss:$36 sps:$4 sm:$0xff]  }
 0x172   : > { %v10636_v0 = vadd.f32 %v10635_v60, %v10634_v56  ;;  %v10744_v4 = vpop.f32.mrf.mxu1  ;;  %v12009_v56 = vld [vmem:[#allocation11 + $0x70] sm:$0xff]  }
 0x173   : > { %v10637_v3 = vpop.f32.mrf.mxu0  ;;  %v10745_v5 = vadd.f32 %v10744_v4, %v10743_v63  ;;  %v11985_v63 = vld [vmem:[#allocation4 + $0x448] ss:$36 sps:$4 sm:$0xff]   ;;  %11074 = vmatprep.subr.bf16.mxu1 %v12009_v56 }
 0x174   : > { %v10746_v7 = vpop.f32.mrf.mxu1  ;;  %4315 = vmatmul.mubr.bf16.gmra.mxu1 %v11964_v58 }
 0x175   : > { %v10638_v6 = vpop.f32.mrf.mxu0  ;;  %v12809_v9 = vadd.f32 %v10745_v5, %v10633_v54  ;;  %4322 = vmatprep.mubr.bf16.mxu1 %v11971_v62  ;;  %11075 = vmatpush3.bf16.msra.mxu1 %v12010_v57 }
 0x176   : > { %v10639_v8 = vadd.f32 %v10638_v6, %v10637_v3  ;;  %v10747_v11 = vpop.f32.mrf.mxu1  ;;  %v11991_v3 = vld [vmem:[#allocation4 + $0x20] ss:$36 sps:$4 sm:$0xff]  }
 0x177   : > { %v10640_v10 = vpop.f32.mrf.mxu0  ;;  %4162 = vmatmul.mubr.bf16.gmra.mxu0 %v11965_v61  ;;  %v10748_v13 = vadd.f32 %v10747_v11, %v10746_v7 }
 0x178   : > { %4169 = vmatprep.mubr.bf16.mxu0 %v11974_v1  ;;  %v10749_v19 = vpop.f32.mrf.mxu1 }
 0x179   : > { %v10641_v14 = vpop.f32.mrf.mxu0  ;;  %v12811_v22 = vadd.f32 %v10748_v13, %v10636_v0  ;;  %v11990_v0 = vld [vmem:[#allocation4 + $0x454] ss:$36 sps:$4 sm:$0xff]  }
 0x17a   : > { %v10642_v20 = vadd.f32 %v10641_v14, %v10640_v10  ;;  %v10750_v24 = vpop.f32.mrf.mxu1 }
 0x17b   : > { %v10643_v23 = vpop.f32.mrf.mxu0  ;;  %v10751_v25 = vadd.f32 %v10750_v24, %v10749_v19  ;;  %v11992_v19 = vld [vmem:[#allocation4 + $0x68] ss:$36 sps:$4 sm:$0xff]  }
 0x17c   : > { %v10752_v27 = vpop.f32.mrf.mxu1  ;;  %4323 = vmatmul.mubr.bf16.gmra.mxu1 %v11969_v12 }
 0x17d   : > { %v10644_v26 = vpop.f32.mrf.mxu0  ;;  %v12813_v29 = vadd.f32 %v10751_v25, %v10639_v8  ;;  %4330 = vmatprep.mubr.bf16.mxu1 %v11977_v16 }
 0x17e   : > { %v10645_v28 = vadd.f32 %v10644_v26, %v10643_v23  ;;  %v10753_v32 = vpop.f32.mrf.mxu1 }
 0x17f   : > { %v10646_v31 = vpop.f32.mrf.mxu0  ;;  %4170 = vmatmul.mubr.bf16.gmra.mxu0 %v11972_v15  ;;  %v10754_v34 = vadd.f32 %v10753_v32, %v10752_v27  ;;  %v11988_v15 = vld [vmem:[#allocation4 + $0x450] ss:$36 sps:$4 sm:$0xff]  }
 0x180   : > { %4177 = vmatprep.mubr.bf16.mxu0 %v11980_v21  ;;  %v10755_v39 = vpop.f32.mrf.mxu1  ;;  %v11993_v21 = vld [vmem:[#allocation4 + $0xb0] ss:$36 sps:$4 sm:$0xff]  }
 0x181   : > { %v10647_v35 = vpop.f32.mrf.mxu0  ;;  %v12815_v43 = vadd.f32 %v10754_v34, %v10642_v20  ;;  %v12011_v34 = vld [vmem:[#allocation11 + $0x68] sm:$0xff]  }
 0x182   : > { %v10648_v41 = vadd.f32 %v10647_v35, %v10646_v31  ;;  %v10756_v45 = vpop.f32.mrf.mxu1  ;;  %v12012_v35 = vld [vmem:[#allocation11 + $0x28] sm:$0xff]   ;;  %11076 = vmatprep.subr.bf16.mxu1 %v12011_v34 }
 0x183   : > { %v10649_v44 = vpop.f32.mrf.mxu0  ;;  %v10757_v46 = vadd.f32 %v10756_v45, %v10755_v39  ;;  %v11995_v45 = vld [vmem:[#allocation4 + $0x140] ss:$36 sps:$4 sm:$0xff]   ;;  %11077 = vmatpush3.bf16.msra.mxu1 %v12012_v35 }
 0x184   : > { %v10758_v48 = vpop.f32.mrf.mxu1  ;;  %4331 = vmatmul.mubr.bf16.gmra.mxu1 %v11975_v33 }
 0x185   : > { %v10650_v47 = vpop.f32.mrf.mxu0  ;;  %v12817_v40 = vadd.f32 %v10757_v46, %v10645_v28  ;;  %4338 = vmatprep.mubr.bf16.mxu1 %v11984_v38 }
 0x186   : > { %v10651_v50 = vadd.f32 %v10650_v47, %v10649_v44  ;;  %v10759_v52 = vpop.f32.mrf.mxu1 }
 0x187   : > { %v10652_v51 = vpop.f32.mrf.mxu0  ;;  %4178 = vmatmul.mubr.bf16.gmra.mxu0 %v11978_v36  ;;  %v10760_v53 = vadd.f32 %v10759_v52, %v10758_v48 }
 0x188   : > { %4185 = vmatprep.mubr.bf16.mxu0 %v11987_v42  ;;  %v10761_v58 = vpop.f32.mrf.mxu1  ;;  %v11994_v42 = vld [vmem:[#allocation4 + $0xf8] ss:$36 sps:$4 sm:$0xff]  }
 0x189   : > { %v10653_v54 = vpop.f32.mrf.mxu0  ;;  %v12819_v61 = vadd.f32 %v10760_v53, %v10648_v41 }
 0x18a   : > { %v10654_v60 = vadd.f32 %v10653_v54, %v10652_v51  ;;  %v10762_v1 = vpop.f32.mrf.mxu1 }
 0x18b   : > { %v10655_v62 = vpop.f32.mrf.mxu0  ;;  %v10763_v4 = vadd.f32 %v10762_v1, %v10761_v58 }
 0x18c   : > { %v10764_v6 = vpop.f32.mrf.mxu1  ;;  %4339 = vmatmul.mubr.bf16.gmra.mxu1 %v11982_v59 }
 0x18d   : > { %v10656_v5 = vpop.f32.mrf.mxu0  ;;  %v12821_v8 = vadd.f32 %v10763_v4, %v10651_v50  ;;  %4346 = vmatprep.mubr.bf16.mxu1 %v11990_v0  ;;  %v11997_v0 = vld [vmem:[#allocation4 + $0x1d0] ss:$36 sps:$4 sm:$0xff]  }
 0x18e   : > { %v10657_v7 = vadd.f32 %v10656_v5, %v10655_v62  ;;  %v10765_v11 = vpop.f32.mrf.mxu1  ;;  %v11996_v62 = vld [vmem:[#allocation4 + $0x188] ss:$36 sps:$4 sm:$0xff]  }
 0x18f   : > { %v10658_v10 = vpop.f32.mrf.mxu0  ;;  %4186 = vmatmul.mubr.bf16.gmra.mxu0 %v11985_v63  ;;  %v10766_v12 = vadd.f32 %v10765_v11, %v10764_v6 }
 0x190   : > { %11560 = vmatprep.mubr.bf16.mxu0 %v11991_v3  ;;  %v10767_v14 = vpop.f32.mrf.mxu1 }
 0x191   : > { %v10659_v13 = vpop.f32.mrf.mxu0  ;;  %v12823_v17 = vadd.f32 %v10766_v12, %v10654_v60 }
 0x192   : > { %v10660_v16 = vadd.f32 %v10659_v13, %v10658_v10  ;;  %v10768_v20 = vpop.f32.mrf.mxu1  ;;  %v12013_v13 = vld [vmem:[#allocation11 + $0x60] sm:$0xff]  }
 0x193   : > { %v10661_v18 = vpop.f32.mrf.mxu0  ;;  %v10769_v23 = vadd.f32 %v10768_v20, %v10767_v14  ;;  %v12014_v14 = vld [vmem:[#allocation11 + $0x20] sm:$0xff]   ;;  %v11998_v20 = vld [vmem:[#allocation4 + $0x218] ss:$36 sps:$4 sm:$0xff]   ;;  %11078 = vmatprep.subr.bf16.mxu1 %v12013_v13 }
 0x194   : > { %v10770_v25 = vpop.f32.mrf.mxu1  ;;  %4347 = vmatmul.mubr.bf16.gmra.mxu1 %v11988_v15 }
 0x195   : > { %v10662_v24 = vpop.f32.mrf.mxu0  ;;  %v12825_v27 = vadd.f32 %v10769_v23, %v10657_v7  ;;  %v11999_v23 = vld [vmem:[#allocation4 + $0x260] ss:$36 sps:$4 sm:$0xff]   ;;  %11079 = vmatpush3.bf16.msra.mxu1 %v12014_v14 }
 0x196   : > { %v10663_v26 = vadd.f32 %v10662_v24, %v10661_v18  ;;  %v10771_v31 = vpop.f32.mrf.mxu1 }
 0x197   : > { %v10664_v28 = vpop.f32.mrf.mxu0  ;;  %11561 = vmatmul.mubr.bf16.vlgmr.msra.gmra.mxu0 %v11992_v19  ;;  %v10772_v32 = vadd.f32 %v10771_v31, %v10770_v25 }
 0x198   : > { %11564 = vmatprep.mubr.bf16.mxu0 %v11993_v21  ;;  %v10773_v36 = vpop.f32.mrf.mxu1 }
 0x199   : > { %v10665_v33 = vpop.f32.mrf.mxu0  ;;  %v12827_v39 = vadd.f32 %v10772_v32, %v10660_v16 }
 0x19a   : > { %v10666_v38 = vadd.f32 %v10665_v33, %v10664_v28  ;;  %v10774_v44 = vpop.f32.mrf.mxu1 }
 0x19b   : > { %v10667_v41 = vpop.f32.mrf.mxu0  ;;  %v10775_v46 = vadd.f32 %v10774_v44, %v10773_v36  ;;  %v12000_v44 = vld [vmem:[#allocation4 + $0x2a8] ss:$36 sps:$4 sm:$0xff]  }
 0x19c   : > { %v10776_v48 = vpop.f32.mrf.mxu1 }
 0x19d   : > { %v10668_v47 = vpop.f32.mrf.mxu0  ;;  %v12829_v51 = vadd.f32 %v10775_v46, %v10663_v26  ;;  %v12001_v46 = vld [vmem:[#allocation4 + $0x2f0] ss:$36 sps:$4 sm:$0xff]  }
 0x19e   : > { %v10669_v50 = vadd.f32 %v10668_v47, %v10667_v41  ;;  %v10777_v53 = vpop.f32.mrf.mxu1 }
 0x19f   : > { %v10670_v52 = vpop.f32.mrf.mxu0  ;;  %11565 = vmatmul.mubr.bf16.gmra.mxu0 %v11994_v42  ;;  %v10778_v54 = vadd.f32 %v10777_v53, %v10776_v48 }
 0x1a0   : > { %11568 = vmatprep.mubr.bf16.mxu0 %v11995_v45  ;;  %v10779_v57 = vpop.f32.mrf.mxu1 }
 0x1a1   : > { %v10671_v56 = vpop.f32.mrf.mxu0  ;;  %v12831_v59 = vadd.f32 %v10778_v54, %v10666_v38 }
 0x1a2   : > { %v10672_v58 = vadd.f32 %v10671_v56, %v10670_v52  ;;  %v10780_v63 = vpop.f32.mrf.mxu1 }
 0x1a3   : > { %v10673_v60 = vpop.f32.mrf.mxu0  ;;  %v10781_v1 = vadd.f32 %v10780_v63, %v10779_v57 }
 0x1a4   : > { %v10782_v4 = vpop.f32.mrf.mxu1 }
 0x1a5   : > { %v10674_v3 = vpop.f32.mrf.mxu0  ;;  %v12833_v6 = vadd.f32 %v10781_v1, %v10669_v50 }
 0x1a6   : > { %v10675_v5 = vadd.f32 %v10674_v3, %v10673_v60  ;;  %v10783_v10 = vpop.f32.mrf.mxu1  ;;  %v12015_v60 = vld [vmem:[#allocation11 + $0x58] sm:$0xff]  }
 0x1a7   : > { %v10676_v7 = vpop.f32.mrf.mxu0  ;;  %11569 = vmatmul.mubr.bf16.gmra.mxu0 %v11996_v62  ;;  %v10784_v11 = vadd.f32 %v10783_v10, %v10782_v4  ;;  %v12016_v62 = vld [vmem:[#allocation11 + $0x18] sm:$0xff]   ;;  %11080 = vmatprep.subr.bf16.mxu1 %v12015_v60 }
 0x1a8   : > { %11572 = vmatprep.mubr.bf16.mxu0 %v11997_v0  ;;  %v10785_v15 = vpop.f32.mrf.mxu1  ;;  %v12002_v4 = vld [vmem:[#allocation4 + $0x338] ss:$36 sps:$4 sm:$0xff]   ;;  %11081 = vmatpush3.bf16.msra.mxu1 %v12016_v62 }
 0x1a9   : > { %v10677_v12 = vpop.f32.mrf.mxu0  ;;  %v12835_v18 = vadd.f32 %v10784_v11, %v10672_v58 }
 0x1aa   : > { %v10678_v16 = vadd.f32 %v10677_v12, %v10676_v7  ;;  %v10786_v21 = vpop.f32.mrf.mxu1  ;;  %v12003_v7 = vld [vmem:[#allocation4 + $0x380] ss:$36 sps:$4 sm:$0xff]  }
 0x1ab   : > { %v10679_v19 = vpop.f32.mrf.mxu0  ;;  %v10787_v24 = vadd.f32 %v10786_v21, %v10785_v15 }
 0x1ac   : > { %v10788_v26 = vpop.f32.mrf.mxu1 }
 0x1ad   : > { %v10680_v25 = vpop.f32.mrf.mxu0  ;;  %v12837_v31 = vadd.f32 %v10787_v24, %v10675_v5 }
 0x1ae   : > { %v10681_v28 = vadd.f32 %v10680_v25, %v10679_v19  ;;  %v10789_v33 = vpop.f32.mrf.mxu1 }
 0x1af   : > { %v10682_v32 = vpop.f32.mrf.mxu0  ;;  %11573 = vmatmul.mubr.bf16.gmra.mxu0 %v11998_v20  ;;  %v10790_v34 = vadd.f32 %v10789_v33, %v10788_v26  ;;  %v12004_v26 = vld [vmem:[#allocation4 + $0x3c8] ss:$36 sps:$4 sm:$0xff]  }
 0x1b0   : > { %11576 = vmatprep.mubr.bf16.mxu0 %v11999_v23  ;;  %v10791_v36 = vpop.f32.mrf.mxu1 }
 0x1b1   : > { %v10683_v35 = vpop.f32.mrf.mxu0  ;;  %v12839_v41 = vadd.f32 %v10790_v34, %v10678_v16 }
 0x1b2   : > { %v10684_v38 = vadd.f32 %v10683_v35, %v10682_v32  ;;  %v10792_v45 = vpop.f32.mrf.mxu1  ;;  %v12005_v32 = vld [vmem:[#allocation4 + $0x410] ss:$36 sps:$4 sm:$0xff]  }
 0x1b3   : > { %v10685_v42 = vpop.f32.mrf.mxu0  ;;  %v10793_v47 = vadd.f32 %v10792_v45, %v10791_v36 }
 0x1b4   : > { %v10794_v50 = vpop.f32.mrf.mxu1 }
 0x1b5   : > { %v10686_v48 = vpop.f32.mrf.mxu0  ;;  %v12841_v53 = vadd.f32 %v10793_v47, %v10681_v28  ;;  %v12018_v47 = vld [vmem:[#allocation11 + $0x10] sm:$0xff]  }
 0x1b6   : > { %v10687_v52 = vadd.f32 %v10686_v48, %v10685_v42  ;;  %v10795_v56 = vpop.f32.mrf.mxu1 }
 0x1b7   : > { %v10688_v54 = vpop.f32.mrf.mxu0  ;;  %11577 = vmatmul.mubr.bf16.gmra.mxu0 %v12000_v44  ;;  %v10796_v57 = vadd.f32 %v10795_v56, %v10794_v50 }
 0x1b8   : > { %11580 = vmatprep.mubr.bf16.mxu0 %v12001_v46  ;;  %v10797_v63 = vpop.f32.mrf.mxu1  ;;  %v12017_v46 = vld [vmem:[#allocation11 + $0x50] sm:$0xff]  }
 0x1b9   : > { %v10689_v58 = vpop.f32.mrf.mxu0  ;;  %v12843_v1 = vadd.f32 %v10796_v57, %v10684_v38  ;;  %v12006_v57 = vld [vmem:[#allocation4 + $0x458] ss:$36 sps:$4 sm:$0xff]   ;;  %11082 = vmatprep.subr.bf16.mxu1 %v12017_v46 }
 0x1ba   : > { %v10690_v0 = vadd.f32 %v10689_v58, %v10688_v54  ;;  %v10798_v5 = vpop.f32.mrf.mxu1  ;;  %11083 = vmatpush3.bf16.msra.mxu1 %v12018_v47 }
 0x1bb   : > { %v10691_v3 = vpop.f32.mrf.mxu0  ;;  %v10799_v10 = vadd.f32 %v10798_v5, %v10797_v63 }
 0x1bc   : > { %v10800_v12 = vpop.f32.mrf.mxu1 }
 0x1bd   : > { %v10692_v11 = vpop.f32.mrf.mxu0  ;;  %v12845_v13 = vadd.f32 %v10799_v10, %v10687_v52 }
 0x1be   : > { %v10801_v15 = vpop.f32.mrf.mxu1  ;;  %v10693_v24 = vadd.f32 %v10692_v11, %v10691_v3 }
 0x1bf   : > { %v10694_v14 = vpop.f32.mrf.mxu0  ;;  %11581 = vmatmul.mubr.bf16.gmra.mxu0 %v12002_v4  ;;  %v10802_v16 = vadd.f32 %v10801_v15, %v10800_v12 }
 0x1c0   : > { %11584 = vmatprep.mubr.bf16.mxu0 %v12003_v7  ;;  %v10803_v20 = vpop.f32.mrf.mxu1 }
 0x1c1   : > { %v10695_v19 = vpop.f32.mrf.mxu0  ;;  %v12847_v23 = vadd.f32 %v10802_v16, %v10690_v0 }
 0x1c2   : > { %v10696_v21 = vadd.f32 %v10695_v19, %v10694_v14  ;;  %v10804_v28 = vpop.f32.mrf.mxu1 }
 0x1c3   : > { %v10697_v25 = vpop.f32.mrf.mxu0  ;;  %v10805_v33 = vadd.f32 %v10804_v28, %v10803_v20 }
 0x1c4   : > { %v10806_v35 = vpop.f32.mrf.mxu1 }
 0x1c5   : > { %v10698_v34 = vpop.f32.mrf.mxu0  ;;  %v12849_v36 = vadd.f32 %v10805_v33, %v10693_v24  ;;  %v12019_v33 = vld [vmem:[#allocation11 + $0x48] sm:$0xff]  }
 0x1c6   : > { %v10807_v42 = vpop.f32.mrf.mxu1  ;;  %v10699_v54 = vadd.f32 %v10698_v34, %v10697_v25  ;;  %v12020_v34 = vld [vmem:[#allocation11 + $0x8] sm:$0xff]   ;;  %11084 = vmatprep.subr.bf16.mxu1 %v12019_v33 }
 0x1c7   : > { %v10700_v38 = vpop.f32.mrf.mxu0  ;;  %11585 = vmatmul.mubr.bf16.gmra.mxu0 %v12004_v26  ;;  %v10808_v44 = vadd.f32 %v10807_v42, %v10806_v35  ;;  %11085 = vmatpush3.bf16.msra.mxu1 %v12020_v34 }
 0x1c8   : > { %11588 = vmatprep.mubr.bf16.mxu0 %v12005_v32  ;;  %v10809_v48 = vpop.f32.mrf.mxu1 }
 0x1c9   : > { %v10701_v45 = vpop.f32.mrf.mxu0  ;;  %v12851_v52 = vadd.f32 %v10808_v44, %v10696_v21 }
 0x1ca   : > { %v10702_v50 = vadd.f32 %v10701_v45, %v10700_v38  ;;  %v10810_v58 = vpop.f32.mrf.mxu1 }
 0x1cb   : > { %v10703_v56 = vpop.f32.mrf.mxu0  ;;  %v10811_v60 = vadd.f32 %v10810_v58, %v10809_v48 }
 0x1cc   : > { %v10812_v63 = vpop.f32.mrf.mxu1 }
 0x1cd   : > { %v10704_v62 = vpop.f32.mrf.mxu0  ;;  %v12853_v0 = vadd.f32 %v10811_v60, %v10699_v54  ;;  %v12021_v60 = vld [vmem:[#allocation11 + $0xf8] sm:$0xff]  }
 0x1ce   : > { %v10813_v4 = vpop.f32.mrf.mxu1  ;;  %v10705_v14 = vadd.f32 %v10704_v62, %v10703_v56  ;;  %11184 = vmatprep.subr.bf16.mxu0 %v12021_v60 }
 0x1cf   : > { %v10706_v3 = vpop.f32.mrf.mxu0  ;;  %11589 = vmatmul.mubr.bf16.gmra.mxu0 %v12006_v57  ;;  %v10814_v5 = vadd.f32 %v10813_v4, %v10812_v63 }
 0x1d0   : > { %v10815_v10 = vpop.f32.mrf.mxu1 }
 0x1d1   : > { %v10707_v7 = vpop.f32.mrf.mxu0  ;;  %v12855_v12 = vadd.f32 %v10814_v5, %v10702_v50 }
 0x1d2   : > { %v10708_v11 = vadd.f32 %v10707_v7, %v10706_v3  ;;  %v10816_v16 = vpop.f32.mrf.mxu1  ;;  %v12022_v3 = vld [vmem:[#allocation11 + $0xb8] sm:$0xff]  }
 0x1d3   : > { %v10709_v15 = vpop.f32.mrf.mxu0  ;;  %v10817_v19 = vadd.f32 %v10816_v16, %v10815_v10  ;;  %11185 = vmatpush3.bf16.msra.mxu0 %v12022_v3 }
 0x1d4   : > { %v10818_v21 = vpop.f32.mrf.mxu1 }
 0x1d5   : > { %v10710_v20 = vpop.f32.mrf.mxu0  ;;  %v12857_v24 = vadd.f32 %v10817_v19, %v10705_v14  ;;  %v12023_v14 = vld [vmem:[#allocation11 + $0xf0] sm:$0xff]  }
 0x1d6   : > { %v10819_v26 = vpop.f32.mrf.mxu1  ;;  %v10711_v44 = vadd.f32 %v10710_v20, %v10709_v15  ;;  %v12024_v19 = vld [vmem:[#allocation11 + $0xb0] sm:$0xff]   ;;  %11186 = vmatprep.subr.bf16.mxu0 %v12023_v14 }
 0x1d7   : > { %v10840_v25 = vpop.f32.mrf.mxu0  ;;  %v10820_v28 = vadd.f32 %v10819_v26, %v10818_v21  ;;  %11187 = vmatpush3.bf16.msra.mxu0 %v12024_v19  ;;  %v4659_v26 = vld [vmem:[#allocation3] sm:$0xff] }
 0x1d8   : > { %v10821_v35 = vpop.f32.mrf.mxu1 }
 0x1d9   : > { %v10841_v32 = vpop.f32.mrf.mxu0  ;;  %v12859_v42 = vadd.f32 %v10820_v28, %v10708_v11  ;;  %v4851_v28 = vld [vmem:[#allocation3 + $0x1] sm:$0xff] }
 0x1da   : > { %v10842_v38 = vadd.f32 %v10841_v32, %v10840_v25  ;;  %v10822_v46 = vpop.f32.mrf.mxu1  ;;  %v4852_v32 = vld [vmem:[#allocation3 + $0x9] sm:$0xff] }
 0x1db   : > { %14155 = vst [vmem:[#allocation16_spill] sm:$0xff] %v12859_v42  ;;  %v10843_v45 = vpop.f32.mrf.mxu0  ;;  %v10823_v48 = vadd.f32 %v10822_v46, %v10821_v35  ;;  %v12026_v35 = vld [vmem:[#allocation11 + $0xe8] sm:$0xff]   ;;  %v12056_v42 = vld [vmem:[#allocation11 + $0x170] sm:$0xff]  }
 0x1dc   : > { %v4068_v47 = vadd.f32 %v10842_v38, %v12799_v30  ;;  %v10952_v54 = vpop.f32.mrf.mxu1  ;;  %v10232_v38 = vpack.c.bf16 %v4659_v26, %v4659_v26  ;;  %11188 = vmatprep.subr.bf16.mxu0 %v12026_v35 }
 0x1dd   : > { %v10844_v50 = vpop.f32.mrf.mxu0  ;;  %v12862_v57 = vadd.f32 %v10823_v48, %v10711_v44  ;;  %v12288_v44 = vld [vmem:[#allocation2 + $0x8] sm:$0xff] }
 0x1de   : > { %v10845_v56 = vadd.f32 %v10844_v50, %v10843_v45  ;;  %v10953_v62 = vpop.f32.mrf.mxu1  ;;  %v10233_v45 = vpack.c.bf16 %v12288_v44, %v12288_v44  ;;  %v12028_v48 = vld [vmem:[#allocation11 + $0xa8] sm:$0xff]   ;;  %v10265_v50 = vpack.c.bf16 %v4852_v32, %v4852_v32  ;;  %4819 = vst [vmem:[#allocation5] sm:$0xf] %v10232_v38  ;;  %v12036_v44 = vld [vmem:[#allocation11 + $0xd0] sm:$0xff]  }
 0x1df   : > { %14156 = vst [vmem:[#allocation17_spill] sm:$0xff] %v12862_v57  ;;  %v10846_v58 = vpop.f32.mrf.mxu0  ;;  %v10954_v4 = vadd.f32 %v10953_v62, %v10952_v54  ;;  %11189 = vmatpush3.bf16.msra.mxu0 %v12028_v48  ;;  %v12029_v62 = vld [vmem:[#allocation11 + $0xe0] sm:$0xff]  }
 0x1e0   : > { %v4071_v63 = vadd.f32 %v10845_v56, %v12801_v37  ;;  %v10955_v7 = vpop.f32.mrf.mxu1  ;;  %4820 = vst [vmem:[#allocation5 + $0x24] sm:$0xf] %v10233_v45  ;;  %5012 = vst [vmem:[#allocation5 + $0x28] sm:$0xf] %v10265_v50  ;;  %11190 = vmatprep.subr.bf16.mxu0 %v12029_v62  ;;  %v5044_v48 = vld [vmem:[#allocation3 + $0xa] sm:$0xff] }
 0x1e1   : > { %v10847_v5 = vpop.f32.mrf.mxu0  ;;  %v12865_v11 = vadd.f32 %v10954_v4, %v4068_v47 }
 0x1e2   : > { %v10848_v10 = vadd.f32 %v10847_v5, %v10846_v58  ;;  %v10956_v15 = vpop.f32.mrf.mxu1  ;;  %v12025_v5 = vld [vmem:[#allocation11 + $0x40] sm:$0xff]  }
 0x1e3   : > { %v10849_v30 = vpop.f32.mrf.mxu0  ;;  %14157 = vst [vmem:[#allocation18_spill] sm:$0xff] %v12865_v11  ;;  %v10957_v20 = vadd.f32 %v10956_v15, %v10955_v7  ;;  %11086 = vmatprep.subr.bf16.mxu1 %v12025_v5  ;;  %v12031_v15 = vld [vmem:[#allocation11 + $0xd8] sm:$0xff]  }
 0x1e4   : > { %v12868_v16 = vadd.f32 %v10848_v10, %v12803_v49  ;;  %v12870_v37 = vpop.f32.mrf.mxu1  ;;  %v10264_v49 = vpack.c.bf16 %v4851_v28, %v4851_v28 }
 0x1e5   : > { %v10850_v21 = vpop.f32.mrf.mxu0  ;;  %v12872_v34 = vadd.f32 %v10957_v20, %v4071_v63 }
 0x1e6   : > { %v10851_v25 = vadd.f32 %v10850_v21, %v10849_v30  ;;  %v12874_v46 = vpop.f32.mrf.mxu1  ;;  %5011 = vst [vmem:[#allocation5 + $0x4] sm:$0xf] %v10264_v49  ;;  %v12027_v30 = vld [vmem:[#allocation11] sm:$0xff]   ;;  %v5043_v21 = vld [vmem:[#allocation3 + $0x2] sm:$0xff] }
 0x1e7   : > { %v10852_v33 = vpop.f32.mrf.mxu0  ;;  %14158 = vst [vmem:[#allocation19_spill] sm:$0xff] %v12872_v34  ;;  %11087 = vmatpush3.bf16.msra.mxu1 %v12027_v30  ;;  %v12033_v26 = vld [vmem:[#allocation5] ss:$36 sps:$4 sm:$0xff]   ;;  %v10296_v32 = vpack.c.bf16 %v5043_v21, %v5043_v21  ;;  %v12037_v49 = vld [vmem:[#allocation11 + $0x90] sm:$0xff]  }
 0x1e8   : > { %v12877_v47 = vadd.f32 %v10851_v25, %v12805_v55  ;;  %v12879_v56 = vpop.f32.mrf.mxu1  ;;  %v12030_v55 = vld [vmem:[#allocation11 + $0xa0] sm:$0xff]   ;;  %v12063_v34 = vld [vmem:[#allocation11 + $0x130] sm:$0xff]  }
 0x1e9   : > { %v10853_v54 = vpop.f32.mrf.mxu0  ;;  %11191 = vmatpush3.bf16.msra.mxu0 %v12030_v55  ;;  %5203 = vst [vmem:[#allocation5 + $0x8] sm:$0xf] %v10296_v32  ;;  %v12038_v55 = vld [vmem:[#allocation11 + $0xc8] sm:$0xff]  }
 0x1ea   : > { %v10854_v58 = vadd.f32 %v10853_v54, %v10852_v33  ;;  %v12881_v63 = vpop.f32.mrf.mxu1  ;;  %11192 = vmatprep.subr.bf16.mxu0 %v12031_v15  ;;  %v10297_v54 = vpack.c.bf16 %v5044_v48, %v5044_v48 }
 0x1eb   : > { %v10855_v60 = vpop.f32.mrf.mxu0 }
 0x1ec   : > { %v12884_v3 = vadd.f32 %v10854_v58, %v12807_v2  ;;  %v12886_v7 = vpop.f32.mrf.mxu1  ;;  %v12032_v2 = vld [vmem:[#allocation11 + $0x98] sm:$0xff]   ;;  %5204 = vst [vmem:[#allocation5 + $0x2c] sm:$0xf] %v10297_v54 }
 0x1ed   : > { %v10856_v4 = vpop.f32.mrf.mxu0  ;;  %v12035_v28 = vld [vmem:[#allocation5 + $0x4] ss:$36 sps:$4 sm:$0xff]   ;;  %11193 = vmatpush3.bf16.msra.mxu0 %v12032_v2 }
 0x1ee   : > { %v10857_v10 = vadd.f32 %v10856_v4, %v10855_v60  ;;  %v12888_v19 = vpop.f32.mrf.mxu1  ;;  %7892 = vmatprep.mubr.bf16.mxu1 %v12035_v28  ;;  %11194 = vmatprep.subr.bf16.mxu0 %v12036_v44  ;;  %v12042_v2 = vld [vmem:[#allocation11 + $0xc0] sm:$0xff]  }
 0x1ef   : > { %v10858_v14 = vpop.f32.mrf.mxu0  ;;  %7893 = vmatmul.mubr.bf16.vlgmr.msra.gmra.mxu1 %v12033_v26  ;;  %v12043_v26 = vld [vmem:[#allocation11 + $0x80] sm:$0xff]  }
 0x1f0   : > { %v12891_v20 = vadd.f32 %v10857_v10, %v12809_v9  ;;  %v12893_v33 = vpop.f32.mrf.mxu1 }
 0x1f1   : > { %v10859_v25 = vpop.f32.mrf.mxu0  ;;  %11195 = vmatpush3.bf16.msra.mxu0 %v12037_v49 }
 0x1f2   : > { %v10860_v35 = vadd.f32 %v10859_v25, %v10858_v14  ;;  %v12895_v45 = vpop.f32.mrf.mxu1  ;;  %11196 = vmatprep.subr.bf16.mxu0 %v12038_v55  ;;  %v12041_v55 = vld [vmem:[#allocation11 + $0x138] sm:$0xff]  }
 0x1f3   : > { %v10861_v38 = vpop.f32.mrf.mxu0 }
 0x1f4   : > { %v12898_v9 = vadd.f32 %v10860_v35, %v12811_v22  ;;  %v12900_v58 = vpop.f32.mrf.mxu1  ;;  %v12040_v22 = vld [vmem:[#allocation11 + $0x88] sm:$0xff]  }
 0x1f5   : > { %v10862_v50 = vpop.f32.mrf.mxu0  ;;  %11197 = vmatpush3.bf16.msra.mxu0 %v12040_v22 }
 0x1f6   : > { %v10863_v60 = vadd.f32 %v10862_v50, %v10861_v38  ;;  %v12902_v4 = vpop.f32.mrf.mxu1  ;;  %11198 = vmatprep.subr.bf16.mxu0 %v12042_v2 }
 0x1f7   : > { %v10864_v62 = vpop.f32.mrf.mxu0 }
 0x1f8   : > { %v12905_v5 = vadd.f32 %v10863_v60, %v12813_v29  ;;  %v12907_v30 = vpop.f32.mrf.mxu1 }
 0x1f9   : > { %v10865_v10 = vpop.f32.mrf.mxu0  ;;  %11199 = vmatpush3.bf16.msra.mxu0 %v12043_v26 }
 0x1fa   : > { %14159 = vst [vmem:[#allocation20_spill] sm:$0xff] %v12905_v5  ;;  %v10866_v14 = vadd.f32 %v10865_v10, %v10864_v62  ;;  %v12909_v21 = vpop.f32.mrf.mxu1  ;;  %v12039_v62 = vld [vmem:[#allocation11 + $0x178] sm:$0xff]  }
 0x1fb   : > { %v10867_v15 = vpop.f32.mrf.mxu0  ;;  %11296 = vmatprep.subr.bf16.mxu1 %v12039_v62 }
 0x1fc   : > { %v12912_v25 = vadd.f32 %v10866_v14, %v12815_v43  ;;  %v12914_v32 = vpop.f32.mrf.mxu1  ;;  %11297 = vmatpush3.bf16.msra.mxu1 %v12041_v55 }
 0x1fd   : > { %v10868_v28 = vpop.f32.mrf.mxu0  ;;  %11298 = vmatprep.subr.bf16.mxu1 %v12056_v42 }
 0x1fe   : > { %14160 = vst [vmem:[#allocation21_spill] sm:$0xff] %v12912_v25  ;;  %v10869_v29 = vadd.f32 %v10868_v28, %v10867_v15  ;;  %v12916_v38 = vpop.f32.mrf.mxu1 }
 0x1ff   : > { %v10870_v35 = vpop.f32.mrf.mxu0 }
 0x200   : > { %v12919_v44 = vadd.f32 %v10869_v29, %v12817_v40  ;;  %v12921_v48 = vpop.f32.mrf.mxu1  ;;  %11299 = vmatpush3.bf16.msra.mxu1 %v12063_v34 }
 0x201   : > { %v10871_v49 = vpop.f32.mrf.mxu0 }
 0x202   : > { %14161 = vst [vmem:[#allocation22_spill] sm:$0xff] %v12919_v44  ;;  %v10872_v50 = vadd.f32 %v10871_v49, %v10870_v35  ;;  %v12923_v43 = vpop.f32.mrf.mxu1 }
 0x203   : > { %v10873_v54 = vpop.f32.mrf.mxu0 }
 0x204   : > { %v12926_v60 = vadd.f32 %v10872_v50, %v12819_v61  ;;  %v12928_v10 = vpop.f32.mrf.mxu1 }
 0x205   : > { %v10874_v22 = vpop.f32.mrf.mxu0 }
 0x206   : > { %14162 = vst [vmem:[#allocation23_spill] sm:$0xff] %v12926_v60  ;;  %v10875_v14 = vadd.f32 %v10874_v22, %v10873_v54  ;;  %v12930_v40 = vpop.f32.mrf.mxu1 }
 0x207   : > { %v10876_v15 = vpop.f32.mrf.mxu0 }
 0x208   : > { %v12933_v2 = vadd.f32 %v10875_v14, %v12821_v8  ;;  %v12935_v28 = vpop.f32.mrf.mxu1 }
 0x209   : > { %v10877_v26 = vpop.f32.mrf.mxu0 }
 0x20a   : > { %14163 = vst [vmem:[#allocation24_spill] sm:$0xff] %v12933_v2  ;;  %v10878_v29 = vadd.f32 %v10877_v26, %v10876_v15  ;;  %v12937_v35 = vpop.f32.mrf.mxu1 }
 0x20b   : > { %v10879_v61 = vpop.f32.mrf.mxu0 }
 0x20c   : > { %v12940_v49 = vadd.f32 %v10878_v29, %v12823_v17  ;;  %v12942_v54 = vpop.f32.mrf.mxu1 }
 0x20d   : > { %v10880_v50 = vpop.f32.mrf.mxu0 }
 0x20e   : > { %14164 = vst [vmem:[#allocation25_spill] sm:$0xff] %v12940_v49  ;;  %v10881_v62 = vadd.f32 %v10880_v50, %v10879_v61  ;;  %v12944_v22 = vpop.f32.mrf.mxu1 }
 0x20f   : > { %v10882_v55 = vpop.f32.mrf.mxu0 }
 0x210   : > { %v12947_v8 = vadd.f32 %v10881_v62, %v12825_v27  ;;  %v12949_v57 = vpop.f32.mrf.mxu1 }
 0x211   : > { %v10883_v14 = vpop.f32.mrf.mxu0 }
 0x212   : > { %14165 = vst [vmem:[#allocation26_spill] sm:$0xff] %v12947_v8  ;;  %v10884_v15 = vadd.f32 %v10883_v14, %v10882_v55  ;;  %v12951_v11 = vpop.f32.mrf.mxu1 }
 0x213   : > { %v10885_v26 = vpop.f32.mrf.mxu0 }
 0x214   : > { %v12954_v17 = vadd.f32 %v10884_v15, %v12827_v39  ;;  %v12956_v61 = vpop.f32.mrf.mxu1 }
 0x215   : > { %v10886_v29 = vpop.f32.mrf.mxu0 }
 0x216   : > { %14166 = vst [vmem:[#allocation27_spill] sm:$0xff] %v12954_v17  ;;  %v10887_v50 = vadd.f32 %v10886_v29, %v10885_v26  ;;  %v12958_v62 = vpop.f32.mrf.mxu1 }
 0x217   : > { %v10888_v27 = vpop.f32.mrf.mxu0 }
 0x218   : > { %v12961_v8 = vadd.f32 %v10887_v50, %v12829_v51  ;;  %v12963_v14 = vpop.f32.mrf.mxu1 }
 0x219   : > { %v10889_v55 = vpop.f32.mrf.mxu0 }
 0x21a   : > { %14167 = vst [vmem:[#allocation28_spill] sm:$0xff] %v12961_v8  ;;  %v10890_v49 = vadd.f32 %v10889_v55, %v10888_v27  ;;  %v12965_v60 = vpop.f32.mrf.mxu1 }
 0x21b   : > { %v10891_v2 = vpop.f32.mrf.mxu0 }
 0x21c   : > { %v12968_v39 = vadd.f32 %v10890_v49, %v12831_v59  ;;  %v12970_v15 = vpop.f32.mrf.mxu1  ;;  %v12070_v49 = vld [vmem:[#allocation11 + $0x168] sm:$0xff]  }
 0x21d   : > { %v10892_v42 = vpop.f32.mrf.mxu0  ;;  %11300 = vmatprep.subr.bf16.mxu1 %v12070_v49 }
 0x21e   : > { %14168 = vst [vmem:[#allocation29_spill] sm:$0xff] %v12968_v39  ;;  %v10893_v34 = vadd.f32 %v10892_v42, %v10891_v2  ;;  %v12972_v29 = vpop.f32.mrf.mxu1  ;;  %v12077_v39 = vld [vmem:[#allocation11 + $0x128] sm:$0xff]  }
 0x21f   : > { %v10894_v26 = vpop.f32.mrf.mxu0  ;;  %11301 = vmatpush3.bf16.msra.mxu1 %v12077_v39 }
 0x220   : > { %v12975_v51 = vadd.f32 %v10893_v34, %v12833_v6  ;;  %v12977_v8 = vpop.f32.mrf.mxu1 }
 0x221   : > { %v10895_v50 = vpop.f32.mrf.mxu0 }
 0x222   : > { %14169 = vst [vmem:[#allocation30_spill] sm:$0xff] %v12975_v51  ;;  %v10896_v27 = vadd.f32 %v10895_v50, %v10894_v26  ;;  %v12979_v17 = vpop.f32.mrf.mxu1  ;;  %v12084_v50 = vld [vmem:[#allocation11 + $0x160] sm:$0xff]  }
 0x223   : > { %v10897_v55 = vpop.f32.mrf.mxu0  ;;  %v12091_v51 = vld [vmem:[#allocation11 + $0x120] sm:$0xff]   ;;  %11302 = vmatprep.subr.bf16.mxu1 %v12084_v50 }
 0x224   : > { %v12982_v59 = vadd.f32 %v10896_v27, %v12835_v18  ;;  %v12984_v2 = vpop.f32.mrf.mxu1  ;;  %11303 = vmatpush3.bf16.msra.mxu1 %v12091_v51 }
 0x225   : > { %v10898_v44 = vpop.f32.mrf.mxu0 }
 0x226   : > { %14170 = vst [vmem:[#allocation31_spill] sm:$0xff] %v12982_v59  ;;  %v10899_v42 = vadd.f32 %v10898_v44, %v10897_v55  ;;  %v12986_v6 = vpop.f32.mrf.mxu1 }
 0x227   : > { %v10900_v25 = vpop.f32.mrf.mxu0  ;;  %14171 = vst [vmem:[#allocation32_spill] sm:$0xff] %v12986_v6 }
 0x228   : > { %v12989_v34 = vadd.f32 %v10899_v42, %v12837_v31  ;;  %v12991_v5 = vpop.f32.mrf.mxu1  ;;  %v12098_v31 = vld [vmem:[#allocation11 + $0x1f8] sm:$0xff]  }
 0x229   : > { %v10901_v26 = vpop.f32.mrf.mxu0  ;;  %11408 = vmatprep.subr.bf16.mxu0 %v12098_v31 }
 0x22a   : > { %14172 = vst [vmem:[#allocation33_spill] sm:$0xff] %v12989_v34  ;;  %v10902_v18 = vadd.f32 %v10901_v26, %v10900_v25  ;;  %v12993_v59 = vpop.f32.mrf.mxu1 }
 0x22b   : > { %v10903_v27 = vpop.f32.mrf.mxu0  ;;  %14173 = vst [vmem:[#allocation34_spill] sm:$0xff] %v12993_v59 }
 0x22c   : > { %v12996_v44 = vadd.f32 %v10902_v18, %v12839_v41  ;;  %v12998_v55 = vpop.f32.mrf.mxu1 }
 0x22d   : > { %v10904_v39 = vpop.f32.mrf.mxu0  ;;  %14175 = vst [vmem:[#allocation36_spill] sm:$0xff] %v12998_v55 }
 0x22e   : > { %14174 = vst [vmem:[#allocation35_spill] sm:$0xff] %v12996_v44  ;;  %v10905_v49 = vadd.f32 %v10904_v39, %v10903_v27  ;;  %v13000_v34 = vpop.f32.mrf.mxu1  ;;  %v12100_v27 = vld [vmem:[#allocation11 + $0x158] sm:$0xff]  }
 0x22f   : > { %v10906_v42 = vpop.f32.mrf.mxu0  ;;  %14176 = vst [vmem:[#allocation37_spill] sm:$0xff] %v13000_v34  ;;  %v12107_v34 = vld [vmem:[#allocation11 + $0x118] sm:$0xff]   ;;  %11304 = vmatprep.subr.bf16.mxu1 %v12100_v27 }
 0x230   : > { %v13003_v6 = vadd.f32 %v10905_v49, %v12841_v53  ;;  %v13005_v26 = vpop.f32.mrf.mxu1  ;;  %11305 = vmatpush3.bf16.msra.mxu1 %v12107_v34 }
 0x231   : > { %v10907_v25 = vpop.f32.mrf.mxu0 }
 0x232   : > { %14177 = vst [vmem:[#allocation38_spill] sm:$0xff] %v13003_v6  ;;  %v10908_v50 = vadd.f32 %v10907_v25, %v10906_v42  ;;  %v13007_v41 = vpop.f32.mrf.mxu1 }
 0x233   : > { %v10909_v59 = vpop.f32.mrf.mxu0 }
 0x234   : > { %v13010_v51 = vadd.f32 %v10908_v50, %v12843_v1  ;;  %v13012_v39 = vpop.f32.mrf.mxu1 }
 0x235   : > { %v10910_v18 = vpop.f32.mrf.mxu0 }
 0x236   : > { %14178 = vst [vmem:[#allocation39_spill] sm:$0xff] %v13010_v51  ;;  %v10911_v44 = vadd.f32 %v10910_v18, %v10909_v59  ;;  %v13014_v53 = vpop.f32.mrf.mxu1 }
 0x237   : > { %v10912_v55 = vpop.f32.mrf.mxu0  ;;  %14179 = vst [vmem:[#allocation40_spill] sm:$0xff] %v13014_v53 }
 0x238   : > { %v13017_v49 = vadd.f32 %v10911_v44, %v12845_v13  ;;  %v13019_v42 = vpop.f32.mrf.mxu1 }
 0x239   : > { %v10913_v31 = vpop.f32.mrf.mxu0 }
 0x23a   : > { %14180 = vst [vmem:[#allocation41_spill] sm:$0xff] %v13017_v49  ;;  %v10914_v25 = vadd.f32 %v10913_v31, %v10912_v55  ;;  %v13021_v50 = vpop.f32.mrf.mxu1 }
 0x23b   : > { %v10915_v1 = vpop.f32.mrf.mxu0 }
 0x23c   : > { %v13024_v51 = vadd.f32 %v10914_v25, %v12847_v23  ;;  %v13026_v18 = vpop.f32.mrf.mxu1 }
 0x23d   : > { %v10916_v59 = vpop.f32.mrf.mxu0  ;;  %14182 = vst [vmem:[#allocation43_spill] sm:$0xff] %v13026_v18 }
 0x23e   : > { %14181 = vst [vmem:[#allocation42_spill] sm:$0xff] %v13024_v51  ;;  %v10917_v27 = vadd.f32 %v10916_v59, %v10915_v1  ;;  %v13028_v53 = vpop.f32.mrf.mxu1  ;;  %v12116_v51 = vld [vmem:[#allocation11 + $0x150] sm:$0xff]  }
 0x23f   : > { %v10918_v6 = vpop.f32.mrf.mxu0  ;;  %14183 = vst [vmem:[#allocation44_spill] sm:$0xff] %v13028_v53  ;;  %v12123_v59 = vld [vmem:[#allocation11 + $0x110] sm:$0xff]   ;;  %11306 = vmatprep.subr.bf16.mxu1 %v12116_v51  ;;  %v10960_v51 = vadd.f32 %v12874_v46, %v12870_v37  ;;  %v10975_v46 = vadd.f32 %v12909_v21, %v12907_v30  ;;  %v10993_v30 = vadd.f32 %v12951_v11, %v12949_v57 }
 0x240   : > { %v13031_v13 = vadd.f32 %v10917_v27, %v12849_v36  ;;  %v13033_v44 = vpop.f32.mrf.mxu1  ;;  %11307 = vmatpush3.bf16.msra.mxu1 %v12123_v59  ;;  %v10966_v59 = vadd.f32 %v12888_v19, %v12886_v7  ;;  %v10984_v19 = vadd.f32 %v12930_v40, %v12928_v10  ;;  %v10996_v21 = vadd.f32 %v12958_v62, %v12956_v61 }
 0x241   : > { %v10919_v34 = vpop.f32.mrf.mxu0  ;;  %v11005_v11 = vadd.f32 %v12979_v17, %v12977_v8  ;;  %v14192_v17 = vld [vmem:[#allocation24_spill] sm:$0xff] }
 0x242   : > { %14184 = vst [vmem:[#allocation45_spill] sm:$0xff] %v13031_v13  ;;  %v10920_v55 = vadd.f32 %v10919_v34, %v10918_v6  ;;  %v13035_v49 = vpop.f32.mrf.mxu1 }
 0x243   : > { %v10921_v31 = vpop.f32.mrf.mxu0 }
 0x244   : > { %v13038_v23 = vadd.f32 %v10920_v55, %v12851_v52  ;;  %v13040_v18 = vpop.f32.mrf.mxu1 }
 0x245   : > { %v10922_v25 = vpop.f32.mrf.mxu0 }
 0x246   : > { %14185 = vst [vmem:[#allocation46_spill] sm:$0xff] %v13038_v23  ;;  %v10923_v1 = vadd.f32 %v10922_v25, %v10921_v31  ;;  %v13042_v36 = vpop.f32.mrf.mxu1  ;;  %v10963_v25 = vadd.f32 %v12881_v63, %v12879_v56  ;;  %v10978_v56 = vadd.f32 %v12916_v38, %v12914_v32  ;;  %v10981_v63 = vadd.f32 %v12923_v43, %v12921_v48 }
 0x247   : > { %v10924_v53 = vpop.f32.mrf.mxu0  ;;  %v13096_v38 = vadd.f32 %v10966_v59, %v12884_v3  ;;  %v10999_v48 = vadd.f32 %v12965_v60, %v12963_v14  ;;  %v14186_v3 = vld [vmem:[#allocation20_spill] sm:$0xff]  ;;  %v14187_v60 = vld [vmem:[#allocation21_spill] sm:$0xff]  ;;  %v14191_v14 = vld [vmem:[#allocation23_spill] sm:$0xff] }
 0x248   : > { %v13045_v27 = vadd.f32 %v10923_v1, %v12853_v0  ;;  %v13047_v34 = vpop.f32.mrf.mxu1  ;;  %v13115_v40 = vadd.f32 %v10975_v46, %v14186_v3  ;;  %v13128_v8 = vadd.f32 %v10984_v19, %v14191_v14  ;;  %v14204_v14 = vld [vmem:[#allocation18_spill] sm:$0xff] }
 0x249   : > { %v10925_v6 = vpop.f32.mrf.mxu0 }
 0x24a   : > { %v10926_v13 = vadd.f32 %v10925_v6, %v10924_v53  ;;  %v13049_v55 = vpop.f32.mrf.mxu1  ;;  %v10969_v6 = vadd.f32 %v12895_v45, %v12893_v33  ;;  %v10987_v33 = vadd.f32 %v12937_v35, %v12935_v28  ;;  %v13118_v28 = vadd.f32 %v10978_v56, %v14187_v60  ;;  %v14188_v35 = vld [vmem:[#allocation22_spill] sm:$0xff]  ;;  %v14199_v60 = vld [vmem:[#allocation29_spill] sm:$0xff] }
 0x24b   : > { %v10927_v52 = vpop.f32.mrf.mxu0  ;;  %v11017_v56 = vadd.f32 %v13007_v41, %v13005_v26  ;;  %v13166_v26 = vld [vmem:[%s14130_s3] ss:$0 sm:$0xff] }
 0x24c   : > { %v13052_v23 = vadd.f32 %v10926_v13, %v12855_v12  ;;  %v13058_v0 = vpop.f32.mrf.mxu1  ;;  %v10972_v12 = vadd.f32 %v12902_v4, %v12900_v58  ;;  %v4240_v58 = vadd.f32 %v10963_v25, %v12877_v47  ;;  %v10990_v4 = vadd.f32 %v12944_v22, %v12942_v54  ;;  %v12132_v22 = vld [vmem:[#allocation11 + $0x148] sm:$0xff]  }
 0x24d   : > { %v10928_v31 = vpop.f32.mrf.mxu0  ;;  %v13108_v57 = vadd.f32 %v10969_v6, %v12891_v20  ;;  %v13121_v54 = vadd.f32 %v10981_v63, %v14188_v35  ;;  %v14190_v20 = vld [vmem:[#allocation34_spill] sm:$0xff]  ;;  %11308 = vmatprep.subr.bf16.mxu1 %v12132_v22  ;;  %v14202_v22 = vld [vmem:[#allocation44_spill] sm:$0xff] }
 0x24e   : > { %v10929_v1 = vadd.f32 %v10928_v31, %v10927_v52  ;;  %v13068_v13 = vpop.f32.mrf.mxu1  ;;  %v13105_v43 = vadd.f32 %v10972_v12, %v12898_v9  ;;  %v14189_v9 = vld [vmem:[#allocation32_spill] sm:$0xff]  ;;  %v11011_v62 = vadd.f32 %v14190_v20, %v12991_v5  ;;  %v14194_v31 = vld [vmem:[#allocation37_spill] sm:$0xff]  ;;  %v14197_v12 = vld [vmem:[#allocation26_spill] sm:$0xff] }
 0x24f   : > { %v13062_v53 = vpop.f32.mrf.mxu0  ;;  %v11008_v61 = vadd.f32 %v14189_v9, %v12984_v2  ;;  %v14193_v52 = vld [vmem:[#allocation36_spill] sm:$0xff]  ;;  %v14195_v2 = vld [vmem:[#allocation27_spill] sm:$0xff]  ;;  %v14196_v5 = vld [vmem:[#allocation25_spill] sm:$0xff]  ;;  %v13147_v46 = vadd.f32 %v10993_v30, %v14197_v12  ;;  %v11023_v30 = vadd.f32 %v13021_v50, %v13019_v42 }
 0x250   : > { %v13071_v37 = vadd.f32 %v10929_v1, %v12857_v24  ;;  %v13083_v45 = vpop.f32.mrf.mxu1  ;;  %v4237_v24 = vadd.f32 %v10960_v51, %v12868_v16  ;;  %v11002_v16 = vadd.f32 %v12972_v29, %v12970_v15  ;;  %v13131_v15 = vadd.f32 %v10987_v33, %v14192_v17  ;;  %v12139_v29 = vld [vmem:[#allocation11 + $0x108] sm:$0xff]   ;;  %v13138_v1 = vld [vmem:[%s14129_s2] ss:$0 sm:$0xff]  ;;  %v14201_v9 = vld [vmem:[#allocation43_spill] sm:$0xff] }
 0x251   : > { %v10931_v7 = vpop.f32.mrf.mxu0  ;;  %v11014_v51 = vadd.f32 %v14194_v31, %v14193_v52  ;;  %v13141_v59 = vadd.f32 %v10996_v21, %v14195_v2  ;;  %v13144_v6 = vadd.f32 %v10990_v4, %v14196_v5  ;;  %v14198_v33 = vld [vmem:[#allocation28_spill] sm:$0xff]  ;;  %11309 = vmatpush3.bf16.msra.mxu1 %v12139_v29  ;;  %v11026_v20 = vadd.f32 %v14202_v22, %v14201_v9  ;;  %v14206_v42 = vld [vmem:[#allocation33_spill] sm:$0xff]  ;;  %v14207_v2 = vld [vmem:[#allocation35_spill] sm:$0xff] }
 0x252   : > { %v13102_v47 = vpop.f32.mrf.mxu1  ;;  %v13152_v3 = vadd.f32 %v10999_v48, %v14198_v33  ;;  %v13155_v35 = vadd.f32 %v11002_v16, %v14199_v60  ;;  %v14200_v21 = vld [vmem:[#allocation40_spill] sm:$0xff]  ;;  %v13177_v50 = vadd.f32 %v11011_v62, %v14206_v42  ;;  %v11029_v52 = vadd.f32 %v13035_v49, %v13033_v44  ;;  %v14208_v33 = vld [vmem:[#allocation38_spill] sm:$0xff] }
 0x253   : > { %v13093_v32 = vpop.f32.mrf.mxu0  ;;  %v11020_v4 = vadd.f32 %v14200_v21, %v13012_v39  ;;  %v14205_v39 = vld [vmem:[#allocation31_spill] sm:$0xff]  ;;  %v11032_v31 = vadd.f32 %v13042_v36, %v13040_v18  ;;  %v13186_v5 = vadd.f32 %v11014_v51, %v14207_v2  ;;  %v13191_v60 = vadd.f32 %v11017_v56, %v14208_v33  ;;  %v14211_v51 = vld [vmem:[#allocation42_spill] sm:$0xff] }
 0x254   : > { %v11042_v63 = vpop.f32.mrf.mxu1  ;;  %v13174_v29 = vadd.f32 %v11008_v61, %v14205_v39  ;;  %v10932_v49 = vadd.f32 %v10931_v7, %v13062_v53  ;;  %v14209_v18 = vld [vmem:[#allocation39_spill] sm:$0xff]  ;;  %v13201_v21 = vadd.f32 %v11026_v20, %v14211_v51  ;;  %v11038_v53 = vadd.f32 %v13068_v13, %v13058_v0  ;;  %v14215_v13 = vld [vmem:[#allocation16_spill] sm:$0xff] }
 0x255   : > { %v13112_v10 = vpop.f32.mrf.mxu0  ;;  %v13195_v36 = vadd.f32 %v11020_v4, %v14209_v18  ;;  %v11041_v0 = vadd.f32 %v13102_v47, %v13083_v45 }
 0x256   : > { %v11043_v12 = vpop.f32.mrf.mxu1  ;;  %v10935_v33 = vadd.f32 %v13112_v10, %v13093_v32  ;;  %v12148_v10 = vld [vmem:[#allocation11 + $0x140] sm:$0xff]  }
 0x257   : > { %v11562_v25 = vpop.f32.mrf.mxu0  ;;  %v13235_v32 = vadd.f32 %v11041_v0, %v13071_v37  ;;  %11310 = vmatprep.subr.bf16.mxu1 %v12148_v10 }
 0x258   : > { %v4398_v19 = vadd.f32 %v11562_v25, %v4237_v24  ;;  %v14203_v24 = vld [vmem:[#allocation30_spill] sm:$0xff] }
 0x259   : > { %v4389_v41 = vpop.f32.mrf.mxu0  ;;  %v13169_v48 = vadd.f32 %v11005_v11, %v14203_v24  ;;  %v11035_v11 = vadd.f32 %v13049_v55, %v13047_v34  ;;  %v14210_v34 = vld [vmem:[#allocation41_spill] sm:$0xff]  ;;  %v14213_v24 = vld [vmem:[#allocation46_spill] sm:$0xff] }
 0x25a   : > { %v4525_v16 = vmul.f32 %v13138_v1, %v4398_v19  ;;  %v4390_v17 = vadd.f32 %v4389_v41, %v14204_v14  ;;  %v13198_v55 = vadd.f32 %v11023_v30, %v14210_v34  ;;  %v14212_v41 = vld [vmem:[#allocation19_spill] sm:$0xff]  ;;  %v13209_v4 = vadd.f32 %v11032_v31, %v14213_v24  ;;  %v11045_v14 = vpop.f32.mrf.mxu1 }
 0x25b   : > { %v11563_v25 = vpop.f32.mrf.mxu0  ;;  %v13212_v30 = vadd.f32 %v11035_v11, %v13045_v27  ;;  %v4188_v31 = vadd.f32 %v10932_v49, %v14215_v13 }
 0x25c   : > { %v4564_v61 = vadd.f32 %v13166_v26, %v4525_v16  ;;  %v4523_v19 = vmul.f32 %v13138_v1, %v4390_v17  ;;  %v4401_v62 = vadd.f32 %v11563_v25, %v4240_v58  ;;  %v14214_v16 = vld [vmem:[#allocation45_spill] sm:$0xff]  ;;  %v11046_v45 = vpop.f32.mrf.mxu1 }
 0x25d   : > { %v4392_v44 = vpop.f32.mrf.mxu0  ;;  %v13215_v20 = vadd.f32 %v11029_v52, %v14214_v16 }
 0x25e   : > { %v4596_v9 = vmax.f32 %v4564_v61, 0.0  ;;  %v4562_v22 = vadd.f32 %v13166_v26, %v4523_v19  ;;  %v4526_v58 = vmul.f32 %v13138_v1, %v4401_v62  ;;  %v4393_v56 = vadd.f32 %v4392_v44, %v14212_v41  ;;  %v14216_v41 = vld [vmem:[#allocation17_spill] sm:$0xff] }
 0x25f   : > { %v11566_v7 = vpop.f32.mrf.mxu0  ;;  %v11044_v62 = vadd.f32 %v11043_v12, %v11042_v63  ;;  %v13232_v63 = vadd.f32 %v11038_v53, %v13052_v23 }
 0x260   : > { %4629 = vst [vmem:[#allocation3 + $0x31] sm:$0xff] %v4596_v9  ;;  %v4594_v17 = vmax.f32 %v4562_v22, 0.0  ;;  %v4565_v39 = vadd.f32 %v13166_v26, %v4526_v58  ;;  %v4524_v42 = vmul.f32 %v13138_v1, %v4393_v56  ;;  %v4414_v25 = vadd.f32 %v11566_v7, %v13105_v43 }
 0x261   : > { %v4405_v2 = vpop.f32.mrf.mxu0  ;;  %v10268_v27 = vpack.c.bf16 %v4596_v9, %v4596_v9  ;;  %v4191_v56 = vadd.f32 %v10935_v33, %v14216_v41  ;;  %v11047_v7 = vadd.f32 %v11046_v45, %v11045_v14  ;;  %v13241_v37 = vadd.f32 %v11044_v62, %v4188_v31 }
 0x262   : > { %4627 = vst [vmem:[#allocation3 + $0x19] sm:$0xff] %v4594_v17  ;;  %v4597_v11 = vmax.f32 %v4565_v39, 0.0  ;;  %v4563_v52 = vadd.f32 %v13166_v26, %v4524_v42  ;;  %v4529_v61 = vmul.f32 %v13138_v1, %v4414_v25  ;;  %v4406_v19 = vadd.f32 %v4405_v2, %v13096_v38 }
 0x263   : > { %v11567_v43 = vpop.f32.mrf.mxu0  ;;  %v10266_v44 = vpack.c.bf16 %v4594_v17, %v4594_v17  ;;  %5015 = vst [vmem:[#allocation5 + $0x94] sm:$0xf] %v10268_v27  ;;  %5589 = vst [vmem:[#allocation5 + $0x58] sm:$0xf] %v10268_v27  ;;  %v13249_v33 = vadd.f32 %v11047_v7, %v4191_v56 }
 0x264   : > { %6164 = vst [vmem:[#allocation5 + $0x1c] sm:$0xf] %v10268_v27  ;;  %4630 = vst [vmem:[#allocation3 + $0x39] sm:$0xff] %v4597_v11  ;;  %v4595_v47 = vmax.f32 %v4563_v52, 0.0  ;;  %v4568_v49 = vadd.f32 %v13166_v26, %v4529_v61  ;;  %v4527_v18 = vmul.f32 %v13138_v1, %v4406_v19  ;;  %v4417_v34 = vadd.f32 %v11567_v43, %v13115_v40  ;;  %v12155_v40 = vld [vmem:[#allocation11 + $0x100] sm:$0xff]  }
 0x265   : > { %v4408_v51 = vpop.f32.mrf.mxu0  ;;  %5013 = vst [vmem:[#allocation5 + $0x4c] sm:$0xf] %v10266_v44  ;;  %v10269_v38 = vpack.c.bf16 %v4597_v11, %v4597_v11  ;;  %5587 = vst [vmem:[#allocation5 + $0x10] sm:$0xf] %v10266_v44  ;;  %11311 = vmatpush3.bf16.msra.mxu1 %v12155_v40 }
 0x266   : > { %4628 = vst [vmem:[#allocation3 + $0x21] sm:$0xff] %v4595_v47  ;;  %v4600_v12 = vmax.f32 %v4568_v49, 0.0  ;;  %v4566_v9 = vadd.f32 %v13166_v26, %v4527_v18  ;;  %v4530_v22 = vmul.f32 %v13138_v1, %v4417_v34  ;;  %v4409_v58 = vadd.f32 %v4408_v51, %v13108_v57 }
 0x267   : > { %v4663_v24 = vld [vmem:[#allocation3 + $0x30] sm:$0xff]  ;;  %v11570_v23 = vpop.f32.mrf.mxu0  ;;  %v10267_v53 = vpack.c.bf16 %v4595_v47, %v4595_v47  ;;  %5016 = vst [vmem:[#allocation5 + $0xb8] sm:$0xf] %v10269_v38  ;;  %5590 = vst [vmem:[#allocation5 + $0x7c] sm:$0xf] %v10269_v38 }
 0x268   : > { %6165 = vst [vmem:[#allocation5 + $0x40] sm:$0xf] %v10269_v38  ;;  %4633 = vst [vmem:[#allocation3 + $0x61] sm:$0xff] %v4600_v12  ;;  %v4598_v16 = vmax.f32 %v4566_v9, 0.0  ;;  %v4569_v17 = vadd.f32 %v13166_v26, %v4530_v22  ;;  %v4528_v39 = vmul.f32 %v13138_v1, %v4409_v58  ;;  %v4430_v57 = vadd.f32 %v11570_v23, %v13128_v8 }
 0x269   : > { %v4661_v42 = vld [vmem:[#allocation3 + $0x18] sm:$0xff]  ;;  %v4421_v14 = vpop.f32.mrf.mxu0  ;;  %5014 = vst [vmem:[#allocation5 + $0x70] sm:$0xf] %v10267_v53  ;;  %v10236_v25 = vpack.c.bf16 %v4663_v24, %v4663_v24  ;;  %v10272_v0 = vpack.c.bf16 %v4600_v12, %v4600_v12 }
 0x26a   : > { %4631 = vst [vmem:[#allocation3 + $0x49] sm:$0xff] %v4598_v16  ;;  %v4601_v13 = vmax.f32 %v4569_v17, 0.0  ;;  %v4567_v31 = vadd.f32 %v13166_v26, %v4528_v39  ;;  %v4533_v2 = vmul.f32 %v13138_v1, %v4430_v57  ;;  %v4422_v27 = vadd.f32 %v4421_v14, %v13118_v28 }
 0x26b   : > { %v4664_v11 = vld [vmem:[#allocation3 + $0x38] sm:$0xff]  ;;  %v11571_v19 = vpop.f32.mrf.mxu0  ;;  %v10234_v62 = vpack.c.bf16 %v4661_v42, %v4661_v42  ;;  %4823 = vst [vmem:[#allocation5 + $0x90] sm:$0xf] %v10236_v25  ;;  %5397 = vst [vmem:[#allocation5 + $0x54] sm:$0xf] %v10236_v25  ;;  %v10270_v8 = vpack.c.bf16 %v4598_v16, %v4598_v16 }
 0x26c   : > { %v5047_v52 = vld [vmem:[#allocation3 + $0x32] sm:$0xff]  ;;  %v5048_v61 = vld [vmem:[#allocation3 + $0x3a] sm:$0xff]  ;;  %5019 = vst [vmem:[#allocation5 + $0x124] sm:$0xf] %v10272_v0  ;;  %5972 = vst [vmem:[#allocation5 + $0x18] sm:$0xf] %v10236_v25  ;;  %v4572_v44 = vadd.f32 %v13166_v26, %v4533_v2  ;;  %v4531_v28 = vmul.f32 %v13138_v1, %v4422_v27  ;;  %v4433_v45 = vadd.f32 %v11571_v19, %v13131_v15 }
 0x26d   : > { %5593 = vst [vmem:[#allocation5 + $0xe8] sm:$0xf] %v10272_v0  ;;  %6168 = vst [vmem:[#allocation5 + $0xac] sm:$0xf] %v10272_v0  ;;  %v4599_v43 = vmax.f32 %v4567_v31, 0.0  ;;  %v4424_v47 = vpop.f32.mrf.mxu0  ;;  %v4662_v49 = vld [vmem:[#allocation3 + $0x20] sm:$0xff]  ;;  %v13254_v18 = vpack.c.bf16 %v4664_v11, %v4664_v11  ;;  %v13256_v38 = vpack.c.bf16 %v5047_v52, %v5047_v52  ;;  %v13258_v10 = vpack.c.bf16 %v5048_v61, %v5048_v61 }
 0x26e   : > { %4634 = vst [vmem:[#allocation3 + $0x69] sm:$0xff] %v4601_v13  ;;  %4821 = vst [vmem:[#allocation5 + $0x48] sm:$0xf] %v10234_v62  ;;  %v5045_v34 = vld [vmem:[#allocation3 + $0x1a] sm:$0xff]  ;;  %v5046_v51 = vld [vmem:[#allocation3 + $0x22] sm:$0xff]  ;;  %v13260_v12 = vpack.c.bf16 %v4601_v13, %v4601_v13  ;;  %v4604_v9 = vmax.f32 %v4572_v44, 0.0  ;;  %v4570_v15 = vadd.f32 %v13166_v26, %v4531_v28  ;;  %v4534_v22 = vmul.f32 %v13138_v1, %v4433_v45 }
 0x26f   : > { %5395 = vst [vmem:[#allocation5 + $0xc] sm:$0xf] %v10234_v62  ;;  %5017 = vst [vmem:[#allocation5 + $0xdc] sm:$0xf] %v10270_v8  ;;  %v4425_v58 = vadd.f32 %v4424_v47, %v13121_v54  ;;  %v5428_v40 = vld [vmem:[#allocation3 + $0x21] sm:$0xff]  ;;  %v11574_v7 = vpop.f32.mrf.mxu0  ;;  %v10235_v24 = vpack.c.bf16 %v4662_v49, %v4662_v49  ;;  %v10298_v23 = vpack.c.bf16 %v5045_v34, %v5045_v34 }
 0x270   : > { %5591 = vst [vmem:[#allocation5 + $0xa0] sm:$0xf] %v10270_v8  ;;  %6166 = vst [vmem:[#allocation5 + $0x64] sm:$0xf] %v10270_v8  ;;  %v5619_v41 = vld [vmem:[#allocation3 + $0x1a] sm:$0xff]  ;;  %v10299_v53 = vpack.c.bf16 %v5046_v51, %v5046_v51  ;;  %v10271_v16 = vpack.c.bf16 %v4599_v43, %v4599_v43  ;;  %v4602_v54 = vmax.f32 %v4570_v15, 0.0  ;;  %v4573_v17 = vadd.f32 %v13166_v26, %v4534_v22 }
 0x271   : > { %4632 = vst [vmem:[#allocation3 + $0x51] sm:$0xff] %v4599_v43  ;;  %v4667_v56 = vld [vmem:[#allocation3 + $0x60] sm:$0xff]  ;;  %4824 = vst [vmem:[#allocation5 + $0xb4] sm:$0xf] %v13254_v18  ;;  %v4532_v39 = vmul.f32 %v13138_v1, %v4425_v58  ;;  %v4446_v57 = vadd.f32 %v11574_v7, %v13141_v59  ;;  %v4665_v14 = vld [vmem:[#allocation3 + $0x48] sm:$0xff]  ;;  %v4437_v25 = vpop.f32.mrf.mxu0  ;;  %v13275_v13 = vpack.c.bf16 %v4604_v9, %v4604_v9 }
 0x272   : > { %5398 = vst [vmem:[#allocation5 + $0x78] sm:$0xf] %v13254_v18  ;;  %5207 = vst [vmem:[#allocation5 + $0x98] sm:$0xf] %v13256_v38  ;;  %v5620_v42 = vld [vmem:[#allocation3 + $0x22] sm:$0xff]  ;;  %v13273_v0 = vpack.c.bf16 %v4667_v56, %v4667_v56  ;;  %v10361_v31 = vpack.c.bf16 %v5428_v40, %v5428_v40  ;;  %v10392_v2 = vpack.c.bf16 %v5619_v41, %v5619_v41  ;;  %v4605_v27 = vmax.f32 %v4573_v17, 0.0 }
 0x273   : > { %5208 = vst [vmem:[#allocation5 + $0xbc] sm:$0xf] %v13258_v10  ;;  %5020 = vst [vmem:[#allocation5 + $0x148] sm:$0xf] %v13260_v12  ;;  %v4571_v11 = vadd.f32 %v13166_v26, %v4532_v39  ;;  %v4537_v59 = vmul.f32 %v13138_v1, %v4446_v57  ;;  %v4438_v52 = vadd.f32 %v4437_v25, %v13144_v6  ;;  %v11575_v8 = vpop.f32.mrf.mxu0  ;;  %v12052_v25 = vld [vmem:[#allocation5 + $0x94] ss:$36 sps:$4 sm:$0xff]  }
 0x274   : > { %4637 = vst [vmem:[#allocation3 + $0x91] sm:$0xff] %v4604_v9  ;;  %4822 = vst [vmem:[#allocation5 + $0x6c] sm:$0xf] %v10235_v24  ;;  %v13280_v43 = vpack.c.bf16 %v4665_v14, %v4665_v14  ;;  %v13284_v44 = vpack.c.bf16 %v4602_v54, %v4602_v54  ;;  %v10393_v28 = vpack.c.bf16 %v5620_v42, %v5620_v42  ;;  %v12046_v14 = vld [vmem:[#allocation5 + $0x4c] ss:$36 sps:$4 sm:$0xff]  }
 0x275   : > { %5396 = vst [vmem:[#allocation5 + $0x30] sm:$0xf] %v10235_v24  ;;  %5205 = vst [vmem:[#allocation5 + $0x50] sm:$0xf] %v10298_v23  ;;  %v4668_v61 = vld [vmem:[#allocation3 + $0x68] sm:$0xff]  ;;  %v4603_v45 = vmax.f32 %v4571_v11, 0.0  ;;  %v4576_v6 = vadd.f32 %v13166_v26, %v4537_v59  ;;  %v4535_v47 = vmul.f32 %v13138_v1, %v4438_v52  ;;  %v4449_v49 = vadd.f32 %v11575_v8, %v13152_v3  ;;  %v4440_v9 = vpop.f32.mrf.mxu0 }
 0x276   : > { %5206 = vst [vmem:[#allocation5 + $0x74] sm:$0xf] %v10299_v53  ;;  %5018 = vst [vmem:[#allocation5 + $0x100] sm:$0xf] %v10271_v16  ;;  %v5051_v19 = vld [vmem:[#allocation3 + $0x62] sm:$0xff]  ;;  %v5052_v62 = vld [vmem:[#allocation3 + $0x6a] sm:$0xff]  ;;  %v13292_v22 = vpack.c.bf16 %v4668_v61, %v4668_v61  ;;  %v13299_v41 = vpack.c.bf16 %v4605_v27, %v4605_v27  ;;  %v4441_v16 = vadd.f32 %v4440_v9, %v13147_v46  ;;  %7900 = vmatprep.mubr.bf16.mxu1 %v12046_v14 }
 0x277   : > { %4635 = vst [vmem:[#allocation3 + $0x79] sm:$0xff] %v4602_v54  ;;  %4827 = vst [vmem:[#allocation5 + $0x120] sm:$0xf] %v13273_v0  ;;  %v13295_v58 = vpack.c.bf16 %v5051_v19, %v5051_v19  ;;  %v13297_v40 = vpack.c.bf16 %v5052_v62, %v5052_v62  ;;  %v4608_v7 = vmax.f32 %v4576_v6, 0.0  ;;  %v4574_v24 = vadd.f32 %v13166_v26, %v4535_v47  ;;  %v11578_v54 = vpop.f32.mrf.mxu0  ;;  %v12047_v19 = vld [vmem:[#allocation5 + $0x8] ss:$36 sps:$4 sm:$0xff]  }
 0x278   : > { %5401 = vst [vmem:[#allocation5 + $0xe4] sm:$0xf] %v13273_v0  ;;  %5023 = vst [vmem:[#allocation5 + $0x1b4] sm:$0xf] %v13275_v13  ;;  %v6198_v34 = vld [vmem:[#allocation3 + $0x4a] sm:$0xff]  ;;  %v6199_v51 = vld [vmem:[#allocation3 + $0x52] sm:$0xff]  ;;  %v4538_v53 = vmul.f32 %v13138_v1, %v4449_v49  ;;  %v10275_v39 = vpack.c.bf16 %v4603_v45, %v4603_v45  ;;  %v4462_v46 = vadd.f32 %v11578_v54, %v13174_v29 }
 0x279   : > { %5588 = vst [vmem:[#allocation5 + $0x34] sm:$0xf] %v10361_v31  ;;  %5779 = vst [vmem:[#allocation5 + $0x14] sm:$0xf] %v10392_v2  ;;  %v4666_v15 = vld [vmem:[#allocation3 + $0x50] sm:$0xff]  ;;  %v10490_v3 = vpack.c.bf16 %v6198_v34, %v6198_v34  ;;  %v10491_v56 = vpack.c.bf16 %v6199_v51, %v6199_v51  ;;  %v4606_v57 = vmax.f32 %v4574_v24, 0.0  ;;  %v13313_v2 = vpack.c.bf16 %v4608_v7, %v4608_v7  ;;  %v4453_v61 = vpop.f32.mrf.mxu0 }
 0x27a   : > { %4638 = vst [vmem:[#allocation3 + $0x99] sm:$0xff] %v4605_v27  ;;  %4825 = vst [vmem:[#allocation5 + $0xd8] sm:$0xf] %v13280_v43  ;;  %v10239_v17 = vpack.c.bf16 %v4666_v15, %v4666_v15  ;;  %v12099_v27 = vld [vmem:[#allocation11 + $0x1b8] sm:$0xff]   ;;  %v4577_v59 = vadd.f32 %v13166_v26, %v4538_v53  ;;  %v4536_v52 = vmul.f32 %v13138_v1, %v4441_v16  ;;  %v12114_v29 = vld [vmem:[#allocation11 + $0x1f0] sm:$0xff]  }
 0x27b   : > { %5399 = vst [vmem:[#allocation5 + $0x9c] sm:$0xf] %v13280_v43  ;;  %5021 = vst [vmem:[#allocation5 + $0x16c] sm:$0xf] %v13284_v44  ;;  %v4671_v23 = vld [vmem:[#allocation3 + $0x90] sm:$0xff]  ;;  %v4541_v62 = vmul.f32 %v13138_v1, %v4462_v46  ;;  %v4454_v8 = vadd.f32 %v4453_v61, %v13155_v35  ;;  %v13323_v6 = vpack.c.bf16 %v4606_v57, %v4606_v57  ;;  %v11579_v15 = vpop.f32.mrf.mxu0  ;;  %v12131_v61 = vld [vmem:[#allocation11 + $0x1a8] sm:$0xff]  }
 0x27c   : > { %5780 = vst [vmem:[#allocation5 + $0x38] sm:$0xf] %v10393_v28  ;;  %5781 = vst [vmem:[#allocation5 + $0x5c] sm:$0xf] %v13256_v38  ;;  %v12167_v38 = vld [vmem:[#allocation11 + $0x238] sm:$0xff]   ;;  %v13311_v31 = vpack.c.bf16 %v4671_v23, %v4671_v23  ;;  %v4609_v51 = vmax.f32 %v4577_v59, 0.0  ;;  %v4575_v9 = vadd.f32 %v13166_v26, %v4536_v52 }
 0x27d   : > { %4636 = vst [vmem:[#allocation3 + $0x81] sm:$0xff] %v4603_v45  ;;  %4828 = vst [vmem:[#allocation5 + $0x144] sm:$0xf] %v13292_v22  ;;  %v12044_v42 = vld [vmem:[#allocation5 + $0x48] ss:$36 sps:$4 sm:$0xff]   ;;  %11592 = vmatprep.subr.bf16.mxu1 %v12167_v38  ;;  %v4580_v35 = vadd.f32 %v13166_v26, %v4541_v62 }
 0x27e   : > { %5402 = vst [vmem:[#allocation5 + $0x108] sm:$0xf] %v13292_v22  ;;  %5211 = vst [vmem:[#allocation5 + $0x128] sm:$0xf] %v13295_v58  ;;  %v4669_v11 = vld [vmem:[#allocation3 + $0x78] sm:$0xff]  ;;  %7901 = vmatmul.mubr.bf16.gmra.mxu1 %v12044_v42 }
 0x27f   : > { %5212 = vst [vmem:[#allocation5 + $0x14c] sm:$0xf] %v13297_v40  ;;  %5024 = vst [vmem:[#allocation5 + $0x1d8] sm:$0xf] %v13299_v41  ;;  %v12049_v28 = vld [vmem:[#allocation5 + $0xc] ss:$36 sps:$4 sm:$0xff]   ;;  %v13319_v45 = vpack.c.bf16 %v4669_v11, %v4669_v11  ;;  %7908 = vmatprep.mubr.bf16.mxu1 %v12052_v25 }
 0x280   : > { %6358 = vst [vmem:[#allocation5 + $0x68] sm:$0xf] %v10490_v3  ;;  %6359 = vst [vmem:[#allocation5 + $0x8c] sm:$0xf] %v10491_v56  ;;  %8053 = vmatprep.mubr.bf16.mxu0 %v12049_v28 }
 0x281   : > { %4641 = vst [vmem:[#allocation3 + $0xc1] sm:$0xff] %v4608_v7  ;;  %5209 = vst [vmem:[#allocation5 + $0xe0] sm:$0xf] %v10490_v3  ;;  %v4672_v47 = vld [vmem:[#allocation3 + $0x98] sm:$0xff]  ;;  %v4539_v3 = vmul.f32 %v13138_v1, %v4454_v8  ;;  %v12055_v7 = vld [vmem:[#allocation5 + $0x54] ss:$36 sps:$4 sm:$0xff]   ;;  %8054 = vmatmul.mubr.bf16.vlgmr.msra.gmra.mxu0 %v12047_v19 }
 0x282   : > { %5210 = vst [vmem:[#allocation5 + $0x104] sm:$0xf] %v10491_v56  ;;  %4826 = vst [vmem:[#allocation5 + $0xfc] sm:$0xf] %v10239_v17  ;;  %v5055_v49 = vld [vmem:[#allocation3 + $0x92] sm:$0xff]  ;;  %v5056_v34 = vld [vmem:[#allocation3 + $0x9a] sm:$0xff]  ;;  %v4465_v56 = vadd.f32 %v11579_v15, %v13177_v50  ;;  %v13335_v53 = vpack.c.bf16 %v4672_v47, %v4672_v47  ;;  %8061 = vmatprep.mubr.bf16.mxu0 %v12055_v7  ;;  %11409 = vmatpush3.bf16.msra.mxu0 %v12099_v27 }
 0x283   : > { %5400 = vst [vmem:[#allocation5 + $0xc0] sm:$0xf] %v10239_v17  ;;  %5022 = vst [vmem:[#allocation5 + $0x190] sm:$0xf] %v10275_v39  ;;  %v13337_v16 = vpack.c.bf16 %v5055_v49, %v5055_v49  ;;  %v13339_v54 = vpack.c.bf16 %v5056_v34, %v5056_v34  ;;  %v4612_v39 = vmax.f32 %v4580_v35, 0.0  ;;  %v4578_v38 = vadd.f32 %v13166_v26, %v4539_v3  ;;  %v12130_v27 = vld [vmem:[#allocation11 + $0x1e8] sm:$0xff]  }
 0x284   : > { %4639 = vst [vmem:[#allocation3 + $0xa9] sm:$0xff] %v4606_v57  ;;  %4831 = vst [vmem:[#allocation5 + $0x1b0] sm:$0xf] %v13311_v31  ;;  %v6202_v24 = vld [vmem:[#allocation3 + $0x7a] sm:$0xff]  ;;  %v6203_v23 = vld [vmem:[#allocation3 + $0x82] sm:$0xff]  ;;  %v4542_v42 = vmul.f32 %v13138_v1, %v4465_v56  ;;  %11410 = vmatprep.subr.bf16.mxu0 %v12114_v29 }
 0x285   : > { %5405 = vst [vmem:[#allocation5 + $0x174] sm:$0xf] %v13311_v31  ;;  %5027 = vst [vmem:[#allocation5 + $0x244] sm:$0xf] %v13313_v2  ;;  %v10494_v50 = vpack.c.bf16 %v6202_v24, %v6202_v24  ;;  %v10495_v17 = vpack.c.bf16 %v6203_v23, %v6203_v23  ;;  %v12115_v57 = vld [vmem:[#allocation11 + $0x1b0] sm:$0xff]   ;;  %v4610_v11 = vmax.f32 %v4578_v38, 0.0  ;;  %v13356_v52 = vpack.c.bf16 %v4612_v39, %v4612_v39 }
 0x286   : > { %5782 = vst [vmem:[#allocation5 + $0x80] sm:$0xf] %v13258_v10  ;;  %5973 = vst [vmem:[#allocation5 + $0x3c] sm:$0xf] %v13254_v18  ;;  %v4607_v10 = vmax.f32 %v4575_v9, 0.0  ;;  %v4456_v18 = vpop.f32.mrf.mxu0  ;;  %v4581_v62 = vadd.f32 %v13166_v26, %v4542_v42  ;;  %v13361_v29 = vld [vmem:[#allocation11 + $0x1e0] sm:$0xff]   ;;  %11411 = vmatpush3.bf16.msra.mxu0 %v12115_v57 }
 0x287   : > { %4829 = vst [vmem:[#allocation5 + $0x168] sm:$0xf] %v13319_v45  ;;  %5403 = vst [vmem:[#allocation5 + $0x12c] sm:$0xf] %v13319_v45  ;;  %v4457_v14 = vadd.f32 %v4456_v18, %v13169_v48  ;;  %v12050_v8 = vld [vmem:[#allocation5 + $0x90] ss:$36 sps:$4 sm:$0xff]   ;;  %v13369_v15 = vpack.c.bf16 %v4610_v11, %v4610_v11  ;;  %11412 = vmatprep.subr.bf16.mxu0 %v12130_v27 }
 0x288   : > { %5025 = vst [vmem:[#allocation5 + $0x1fc] sm:$0xf] %v13323_v6  ;;  %4642 = vst [vmem:[#allocation3 + $0xc9] sm:$0xff] %v4609_v51  ;;  %v4675_v46 = vld [vmem:[#allocation3 + $0xc0] sm:$0xff]  ;;  %v11582_v25 = vpop.f32.mrf.mxu0  ;;  %v13372_v35 = vmax.f32 %v4581_v62, 0.0  ;;  %7909 = vmatmul.mubr.bf16.gmra.mxu1 %v12050_v8 }
 0x289   : > { %5974 = vst [vmem:[#allocation5 + $0x60] sm:$0xf] %v13280_v43  ;;  %5594 = vst [vmem:[#allocation5 + $0x10c] sm:$0xf] %v13260_v12  ;;  %v13351_v43 = vpack.c.bf16 %v4609_v51, %v4609_v51  ;;  %v4478_v48 = vadd.f32 %v11582_v25, %v13195_v36  ;;  %v13354_v59 = vpack.c.bf16 %v4675_v46, %v4675_v46  ;;  %v12053_v49 = vld [vmem:[#allocation5 + $0x50] ss:$36 sps:$4 sm:$0xff]  }
 0x28a   : > { %6169 = vst [vmem:[#allocation5 + $0xd0] sm:$0xf] %v13260_v12  ;;  %4640 = vst [vmem:[#allocation3 + $0xb1] sm:$0xff] %v4607_v10  ;;  %v10279_v12 = vpack.c.bf16 %v4607_v10, %v4607_v10  ;;  %v4540_v28 = vmul.f32 %v13138_v1, %v4457_v14  ;;  %v4469_v47 = vpop.f32.mrf.mxu0  ;;  %v12059_v51 = vld [vmem:[#allocation5 + $0xdc] ss:$36 sps:$4 sm:$0xff]   ;;  %8062 = vmatmul.mubr.bf16.gmra.mxu0 %v12053_v49  ;;  %v5053_v57 = vld [vmem:[#allocation3 + $0x7a] sm:$0xff] }
 0x28b   : > { %4832 = vst [vmem:[#allocation5 + $0x1d4] sm:$0xf] %v13335_v53  ;;  %5406 = vst [vmem:[#allocation5 + $0x198] sm:$0xf] %v13335_v53  ;;  %v4673_v19 = vld [vmem:[#allocation3 + $0xa8] sm:$0xff]  ;;  %v4545_v36 = vmul.f32 %v13138_v1, %v4478_v48  ;;  %v4470_v34 = vadd.f32 %v4469_v47, %v13186_v5  ;;  %v4670_v5 = vld [vmem:[#allocation3 + $0x80] sm:$0xff]  ;;  %7916 = vmatprep.mubr.bf16.mxu1 %v12059_v51  ;;  %11413 = vmatpush3.bf16.msra.mxu0 %v12131_v61 }
 0x28c   : > { %5215 = vst [vmem:[#allocation5 + $0x1b8] sm:$0xf] %v13337_v16  ;;  %5216 = vst [vmem:[#allocation5 + $0x1dc] sm:$0xf] %v13339_v54  ;;  %v13365_v9 = vpack.c.bf16 %v4673_v19, %v4673_v19  ;;  %v4579_v3 = vadd.f32 %v13166_v26, %v4540_v28  ;;  %v11583_v56 = vpop.f32.mrf.mxu0  ;;  %v12062_v7 = vld [vmem:[#allocation5 + $0x9c] ss:$36 sps:$4 sm:$0xff]   ;;  %11414 = vmatprep.subr.bf16.mxu0 %v13361_v29 }
 0x28d   : > { %6362 = vst [vmem:[#allocation5 + $0xf8] sm:$0xf] %v10494_v50  ;;  %6363 = vst [vmem:[#allocation5 + $0x11c] sm:$0xf] %v10495_v17  ;;  %v4584_v18 = vadd.f32 %v13166_v26, %v4545_v36  ;;  %v4543_v50 = vmul.f32 %v13138_v1, %v4470_v34  ;;  %v4481_v17 = vadd.f32 %v11583_v56, %v13198_v55  ;;  %8069 = vmatprep.mubr.bf16.mxu0 %v12062_v7  ;;  %v12066_v51 = vld [vmem:[#allocation5 + $0x124] ss:$36 sps:$4 sm:$0xff]  }
 0x28e   : > { %4645 = vst [vmem:[#allocation3 + $0xf1] sm:$0xff] %v4612_v39  ;;  %5026 = vst [vmem:[#allocation5 + $0x220] sm:$0xf] %v10279_v12  ;;  %v10243_v39 = vpack.c.bf16 %v4670_v5, %v4670_v5  ;;  %v4472_v38 = vpop.f32.mrf.mxu0  ;;  %v12163_v7 = vld [vmem:[#allocation11 + $0x198] sm:$0xff]  }
 0x28f   : > { %5028 = vst [vmem:[#allocation5 + $0x268] sm:$0xf] %v13351_v43  ;;  %4643 = vst [vmem:[#allocation3 + $0xd9] sm:$0xff] %v4610_v11  ;;  %v4676_v24 = vld [vmem:[#allocation3 + $0xc8] sm:$0xff]  ;;  %v4616_v12 = vmax.f32 %v4584_v18, 0.0  ;;  %v4582_v27 = vadd.f32 %v13166_v26, %v4543_v50  ;;  %v4546_v11 = vmul.f32 %v13138_v1, %v4481_v17  ;;  %v4473_v48 = vadd.f32 %v4472_v38, %v13191_v60 }
 0x290   : > { %4835 = vst [vmem:[#allocation5 + $0x240] sm:$0xf] %v13354_v59  ;;  %5409 = vst [vmem:[#allocation5 + $0x204] sm:$0xf] %v13354_v59  ;;  %v5059_v23 = vld [vmem:[#allocation3 + $0xc2] sm:$0xff]  ;;  %v5060_v10 = vld [vmem:[#allocation3 + $0xca] sm:$0xff]  ;;  %v13386_v46 = vpack.c.bf16 %v4676_v24, %v4676_v24  ;;  %v11586_v28 = vpop.f32.mrf.mxu0  ;;  %v13409_v18 = vpack.c.bf16 %v13372_v35, %v13372_v35 }
 0x291   : > { %5031 = vst [vmem:[#allocation5 + $0x2d4] sm:$0xf] %v13356_v52  ;;  %5785 = vst [vmem:[#allocation5 + $0xec] sm:$0xf] %v13295_v58  ;;  %v13383_v58 = vld [vmem:[#allocation11 + $0x1a0] sm:$0xff]   ;;  %v13388_v42 = vpack.c.bf16 %v5059_v23, %v5059_v23  ;;  %v13390_v55 = vpack.c.bf16 %v5060_v10, %v5060_v10  ;;  %v12156_v60 = vld [vmem:[#allocation11 + $0x1d8] sm:$0xff]   ;;  %v4585_v49 = vadd.f32 %v13166_v26, %v4546_v11 }
 0x292   : > { %5786 = vst [vmem:[#allocation5 + $0x110] sm:$0xf] %v13297_v40  ;;  %4833 = vst [vmem:[#allocation5 + $0x1f8] sm:$0xf] %v13365_v9  ;;  %v4611_v40 = vmax.f32 %v4579_v3, 0.0  ;;  %v6206_v14 = vld [vmem:[#allocation3 + $0xaa] sm:$0xff]  ;;  %v4544_v36 = vmul.f32 %v13138_v1, %v4473_v48  ;;  %v4494_v34 = vadd.f32 %v11586_v28, %v13209_v4  ;;  %v4485_v24 = vpop.f32.mrf.mxu0  ;;  %11415 = vmatpush3.bf16.msra.mxu0 %v13383_v58 }
 0x293   : > { %5407 = vst [vmem:[#allocation5 + $0x1bc] sm:$0xf] %v13365_v9  ;;  %5029 = vst [vmem:[#allocation5 + $0x28c] sm:$0xf] %v13369_v15  ;;  %v6207_v25 = vld [vmem:[#allocation3 + $0xb2] sm:$0xff]  ;;  %v10498_v19 = vpack.c.bf16 %v6206_v14, %v6206_v14  ;;  %v4614_v61 = vmax.f32 %v4582_v27, 0.0  ;;  %v4486_v38 = vadd.f32 %v4485_v24, %v13201_v21  ;;  %v13422_v27 = vpack.c.bf16 %v4616_v12, %v4616_v12 }
 0x294   : > { %4646 = vst [vmem:[#allocation3 + $0xf9] sm:$0xff] %v13372_v35  ;;  %5976 = vst [vmem:[#allocation5 + $0xa8] sm:$0xf] %v13273_v0  ;;  %v10499_v62 = vpack.c.bf16 %v6207_v25, %v6207_v25  ;;  %v12057_v0 = vld [vmem:[#allocation5 + $0xd8] ss:$36 sps:$4 sm:$0xff]   ;;  %v10283_v47 = vpack.c.bf16 %v4611_v40, %v4611_v40  ;;  %v4674_v56 = vld [vmem:[#allocation3 + $0xb0] sm:$0xff]  ;;  %v11587_v14 = vpop.f32.mrf.mxu0  ;;  %11416 = vmatprep.subr.bf16.mxu0 %v12156_v60 }
 0x295   : > { %5977 = vst [vmem:[#allocation5 + $0xcc] sm:$0xf] %v13292_v22  ;;  %4830 = vst [vmem:[#allocation5 + $0x18c] sm:$0xf] %v10243_v39  ;;  %v4679_v8 = vld [vmem:[#allocation3 + $0xf0] sm:$0xff]  ;;  %v10306_v22 = vpack.c.bf16 %v5053_v57, %v5053_v57  ;;  %v5054_v3 = vld [vmem:[#allocation3 + $0x82] sm:$0xff]  ;;  %v10247_v29 = vpack.c.bf16 %v4674_v56, %v4674_v56  ;;  %7917 = vmatmul.mubr.bf16.gmra.mxu1 %v12057_v0  ;;  %v13420_v25 = vpack.c.bf16 %v4614_v61, %v4614_v61 }
 0x296   : > { %5404 = vst [vmem:[#allocation5 + $0x150] sm:$0xf] %v10243_v39  ;;  %4644 = vst [vmem:[#allocation3 + $0xe1] sm:$0xff] %v4611_v40  ;;  %v4677_v5 = vld [vmem:[#allocation3 + $0xd8] sm:$0xff]  ;;  %v10307_v23 = vpack.c.bf16 %v5054_v3, %v5054_v3  ;;  %v13405_v10 = vpack.c.bf16 %v4679_v8, %v4679_v8  ;;  %v12164_v4 = vld [vmem:[#allocation11 + $0x1d0] sm:$0xff]   ;;  %v4617_v50 = vmax.f32 %v4585_v49, 0.0  ;;  %v4583_v39 = vadd.f32 %v13166_v26, %v4544_v36  ;;  %v4488_v0 = vpop.f32.mrf.mxu0 }
 0x297   : > { %4836 = vst [vmem:[#allocation5 + $0x264] sm:$0xf] %v13386_v46  ;;  %5410 = vst [vmem:[#allocation5 + $0x228] sm:$0xf] %v13386_v46  ;;  %v12060_v17 = vld [vmem:[#allocation5 + $0x98] ss:$36 sps:$4 sm:$0xff]   ;;  %v4549_v40 = vmul.f32 %v13138_v1, %v4494_v34  ;;  %v13415_v35 = vpack.c.bf16 %v4677_v5, %v4677_v5  ;;  %v4497_v8 = vadd.f32 %v11587_v14, %v13212_v30  ;;  %7924 = vmatprep.mubr.bf16.mxu1 %v12066_v51 }
 0x298   : > { %5219 = vst [vmem:[#allocation5 + $0x248] sm:$0xf] %v13388_v42  ;;  %5220 = vst [vmem:[#allocation5 + $0x26c] sm:$0xf] %v13390_v55  ;;  %v12069_v57 = vld [vmem:[#allocation5 + $0xe4] ss:$36 sps:$4 sm:$0xff]   ;;  %8070 = vmatmul.mubr.bf16.gmra.mxu0 %v12060_v17  ;;  %v4489_v51 = vadd.f32 %v4488_v0, %v13215_v20  ;;  %v11590_v24 = vpop.f32.mrf.mxu0 }
 0x299   : > { %4649 = vst [vmem:[#allocation3 + $0x121] sm:$0xff] %v4616_v12  ;;  %6366 = vst [vmem:[#allocation5 + $0x188] sm:$0xf] %v10498_v19  ;;  %v4615_v48 = vmax.f32 %v4583_v39, 0.0  ;;  %v12165_v30 = vld [vmem:[#allocation11 + $0x190] sm:$0xff]   ;;  %v4550_v34 = vmul.f32 %v13138_v1, %v4497_v8  ;;  %8077 = vmatprep.mubr.bf16.mxu0 %v12069_v57  ;;  %11417 = vmatpush3.bf16.msra.mxu0 %v12163_v7  ;;  %v4510_v17 = vadd.f32 %v11590_v24, %v13241_v37 }
 0x29a   : > { %6367 = vst [vmem:[#allocation5 + $0x1ac] sm:$0xf] %v10499_v62  ;;  %5213 = vst [vmem:[#allocation5 + $0x170] sm:$0xf] %v10306_v22  ;;  %11418 = vmatprep.subr.bf16.mxu0 %v12164_v4  ;;  %v13450_v20 = vld [vmem:[%s14130_s3] ss:$0 sm:$0xff] }
 0x29b   : > { %5217 = vst [vmem:[#allocation5 + $0x200] sm:$0xf] %v10498_v19  ;;  %5218 = vst [vmem:[#allocation5 + $0x224] sm:$0xf] %v10499_v62  ;;  %v4680_v21 = vld [vmem:[#allocation3 + $0xf8] sm:$0xff]  ;;  %v4588_v19 = vadd.f32 %v13166_v26, %v4549_v40  ;;  %v4547_v62 = vmul.f32 %v13138_v1, %v4486_v38  ;;  %v4589_v7 = vadd.f32 %v13450_v20, %v4550_v34  ;;  %v4501_v40 = vpop.f32.mrf.mxu0 }
 0x29c   : > { %5030 = vst [vmem:[#allocation5 + $0x2b0] sm:$0xf] %v10283_v47  ;;  %4647 = vst [vmem:[#allocation3 + $0x109] sm:$0xff] %v4614_v61  ;;  %v5063_v58 = vld [vmem:[#allocation3 + $0xf2] sm:$0xff]  ;;  %v5064_v11 = vld [vmem:[#allocation3 + $0xfa] sm:$0xff]  ;;  %v13429_v12 = vpack.c.bf16 %v4680_v21, %v4680_v21  ;;  %v13436_v47 = vpack.c.bf16 %v4617_v50, %v4617_v50 }
 0x29d   : > { %5214 = vst [vmem:[#allocation5 + $0x194] sm:$0xf] %v10307_v23  ;;  %4834 = vst [vmem:[#allocation5 + $0x21c] sm:$0xf] %v10247_v29  ;;  %v13432_v28 = vpack.c.bf16 %v5063_v58, %v5063_v58  ;;  %v13434_v22 = vpack.c.bf16 %v5064_v11, %v5064_v11  ;;  %v6210_v60 = vld [vmem:[#allocation3 + $0xda] sm:$0xff]  ;;  %v6211_v61 = vld [vmem:[#allocation3 + $0xe2] sm:$0xff]  ;;  %v4586_v36 = vadd.f32 %v13166_v26, %v4547_v62  ;;  %11419 = vmatpush3.bf16.msra.mxu0 %v12165_v30  ;;  %v11591_v0 = vpop.f32.mrf.mxu0 }
 0x29e   : > { %5408 = vst [vmem:[#allocation5 + $0x1e0] sm:$0xf] %v10247_v29  ;;  %4839 = vst [vmem:[#allocation5 + $0x2d0] sm:$0xf] %v13405_v10  ;;  %v4620_v49 = vmax.f32 %v4588_v19, 0.0  ;;  %v10502_v3 = vpack.c.bf16 %v6210_v60, %v6210_v60  ;;  %v10503_v56 = vpack.c.bf16 %v6211_v61, %v6211_v61  ;;  %v10287_v23 = vpack.c.bf16 %v4615_v48, %v4615_v48  ;;  %v12166_v1 = vld [vmem:[#allocation11 + $0x1c8] sm:$0xff]  }
 0x29f   : > { %5032 = vst [vmem:[#allocation5 + $0x2f8] sm:$0xf] %v13409_v18  ;;  %5413 = vst [vmem:[#allocation5 + $0x294] sm:$0xf] %v13405_v10  ;;  %v4618_v26 = vmax.f32 %v4586_v36, 0.0  ;;  %v4621_v14 = vmax.f32 %v4589_v7, 0.0  ;;  %v4502_v11 = vadd.f32 %v4501_v40, %v13232_v63  ;;  %11420 = vmatprep.subr.bf16.mxu0 %v12166_v1 }
 0x2a0   : > { %4650 = vst [vmem:[#allocation3 + $0x129] sm:$0xff] %v4617_v50  ;;  %4837 = vst [vmem:[#allocation5 + $0x288] sm:$0xf] %v13415_v35  ;;  %v4683_v5 = vld [vmem:[#allocation3 + $0x120] sm:$0xff]  ;;  %v13456_v29 = vld [vmem:[%s14129_s2] ss:$0 sm:$0xff]  ;;  %v13462_v57 = vpack.c.bf16 %v4620_v49, %v4620_v49 }
 0x2a1   : > { %5411 = vst [vmem:[#allocation5 + $0x24c] sm:$0xf] %v13415_v35  ;;  %5033 = vst [vmem:[#allocation5 + $0x31c] sm:$0xf] %v13420_v25  ;;  %v4548_v50 = vmul.f32 %v13456_v29, %v4489_v51  ;;  %v12064_v39 = vld [vmem:[#allocation5 + $0x120] ss:$36 sps:$4 sm:$0xff]   ;;  %v13460_v38 = vpack.c.bf16 %v4683_v5, %v4683_v5  ;;  %v4553_v58 = vmul.f32 %v13456_v29, %v4510_v17 }
 0x2a2   : > { %5035 = vst [vmem:[#allocation5 + $0x364] sm:$0xf] %v13422_v27  ;;  %4648 = vst [vmem:[#allocation3 + $0x111] sm:$0xff] %v4615_v48  ;;  %v12067_v21 = vld [vmem:[#allocation5 + $0xe0] ss:$36 sps:$4 sm:$0xff]   ;;  %7925 = vmatmul.mubr.bf16.gmra.mxu1 %v12064_v39  ;;  %v4551_v61 = vmul.f32 %v13456_v29, %v4502_v11  ;;  %v13491_v5 = vpack.c.bf16 %v4621_v14, %v4621_v14  ;;  %v4678_v39 = vld [vmem:[#allocation3 + $0xe0] sm:$0xff] }
 0x2a3   : > { %4840 = vst [vmem:[#allocation5 + $0x2f4] sm:$0xf] %v13429_v12  ;;  %5414 = vst [vmem:[#allocation5 + $0x2b8] sm:$0xf] %v13429_v12  ;;  %v4681_v4 = vld [vmem:[#allocation3 + $0x108] sm:$0xff]  ;;  %v4587_v37 = vadd.f32 %v13450_v20, %v4548_v50  ;;  %v4592_v30 = vadd.f32 %v13450_v20, %v4553_v58  ;;  %8078 = vmatmul.mubr.bf16.gmra.mxu0 %v12067_v21 }
 0x2a4   : > { %5223 = vst [vmem:[#allocation5 + $0x2d8] sm:$0xf] %v13432_v28  ;;  %5224 = vst [vmem:[#allocation5 + $0x2fc] sm:$0xf] %v13434_v22  ;;  %v12073_v48 = vld [vmem:[#allocation5 + $0x16c] ss:$36 sps:$4 sm:$0xff]   ;;  %v13469_v60 = vpack.c.bf16 %v4681_v4, %v4681_v4  ;;  %v4590_v1 = vadd.f32 %v13450_v20, %v4551_v61 }
 0x2a5   : > { %5036 = vst [vmem:[#allocation5 + $0x388] sm:$0xf] %v13436_v47  ;;  %4653 = vst [vmem:[#allocation3 + $0x151] sm:$0xff] %v4620_v49  ;;  %v4619_v63 = vmax.f32 %v4587_v37, 0.0  ;;  %v4513_v49 = vadd.f32 %v11591_v0, %v13249_v33  ;;  %7932 = vmatprep.mubr.bf16.mxu1 %v12073_v48  ;;  %v12076_v36 = vld [vmem:[#allocation5 + $0x12c] ss:$36 sps:$4 sm:$0xff]   ;;  %v10251_v37 = vpack.c.bf16 %v4678_v39, %v4678_v39 }
 0x2a6   : > { %6370 = vst [vmem:[#allocation5 + $0x218] sm:$0xf] %v10502_v3  ;;  %6371 = vst [vmem:[#allocation5 + $0x23c] sm:$0xf] %v10503_v56  ;;  %8085 = vmatprep.mubr.bf16.mxu0 %v12076_v36  ;;  %v12071_v50 = vld [vmem:[#allocation5 + $0x168] ss:$36 sps:$4 sm:$0xff]  }
 0x2a7   : > { %5221 = vst [vmem:[#allocation5 + $0x290] sm:$0xf] %v10502_v3  ;;  %5222 = vst [vmem:[#allocation5 + $0x2b4] sm:$0xf] %v10503_v56  ;;  %v4684_v19 = vld [vmem:[#allocation3 + $0x128] sm:$0xff]  ;;  %v4504_v3 = vpop.f32.mrf.mxu0  ;;  %v4554_v7 = vmul.f32 %v13456_v29, %v4513_v49  ;;  %v10291_v4 = vpack.c.bf16 %v4619_v63, %v4619_v63 }
 0x2a8   : > { %5034 = vst [vmem:[#allocation5 + $0x340] sm:$0xf] %v10287_v23  ;;  %5595 = vst [vmem:[#allocation5 + $0x130] sm:$0xf] %v13284_v44  ;;  %v5067_v62 = vld [vmem:[#allocation3 + $0x122] sm:$0xff]  ;;  %v5068_v8 = vld [vmem:[#allocation3 + $0x12a] sm:$0xff]  ;;  %v4505_v17 = vadd.f32 %v4504_v3, %v13235_v32 }
 0x2a9   : > { %6170 = vst [vmem:[#allocation5 + $0xf4] sm:$0xf] %v13284_v44  ;;  %4651 = vst [vmem:[#allocation3 + $0x139] sm:$0xff] %v4618_v26  ;;  %v13473_v44 = vpack.c.bf16 %v4618_v26, %v4618_v26  ;;  %v6214_v34 = vld [vmem:[#allocation3 + $0x10a] sm:$0xff]  ;;  %v6215_v51 = vld [vmem:[#allocation3 + $0x112] sm:$0xff]  ;;  %v13489_v56 = vpack.c.bf16 %v5068_v8, %v5068_v8  ;;  %v13495_v23 = vmax.f32 %v4592_v30, 0.0 }
 0x2aa   : > { %4843 = vst [vmem:[#allocation5 + $0x360] sm:$0xf] %v13460_v38  ;;  %5417 = vst [vmem:[#allocation5 + $0x324] sm:$0xf] %v13460_v38  ;;  %v10506_v33 = vpack.c.bf16 %v6214_v34, %v6214_v34  ;;  %v10507_v24 = vpack.c.bf16 %v6215_v51, %v6215_v51  ;;  %v4552_v21 = vmul.f32 %v13456_v29, %v4505_v17  ;;  %v12074_v58 = vld [vmem:[#allocation5 + $0x128] ss:$36 sps:$4 sm:$0xff]   ;;  %7933 = vmatmul.mubr.bf16.gmra.mxu1 %v12071_v50 }
 0x2ab   : > { %5039 = vst [vmem:[#allocation5 + $0x3f4] sm:$0xf] %v13462_v57  ;;  %5978 = vst [vmem:[#allocation5 + $0xf0] sm:$0xf] %v13319_v45  ;;  %v13484_v45 = vpack.c.bf16 %v4684_v19, %v4684_v19  ;;  %v12080_v11 = vld [vmem:[#allocation5 + $0x1b4] ss:$36 sps:$4 sm:$0xff]   ;;  %8086 = vmatmul.mubr.bf16.gmra.mxu0 %v12074_v58 }
 0x2ac   : > { %5597 = vst [vmem:[#allocation5 + $0x178] sm:$0xf] %v13275_v13  ;;  %6172 = vst [vmem:[#allocation5 + $0x13c] sm:$0xf] %v13275_v13  ;;  %v13487_v13 = vpack.c.bf16 %v5067_v62, %v5067_v62  ;;  %v4687_v26 = vld [vmem:[#allocation3 + $0x150] sm:$0xff]  ;;  %7940 = vmatprep.mubr.bf16.mxu1 %v12080_v11  ;;  %v12296_v50 = vld [vmem:[#allocation3 + $0x9a] sm:$0xff] }
 0x2ad   : > { %4654 = vst [vmem:[#allocation3 + $0x159] sm:$0xff] %v4621_v14  ;;  %4841 = vst [vmem:[#allocation5 + $0x318] sm:$0xf] %v13469_v60  ;;  %v13506_v32 = vpack.c.bf16 %v4687_v26, %v4687_v26  ;;  %v4593_v14 = vadd.f32 %v13450_v20, %v4554_v7  ;;  %v4682_v49 = vld [vmem:[#allocation3 + $0x110] sm:$0xff]  ;;  %v12078_v51 = vld [vmem:[#allocation5 + $0x1b0] ss:$36 sps:$4 sm:$0xff]   ;;  %v10497_v17 = vpack.c.bf16 %v12296_v50, %v12296_v50 }
 0x2ae   : > { %5415 = vst [vmem:[#allocation5 + $0x2dc] sm:$0xf] %v13469_v60  ;;  %5037 = vst [vmem:[#allocation5 + $0x3ac] sm:$0xf] %v13473_v44  ;;  %v12291_v3 = vld [vmem:[#allocation3 + $0x32] sm:$0xff] }
 0x2af   : > { %5598 = vst [vmem:[#allocation5 + $0x19c] sm:$0xf] %v13299_v41  ;;  %6173 = vst [vmem:[#allocation5 + $0x160] sm:$0xf] %v13299_v41  ;;  %v4622_v41 = vmax.f32 %v4590_v1, 0.0  ;;  %v13519_v0 = vmax.f32 %v4593_v14, 0.0 }
 0x2b0   : > { %4652 = vst [vmem:[#allocation3 + $0x141] sm:$0xff] %v4619_v63  ;;  %4844 = vst [vmem:[#allocation5 + $0x384] sm:$0xf] %v13484_v45  ;;  %v4685_v40 = vld [vmem:[#allocation3 + $0x138] sm:$0xff]  ;;  %v12083_v63 = vld [vmem:[#allocation5 + $0x174] ss:$36 sps:$4 sm:$0xff]  }
 0x2b1   : > { %5418 = vst [vmem:[#allocation5 + $0x348] sm:$0xf] %v13484_v45  ;;  %5227 = vst [vmem:[#allocation5 + $0x368] sm:$0xf] %v13487_v13  ;;  %v13511_v48 = vpack.c.bf16 %v4685_v40, %v4685_v40  ;;  %v13515_v19 = vpack.c.bf16 %v4622_v41, %v4622_v41  ;;  %8093 = vmatprep.mubr.bf16.mxu0 %v12083_v63  ;;  %v12295_v26 = vld [vmem:[#allocation3 + $0x92] sm:$0xff] }
 0x2b2   : > { %5228 = vst [vmem:[#allocation5 + $0x38c] sm:$0xf] %v13489_v56  ;;  %5040 = vst [vmem:[#allocation5 + $0x418] sm:$0xf] %v13491_v5  ;;  %7941 = vmatmul.mubr.bf16.gmra.mxu1 %v12078_v51  ;;  %v10496_v7 = vpack.c.bf16 %v12295_v26, %v12295_v26  ;;  %v12171_v14 = vld [vmem:[#allocation11 + $0x188] sm:$0xff]   ;;  %v5639_v26 = vld [vmem:[#allocation3 + $0x10a] sm:$0xff] }
 0x2b3   : > { %6374 = vst [vmem:[#allocation5 + $0x2a8] sm:$0xf] %v10506_v33  ;;  %6375 = vst [vmem:[#allocation5 + $0x2cc] sm:$0xf] %v10507_v24  ;;  %11421 = vmatpush3.bf16.msra.mxu0 %v12171_v14  ;;  %v12092_v58 = vld [vmem:[#allocation5 + $0x240] ss:$36 sps:$4 sm:$0xff]  }
 0x2b4   : > { %4657 = vst [vmem:[#allocation3 + $0x181] sm:$0xff] %v13495_v23  ;;  %5225 = vst [vmem:[#allocation5 + $0x320] sm:$0xf] %v10506_v33  ;;  %v4688_v29 = vld [vmem:[#allocation3 + $0x158] sm:$0xff]  ;;  %v12293_v33 = vld [vmem:[#allocation3 + $0x62] sm:$0xff] }
 0x2b5   : > { %5226 = vst [vmem:[#allocation5 + $0x344] sm:$0xf] %v10507_v24  ;;  %5038 = vst [vmem:[#allocation5 + $0x3d0] sm:$0xf] %v10291_v4  ;;  %v5071_v62 = vld [vmem:[#allocation3 + $0x152] sm:$0xff]  ;;  %v5072_v8 = vld [vmem:[#allocation3 + $0x15a] sm:$0xff]  ;;  %v10492_v24 = vpack.c.bf16 %v12293_v33, %v12293_v33 }
 0x2b6   : > { %5789 = vst [vmem:[#allocation5 + $0x17c] sm:$0xf] %v13337_v16  ;;  %4655 = vst [vmem:[#allocation3 + $0x169] sm:$0xff] %v4622_v41  ;;  %v4591_v16 = vadd.f32 %v13450_v20, %v4552_v21  ;;  %v13530_v30 = vpack.c.bf16 %v5072_v8, %v5072_v8  ;;  %v12094_v4 = vld [vmem:[#allocation5 + $0x244] ss:$36 sps:$4 sm:$0xff]  }
 0x2b7   : > { %4847 = vst [vmem:[#allocation5 + $0x3f0] sm:$0xf] %v13506_v32  ;;  %5421 = vst [vmem:[#allocation5 + $0x3b4] sm:$0xf] %v13506_v32  ;;  %v6219_v20 = vld [vmem:[#allocation3 + $0x142] sm:$0xff]  ;;  %v12175_v21 = vld [vmem:[#allocation11 + $0x1c0] sm:$0xff]  }
 0x2b8   : > { %5790 = vst [vmem:[#allocation5 + $0x1a0] sm:$0xf] %v13339_v54  ;;  %5980 = vst [vmem:[#allocation5 + $0x138] sm:$0xf] %v13311_v31  ;;  %v13525_v54 = vpack.c.bf16 %v4688_v29, %v4688_v29  ;;  %v13528_v31 = vpack.c.bf16 %v5071_v62, %v5071_v62  ;;  %v4623_v61 = vmax.f32 %v4591_v16, 0.0  ;;  %v10511_v34 = vpack.c.bf16 %v6219_v20, %v6219_v20  ;;  %v5623_v29 = vld [vmem:[#allocation3 + $0x4a] sm:$0xff] }
 0x2b9   : > { %4838 = vst [vmem:[#allocation5 + $0x2ac] sm:$0xf] %v10251_v37  ;;  %5412 = vst [vmem:[#allocation5 + $0x270] sm:$0xf] %v10251_v37  ;;  %v12088_v41 = vld [vmem:[#allocation5 + $0x1b8] ss:$36 sps:$4 sm:$0xff]   ;;  %11422 = vmatprep.subr.bf16.mxu0 %v12175_v21 }
 0x2ba   : > { %5981 = vst [vmem:[#allocation5 + $0x15c] sm:$0xf] %v13335_v53  ;;  %4845 = vst [vmem:[#allocation5 + $0x3a8] sm:$0xf] %v13511_v48  ;;  %v6218_v53 = vld [vmem:[#allocation3 + $0x13a] sm:$0xff]  ;;  %v12176_v37 = vld [vmem:[#allocation11 + $0x180] sm:$0xff]  }
 0x2bb   : > { %5419 = vst [vmem:[#allocation5 + $0x36c] sm:$0xf] %v13511_v48  ;;  %5041 = vst [vmem:[#allocation5 + $0x43c] sm:$0xf] %v13515_v19  ;;  %v10510_v36 = vpack.c.bf16 %v6218_v53, %v6218_v53  ;;  %v12095_v11 = vld [vmem:[#allocation5 + $0x200] ss:$36 sps:$4 sm:$0xff]   ;;  %11423 = vmatpush3.bf16.msra.mxu0 %v12176_v37 }
 0x2bc   : > { %5599 = vst [vmem:[#allocation5 + $0x1c0] sm:$0xf] %v13323_v6  ;;  %5982 = vst [vmem:[#allocation5 + $0x180] sm:$0xf] %v13365_v9  ;;  %v10255_v9 = vpack.c.bf16 %v4682_v49, %v4682_v49  ;;  %v5624_v8 = vld [vmem:[#allocation3 + $0x52] sm:$0xff]  ;;  %v5436_v49 = vld [vmem:[#allocation3 + $0x81] sm:$0xff] }
 0x2bd   : > { %6174 = vst [vmem:[#allocation5 + $0x184] sm:$0xf] %v13323_v6  ;;  %4658 = vst [vmem:[#allocation3 + $0x189] sm:$0xff] %v13519_v0  ;;  %v5265_v6 = vld [vmem:[#allocation3 + $0x180] sm:$0xff]  ;;  %v5815_v16 = vld [vmem:[#allocation3 + $0x50] sm:$0xff] }
 0x2be   : > { %5601 = vst [vmem:[#allocation5 + $0x208] sm:$0xf] %v13313_v2  ;;  %5602 = vst [vmem:[#allocation5 + $0x22c] sm:$0xf] %v13351_v43  ;;  %v12104_v51 = vld [vmem:[#allocation5 + $0x248] ss:$36 sps:$4 sm:$0xff]  }
 0x2bf   : > { %6176 = vst [vmem:[#allocation5 + $0x1cc] sm:$0xf] %v13313_v2  ;;  %6177 = vst [vmem:[#allocation5 + $0x1f0] sm:$0xf] %v13351_v43  ;;  %v10295_v2 = vpack.c.bf16 %v4623_v61, %v4623_v61  ;;  %v13550_v43 = vpack.c.bf16 %v5265_v6, %v5265_v6  ;;  %v10369_v6 = vpack.c.bf16 %v5436_v49, %v5436_v49  ;;  %v12126_v33 = vld [vmem:[#allocation5 + $0x364] ss:$36 sps:$4 sm:$0xff]  }
 0x2c0   : > { %4848 = vst [vmem:[#allocation5 + $0x414] sm:$0xf] %v13525_v54  ;;  %5422 = vst [vmem:[#allocation5 + $0x3d8] sm:$0xf] %v13525_v54  ;;  %v12106_v63 = vld [vmem:[#allocation5 + $0x24c] ss:$36 sps:$4 sm:$0xff]  }
 0x2c1   : > { %5231 = vst [vmem:[#allocation5 + $0x3f8] sm:$0xf] %v13528_v31  ;;  %5232 = vst [vmem:[#allocation5 + $0x41c] sm:$0xf] %v13530_v30  ;;  %v12127_v14 = vld [vmem:[#allocation5 + $0x320] ss:$36 sps:$4 sm:$0xff]  }
 0x2c2   : > { %5793 = vst [vmem:[#allocation5 + $0x20c] sm:$0xf] %v13388_v42  ;;  %6368 = vst [vmem:[#allocation5 + $0x1d0] sm:$0xf] %v13388_v42  ;;  %v4689_v42 = vld [vmem:[#allocation3 + $0x168] sm:$0xff] }
 0x2c3   : > { %4656 = vst [vmem:[#allocation3 + $0x171] sm:$0xff] %v4623_v61  ;;  %5794 = vst [vmem:[#allocation5 + $0x230] sm:$0xf] %v13390_v55  ;;  %v12101_v61 = vld [vmem:[#allocation5 + $0x288] ss:$36 sps:$4 sm:$0xff]   ;;  %v5452_v37 = vld [vmem:[#allocation3 + $0x141] sm:$0xff] }
 0x2c4   : > { %5984 = vst [vmem:[#allocation5 + $0x1c8] sm:$0xf] %v13354_v59  ;;  %5985 = vst [vmem:[#allocation5 + $0x1ec] sm:$0xf] %v13386_v46  ;;  %v12087_v59 = vld [vmem:[#allocation5 + $0x1fc] ss:$36 sps:$4 sm:$0xff]   ;;  %v10262_v46 = vpack.c.bf16 %v4689_v42, %v4689_v42 }
 0x2c5   : > { %6369 = vst [vmem:[#allocation5 + $0x1f4] sm:$0xf] %v13390_v55  ;;  %6378 = vst [vmem:[#allocation5 + $0x338] sm:$0xf] %v10510_v36  ;;  %v12090_v55 = vld [vmem:[#allocation5 + $0x1bc] ss:$36 sps:$4 sm:$0xff]   ;;  %7948 = vmatprep.mubr.bf16.mxu1 %v12087_v59 }
 0x2c6   : > { %6379 = vst [vmem:[#allocation5 + $0x35c] sm:$0xf] %v10511_v34  ;;  %4842 = vst [vmem:[#allocation5 + $0x33c] sm:$0xf] %v10255_v9  ;;  %v5819_v42 = vld [vmem:[#allocation3 + $0x80] sm:$0xff] }
 0x2c7   : > { %5416 = vst [vmem:[#allocation5 + $0x300] sm:$0xf] %v10255_v9  ;;  %5229 = vst [vmem:[#allocation5 + $0x3b0] sm:$0xf] %v10510_v36  ;;  %v5627_v36 = vld [vmem:[#allocation3 + $0x7a] sm:$0xff]  ;;  %v10431_v59 = vpack.c.bf16 %v5819_v42, %v5819_v42 }
 0x2c8   : > { %5230 = vst [vmem:[#allocation5 + $0x3d4] sm:$0xf] %v10511_v34  ;;  %5603 = vst [vmem:[#allocation5 + $0x250] sm:$0xf] %v13369_v15  ;;  %v5628_v34 = vld [vmem:[#allocation3 + $0x82] sm:$0xff] }
 0x2c9   : > { %6178 = vst [vmem:[#allocation5 + $0x214] sm:$0xf] %v13369_v15  ;;  %5042 = vst [vmem:[#allocation5 + $0x460] sm:$0xf] %v10295_v2  ;;  %v12081_v15 = vld [vmem:[#allocation5 + $0x170] ss:$36 sps:$4 sm:$0xff]   ;;  %v10400_v2 = vpack.c.bf16 %v5627_v36, %v5627_v36 }
 0x2ca   : > { %5986 = vst [vmem:[#allocation5 + $0x210] sm:$0xf] %v13415_v35  ;;  %5605 = vst [vmem:[#allocation5 + $0x298] sm:$0xf] %v13356_v52  ;;  %8094 = vmatmul.mubr.bf16.gmra.mxu0 %v12081_v15  ;;  %v4686_v35 = vld [vmem:[#allocation3 + $0x140] sm:$0xff]  ;;  %v4690_v39 = vld [vmem:[#allocation3 + $0x170] sm:$0xff] }
 0x2cb   : > { %5606 = vst [vmem:[#allocation5 + $0x2bc] sm:$0xf] %v13409_v18  ;;  %6180 = vst [vmem:[#allocation5 + $0x25c] sm:$0xf] %v13356_v52  ;;  %v5266_v52 = vld [vmem:[#allocation3 + $0x188] sm:$0xff]  ;;  %8101 = vmatprep.mubr.bf16.mxu0 %v12090_v55  ;;  %v10263_v40 = vpack.c.bf16 %v4690_v39, %v4690_v39  ;;  %v5440_v15 = vld [vmem:[#allocation3 + $0xb1] sm:$0xff] }
 0x2cc   : > { %6181 = vst [vmem:[#allocation5 + $0x280] sm:$0xf] %v13409_v18  ;;  %5425 = vst [vmem:[#allocation5 + $0x444] sm:$0xf] %v13550_v43  ;;  %v5650_v18 = vld [vmem:[#allocation3 + $0x18a] sm:$0xff] }
 0x2cd   : > { %5797 = vst [vmem:[#allocation5 + $0x29c] sm:$0xf] %v13432_v28  ;;  %5798 = vst [vmem:[#allocation5 + $0x2c0] sm:$0xf] %v13434_v22  ;;  %v12110_v9 = vld [vmem:[#allocation5 + $0x2d4] ss:$36 sps:$4 sm:$0xff]  }
 0x2ce   : > { %5988 = vst [vmem:[#allocation5 + $0x258] sm:$0xf] %v13405_v10  ;;  %6372 = vst [vmem:[#allocation5 + $0x260] sm:$0xf] %v13432_v28  ;;  %v5649_v10 = vld [vmem:[#allocation3 + $0x182] sm:$0xff]  ;;  %v10259_v28 = vpack.c.bf16 %v4686_v35, %v4686_v35  ;;  %v5631_v55 = vld [vmem:[#allocation3 + $0xaa] sm:$0xff] }
 0x2cf   : > { %6373 = vst [vmem:[#allocation5 + $0x284] sm:$0xf] %v13434_v22  ;;  %5989 = vst [vmem:[#allocation5 + $0x27c] sm:$0xf] %v13429_v12  ;;  %v6223_v12 = vld [vmem:[#allocation3 + $0x172] sm:$0xff]  ;;  %v10390_v22 = vpack.c.bf16 %v13495_v23, %v13495_v23  ;;  %v12294_v23 = vld [vmem:[#allocation3 + $0x6a] sm:$0xff]  ;;  %v10404_v35 = vpack.c.bf16 %v5631_v55, %v5631_v55 }
 0x2d0   : > { %5607 = vst [vmem:[#allocation5 + $0x2e0] sm:$0xf] %v13420_v25  ;;  %5990 = vst [vmem:[#allocation5 + $0x2a0] sm:$0xf] %v13469_v60  ;;  %v10515_v60 = vpack.c.bf16 %v6223_v12, %v6223_v12  ;;  %v10493_v1 = vpack.c.bf16 %v12294_v23, %v12294_v23  ;;  %v12119_v12 = vld [vmem:[#allocation5 + $0x31c] ss:$36 sps:$4 sm:$0xff]  }
 0x2d1   : > { %6182 = vst [vmem:[#allocation5 + $0x2a4] sm:$0xf] %v13420_v25  ;;  %5609 = vst [vmem:[#allocation5 + $0x328] sm:$0xf] %v13422_v27  ;;  %v10359_v25 = vpack.c.bf16 %v5266_v52, %v5266_v52  ;;  %v5632_v52 = vld [vmem:[#allocation3 + $0xb2] sm:$0xff] }
 0x2d2   : > { %6184 = vst [vmem:[#allocation5 + $0x2ec] sm:$0xf] %v13422_v27  ;;  %4849 = vst [vmem:[#allocation5 + $0x438] sm:$0xf] %v10262_v46  ;;  %v6222_v27 = vld [vmem:[#allocation3 + $0x16a] sm:$0xff]  ;;  %8102 = vmatmul.mubr.bf16.gmra.mxu0 %v12088_v41 }
 0x2d3   : > { %5423 = vst [vmem:[#allocation5 + $0x3fc] sm:$0xf] %v10262_v46  ;;  %5610 = vst [vmem:[#allocation5 + $0x34c] sm:$0xf] %v13436_v47  ;;  %v12129_v23 = vld [vmem:[#allocation5 + $0x324] ss:$36 sps:$4 sm:$0xff]  }
 0x2d4   : > { %5801 = vst [vmem:[#allocation5 + $0x32c] sm:$0xf] %v13487_v13  ;;  %5802 = vst [vmem:[#allocation5 + $0x350] sm:$0xf] %v13489_v56  ;;  %v5831_v41 = vld [vmem:[#allocation3 + $0x110] sm:$0xff] }
 0x2d5   : > { %6185 = vst [vmem:[#allocation5 + $0x310] sm:$0xf] %v13436_v47  ;;  %6376 = vst [vmem:[#allocation5 + $0x2f0] sm:$0xf] %v13487_v13  ;;  %v10391_v47 = vpack.c.bf16 %v13519_v0, %v13519_v0  ;;  %v12292_v13 = vld [vmem:[#allocation3 + $0x3a] sm:$0xff]  ;;  %v10396_v0 = vpack.c.bf16 %v5623_v29, %v5623_v29  ;;  %v10443_v39 = vpack.c.bf16 %v5831_v41, %v5831_v41 }
 0x2d6   : > { %6377 = vst [vmem:[#allocation5 + $0x314] sm:$0xf] %v13489_v56  ;;  %5992 = vst [vmem:[#allocation5 + $0x2e8] sm:$0xf] %v13460_v38  ;;  %v10514_v38 = vpack.c.bf16 %v6222_v27, %v6222_v27  ;;  %v10489_v56 = vpack.c.bf16 %v12292_v13, %v12292_v13  ;;  %v5823_v27 = vld [vmem:[#allocation3 + $0xb0] sm:$0xff]  ;;  %v5827_v13 = vld [vmem:[#allocation3 + $0xe0] sm:$0xff] }
 0x2d7   : > { %5993 = vst [vmem:[#allocation5 + $0x30c] sm:$0xf] %v13484_v45  ;;  %5611 = vst [vmem:[#allocation5 + $0x370] sm:$0xf] %v13473_v44  ;;  %v10488_v45 = vpack.c.bf16 %v12291_v3, %v12291_v3  ;;  %v12160_v55 = vld [vmem:[#allocation5 + $0x10] ss:$36 sps:$4 sm:$0xff]  }
 0x2d8   : > { %5994 = vst [vmem:[#allocation5 + $0x330] sm:$0xf] %v13511_v48  ;;  %6186 = vst [vmem:[#allocation5 + $0x334] sm:$0xf] %v13473_v44  ;;  %v10423_v44 = vpack.c.bf16 %v5650_v18, %v5650_v18  ;;  %v12103_v48 = vld [vmem:[#allocation5 + $0x28c] ss:$36 sps:$4 sm:$0xff]   ;;  %v10373_v18 = vpack.c.bf16 %v5440_v15, %v5440_v15 }
 0x2d9   : > { %5613 = vst [vmem:[#allocation5 + $0x3b8] sm:$0xf] %v13462_v57  ;;  %5614 = vst [vmem:[#allocation5 + $0x3dc] sm:$0xf] %v13491_v5 }
 0x2da   : > { %5805 = vst [vmem:[#allocation5 + $0x3bc] sm:$0xf] %v13528_v31  ;;  %5806 = vst [vmem:[#allocation5 + $0x3e0] sm:$0xf] %v13530_v30 }
 0x2db   : > { %6188 = vst [vmem:[#allocation5 + $0x37c] sm:$0xf] %v13462_v57  ;;  %6189 = vst [vmem:[#allocation5 + $0x3a0] sm:$0xf] %v13491_v5  ;;  %v10422_v57 = vpack.c.bf16 %v5649_v10, %v5649_v10  ;;  %v12085_v5 = vld [vmem:[#allocation5 + $0x1f8] ss:$36 sps:$4 sm:$0xff]  }
 0x2dc   : > { %6380 = vst [vmem:[#allocation5 + $0x380] sm:$0xf] %v13528_v31  ;;  %6381 = vst [vmem:[#allocation5 + $0x3a4] sm:$0xf] %v13530_v30  ;;  %7949 = vmatmul.mubr.bf16.gmra.mxu1 %v12085_v5  ;;  %v10427_v31 = vpack.c.bf16 %v5815_v16, %v5815_v16  ;;  %v11088_v30 = vpop.f32.mrf.mxu1  ;;  %v12108_v10 = vld [vmem:[#allocation5 + $0x2d0] ss:$36 sps:$4 sm:$0xff]   ;;  %v10439_v5 = vpack.c.bf16 %v5827_v13, %v5827_v13 }
 0x2dd   : > { %5426 = vst [vmem:[#allocation5 + $0x468] sm:$0xf] %v10359_v25  ;;  %5996 = vst [vmem:[#allocation5 + $0x378] sm:$0xf] %v13506_v32  ;;  %7956 = vmatprep.mubr.bf16.mxu1 %v12094_v4  ;;  %v12097_v32 = vld [vmem:[#allocation5 + $0x204] ss:$36 sps:$4 sm:$0xff]  }
 0x2de   : > { %5997 = vst [vmem:[#allocation5 + $0x39c] sm:$0xf] %v13525_v54  ;;  %5615 = vst [vmem:[#allocation5 + $0x400] sm:$0xf] %v13515_v19  ;;  %8109 = vmatprep.mubr.bf16.mxu0 %v12097_v32  ;;  %v10397_v54 = vpack.c.bf16 %v5624_v8, %v5624_v8  ;;  %v11089_v53 = vpop.f32.mrf.mxu1  ;;  %v12124_v32 = vld [vmem:[#allocation5 + $0x360] ss:$36 sps:$4 sm:$0xff]  }
 0x2df   : > { %6190 = vst [vmem:[#allocation5 + $0x3c4] sm:$0xf] %v13515_v19  ;;  %4846 = vst [vmem:[#allocation5 + $0x3cc] sm:$0xf] %v10259_v28  ;;  %v5432_v19 = vld [vmem:[#allocation3 + $0x51] sm:$0xff]  ;;  %8110 = vmatmul.mubr.bf16.gmra.mxu0 %v12095_v11  ;;  %v13599_v20 = vadd.f32 %v11089_v53, %v11088_v30  ;;  %v5644_v11 = vld [vmem:[#allocation3 + $0x142] sm:$0xff] }
 0x2e0   : > { %5420 = vst [vmem:[#allocation5 + $0x390] sm:$0xf] %v10259_v28  ;;  %5998 = vst [vmem:[#allocation5 + $0x3c0] sm:$0xf] %v10262_v46  ;;  %v10365_v62 = vpack.c.bf16 %v5432_v19, %v5432_v19  ;;  %8117 = vmatprep.mubr.bf16.mxu0 %v12106_v63  ;;  %v12113_v46 = vld [vmem:[#allocation5 + $0x294] ss:$36 sps:$4 sm:$0xff]   ;;  %v10435_v28 = vpack.c.bf16 %v5823_v27, %v5823_v27  ;;  %v10417_v29 = vpack.c.bf16 %v5644_v11, %v5644_v11 }
 0x2e1   : > { %5617 = vst [vmem:[#allocation5 + $0x448] sm:$0xf] %v10390_v22  ;;  %5618 = vst [vmem:[#allocation5 + $0x46c] sm:$0xf] %v10391_v47  ;;  %v12142_v16 = vld [vmem:[#allocation5 + $0x3f4] ss:$36 sps:$4 sm:$0xff]  }
 0x2e2   : > { %6192 = vst [vmem:[#allocation5 + $0x40c] sm:$0xf] %v10390_v22  ;;  %6193 = vst [vmem:[#allocation5 + $0x430] sm:$0xf] %v10391_v47  ;;  %v12111_v22 = vld [vmem:[#allocation5 + $0x290] ss:$36 sps:$4 sm:$0xff]  }
 0x2e3   : > { %6382 = vst [vmem:[#allocation5 + $0x3c8] sm:$0xf] %v10514_v38  ;;  %6383 = vst [vmem:[#allocation5 + $0x3ec] sm:$0xf] %v10515_v60  ;;  %v12122_v47 = vld [vmem:[#allocation5 + $0x2dc] ss:$36 sps:$4 sm:$0xff]  }
 0x2e4   : > { %5233 = vst [vmem:[#allocation5 + $0x440] sm:$0xf] %v10514_v38  ;;  %5234 = vst [vmem:[#allocation5 + $0x464] sm:$0xf] %v10515_v60  ;;  %7957 = vmatmul.mubr.bf16.gmra.mxu1 %v12092_v58  ;;  %v5444_v38 = vld [vmem:[#allocation3 + $0xe1] sm:$0xff]  ;;  %v5647_v30 = vld [vmem:[#allocation3 + $0x16a] sm:$0xff] }
 0x2e5   : > { %5809 = vst [vmem:[#allocation5 + $0x44c] sm:$0xf] %v10422_v57  ;;  %5810 = vst [vmem:[#allocation5 + $0x470] sm:$0xf] %v10423_v44  ;;  %7964 = vmatprep.mubr.bf16.mxu1 %v12103_v48  ;;  %v5635_v60 = vld [vmem:[#allocation3 + $0xda] sm:$0xff]  ;;  %v10385_v48 = vpack.c.bf16 %v5452_v37, %v5452_v37  ;;  %v5648_v53 = vld [vmem:[#allocation3 + $0x172] sm:$0xff]  ;;  %v10420_v49 = vpack.c.bf16 %v5647_v30, %v5647_v30 }
 0x2e6   : > { %6384 = vst [vmem:[#allocation5 + $0x410] sm:$0xf] %v10422_v57  ;;  %6385 = vst [vmem:[#allocation5 + $0x434] sm:$0xf] %v10423_v44  ;;  %v5636_v57 = vld [vmem:[#allocation3 + $0xe2] sm:$0xff]  ;;  %v10377_v44 = vpack.c.bf16 %v5444_v38, %v5444_v38  ;;  %v10408_v3 = vpack.c.bf16 %v5635_v60, %v5635_v60  ;;  %v5643_v58 = vld [vmem:[#allocation3 + $0x13a] sm:$0xff]  ;;  %v10421_v36 = vpack.c.bf16 %v5648_v53, %v5648_v53 }
 0x2e7   : > { %6000 = vst [vmem:[#allocation5 + $0x408] sm:$0xf] %v13550_v43  ;;  %6001 = vst [vmem:[#allocation5 + $0x42c] sm:$0xf] %v10359_v25  ;;  %v10401_v43 = vpack.c.bf16 %v5628_v34, %v5628_v34  ;;  %8118 = vmatmul.mubr.bf16.gmra.mxu0 %v12104_v51  ;;  %v10405_v25 = vpack.c.bf16 %v5632_v52, %v5632_v52  ;;  %v12138_v21 = vld [vmem:[#allocation5 + $0x36c] ss:$36 sps:$4 sm:$0xff]   ;;  %v10416_v19 = vpack.c.bf16 %v5643_v58, %v5643_v58 }
 0x2e8   : > { %6356 = vst [vmem:[#allocation5 + $0x20] sm:$0xf] %v10488_v45  ;;  %6357 = vst [vmem:[#allocation5 + $0x44] sm:$0xf] %v10489_v56  ;;  %8125 = vmatprep.mubr.bf16.mxu0 %v12113_v46  ;;  %v10409_v45 = vpack.c.bf16 %v5636_v57, %v5636_v57  ;;  %v12117_v56 = vld [vmem:[#allocation5 + $0x318] ss:$36 sps:$4 sm:$0xff]  }
 0x2e9   : > { %6360 = vst [vmem:[#allocation5 + $0xb0] sm:$0xf] %v10492_v24  ;;  %6361 = vst [vmem:[#allocation5 + $0xd4] sm:$0xf] %v10493_v1  ;;  %v12120_v24 = vld [vmem:[#allocation5 + $0x2d8] ss:$36 sps:$4 sm:$0xff]  }
 0x2ea   : > { %6364 = vst [vmem:[#allocation5 + $0x140] sm:$0xf] %v10496_v7  ;;  %6365 = vst [vmem:[#allocation5 + $0x164] sm:$0xf] %v10497_v17  ;;  %v5448_v1 = vld [vmem:[#allocation3 + $0x111] sm:$0xff]  ;;  %v10412_v17 = vpack.c.bf16 %v5639_v26, %v5639_v26  ;;  %v12183_v52 = vld [vmem:[#allocation11 + $0x230] sm:$0xff]  }
 0x2eb   : > { %4850 = vst [vmem:[#allocation5 + $0x45c] sm:$0xf] %v10263_v40  ;;  %5424 = vst [vmem:[#allocation5 + $0x420] sm:$0xf] %v10263_v40  ;;  %v5640_v7 = vld [vmem:[#allocation3 + $0x112] sm:$0xff]  ;;  %v10381_v50 = vpack.c.bf16 %v5448_v1, %v5448_v1  ;;  %v6035_v38 = vld [vmem:[#allocation3 + $0x1a1] sm:$0xff] }
 0x2ec   : > { %5592 = vst [vmem:[#allocation5 + $0xc4] sm:$0xf] %v10365_v62  ;;  %5783 = vst [vmem:[#allocation5 + $0xa4] sm:$0xf] %v10396_v0  ;;  %7965 = vmatmul.mubr.bf16.gmra.mxu1 %v12101_v61  ;;  %v10413_v4 = vpack.c.bf16 %v5640_v7, %v5640_v7  ;;  %v12135_v40 = vld [vmem:[#allocation5 + $0x3ac] ss:$36 sps:$4 sm:$0xff]  }
 0x2ed   : > { %6167 = vst [vmem:[#allocation5 + $0x88] sm:$0xf] %v10365_v62  ;;  %5784 = vst [vmem:[#allocation5 + $0xc8] sm:$0xf] %v10397_v54  ;;  %7972 = vmatprep.mubr.bf16.mxu1 %v12110_v9  ;;  %v5835_v62 = vld [vmem:[#allocation3 + $0x140] sm:$0xff]  ;;  %v5839_v34 = vld [vmem:[#allocation3 + $0x170] sm:$0xff] }
 0x2ee   : > { %5975 = vst [vmem:[#allocation5 + $0x84] sm:$0xf] %v10427_v31  ;;  %5596 = vst [vmem:[#allocation5 + $0x154] sm:$0xf] %v10369_v6  ;;  %v10447_v8 = vpack.c.bf16 %v5835_v62, %v5835_v62  ;;  %v12133_v0 = vld [vmem:[#allocation5 + $0x3a8] ss:$36 sps:$4 sm:$0xff]   ;;  %v10451_v9 = vpack.c.bf16 %v5839_v34, %v5839_v34 }
 0x2ef   : > { %5787 = vst [vmem:[#allocation5 + $0x134] sm:$0xf] %v10400_v2  ;;  %5788 = vst [vmem:[#allocation5 + $0x158] sm:$0xf] %v10401_v43  ;;  %8126 = vmatmul.mubr.bf16.gmra.mxu0 %v12111_v22  ;;  %v12136_v63 = vld [vmem:[#allocation5 + $0x368] ss:$36 sps:$4 sm:$0xff]  }
 0x2f0   : > { %6171 = vst [vmem:[#allocation5 + $0x118] sm:$0xf] %v10369_v6  ;;  %5979 = vst [vmem:[#allocation5 + $0x114] sm:$0xf] %v10431_v59  ;;  %8133 = vmatprep.mubr.bf16.mxu0 %v12122_v47  ;;  %v12145_v54 = vld [vmem:[#allocation5 + $0x3b4] ss:$36 sps:$4 sm:$0xff]  }
 0x2f1   : > { %5600 = vst [vmem:[#allocation5 + $0x1e4] sm:$0xf] %v10373_v18  ;;  %5791 = vst [vmem:[#allocation5 + $0x1c4] sm:$0xf] %v10404_v35  ;;  %v5456_v31 = vld [vmem:[#allocation3 + $0x171] sm:$0xff]  ;;  %v6034_v47 = vld [vmem:[#allocation3 + $0x199] sm:$0xff] }
 0x2f2   : > { %5792 = vst [vmem:[#allocation5 + $0x1e8] sm:$0xf] %v10405_v25  ;;  %6175 = vst [vmem:[#allocation5 + $0x1a8] sm:$0xf] %v10373_v18  ;;  %v10389_v61 = vpack.c.bf16 %v5456_v31, %v5456_v31  ;;  %v12140_v6 = vld [vmem:[#allocation5 + $0x3f0] ss:$36 sps:$4 sm:$0xff]   ;;  %v10486_v57 = vpack.c.bf16 %v6034_v47, %v6034_v47 }
 0x2f3   : > { %5983 = vst [vmem:[#allocation5 + $0x1a4] sm:$0xf] %v10435_v28  ;;  %5604 = vst [vmem:[#allocation5 + $0x274] sm:$0xf] %v10377_v44  ;;  %v12151_v2 = vld [vmem:[#allocation5 + $0x43c] ss:$36 sps:$4 sm:$0xff]  }
 0x2f4   : > { %7973 = vmatmul.mubr.bf16.gmra.mxu1 %v12108_v10  ;;  %5795 = vst [vmem:[#allocation5 + $0x254] sm:$0xf] %v10408_v3  ;;  %5796 = vst [vmem:[#allocation5 + $0x278] sm:$0xf] %v10409_v45  ;;  %v12143_v43 = vld [vmem:[#allocation5 + $0x3b0] ss:$36 sps:$4 sm:$0xff]  }
 0x2f5   : > { %7980 = vmatprep.mubr.bf16.mxu1 %v12119_v12  ;;  %6179 = vst [vmem:[#allocation5 + $0x238] sm:$0xf] %v10377_v44  ;;  %5987 = vst [vmem:[#allocation5 + $0x234] sm:$0xf] %v10439_v5  ;;  %v12154_v42 = vld [vmem:[#allocation5 + $0x3fc] ss:$36 sps:$4 sm:$0xff]   ;;  %v10487_v44 = vpack.c.bf16 %v6035_v38, %v6035_v38 }
 0x2f6   : > { %5608 = vst [vmem:[#allocation5 + $0x304] sm:$0xf] %v10381_v50  ;;  %5799 = vst [vmem:[#allocation5 + $0x2e4] sm:$0xf] %v10412_v17  ;;  %v12149_v51 = vld [vmem:[#allocation5 + $0x438] ss:$36 sps:$4 sm:$0xff]  }
 0x2f7   : > { %8134 = vmatmul.mubr.bf16.gmra.mxu0 %v12120_v24  ;;  %5800 = vst [vmem:[#allocation5 + $0x308] sm:$0xf] %v10413_v4  ;;  %6183 = vst [vmem:[#allocation5 + $0x2c8] sm:$0xf] %v10381_v50  ;;  %v12162_v59 = vld [vmem:[#allocation5 + $0x14] ss:$36 sps:$4 sm:$0xff]  }
 0x2f8   : > { %8141 = vmatprep.mubr.bf16.mxu0 %v12129_v23  ;;  %5991 = vst [vmem:[#allocation5 + $0x2c4] sm:$0xf] %v10443_v39  ;;  %5612 = vst [vmem:[#allocation5 + $0x394] sm:$0xf] %v10385_v48  ;;  %v12152_v46 = vld [vmem:[#allocation5 + $0x3f8] ss:$36 sps:$4 sm:$0xff]  }
 0x2f9   : > { %5803 = vst [vmem:[#allocation5 + $0x374] sm:$0xf] %v10416_v19  ;;  %5804 = vst [vmem:[#allocation5 + $0x398] sm:$0xf] %v10417_v29  ;;  %v12159_v15 = vld [vmem:[#allocation5 + $0x444] ss:$36 sps:$4 sm:$0xff]  }
 0x2fa   : > { %6187 = vst [vmem:[#allocation5 + $0x358] sm:$0xf] %v10385_v48  ;;  %5995 = vst [vmem:[#allocation5 + $0x354] sm:$0xf] %v10447_v8  ;;  %v12170_v10 = vld [vmem:[#allocation5 + $0x5c] ss:$36 sps:$4 sm:$0xff]  }
 0x2fb   : > { %5616 = vst [vmem:[#allocation5 + $0x424] sm:$0xf] %v10389_v61  ;;  %5807 = vst [vmem:[#allocation5 + $0x404] sm:$0xf] %v10420_v49  ;;  %v12157_v18 = vld [vmem:[#allocation5 + $0x440] ss:$36 sps:$4 sm:$0xff]  }
 0x2fc   : > { %7981 = vmatmul.mubr.bf16.gmra.mxu1 %v12117_v56  ;;  %5808 = vst [vmem:[#allocation5 + $0x428] sm:$0xf] %v10421_v36  ;;  %6191 = vst [vmem:[#allocation5 + $0x3e8] sm:$0xf] %v10389_v61  ;;  %v12174_v35 = vld [vmem:[#allocation5 + $0x1c] ss:$36 sps:$4 sm:$0xff]  }
 0x2fd   : > { %7988 = vmatprep.mubr.bf16.mxu1 %v12126_v33  ;;  %5999 = vst [vmem:[#allocation5 + $0x3e4] sm:$0xf] %v10451_v9  ;;  %v12297_v25 = vld [vmem:[#allocation11 + $0x238] sm:$0xff]   ;;  %v12196_v27 = vld [vmem:[#allocation11 + $0x228] sm:$0xff]   ;;  %v12209_v45 = vld [vmem:[#allocation11 + $0x220] sm:$0xff]  }
 0x2fe   : > { %v5842_v12 = vld [vmem:[#allocation3 + $0x198] sm:$0xff]  ;;  %v12168_v3 = vld [vmem:[#allocation5 + $0x58] ss:$36 sps:$4 sm:$0xff]   ;;  %6194 = vst [vmem:[#allocation5 + $0x454] sm:$0xf] %v10486_v57  ;;  %v12235_v23 = vld [vmem:[#allocation11 + $0x210] sm:$0xff]  }
 0x2ff   : > { %8142 = vmatmul.mubr.bf16.gmra.mxu0 %v12127_v14  ;;  %v12298_v28 = vld [vmem:[#allocation2 + $0x8] sm:$0xff]  ;;  %v10454_v60 = vpack.c.bf16 %v5842_v12, %v5842_v12  ;;  %6195 = vst [vmem:[#allocation5 + $0x478] sm:$0xf] %v10487_v44  ;;  %v12172_v56 = vld [vmem:[#allocation5 + $0x18] ss:$36 sps:$4 sm:$0xff]   ;;  %v12261_v4 = vld [vmem:[#allocation11 + $0x200] sm:$0xff]  }
 0x300   : > { %8149 = vmatprep.mubr.bf16.mxu0 %v12138_v21  ;;  %v10455_v22 = vpack.c.bf16 %v12298_v28, %v12298_v28  ;;  %v12179_v13 = vld [vmem:[#allocation5 + $0xa4] ss:$36 sps:$4 sm:$0xff]   ;;  %v12222_v33 = vld [vmem:[#allocation11 + $0x218] sm:$0xff]   ;;  %v12186_v1 = vld [vmem:[#allocation5 + $0xec] ss:$36 sps:$4 sm:$0xff]  }
 0x301   : > { %6002 = vst [vmem:[#allocation5 + $0x450] sm:$0xf] %v10454_v60  ;;  %v12182_v5 = vld [vmem:[#allocation5 + $0x64] ss:$36 sps:$4 sm:$0xff]   ;;  %v12189_v7 = vld [vmem:[#allocation5 + $0xac] ss:$36 sps:$4 sm:$0xff]  }
 0x302   : > { %6003 = vst [vmem:[#allocation5 + $0x474] sm:$0xf] %v10455_v22  ;;  %v12177_v24 = vld [vmem:[#allocation5 + $0xa0] ss:$36 sps:$4 sm:$0xff]   ;;  %v12248_v50 = vld [vmem:[#allocation11 + $0x208] sm:$0xff]   ;;  %v6227_v53 = vld [vmem:[#allocation3 + $0x1a2] sm:$0xff] }
 0x303   : > { %v12180_v26 = vld [vmem:[#allocation5 + $0x60] ss:$36 sps:$4 sm:$0xff]   ;;  %v12184_v17 = vld [vmem:[#allocation5 + $0xe8] ss:$36 sps:$4 sm:$0xff]   ;;  %v12192_v41 = vld [vmem:[#allocation5 + $0x134] ss:$36 sps:$4 sm:$0xff]   ;;  %v10519_v49 = vpack.c.bf16 %v6227_v53, %v6227_v53 }
 0x304   : > { %7989 = vmatmul.mubr.bf16.gmra.mxu1 %v12124_v32  ;;  %v12187_v39 = vld [vmem:[#allocation5 + $0xa8] ss:$36 sps:$4 sm:$0xff]   ;;  %v12195_v32 = vld [vmem:[#allocation5 + $0xf4] ss:$36 sps:$4 sm:$0xff]   ;;  %v12199_v14 = vld [vmem:[#allocation5 + $0x17c] ss:$36 sps:$4 sm:$0xff]  }
 0x305   : > { %7996 = vmatprep.mubr.bf16.mxu1 %v12135_v40  ;;  %v12190_v40 = vld [vmem:[#allocation5 + $0x130] ss:$36 sps:$4 sm:$0xff]   ;;  %v12202_v37 = vld [vmem:[#allocation5 + $0x13c] ss:$36 sps:$4 sm:$0xff]   ;;  %v12205_v11 = vld [vmem:[#allocation5 + $0x1c4] ss:$36 sps:$4 sm:$0xff]  }
 0x306   : > { %v12193_v21 = vld [vmem:[#allocation5 + $0xf0] ss:$36 sps:$4 sm:$0xff]   ;;  %v12197_v58 = vld [vmem:[#allocation5 + $0x178] ss:$36 sps:$4 sm:$0xff]   ;;  %v12208_v19 = vld [vmem:[#allocation5 + $0x184] ss:$36 sps:$4 sm:$0xff]  }
 0x307   : > { %8150 = vmatmul.mubr.bf16.gmra.mxu0 %v12136_v63  ;;  %v12200_v48 = vld [vmem:[#allocation5 + $0x138] ss:$36 sps:$4 sm:$0xff]   ;;  %v12203_v29 = vld [vmem:[#allocation5 + $0x1c0] ss:$36 sps:$4 sm:$0xff]   ;;  %v12212_v62 = vld [vmem:[#allocation5 + $0x20c] ss:$36 sps:$4 sm:$0xff]  }
 0x308   : > { %8157 = vmatprep.mubr.bf16.mxu0 %v12145_v54  ;;  %v12206_v8 = vld [vmem:[#allocation5 + $0x180] ss:$36 sps:$4 sm:$0xff]   ;;  %v12218_v63 = vld [vmem:[#allocation5 + $0x254] ss:$36 sps:$4 sm:$0xff]   ;;  %v12213_v54 = vld [vmem:[#allocation5 + $0x1c8] ss:$36 sps:$4 sm:$0xff]  }
 0x309   : > { %v12221_v31 = vld [vmem:[#allocation5 + $0x214] ss:$36 sps:$4 sm:$0xff]   ;;  %v6226_v30 = vld [vmem:[#allocation3 + $0x19a] sm:$0xff]  ;;  %6387 = vst [vmem:[#allocation5 + $0x47c] sm:$0xf] %v10519_v49 }
 0x30a   : > { %v10518_v61 = vpack.c.bf16 %v6226_v30, %v6226_v30  ;;  %v12216_v36 = vld [vmem:[#allocation5 + $0x250] ss:$36 sps:$4 sm:$0xff]   ;;  %v12225_v34 = vld [vmem:[#allocation5 + $0x29c] ss:$36 sps:$4 sm:$0xff]  }
 0x30b   : > { %v12219_v9 = vld [vmem:[#allocation5 + $0x210] ss:$36 sps:$4 sm:$0xff]   ;;  %v12232_v60 = vld [vmem:[#allocation5 + $0x2a0] ss:$36 sps:$4 sm:$0xff]  }
 0x30c   : > { %7997 = vmatmul.mubr.bf16.gmra.mxu1 %v12133_v0  ;;  %v12215_v0 = vld [vmem:[#allocation5 + $0x1cc] ss:$36 sps:$4 sm:$0xff]   ;;  %6386 = vst [vmem:[#allocation5 + $0x458] sm:$0xf] %v10518_v61 }
 0x30d   : > { %8004 = vmatprep.mubr.bf16.mxu1 %v12142_v16  ;;  %v12210_v16 = vld [vmem:[#allocation5 + $0x208] ss:$36 sps:$4 sm:$0xff]   ;;  %v12245_v30 = vld [vmem:[#allocation5 + $0x330] ss:$36 sps:$4 sm:$0xff]  }
 0x30e   : > { %v12238_v38 = vld [vmem:[#allocation5 + $0x32c] ss:$36 sps:$4 sm:$0xff]  }
 0x30f   : > { %8158 = vmatmul.mubr.bf16.gmra.mxu0 %v12143_v43 }
 0x310   : > { %8165 = vmatprep.mubr.bf16.mxu0 %v12154_v42  ;;  %v12223_v42 = vld [vmem:[#allocation5 + $0x298] ss:$36 sps:$4 sm:$0xff]  }
 0x314   : > { %8005 = vmatmul.mubr.bf16.gmra.mxu1 %v12140_v6  ;;  %v12228_v6 = vld [vmem:[#allocation5 + $0x25c] ss:$36 sps:$4 sm:$0xff]  }
 0x315   : > { %8012 = vmatprep.mubr.bf16.mxu1 %v12151_v2  ;;  %v11091_v2 = vpop.f32.mrf.mxu1 }
 0x317   : > { %8166 = vmatmul.mubr.bf16.gmra.mxu0 %v12152_v46  ;;  %v11092_v43 = vpop.f32.mrf.mxu1 }
 0x318   : > { %8173 = vmatprep.mubr.bf16.mxu0 %v12159_v15  ;;  %v12234_v15 = vld [vmem:[#allocation5 + $0x2a4] ss:$36 sps:$4 sm:$0xff]  }
 0x31c   : > { %8013 = vmatmul.mubr.bf16.gmra.mxu1 %v12149_v51  ;;  %v12231_v51 = vld [vmem:[#allocation5 + $0x2e4] ss:$36 sps:$4 sm:$0xff]  }
 0x31d   : > { %8214 = vmatprep.mubr.bf16.mxu1 %v12162_v59  ;;  %v12226_v59 = vld [vmem:[#allocation5 + $0x258] ss:$36 sps:$4 sm:$0xff]  }
 0x31f   : > { %8174 = vmatmul.mubr.bf16.gmra.mxu0 %v12157_v18 }
 0x320   : > { %8375 = vmatprep.mubr.bf16.mxu0 %v12174_v35 }
 0x324   : > { %8215 = vmatmul.mubr.bf16.vlgmr.msra.gmra.mxu1 %v12160_v55 }
 0x325   : > { %8222 = vmatprep.mubr.bf16.mxu1 %v12170_v10  ;;  %11593 = vmatpush3.bf16.msra.mxu1 %v12297_v25 }
 0x326   : > { %11594 = vmatprep.subr.bf16.mxu1 %v12183_v52 }
 0x327   : > { %8376 = vmatmul.mubr.bf16.vlgmr.msra.gmra.mxu0 %v12172_v56 }
 0x328   : > { %8383 = vmatprep.mubr.bf16.mxu0 %v12182_v5 }
 0x329   : > { %11595 = vmatpush3.bf16.msra.mxu1 %v12183_v52 }
 0x32a   : > { %11596 = vmatprep.subr.bf16.mxu1 %v12196_v27 }
 0x32c   : > { %8223 = vmatmul.mubr.bf16.gmra.mxu1 %v12168_v3  ;;  %v11093_v3 = vadd.f32 %v11092_v43, %v11091_v2 }
 0x32d   : > { %8230 = vmatprep.mubr.bf16.mxu1 %v12179_v13  ;;  %11597 = vmatpush3.bf16.msra.mxu1 %v12196_v27  ;;  %v12229_v27 = vld [vmem:[#allocation5 + $0x2e0] ss:$36 sps:$4 sm:$0xff]   ;;  %v12241_v13 = vld [vmem:[#allocation5 + $0x2ec] ss:$36 sps:$4 sm:$0xff]  }
 0x32e   : > { %11598 = vmatprep.subr.bf16.mxu1 %v12209_v45 }
 0x32f   : > { %8384 = vmatmul.mubr.bf16.gmra.mxu0 %v12180_v26  ;;  %v12236_v26 = vld [vmem:[#allocation5 + $0x328] ss:$36 sps:$4 sm:$0xff]  }
 0x330   : > { %8391 = vmatprep.mubr.bf16.mxu0 %v12189_v7 }
 0x331   : > { %11599 = vmatpush3.bf16.msra.mxu1 %v12209_v45 }
 0x332   : > { %11600 = vmatprep.subr.bf16.mxu1 %v12222_v33 }
 0x334   : > { %8231 = vmatmul.mubr.bf16.gmra.mxu1 %v12177_v24 }
 0x335   : > { %8238 = vmatprep.mubr.bf16.mxu1 %v12186_v1  ;;  %11601 = vmatpush3.bf16.msra.mxu1 %v12222_v33 }
 0x336   : > { %11602 = vmatprep.subr.bf16.mxu1 %v12235_v23 }
 0x337   : > { %8392 = vmatmul.mubr.bf16.gmra.mxu0 %v12187_v39  ;;  %v12239_v39 = vld [vmem:[#allocation5 + $0x2e8] ss:$36 sps:$4 sm:$0xff]  }
 0x338   : > { %8399 = vmatprep.mubr.bf16.mxu0 %v12195_v32 }
 0x339   : > { %11603 = vmatpush3.bf16.msra.mxu1 %v12235_v23 }
 0x33a   : > { %11604 = vmatprep.subr.bf16.mxu1 %v12248_v50 }
 0x33c   : > { %8239 = vmatmul.mubr.bf16.gmra.mxu1 %v12184_v17 }
 0x33d   : > { %8246 = vmatprep.mubr.bf16.mxu1 %v12192_v41  ;;  %11605 = vmatpush3.bf16.msra.mxu1 %v12248_v50  ;;  %v12244_v41 = vld [vmem:[#allocation5 + $0x374] ss:$36 sps:$4 sm:$0xff]  }
 0x33e   : > { %11606 = vmatprep.subr.bf16.mxu1 %v12261_v4  ;;  %v11094_v46 = vpop.f32.mrf.mxu1 }
 0x33f   : > { %8400 = vmatmul.mubr.bf16.gmra.mxu0 %v12193_v21  ;;  %v12247_v21 = vld [vmem:[#allocation5 + $0x334] ss:$36 sps:$4 sm:$0xff]  }
 0x340   : > { %8407 = vmatprep.mubr.bf16.mxu0 %v12202_v37  ;;  %v11095_v52 = vpop.f32.mrf.mxu1 }
 0x341   : > { %11607 = vmatpush3.bf16.msra.mxu1 %v12261_v4  ;;  %v11200_v55 = vpop.f32.mrf.mxu0  ;;  %v11096_v10 = vadd.f32 %v11095_v52, %v11094_v46 }
 0x342   : > { %v11097_v35 = vpop.f32.mrf.mxu1 }
 0x343   : > { %v11201_v18 = vpop.f32.mrf.mxu0 }
 0x344   : > { %8247 = vmatmul.mubr.bf16.gmra.mxu1 %v12190_v40  ;;  %v11202_v25 = vadd.f32 %v11201_v18, %v11200_v55  ;;  %v11098_v28 = vpop.f32.mrf.mxu1  ;;  %v12252_v18 = vld [vmem:[#allocation5 + $0x378] ss:$36 sps:$4 sm:$0xff]  }
 0x345   : > { %8254 = vmatprep.mubr.bf16.mxu1 %v12199_v14  ;;  %v11203_v12 = vpop.f32.mrf.mxu0  ;;  %v11099_v47 = vadd.f32 %v11098_v28, %v11097_v35 }
 0x346   : > { %v13602_v22 = vadd.f32 %v11202_v25, %v13599_v20 }
 0x347   : > { %8408 = vmatmul.mubr.bf16.gmra.mxu0 %v12200_v48  ;;  %v11204_v57 = vpop.f32.mrf.mxu0 }
 0x348   : > { %8415 = vmatprep.mubr.bf16.mxu0 %v12208_v19  ;;  %v11100_v44 = vpop.f32.mrf.mxu1  ;;  %v11205_v45 = vadd.f32 %v11204_v57, %v11203_v12  ;;  %v12260_v12 = vld [vmem:[#allocation5 + $0x3c4] ss:$36 sps:$4 sm:$0xff]  }
 0x34a   : > { %v11206_v56 = vpop.f32.mrf.mxu0  ;;  %v11101_v5 = vpop.f32.mrf.mxu1  ;;  %v13604_v33 = vadd.f32 %v11205_v45, %v11093_v3  ;;  %v12255_v45 = vld [vmem:[#allocation5 + $0x400] ss:$36 sps:$4 sm:$0xff]  }
 0x34b   : > { %v11102_v24 = vadd.f32 %v11101_v5, %v11100_v44 }
 0x34c   : > { %8255 = vmatmul.mubr.bf16.gmra.mxu1 %v12197_v58  ;;  %v11207_v23 = vpop.f32.mrf.mxu0  ;;  %v11103_v20 = vpop.f32.mrf.mxu1 }
 0x34d   : > { %8262 = vmatprep.mubr.bf16.mxu1 %v12205_v11  ;;  %v11208_v1 = vadd.f32 %v11207_v23, %v11206_v56  ;;  %v12264_v23 = vld [vmem:[#allocation5 + $0x44c] ss:$36 sps:$4 sm:$0xff]  }
 0x34e   : > { %v11209_v7 = vpop.f32.mrf.mxu0  ;;  %v11104_v50 = vpop.f32.mrf.mxu1 }
 0x34f   : > { %8416 = vmatmul.mubr.bf16.gmra.mxu0 %v12206_v8  ;;  %v13606_v17 = vadd.f32 %v11208_v1, %v11096_v10  ;;  %v11105_v4 = vadd.f32 %v11104_v50, %v11103_v20  ;;  %v12242_v8 = vld [vmem:[#allocation5 + $0x370] ss:$36 sps:$4 sm:$0xff]   ;;  %v12257_v10 = vld [vmem:[#allocation5 + $0x404] ss:$36 sps:$4 sm:$0xff]  }
 0x350   : > { %8423 = vmatprep.mubr.bf16.mxu0 %v12215_v0  ;;  %v11210_v32 = vpop.f32.mrf.mxu0  ;;  %v12258_v20 = vld [vmem:[#allocation5 + $0x3c0] ss:$36 sps:$4 sm:$0xff]   ;;  %v12267_v50 = vld [vmem:[#allocation5 + $0x40c] ss:$36 sps:$4 sm:$0xff]  }
 0x351   : > { %v11211_v14 = vadd.f32 %v11210_v32, %v11209_v7 }
 0x353   : > { %v13608_v11 = vadd.f32 %v11211_v14, %v11099_v47 }
 0x354   : > { %8263 = vmatmul.mubr.bf16.gmra.mxu1 %v12203_v29 }
 0x355   : > { %8270 = vmatprep.mubr.bf16.mxu1 %v12212_v62  ;;  %v11106_v40 = vpop.f32.mrf.mxu1 }
 0x357   : > { %8424 = vmatmul.mubr.bf16.gmra.mxu0 %v12213_v54  ;;  %v11107_v58 = vpop.f32.mrf.mxu1 }
 0x358   : > { %8431 = vmatprep.mubr.bf16.mxu0 %v12221_v31  ;;  %v11212_v37 = vpop.f32.mrf.mxu0  ;;  %v11108_v48 = vadd.f32 %v11107_v58, %v11106_v40  ;;  %v12251_v31 = vld [vmem:[#allocation5 + $0x3bc] ss:$36 sps:$4 sm:$0xff]  }
 0x359   : > { %v11109_v29 = vpop.f32.mrf.mxu1 }
 0x35a   : > { %v11213_v19 = vpop.f32.mrf.mxu0 }
 0x35b   : > { %v11214_v62 = vadd.f32 %v11213_v19, %v11212_v37  ;;  %v12262_v37 = vld [vmem:[#allocation5 + $0x448] ss:$36 sps:$4 sm:$0xff]  }
 0x35c   : > { %8271 = vmatmul.mubr.bf16.gmra.mxu1 %v12210_v16  ;;  %v11215_v0 = vpop.f32.mrf.mxu0  ;;  %v11110_v16 = vpop.f32.mrf.mxu1 }
 0x35d   : > { %8278 = vmatprep.mubr.bf16.mxu1 %v12218_v63  ;;  %v13610_v63 = vadd.f32 %v11214_v62, %v11102_v24  ;;  %v11111_v54 = vadd.f32 %v11110_v16, %v11109_v29  ;;  %v12268_v62 = vld [vmem:[#allocation5 + $0x20] ss:$36 sps:$4 sm:$0xff]  }
 0x35e   : > { %v11216_v53 = vpop.f32.mrf.mxu0 }
 0x35f   : > { %8432 = vmatmul.mubr.bf16.gmra.mxu0 %v12219_v9  ;;  %v11217_v49 = vadd.f32 %v11216_v53, %v11215_v0  ;;  %v12265_v0 = vld [vmem:[#allocation5 + $0x408] ss:$36 sps:$4 sm:$0xff]  }
 0x360   : > { %8439 = vmatprep.mubr.bf16.mxu0 %v12228_v6 }
 0x361   : > { %v13612_v6 = vadd.f32 %v11217_v49, %v11105_v4 }
 0x362   : > { %v11112_v61 = vpop.f32.mrf.mxu1 }
 0x364   : > { %8279 = vmatmul.mubr.bf16.gmra.mxu1 %v12216_v36  ;;  %v12254_v36 = vld [vmem:[#allocation5 + $0x37c] ss:$36 sps:$4 sm:$0xff]   ;;  %v11113_v9 = vpop.f32.mrf.mxu1 }
 0x365   : > { %8286 = vmatprep.mubr.bf16.mxu1 %v12225_v34  ;;  %v11218_v34 = vpop.f32.mrf.mxu0  ;;  %v11114_v2 = vadd.f32 %v11113_v9, %v11112_v61 }
 0x367   : > { %8440 = vmatmul.mubr.bf16.gmra.mxu0 %v12226_v59  ;;  %v11219_v43 = vpop.f32.mrf.mxu0  ;;  %v12249_v59 = vld [vmem:[#allocation5 + $0x3b8] ss:$36 sps:$4 sm:$0xff]  }
 0x368   : > { %8447 = vmatprep.mubr.bf16.mxu0 %v12234_v15 }
 0x369   : > { %v11221_v46 = vpop.f32.mrf.mxu0 }
 0x36b   : > { %v11222_v35 = vpop.f32.mrf.mxu0 }
 0x36c   : > { %8287 = vmatmul.mubr.bf16.gmra.mxu1 %v12223_v42  ;;  %v11115_v42 = vpop.f32.mrf.mxu1 }
 0x36d   : > { %8294 = vmatprep.mubr.bf16.mxu1 %v12231_v51  ;;  %v11220_v51 = vadd.f32 %v11219_v43, %v11218_v34  ;;  %v11224_v28 = vpop.f32.mrf.mxu0 }
 0x36e   : > { %v11116_v15 = vpop.f32.mrf.mxu1 }
 0x36f   : > { %8448 = vmatmul.mubr.bf16.gmra.mxu0 %v12232_v60  ;;  %v13614_v55 = vadd.f32 %v11220_v51, %v11108_v48  ;;  %v11117_v52 = vadd.f32 %v11116_v15, %v11115_v42  ;;  %v11225_v57 = vpop.f32.mrf.mxu0  ;;  %v12269_v42 = vld [vmem:[#allocation5 + $0x450] ss:$36 sps:$4 sm:$0xff]   ;;  %v12272_v51 = vld [vmem:[#allocation5 + $0x68] ss:$36 sps:$4 sm:$0xff]  }
 0x370   : > { %8455 = vmatprep.mubr.bf16.mxu0 %v12241_v13  ;;  %v11118_v25 = vpop.f32.mrf.mxu1  ;;  %v11226_v3 = vadd.f32 %v11225_v57, %v11224_v28  ;;  %v12273_v15 = vld [vmem:[#allocation5 + $0xb0] ss:$36 sps:$4 sm:$0xff]  }
 0x371   : > { %v11227_v13 = vpop.f32.mrf.mxu0 }
 0x372   : > { %v11119_v47 = vpop.f32.mrf.mxu1  ;;  %v13618_v5 = vadd.f32 %v11226_v3, %v11114_v2  ;;  %v12274_v3 = vld [vmem:[#allocation5 + $0xf8] ss:$36 sps:$4 sm:$0xff]  }
 0x373   : > { %v11120_v60 = vadd.f32 %v11119_v47, %v11118_v25  ;;  %v11228_v1 = vpop.f32.mrf.mxu0 }
 0x374   : > { %8295 = vmatmul.mubr.bf16.gmra.mxu1 %v12229_v27  ;;  %v11223_v27 = vadd.f32 %v11222_v35, %v11221_v46  ;;  %v11121_v44 = vpop.f32.mrf.mxu1  ;;  %v11229_v7 = vadd.f32 %v11228_v1, %v11227_v13 }
 0x375   : > { %8302 = vmatprep.mubr.bf16.mxu1 %v12238_v38 }
 0x376   : > { %v13616_v38 = vadd.f32 %v11223_v27, %v11111_v54  ;;  %v11122_v56 = vpop.f32.mrf.mxu1 }
 0x377   : > { %8456 = vmatmul.mubr.bf16.gmra.mxu0 %v12239_v39  ;;  %v11123_v24 = vadd.f32 %v11122_v56, %v11121_v44  ;;  %v13620_v39 = vadd.f32 %v11229_v7, %v11117_v52  ;;  %v12275_v56 = vld [vmem:[#allocation5 + $0x140] ss:$36 sps:$4 sm:$0xff]  }
 0x378   : > { %8463 = vmatprep.mubr.bf16.mxu0 %v12247_v21 }
 0x37c   : > { %8303 = vmatmul.mubr.bf16.gmra.mxu1 %v12236_v26  ;;  %v11124_v26 = vpop.f32.mrf.mxu1 }
 0x37d   : > { %8310 = vmatprep.mubr.bf16.mxu1 %v12244_v41 }
 0x37e   : > { %v11125_v41 = vpop.f32.mrf.mxu1 }
 0x37f   : > { %8464 = vmatmul.mubr.bf16.gmra.mxu0 %v12245_v30  ;;  %v11126_v32 = vadd.f32 %v11125_v41, %v11124_v26 }
 0x380   : > { %8471 = vmatprep.mubr.bf16.mxu0 %v12254_v36  ;;  %v11127_v14 = vpop.f32.mrf.mxu1 }
 0x382   : > { %v11128_v48 = vpop.f32.mrf.mxu1 }
 0x383   : > { %v11129_v29 = vadd.f32 %v11128_v48, %v11127_v14  ;;  %v12277_v48 = vld [vmem:[#allocation5 + $0x1d0] ss:$36 sps:$4 sm:$0xff]  }
 0x384   : > { %8311 = vmatmul.mubr.bf16.gmra.mxu1 %v12242_v8  ;;  %v12271_v8 = vld [vmem:[#allocation5 + $0x454] ss:$36 sps:$4 sm:$0xff]  }
 0x385   : > { %8318 = vmatprep.mubr.bf16.mxu1 %v12251_v31 }
 0x387   : > { %8472 = vmatmul.mubr.bf16.gmra.mxu0 %v12252_v18 }
 0x388   : > { %8479 = vmatprep.mubr.bf16.mxu0 %v12260_v12 }
 0x38a   : > { %v11230_v4 = vpop.f32.mrf.mxu0 }
 0x38c   : > { %8319 = vmatmul.mubr.bf16.gmra.mxu1 %v12249_v59  ;;  %v11231_v40 = vpop.f32.mrf.mxu0 }
 0x38d   : > { %8326 = vmatprep.mubr.bf16.mxu1 %v12257_v10  ;;  %v11232_v21 = vadd.f32 %v11231_v40, %v11230_v4 }
 0x38e   : > { %v11233_v58 = vpop.f32.mrf.mxu0 }
 0x38f   : > { %8480 = vmatmul.mubr.bf16.gmra.mxu0 %v12258_v20  ;;  %v13622_v19 = vadd.f32 %v11232_v21, %v11120_v60  ;;  %v12276_v21 = vld [vmem:[#allocation5 + $0x188] ss:$36 sps:$4 sm:$0xff]  }
 0x390   : > { %8487 = vmatprep.mubr.bf16.mxu0 %v12267_v50  ;;  %v11234_v16 = vpop.f32.mrf.mxu0 }
 0x391   : > { %v11235_v31 = vadd.f32 %v11234_v16, %v11233_v58 }
 0x392   : > { %v11236_v30 = vpop.f32.mrf.mxu0 }
 0x393   : > { %v13624_v61 = vadd.f32 %v11235_v31, %v11123_v24 }
 0x394   : > { %8327 = vmatmul.mubr.bf16.gmra.mxu1 %v12255_v45  ;;  %v11237_v36 = vpop.f32.mrf.mxu0 }
 0x395   : > { %8334 = vmatprep.mubr.bf16.mxu1 %v12264_v23  ;;  %v11238_v9 = vadd.f32 %v11237_v36, %v11236_v30 }
 0x396   : > { %v11239_v2 = vpop.f32.mrf.mxu0 }
 0x397   : > { %8488 = vmatmul.mubr.bf16.gmra.mxu0 %v12265_v0  ;;  %v13626_v59 = vadd.f32 %v11238_v9, %v11126_v32  ;;  %v12278_v9 = vld [vmem:[#allocation5 + $0x218] ss:$36 sps:$4 sm:$0xff]  }
 0x398   : > { %8495 = vmatprep.mubr.bf16.mxu0 %v12271_v8  ;;  %v11240_v52 = vpop.f32.mrf.mxu0 }
 0x399   : > { %v11241_v18 = vadd.f32 %v11240_v52, %v11239_v2 }
 0x39b   : > { %v13628_v27 = vadd.f32 %v11241_v18, %v11129_v29 }
 0x39c   : > { %v11130_v54 = vpop.f32.mrf.mxu1  ;;  %8335 = vmatmul.mubr.bf16.gmra.mxu1 %v12262_v37 }
 0x39d   : > { %11608 = vmatprep.mubr.bf16.mxu1 %v12268_v62 }
 0x39e   : > { %v11131_v53 = vpop.f32.mrf.mxu1 }
 0x39f   : > { %v11132_v49 = vadd.f32 %v11131_v53, %v11130_v54  ;;  %v11242_v35 = vpop.f32.mrf.mxu0  ;;  %8496 = vmatmul.mubr.bf16.gmra.mxu0 %v12269_v42  ;;  %v12279_v42 = vld [vmem:[#allocation5 + $0x260] ss:$36 sps:$4 sm:$0xff]  }
 0x3a0   : > { %v11133_v34 = vpop.f32.mrf.mxu1 }
 0x3a1   : > { %v11243_v28 = vpop.f32.mrf.mxu0 }
 0x3a2   : > { %v11134_v43 = vpop.f32.mrf.mxu1  ;;  %v11244_v60 = vadd.f32 %v11243_v28, %v11242_v35 }
 0x3a3   : > { %v11135_v46 = vadd.f32 %v11134_v43, %v11133_v34  ;;  %v11245_v57 = vpop.f32.mrf.mxu0 }
 0x3a4   : > { %v11136_v10 = vpop.f32.mrf.mxu1  ;;  %11609 = vmatmul.mubr.bf16.vlgmr.msra.gmra.mxu1 %v12272_v51  ;;  %v13630_v45 = vadd.f32 %v11244_v60, %v11132_v49 }
 0x3a5   : > { %11612 = vmatprep.mubr.bf16.mxu1 %v12273_v15  ;;  %v11246_v24 = vpop.f32.mrf.mxu0 }
 0x3a6   : > { %v11137_v25 = vpop.f32.mrf.mxu1  ;;  %v11247_v20 = vadd.f32 %v11246_v24, %v11245_v57  ;;  %v12280_v57 = vld [vmem:[#allocation5 + $0x2a8] ss:$36 sps:$4 sm:$0xff]  }
 0x3a7   : > { %v11138_v12 = vadd.f32 %v11137_v25, %v11136_v10  ;;  %v11248_v1 = vpop.f32.mrf.mxu0 }
 0x3a8   : > { %v11139_v47 = vpop.f32.mrf.mxu1  ;;  %v13632_v7 = vadd.f32 %v11247_v20, %v11135_v46 }
 0x3a9   : > { %v11249_v4 = vpop.f32.mrf.mxu0 }
 0x3aa   : > { %v11140_v44 = vpop.f32.mrf.mxu1  ;;  %v11250_v32 = vadd.f32 %v11249_v4, %v11248_v1 }
 0x3ab   : > { %v11141_v13 = vadd.f32 %v11140_v44, %v11139_v47  ;;  %v11251_v40 = vpop.f32.mrf.mxu0 }
 0x3ac   : > { %v11142_v23 = vpop.f32.mrf.mxu1  ;;  %11613 = vmatmul.mubr.bf16.gmra.mxu1 %v12274_v3  ;;  %v13634_v37 = vadd.f32 %v11250_v32, %v11138_v12 }
 0x3ad   : > { %11616 = vmatprep.mubr.bf16.mxu1 %v12275_v56  ;;  %v11252_v29 = vpop.f32.mrf.mxu0 }
 0x3ae   : > { %v11143_v26 = vpop.f32.mrf.mxu1  ;;  %v11253_v8 = vadd.f32 %v11252_v29, %v11251_v40  ;;  %v12283_v29 = vld [vmem:[#allocation5 + $0x380] ss:$36 sps:$4 sm:$0xff]  }
 0x3af   : > { %v11144_v50 = vadd.f32 %v11143_v26, %v11142_v23  ;;  %v11254_v0 = vpop.f32.mrf.mxu0 }
 0x3b0   : > { %v11145_v41 = vpop.f32.mrf.mxu1  ;;  %v13636_v54 = vadd.f32 %v11253_v8, %v11141_v13  ;;  %v12281_v13 = vld [vmem:[#allocation5 + $0x2f0] ss:$36 sps:$4 sm:$0xff]  }
 0x3b1   : > { %v11255_v30 = vpop.f32.mrf.mxu0 }
 0x3b2   : > { %v11146_v14 = vpop.f32.mrf.mxu1  ;;  %v11256_v49 = vadd.f32 %v11255_v30, %v11254_v0 }
 0x3b3   : > { %v11147_v58 = vadd.f32 %v11146_v14, %v11145_v41  ;;  %v11257_v36 = vpop.f32.mrf.mxu0 }
 0x3b4   : > { %v11148_v62 = vpop.f32.mrf.mxu1  ;;  %11617 = vmatmul.mubr.bf16.gmra.mxu1 %v12276_v21  ;;  %v13638_v2 = vadd.f32 %v11256_v49, %v11144_v50  ;;  %v12282_v21 = vld [vmem:[#allocation5 + $0x338] ss:$36 sps:$4 sm:$0xff]  }
 0x3b5   : > { %11620 = vmatprep.mubr.bf16.mxu1 %v12277_v48  ;;  %v11258_v51 = vpop.f32.mrf.mxu0 }
 0x3b6   : > { %v11149_v16 = vpop.f32.mrf.mxu1  ;;  %v11259_v15 = vadd.f32 %v11258_v51, %v11257_v36 }
 0x3b7   : > { %v11150_v31 = vadd.f32 %v11149_v16, %v11148_v62  ;;  %v11260_v52 = vpop.f32.mrf.mxu0 }
 0x3b8   : > { %v11151_v53 = vpop.f32.mrf.mxu1  ;;  %v13640_v18 = vadd.f32 %v11259_v15, %v11147_v58  ;;  %v12285_v15 = vld [vmem:[#allocation5 + $0x410] ss:$36 sps:$4 sm:$0xff]  }
 0x3b9   : > { %v11261_v25 = vpop.f32.mrf.mxu0 }
 0x3ba   : > { %v11152_v34 = vpop.f32.mrf.mxu1  ;;  %v11262_v28 = vadd.f32 %v11261_v25, %v11260_v52 }
 0x3bb   : > { %v11153_v43 = vadd.f32 %v11152_v34, %v11151_v53  ;;  %v11263_v47 = vpop.f32.mrf.mxu0 }
 0x3bc   : > { %v11154_v46 = vpop.f32.mrf.mxu1  ;;  %11621 = vmatmul.mubr.bf16.gmra.mxu1 %v12278_v9  ;;  %v13642_v44 = vadd.f32 %v11262_v28, %v11150_v31 }
 0x3bd   : > { %11624 = vmatprep.mubr.bf16.mxu1 %v12279_v42  ;;  %v11264_v56 = vpop.f32.mrf.mxu0  ;;  %v12284_v42 = vld [vmem:[#allocation5 + $0x3c8] ss:$36 sps:$4 sm:$0xff]  }
 0x3be   : > { %v11155_v10 = vpop.f32.mrf.mxu1  ;;  %v11265_v23 = vadd.f32 %v11264_v56, %v11263_v47 }
 0x3bf   : > { %v11156_v35 = vadd.f32 %v11155_v10, %v11154_v46  ;;  %v11266_v20 = vpop.f32.mrf.mxu0 }
 0x3c0   : > { %v11157_v12 = vpop.f32.mrf.mxu1  ;;  %v13644_v26 = vadd.f32 %v11265_v23, %v11153_v43 }
 0x3c1   : > { %v11267_v4 = vpop.f32.mrf.mxu0 }
 0x3c2   : > { %v11158_v60 = vpop.f32.mrf.mxu1  ;;  %v11268_v32 = vadd.f32 %v11267_v4, %v11266_v20 }
 0x3c3   : > { %v11159_v3 = vadd.f32 %v11158_v60, %v11157_v12  ;;  %v11269_v40 = vpop.f32.mrf.mxu0 }
 0x3c4   : > { %v11160_v24 = vpop.f32.mrf.mxu1  ;;  %11625 = vmatmul.mubr.bf16.gmra.mxu1 %v12280_v57  ;;  %v13646_v58 = vadd.f32 %v11268_v32, %v11156_v35 }
 0x3c5   : > { %11628 = vmatprep.mubr.bf16.mxu1 %v12281_v13  ;;  %v11270_v62 = vpop.f32.mrf.mxu0 }
 0x3c6   : > { %v11161_v1 = vpop.f32.mrf.mxu1  ;;  %v11271_v0 = vadd.f32 %v11270_v62, %v11269_v40 }
 0x3c7   : > { %v11162_v50 = vadd.f32 %v11161_v1, %v11160_v24  ;;  %v11272_v16 = vpop.f32.mrf.mxu0 }
 0x3c8   : > { %v11163_v41 = vpop.f32.mrf.mxu1  ;;  %v13648_v30 = vadd.f32 %v11271_v0, %v11159_v3  ;;  %v12286_v3 = vld [vmem:[#allocation5 + $0x458] ss:$36 sps:$4 sm:$0xff]  }
 0x3c9   : > { %v11273_v49 = vpop.f32.mrf.mxu0 }
 0x3ca   : > { %v11164_v14 = vpop.f32.mrf.mxu1  ;;  %v11274_v34 = vadd.f32 %v11273_v49, %v11272_v16 }
 0x3cb   : > { %v11165_v48 = vadd.f32 %v11164_v14, %v11163_v41  ;;  %v11275_v9 = vpop.f32.mrf.mxu0 }
 0x3cc   : > { %v11166_v8 = vpop.f32.mrf.mxu1  ;;  %11629 = vmatmul.mubr.bf16.gmra.mxu1 %v12282_v21  ;;  %v13650_v51 = vadd.f32 %v11274_v34, %v11162_v50 }
 0x3cd   : > { %11632 = vmatprep.mubr.bf16.mxu1 %v12283_v29  ;;  %v11276_v52 = vpop.f32.mrf.mxu0 }
 0x3ce   : > { %v11167_v31 = vpop.f32.mrf.mxu1  ;;  %v11277_v35 = vadd.f32 %v11276_v52, %v11275_v9 }
 0x3cf   : > { %v11168_v53 = vadd.f32 %v11167_v31, %v11166_v8  ;;  %v11278_v25 = vpop.f32.mrf.mxu0 }
 0x3d0   : > { %v11169_v36 = vpop.f32.mrf.mxu1  ;;  %v13652_v28 = vadd.f32 %v11277_v35, %v11165_v48 }
 0x3d1   : > { %v11279_v60 = vpop.f32.mrf.mxu0 }
 0x3d2   : > { %v11170_v43 = vpop.f32.mrf.mxu1  ;;  %v11280_v13 = vadd.f32 %v11279_v60, %v11278_v25 }
 0x3d3   : > { %v11171_v46 = vadd.f32 %v11170_v43, %v11169_v36  ;;  %v11281_v56 = vpop.f32.mrf.mxu0 }
 0x3d4   : > { %v11172_v10 = vpop.f32.mrf.mxu1  ;;  %11633 = vmatmul.mubr.bf16.gmra.mxu1 %v12284_v42  ;;  %v13654_v23 = vadd.f32 %v11280_v13, %v11168_v53 }
 0x3d5   : > { %11636 = vmatprep.mubr.bf16.mxu1 %v12285_v15  ;;  %v11282_v1 = vpop.f32.mrf.mxu0 }
 0x3d6   : > { %v11173_v12 = vpop.f32.mrf.mxu1  ;;  %v11283_v4 = vadd.f32 %v11282_v1, %v11281_v56 }
 0x3d7   : > { %v11174_v47 = vadd.f32 %v11173_v12, %v11172_v10  ;;  %v11284_v41 = vpop.f32.mrf.mxu0 }
 0x3d8   : > { %v11175_v57 = vpop.f32.mrf.mxu1  ;;  %v13656_v40 = vadd.f32 %v11283_v4, %v11171_v46 }
 0x3d9   : > { %v11285_v21 = vpop.f32.mrf.mxu0 }
 0x3da   : > { %v11176_v24 = vpop.f32.mrf.mxu1  ;;  %v11286_v29 = vadd.f32 %v11285_v21, %v11284_v41 }
 0x3db   : > { %v11177_v20 = vadd.f32 %v11176_v24, %v11175_v57  ;;  %v11287_v62 = vpop.f32.mrf.mxu0 }
 0x3dc   : > { %v11178_v50 = vpop.f32.mrf.mxu1  ;;  %11637 = vmatmul.mubr.bf16.gmra.mxu1 %v12286_v3  ;;  %v13658_v0 = vadd.f32 %v11286_v29, %v11174_v47 }
 0x3dd   : > { %v11288_v31 = vpop.f32.mrf.mxu0 }
 0x3de   : > { %v11179_v32 = vpop.f32.mrf.mxu1  ;;  %v11289_v49 = vadd.f32 %v11288_v31, %v11287_v62 }
 0x3df   : > { %v11180_v14 = vadd.f32 %v11179_v32, %v11178_v50  ;;  %v11290_v36 = vpop.f32.mrf.mxu0 }
 0x3e0   : > { %v11181_v48 = vpop.f32.mrf.mxu1  ;;  %v13660_v9 = vadd.f32 %v11289_v49, %v11177_v20 }
 0x3e1   : > { %v11291_v42 = vpop.f32.mrf.mxu0 }
 0x3e2   : > { %v11182_v8 = vpop.f32.mrf.mxu1  ;;  %v11292_v15 = vadd.f32 %v11291_v42, %v11290_v36 }
 0x3e3   : > { %v11183_v16 = vadd.f32 %v11182_v8, %v11181_v48  ;;  %v11293_v10 = vpop.f32.mrf.mxu0 }
 0x3e4   : > { %v11312_v53 = vpop.f32.mrf.mxu1  ;;  %v13663_v25 = vadd.f32 %v11292_v15, %v11180_v14 }
 0x3e5   : > { %v11294_v47 = vpop.f32.mrf.mxu0 }
 0x3e6   : > { %v11313_v34 = vpop.f32.mrf.mxu1  ;;  %14217 = vst [vmem:[#allocation20_spill] sm:$0xff] %v13663_v25  ;;  %v11295_v57 = vadd.f32 %v11294_v47, %v11293_v10 }
 0x3e7   : > { %v11314_v43 = vadd.f32 %v11313_v34, %v11312_v53  ;;  %v11424_v13 = vpop.f32.mrf.mxu0 }
 0x3e8   : > { %v11315_v46 = vpop.f32.mrf.mxu1  ;;  %v13666_v24 = vadd.f32 %v11295_v57, %v11183_v16 }
 0x3e9   : > { %v8217_v52 = vadd.f32 %v11314_v43, %v13602_v22  ;;  %v11425_v1 = vpop.f32.mrf.mxu0 }
 0x3ea   : > { %v11316_v35 = vpop.f32.mrf.mxu1  ;;  %14218 = vst [vmem:[#allocation21_spill] sm:$0xff] %v13666_v24  ;;  %v11426_v22 = vadd.f32 %v11425_v1, %v11424_v13 }
 0x3eb   : > { %v11317_v12 = vadd.f32 %v11316_v35, %v11315_v46  ;;  %v11427_v41 = vpop.f32.mrf.mxu0 }
 0x3ec   : > { %v11318_v60 = vpop.f32.mrf.mxu1  ;;  %v13671_v21 = vadd.f32 %v11426_v22, %v8217_v52 }
 0x3ed   : > { %v8220_v3 = vadd.f32 %v11317_v12, %v13604_v33  ;;  %v11428_v48 = vpop.f32.mrf.mxu0 }
 0x3ee   : > { %v11319_v56 = vpop.f32.mrf.mxu1  ;;  %v11429_v62 = vadd.f32 %v11428_v48, %v11427_v41 }
 0x3ef   : > { %v11320_v20 = vadd.f32 %v11319_v56, %v11318_v60  ;;  %v13676_v8 = vpop.f32.mrf.mxu0 }
 0x3f0   : > { %v11321_v50 = vpop.f32.mrf.mxu1  ;;  %v13678_v53 = vadd.f32 %v11429_v62, %v8220_v3 }
 0x3f1   : > { %v13669_v4 = vadd.f32 %v11320_v20, %v13606_v17  ;;  %v13680_v17 = vpop.f32.mrf.mxu0 }
 0x3f2   : > { %v11322_v32 = vpop.f32.mrf.mxu1 }
 0x3f3   : > { %v11323_v14 = vadd.f32 %v11322_v32, %v11321_v50  ;;  %v13685_v34 = vpop.f32.mrf.mxu0 }
 0x3f4   : > { %v11324_v29 = vpop.f32.mrf.mxu1 }
 0x3f5   : > { %v13674_v33 = vadd.f32 %v11323_v14, %v13608_v11  ;;  %v13687_v46 = vpop.f32.mrf.mxu0 }
 0x3f6   : > { %v11325_v16 = vpop.f32.mrf.mxu1 }
 0x3f7   : > { %v11326_v31 = vadd.f32 %v11325_v16, %v11324_v29  ;;  %v13692_v52 = vpop.f32.mrf.mxu0 }
 0x3f8   : > { %v11327_v49 = vpop.f32.mrf.mxu1 }
 0x3f9   : > { %v13683_v36 = vadd.f32 %v11326_v31, %v13610_v63  ;;  %v13694_v12 = vpop.f32.mrf.mxu0 }
 0x3fa   : > { %v11328_v43 = vpop.f32.mrf.mxu1 }
 0x3fb   : > { %v11329_v42 = vadd.f32 %v11328_v43, %v11327_v49  ;;  %v13699_v60 = vpop.f32.mrf.mxu0 }
 0x3fc   : > { %v11330_v11 = vpop.f32.mrf.mxu1 }
 0x3fd   : > { %v13690_v15 = vadd.f32 %v11329_v42, %v13612_v6  ;;  %v13701_v13 = vpop.f32.mrf.mxu0 }
 0x3fe   : > { %v11331_v10 = vpop.f32.mrf.mxu1 }
 0x3ff   : > { %v11332_v35 = vadd.f32 %v11331_v10, %v11330_v11  ;;  %v13706_v20 = vpop.f32.mrf.mxu0 }
 0x400   : > { %v11333_v47 = vpop.f32.mrf.mxu1 }
 0x401   : > { %v13697_v63 = vadd.f32 %v11332_v35, %v13614_v55  ;;  %v13708_v22 = vpop.f32.mrf.mxu0 }
 0x402   : > { %v11334_v57 = vpop.f32.mrf.mxu1 }
 0x403   : > { %v11335_v3 = vadd.f32 %v11334_v57, %v11333_v47  ;;  %v13713_v32 = vpop.f32.mrf.mxu0 }
 0x404   : > { %v11336_v56 = vpop.f32.mrf.mxu1 }
 0x405   : > { %v13704_v6 = vadd.f32 %v11335_v3, %v13616_v38  ;;  %v13715_v29 = vpop.f32.mrf.mxu0 }
 0x406   : > { %v11337_v1 = vpop.f32.mrf.mxu1 }
 0x407   : > { %v11338_v50 = vadd.f32 %v11337_v1, %v11336_v56  ;;  %v13720_v16 = vpop.f32.mrf.mxu0 }
 0x408   : > { %v11339_v41 = vpop.f32.mrf.mxu1 }
 0x409   : > { %v13711_v55 = vadd.f32 %v11338_v50, %v13618_v5  ;;  %v13722_v43 = vpop.f32.mrf.mxu0 }
 0x40a   : > { %v11340_v14 = vpop.f32.mrf.mxu1 }
 0x40b   : > { %v11341_v48 = vadd.f32 %v11340_v14, %v11339_v41  ;;  %v13727_v11 = vpop.f32.mrf.mxu0 }
 0x40c   : > { %v11342_v62 = vpop.f32.mrf.mxu1 }
 0x40d   : > { %v13718_v38 = vadd.f32 %v11341_v48, %v13620_v39  ;;  %v13729_v47 = vpop.f32.mrf.mxu0 }
 0x40e   : > { %v11343_v31 = vpop.f32.mrf.mxu1 }
 0x40f   : > { %v11344_v49 = vadd.f32 %v11343_v31, %v11342_v62  ;;  %v13734_v3 = vpop.f32.mrf.mxu0 }
 0x410   : > { %v11345_v42 = vpop.f32.mrf.mxu1 }
 0x411   : > { %v13725_v5 = vadd.f32 %v11344_v49, %v13622_v19  ;;  %v13736_v50 = vpop.f32.mrf.mxu0 }
 0x412   : > { %v11346_v10 = vpop.f32.mrf.mxu1 }
 0x413   : > { %v11347_v35 = vadd.f32 %v11346_v10, %v11345_v42  ;;  %v13741_v14 = vpop.f32.mrf.mxu0 }
 0x414   : > { %v11348_v57 = vpop.f32.mrf.mxu1 }
 0x415   : > { %v13732_v39 = vadd.f32 %v11347_v35, %v13624_v61  ;;  %v13743_v31 = vpop.f32.mrf.mxu0 }
 0x416   : > { %v11349_v56 = vpop.f32.mrf.mxu1 }
 0x417   : > { %v11350_v1 = vadd.f32 %v11349_v56, %v11348_v57  ;;  %v13748_v42 = vpop.f32.mrf.mxu0 }
 0x418   : > { %v11351_v41 = vpop.f32.mrf.mxu1 }
 0x419   : > { %v13739_v19 = vadd.f32 %v11350_v1, %v13626_v59  ;;  %v13750_v57 = vpop.f32.mrf.mxu0 }
 0x41a   : > { %v11352_v48 = vpop.f32.mrf.mxu1 }
 0x41b   : > { %14219 = vst [vmem:[#allocation22_spill] sm:$0xff] %v13739_v19  ;;  %v11353_v62 = vadd.f32 %v11352_v48, %v11351_v41  ;;  %v13755_v1 = vpop.f32.mrf.mxu0 }
 0x41c   : > { %v11354_v49 = vpop.f32.mrf.mxu1  ;;  %14222 = vst [vmem:[#allocation23_spill] sm:$0xff] %v13755_v1 }
 0x41d   : > { %v13746_v61 = vadd.f32 %v11353_v62, %v13628_v27  ;;  %v13757_v48 = vpop.f32.mrf.mxu0 }
 0x41e   : > { %v11355_v10 = vpop.f32.mrf.mxu1  ;;  %14223 = vst [vmem:[#allocation24_spill] sm:$0xff] %v13757_v48 }
 0x41f   : > { %14220 = vst [vmem:[#allocation32_spill] sm:$0xff] %v13746_v61  ;;  %v11356_v35 = vadd.f32 %v11355_v10, %v11354_v49  ;;  %v13762_v62 = vpop.f32.mrf.mxu0 }
 0x420   : > { %v11357_v56 = vpop.f32.mrf.mxu1 }
 0x421   : > { %v13753_v59 = vadd.f32 %v11356_v35, %v13630_v45  ;;  %v13764_v10 = vpop.f32.mrf.mxu0 }
 0x422   : > { %v11358_v24 = vpop.f32.mrf.mxu1 }
 0x423   : > { %14221 = vst [vmem:[#allocation34_spill] sm:$0xff] %v13753_v59  ;;  %v11359_v41 = vadd.f32 %v11358_v24, %v11357_v56  ;;  %v13769_v35 = vpop.f32.mrf.mxu0 }
 0x424   : > { %v11360_v25 = vpop.f32.mrf.mxu1 }
 0x425   : > { %v13760_v27 = vadd.f32 %v11359_v41, %v13632_v7  ;;  %v13771_v56 = vpop.f32.mrf.mxu0 }
 0x426   : > { %v11361_v61 = vpop.f32.mrf.mxu1  ;;  %14226 = vst [vmem:[#allocation27_spill] sm:$0xff] %v13771_v56 }
 0x427   : > { %14224 = vst [vmem:[#allocation36_spill] sm:$0xff] %v13760_v27  ;;  %v11362_v49 = vadd.f32 %v11361_v61, %v11360_v25  ;;  %v13776_v41 = vpop.f32.mrf.mxu0 }
 0x428   : > { %v11363_v19 = vpop.f32.mrf.mxu1 }
 0x429   : > { %v13767_v45 = vadd.f32 %v11362_v49, %v13634_v37  ;;  %v13778_v61 = vpop.f32.mrf.mxu0 }
 0x42a   : > { %v11364_v1 = vpop.f32.mrf.mxu1  ;;  %14228 = vst [vmem:[#allocation26_spill] sm:$0xff] %v13778_v61 }
 0x42b   : > { %14225 = vst [vmem:[#allocation37_spill] sm:$0xff] %v13767_v45  ;;  %v11365_v24 = vadd.f32 %v11364_v1, %v11363_v19  ;;  %v13783_v49 = vpop.f32.mrf.mxu0 }
 0x42c   : > { %v11366_v48 = vpop.f32.mrf.mxu1  ;;  %14230 = vst [vmem:[#allocation29_spill] sm:$0xff] %v13783_v49 }
 0x42d   : > { %v13774_v7 = vadd.f32 %v11365_v24, %v13636_v54  ;;  %v13785_v1 = vpop.f32.mrf.mxu0 }
 0x42e   : > { %v11367_v27 = vpop.f32.mrf.mxu1  ;;  %14231 = vst [vmem:[#allocation40_spill] sm:$0xff] %v13785_v1 }
 0x42f   : > { %14227 = vst [vmem:[#allocation25_spill] sm:$0xff] %v13774_v7  ;;  %v11368_v25 = vadd.f32 %v11367_v27, %v11366_v48  ;;  %v13790_v24 = vpop.f32.mrf.mxu0 }
 0x430   : > { %v11369_v59 = vpop.f32.mrf.mxu1 }
 0x431   : > { %v13781_v37 = vadd.f32 %v11368_v25, %v13638_v2  ;;  %v13792_v27 = vpop.f32.mrf.mxu0 }
 0x432   : > { %v11370_v45 = vpop.f32.mrf.mxu1 }
 0x433   : > { %14229 = vst [vmem:[#allocation28_spill] sm:$0xff] %v13781_v37  ;;  %v11371_v19 = vadd.f32 %v11370_v45, %v11369_v59  ;;  %v13797_v25 = vpop.f32.mrf.mxu0 }
 0x434   : > { %v11372_v56 = vpop.f32.mrf.mxu1 }
 0x435   : > { %v13788_v54 = vadd.f32 %v11371_v19, %v13640_v18  ;;  %v13799_v45 = vpop.f32.mrf.mxu0 }
 0x436   : > { %v11373_v7 = vpop.f32.mrf.mxu1  ;;  %14234 = vst [vmem:[#allocation30_spill] sm:$0xff] %v13799_v45 }
 0x437   : > { %14232 = vst [vmem:[#allocation43_spill] sm:$0xff] %v13788_v54  ;;  %v11374_v48 = vadd.f32 %v11373_v7, %v11372_v56  ;;  %v13804_v19 = vpop.f32.mrf.mxu0 }
 0x438   : > { %v11375_v61 = vpop.f32.mrf.mxu1  ;;  %14236 = vst [vmem:[#allocation31_spill] sm:$0xff] %v13804_v19 }
 0x439   : > { %v13795_v2 = vadd.f32 %v11374_v48, %v13642_v44  ;;  %v13806_v7 = vpop.f32.mrf.mxu0 }
 0x43a   : > { %v11376_v49 = vpop.f32.mrf.mxu1  ;;  %14237 = vst [vmem:[#allocation33_spill] sm:$0xff] %v13806_v7 }
 0x43b   : > { %14233 = vst [vmem:[#allocation44_spill] sm:$0xff] %v13795_v2  ;;  %v11377_v59 = vadd.f32 %v11376_v49, %v11375_v61  ;;  %v13811_v2 = vpop.f32.mrf.mxu0 }
 0x43c   : > { %v11378_v1 = vpop.f32.mrf.mxu1  ;;  %14238 = vst [vmem:[#allocation35_spill] sm:$0xff] %v13811_v2 }
 0x43d   : > { %v13802_v18 = vadd.f32 %v11377_v59, %v13644_v26  ;;  %v13816_v59 = vpop.f32.mrf.mxu0 }
 0x43e   : > { %v11379_v54 = vpop.f32.mrf.mxu1 }
 0x43f   : > { %14235 = vst [vmem:[#allocation18_spill] sm:$0xff] %v13802_v18  ;;  %v11380_v56 = vadd.f32 %v11379_v54, %v11378_v1  ;;  %v13821_v7 = vpop.f32.mrf.mxu0 }
 0x440   : > { %v11381_v37 = vpop.f32.mrf.mxu1 }
 0x441   : > { %v13809_v44 = vadd.f32 %v11380_v56, %v13646_v58 }
 0x442   : > { %v11382_v48 = vpop.f32.mrf.mxu1 }
 0x443   : > { %v11383_v61 = vadd.f32 %v11382_v48, %v11381_v37  ;;  %v13826_v48 = vpop.f32.mrf.mxu0 }
 0x444   : > { %v11384_v49 = vpop.f32.mrf.mxu1 }
 0x445   : > { %v13814_v45 = vadd.f32 %v11383_v61, %v13648_v30 }
 0x446   : > { %v11385_v26 = vpop.f32.mrf.mxu1 }
 0x447   : > { %14239 = vst [vmem:[#allocation38_spill] sm:$0xff] %v13814_v45  ;;  %v11386_v18 = vadd.f32 %v11385_v26, %v11384_v49  ;;  %v13831_v26 = vpop.f32.mrf.mxu0 }
 0x448   : > { %v11387_v19 = vpop.f32.mrf.mxu1 }
 0x449   : > { %v13819_v1 = vadd.f32 %v11386_v18, %v13650_v51 }
 0x44a   : > { %v11388_v54 = vpop.f32.mrf.mxu1 }
 0x44b   : > { %14240 = vst [vmem:[#allocation39_spill] sm:$0xff] %v13819_v1  ;;  %v11389_v58 = vadd.f32 %v11388_v54, %v11387_v19  ;;  %v13836_v54 = vpop.f32.mrf.mxu0 }
 0x44c   : > { %v11390_v56 = vpop.f32.mrf.mxu1 }
 0x44d   : > { %v13824_v2 = vadd.f32 %v11389_v58, %v13652_v28 }
 0x44e   : > { %v11391_v37 = vpop.f32.mrf.mxu1 }
 0x44f   : > { %14241 = vst [vmem:[#allocation41_spill] sm:$0xff] %v13824_v2  ;;  %v11392_v30 = vadd.f32 %v11391_v37, %v11390_v56  ;;  %v13841_v37 = vpop.f32.mrf.mxu0 }
 0x450   : > { %v11393_v61 = vpop.f32.mrf.mxu1 }
 0x451   : > { %v13829_v45 = vadd.f32 %v11392_v30, %v13654_v23 }
 0x452   : > { %v11394_v49 = vpop.f32.mrf.mxu1 }
 0x453   : > { %v11395_v51 = vadd.f32 %v11394_v49, %v11393_v61  ;;  %v11432_v49 = vadd.f32 %v13680_v17, %v13676_v8  ;;  %v13871_v17 = vld [vmem:[%s14133_s6] ss:$0 sm:$0xff] }
 0x454   : > { %v11396_v18 = vpop.f32.mrf.mxu1 }
 0x455   : > { %v13834_v1 = vadd.f32 %v11395_v51, %v13656_v40  ;;  %v13852_v51 = vpop.f32.mrf.mxu0 }
 0x456   : > { %v11397_v19 = vpop.f32.mrf.mxu1 }
 0x457   : > { %14242 = vst [vmem:[#allocation42_spill] sm:$0xff] %v13834_v1  ;;  %v11398_v28 = vadd.f32 %v11397_v19, %v11396_v18  ;;  %v11435_v19 = vadd.f32 %v13687_v46, %v13685_v34  ;;  %v11447_v1 = vadd.f32 %v13715_v29, %v13713_v32 }
 0x458   : > { %v11399_v58 = vpop.f32.mrf.mxu1 }
 0x459   : > { %v13839_v2 = vadd.f32 %v11398_v28, %v13658_v0  ;;  %v13860_v28 = vpop.f32.mrf.mxu0  ;;  %v8389_v46 = vadd.f32 %v11435_v19, %v13674_v33 }
 0x45a   : > { %v11400_v56 = vpop.f32.mrf.mxu1 }
 0x45b   : > { %14243 = vst [vmem:[#allocation19_spill] sm:$0xff] %v13839_v2  ;;  %v11401_v23 = vadd.f32 %v11400_v56, %v11399_v58  ;;  %v8386_v58 = vadd.f32 %v11432_v49, %v13669_v4  ;;  %v13866_v56 = vld [vmem:[%s14132_s5] ss:$0 sm:$0xff]  ;;  %v11438_v49 = vadd.f32 %v13694_v12, %v13692_v52 }
 0x45c   : > { %v13843_v30 = vpop.f32.mrf.mxu1 }
 0x45d   : > { %v13846_v61 = vadd.f32 %v11401_v23, %v13660_v9  ;;  %v8394_v19 = vadd.f32 %v11438_v49, %v13683_v36  ;;  %v11456_v36 = vadd.f32 %v13736_v50, %v13734_v3  ;;  %v11459_v50 = vadd.f32 %v13743_v31, %v13741_v14 }
 0x45e   : > { %v13848_v40 = vpop.f32.mrf.mxu1 }
 0x45f   : > { %14244 = vst [vmem:[#allocation46_spill] sm:$0xff] %v13846_v61  ;;  %14245 = vst [vmem:[#allocation45_spill] sm:$0xff] %v13848_v40  ;;  %v13873_v61 = vpop.f32.mrf.mxu0 }
 0x460   : > { %v13854_v18 = vpop.f32.mrf.mxu1 }
 0x461   : > { %14246 = vst [vmem:[#allocation16_spill] sm:$0xff] %v13854_v18  ;;  %v13887_v40 = vpop.f32.mrf.mxu0 }
 0x462   : > { %v13856_v0 = vpop.f32.mrf.mxu1 }
 0x463   : > { %14247 = vst [vmem:[#allocation17_spill] sm:$0xff] %v13856_v0 }
 0x464   : > { %v11610_v9 = vpop.f32.mrf.mxu1 }
 0x465   : > { %v8547_v8 = vadd.f32 %v11610_v9, %v8386_v58  ;;  %v11444_v58 = vadd.f32 %v13708_v22, %v13706_v20 }
 0x466   : > { %v8538_v23 = vpop.f32.mrf.mxu1 }
 0x467   : > { %v8674_v34 = vmul.f32 %v13866_v56, %v8547_v8  ;;  %v8539_v4 = vadd.f32 %v8538_v23, %v13671_v21  ;;  %v8402_v20 = vadd.f32 %v11444_v58, %v13697_v63  ;;  %v11441_v23 = vadd.f32 %v13701_v13, %v13699_v60 }
 0x468   : > { %v11611_v9 = vpop.f32.mrf.mxu1  ;;  %v8405_v63 = vadd.f32 %v11447_v1, %v13704_v6 }
 0x469   : > { %v8713_v2 = vadd.f32 %v13871_v17, %v8674_v34  ;;  %v8672_v0 = vmul.f32 %v13866_v56, %v8539_v4  ;;  %v8550_v18 = vadd.f32 %v11611_v9, %v8389_v46  ;;  %v11450_v4 = vadd.f32 %v13722_v43, %v13720_v16 }
 0x46a   : > { %v8541_v8 = vpop.f32.mrf.mxu1  ;;  %v8397_v3 = vadd.f32 %v11441_v23, %v13690_v15  ;;  %v11453_v15 = vadd.f32 %v13729_v47, %v13727_v11 }
 0x46b   : > { %v8745_v21 = vmax.f32 %v8713_v2, 0.0  ;;  %v8711_v33 = vadd.f32 %v13871_v17, %v8672_v0  ;;  %v8675_v52 = vmul.f32 %v13866_v56, %v8550_v18  ;;  %v8542_v12 = vadd.f32 %v8541_v8, %v13678_v53  ;;  %v13904_v0 = vpop.f32.mrf.mxu0 }
 0x46c   : > { %v11614_v22 = vpop.f32.mrf.mxu1  ;;  %v8410_v31 = vadd.f32 %v11450_v4, %v13711_v55 }
 0x46d   : > { %8777 = vst [vmem:[%s13896_s19 + $0x10] sm:$0xff] %v8745_v21  ;;  %v8743_v32 = vmax.f32 %v8711_v33, 0.0  ;;  %v8714_v29 = vadd.f32 %v13871_v17, %v8675_v52  ;;  %v8673_v2 = vmul.f32 %v13866_v56, %v8542_v12  ;;  %v8563_v53 = vadd.f32 %v11614_v22, %v8402_v20  ;;  %v13917_v21 = vpop.f32.mrf.mxu0 }
 0x46e   : > { %v8554_v18 = vpop.f32.mrf.mxu1  ;;  %v8418_v52 = vadd.f32 %v11456_v36, %v13725_v5  ;;  %v8421_v5 = vadd.f32 %v11459_v50, %v13732_v39 }
 0x46f   : > { %8775 = vst [vmem:[%s13896_s19] sm:$0xff] %v8743_v32  ;;  %v8746_v60 = vmax.f32 %v8714_v29, 0.0  ;;  %v8712_v13 = vadd.f32 %v13871_v17, %v8673_v2  ;;  %v8555_v34 = vadd.f32 %v8554_v18, %v8394_v19  ;;  %v8678_v46 = vmul.f32 %v13866_v56, %v8563_v53  ;;  %v13932_v2 = vpop.f32.mrf.mxu0 }
 0x470   : > { %v11615_v49 = vpop.f32.mrf.mxu1  ;;  %v11468_v32 = vadd.f32 %v13764_v10, %v13762_v62  ;;  %v11462_v18 = vadd.f32 %v13750_v57, %v13748_v42  ;;  %v8413_v62 = vadd.f32 %v11453_v15, %v13718_v38  ;;  %v11480_v15 = vadd.f32 %v13792_v27, %v13790_v24 }
 0x471   : > { %8778 = vst [vmem:[%s13896_s19 + $0x18] sm:$0xff] %v8746_v60  ;;  %v8744_v58 = vmax.f32 %v8712_v13, 0.0  ;;  %v8676_v6 = vmul.f32 %v13866_v56, %v8555_v34  ;;  %v8566_v1 = vadd.f32 %v11615_v49, %v8405_v63  ;;  %v8717_v9 = vadd.f32 %v13871_v17, %v8678_v46  ;;  %v14248_v13 = vld [vmem:[#allocation27_spill] sm:$0xff]  ;;  %v14249_v46 = vld [vmem:[#allocation34_spill] sm:$0xff] }
 0x472   : > { %v8557_v8 = vpop.f32.mrf.mxu1  ;;  %v11471_v34 = vadd.f32 %v14248_v13, %v13769_v35  ;;  %v8434_v49 = vadd.f32 %v11468_v32, %v14249_v46  ;;  %v14258_v46 = vld [vmem:[#allocation29_spill] sm:$0xff] }
 0x473   : > { %8776 = vst [vmem:[%s13896_s19 + $0x8] sm:$0xff] %v8744_v58  ;;  %v8715_v16 = vadd.f32 %v13871_v17, %v8676_v6  ;;  %v8679_v43 = vmul.f32 %v13866_v56, %v8566_v1  ;;  %v8558_v33 = vadd.f32 %v8557_v8, %v8397_v3  ;;  %v8749_v12 = vmax.f32 %v8717_v9, 0.0  ;;  %v13946_v58 = vpop.f32.mrf.mxu0  ;;  %v14250_v1 = vld [vmem:[#allocation23_spill] sm:$0xff]  ;;  %v14251_v3 = vld [vmem:[#allocation24_spill] sm:$0xff]  ;;  %v14252_v8 = vld [vmem:[#allocation22_spill] sm:$0xff] }
 0x474   : > { %v11618_v14 = vpop.f32.mrf.mxu1  ;;  %v11465_v50 = vadd.f32 %v14251_v3, %v14250_v1 }
 0x475   : > { %v8747_v20 = vmax.f32 %v8715_v16, 0.0  ;;  %v8718_v22 = vadd.f32 %v13871_v17, %v8679_v43  ;;  %v8677_v19 = vmul.f32 %v13866_v56, %v8558_v33  ;;  %v8579_v23 = vadd.f32 %v11618_v14, %v8418_v52  ;;  %8781 = vst [vmem:[%s13896_s19 + $0x30] sm:$0xff] %v8749_v12  ;;  %v14253_v14 = vld [vmem:[#allocation36_spill] sm:$0xff] }
 0x476   : > { %v8570_v29 = vpop.f32.mrf.mxu1  ;;  %v8426_v16 = vadd.f32 %v11462_v18, %v14252_v8 }
 0x477   : > { %8779 = vst [vmem:[%s13896_s19 + $0x20] sm:$0xff] %v8747_v20  ;;  %v8750_v11 = vmax.f32 %v8718_v22, 0.0  ;;  %v8716_v55 = vadd.f32 %v13871_v17, %v8677_v19  ;;  %v8682_v47 = vmul.f32 %v13866_v56, %v8579_v23  ;;  %v8571_v53 = vadd.f32 %v8570_v29, %v8410_v31  ;;  %v13960_v20 = vpop.f32.mrf.mxu0  ;;  %v14254_v29 = vld [vmem:[#allocation26_spill] sm:$0xff] }
 0x478   : > { %v11619_v63 = vpop.f32.mrf.mxu1  ;;  %v8437_v31 = vadd.f32 %v11471_v34, %v14253_v14  ;;  %v14262_v14 = vld [vmem:[#allocation31_spill] sm:$0xff] }
 0x479   : > { %8782 = vst [vmem:[%s13896_s19 + $0x38] sm:$0xff] %v8750_v11  ;;  %v8748_v10 = vmax.f32 %v8716_v55, 0.0  ;;  %v8721_v39 = vadd.f32 %v13871_v17, %v8682_v47  ;;  %v8680_v36 = vmul.f32 %v13866_v56, %v8571_v53  ;;  %v8582_v60 = vadd.f32 %v11619_v63, %v8421_v5  ;;  %v14255_v55 = vld [vmem:[#allocation32_spill] sm:$0xff]  ;;  %v14256_v63 = vld [vmem:[#allocation30_spill] sm:$0xff] }
 0x47a   : > { %v8573_v4 = vpop.f32.mrf.mxu1  ;;  %v11474_v5 = vadd.f32 %v14254_v29, %v13776_v41  ;;  %v8429_v47 = vadd.f32 %v11465_v50, %v14255_v55 }
 0x47b   : > { %8780 = vst [vmem:[%s13896_s19 + $0x28] sm:$0xff] %v8748_v10  ;;  %v8753_v42 = vmax.f32 %v8721_v39, 0.0  ;;  %v8719_v38 = vadd.f32 %v13871_v17, %v8680_v36  ;;  %v8683_v57 = vmul.f32 %v13866_v56, %v8582_v60  ;;  %v8574_v6 = vadd.f32 %v8573_v4, %v8413_v62  ;;  %v14257_v39 = vld [vmem:[#allocation28_spill] sm:$0xff]  ;;  %v13974_v60 = vpop.f32.mrf.mxu0 }
 0x47c   : > { %v11622_v9 = vpop.f32.mrf.mxu1  ;;  %v11483_v62 = vadd.f32 %v14256_v63, %v13797_v25  ;;  %v8450_v36 = vadd.f32 %v11480_v15, %v14257_v39 }
 0x47d   : > { %8785 = vst [vmem:[%s13896_s19 + $0x50] sm:$0xff] %v8753_v42  ;;  %v8751_v35 = vmax.f32 %v8719_v38, 0.0  ;;  %v8722_v43 = vadd.f32 %v13871_v17, %v8683_v57  ;;  %v8681_v33 = vmul.f32 %v13866_v56, %v8574_v6  ;;  %v8595_v52 = vadd.f32 %v11622_v9, %v8434_v49  ;;  %v14259_v49 = vld [vmem:[#allocation40_spill] sm:$0xff]  ;;  %v14260_v57 = vld [vmem:[#allocation37_spill] sm:$0xff] }
 0x47e   : > { %v8586_v12 = vpop.f32.mrf.mxu1  ;;  %v11477_v42 = vadd.f32 %v14259_v49, %v14258_v46  ;;  %v8442_v6 = vadd.f32 %v11474_v5, %v14260_v57  ;;  %v11492_v9 = vadd.f32 %v13826_v48, %v13821_v7  ;;  %v14267_v46 = vld [vmem:[#allocation38_spill] sm:$0xff] }
 0x47f   : > { %8783 = vst [vmem:[%s13896_s19 + $0x40] sm:$0xff] %v8751_v35  ;;  %v8754_v22 = vmax.f32 %v8722_v43, 0.0  ;;  %v8720_v19 = vadd.f32 %v13871_v17, %v8681_v33  ;;  %v8686_v23 = vmul.f32 %v13866_v56, %v8595_v52  ;;  %v8587_v32 = vadd.f32 %v8586_v12, %v8426_v16  ;;  %v14261_v16 = vld [vmem:[#allocation43_spill] sm:$0xff]  ;;  %v13988_v43 = vpop.f32.mrf.mxu0 }
 0x480   : > { %v11623_v11 = vpop.f32.mrf.mxu1  ;;  %v8453_v35 = vadd.f32 %v11483_v62, %v14261_v16  ;;  %v14265_v62 = vld [vmem:[#allocation35_spill] sm:$0xff]  ;;  %v11507_v16 = vadd.f32 %v13932_v2, %v13917_v21 }
 0x481   : > { %8786 = vst [vmem:[%s13896_s19 + $0x58] sm:$0xff] %v8754_v22  ;;  %v8752_v24 = vmax.f32 %v8720_v19, 0.0  ;;  %v8725_v27 = vadd.f32 %v13871_v17, %v8686_v23  ;;  %v8684_v53 = vmul.f32 %v13866_v56, %v8587_v32  ;;  %v8598_v18 = vadd.f32 %v11623_v11, %v8437_v31  ;;  %v14263_v31 = vld [vmem:[#allocation33_spill] sm:$0xff]  ;;  %v14270_v21 = vld [vmem:[#allocation39_spill] sm:$0xff] }
 0x482   : > { %v8589_v10 = vpop.f32.mrf.mxu1  ;;  %v11486_v22 = vadd.f32 %v14263_v31, %v14262_v14  ;;  %v14264_v23 = vld [vmem:[#allocation25_spill] sm:$0xff]  ;;  %v11495_v11 = vadd.f32 %v13836_v54, %v13831_v26  ;;  %v11501_v14 = vadd.f32 %v13873_v61, %v13860_v28 }
 0x483   : > { %8784 = vst [vmem:[%s13896_s19 + $0x48] sm:$0xff] %v8752_v24  ;;  %v8757_v41 = vmax.f32 %v8725_v27, 0.0  ;;  %v8723_v13 = vadd.f32 %v13871_v17, %v8684_v53  ;;  %v8687_v34 = vmul.f32 %v13866_v56, %v8598_v18  ;;  %v8590_v4 = vadd.f32 %v8589_v10, %v8429_v47  ;;  %v11514_v24 = vpop.f32.mrf.mxu0  ;;  %v14269_v31 = vld [vmem:[#allocation45_spill] sm:$0xff] }
 0x484   : > { %v11626_v38 = vpop.f32.mrf.mxu1  ;;  %v8445_v32 = vadd.f32 %v11477_v42, %v14264_v23  ;;  %v8466_v47 = vadd.f32 %v11492_v9, %v13809_v44  ;;  %v11489_v10 = vadd.f32 %v13816_v59, %v14265_v62  ;;  %v8469_v49 = vadd.f32 %v11495_v11, %v14267_v46  ;;  %v14274_v62 = vld [vmem:[#allocation17_spill] sm:$0xff] }
 0x485   : > { %8789 = vst [vmem:[%s13896_s19 + $0x70] sm:$0xff] %v8757_v41  ;;  %v8755_v25 = vmax.f32 %v8723_v13, 0.0  ;;  %v8726_v1 = vadd.f32 %v13871_v17, %v8687_v34  ;;  %v8685_v3 = vmul.f32 %v13866_v56, %v8590_v4  ;;  %v8611_v50 = vadd.f32 %v11626_v38, %v8450_v36  ;;  %v14266_v36 = vld [vmem:[#allocation44_spill] sm:$0xff]  ;;  %v11515_v42 = vpop.f32.mrf.mxu0 }
 0x486   : > { %v8602_v8 = vpop.f32.mrf.mxu1  ;;  %v8458_v41 = vadd.f32 %v11486_v22, %v14266_v36  ;;  %v11504_v34 = vadd.f32 %v13904_v0, %v13887_v40  ;;  %v11404_v22 = vadd.f32 %v14269_v31, %v13843_v30 }
 0x487   : > { %8787 = vst [vmem:[%s13896_s19 + $0x60] sm:$0xff] %v8755_v25  ;;  %v8758_v33 = vmax.f32 %v8726_v1, 0.0  ;;  %v8724_v52 = vadd.f32 %v13871_v17, %v8685_v3  ;;  %v8690_v15 = vmul.f32 %v13866_v56, %v8611_v50  ;;  %v8603_v12 = vadd.f32 %v8602_v8, %v8442_v6  ;;  %v14268_v3 = vld [vmem:[#allocation18_spill] sm:$0xff] }
 0x488   : > { %v11627_v19 = vpop.f32.mrf.mxu1  ;;  %v11498_v25 = vadd.f32 %v13852_v51, %v13841_v37  ;;  %v8461_v50 = vadd.f32 %v11489_v10, %v14268_v3 }
 0x489   : > { %8790 = vst [vmem:[%s13896_s19 + $0x78] sm:$0xff] %v8758_v33  ;;  %v8756_v7 = vmax.f32 %v8724_v52, 0.0  ;;  %v8729_v48 = vadd.f32 %v13871_v17, %v8690_v15  ;;  %v8688_v29 = vmul.f32 %v13866_v56, %v8603_v12  ;;  %v8614_v5 = vadd.f32 %v11627_v19, %v8453_v35  ;;  %v11517_v52 = vpop.f32.mrf.mxu0 }
 0x48a   : > { %v8605_v55 = vpop.f32.mrf.mxu1  ;;  %v8482_v33 = vadd.f32 %v11504_v34, %v13829_v45  ;;  %v8474_v2 = vadd.f32 %v11498_v25, %v14270_v21 }
 0x48b   : > { %8788 = vst [vmem:[%s13896_s19 + $0x68] sm:$0xff] %v8756_v7  ;;  %v8761_v27 = vmax.f32 %v8729_v48, 0.0  ;;  %v8727_v53 = vadd.f32 %v13871_v17, %v8688_v29  ;;  %v8691_v18 = vmul.f32 %v13866_v56, %v8614_v5  ;;  %v8606_v63 = vadd.f32 %v8605_v55, %v8445_v32  ;;  %v14271_v5 = vld [vmem:[#allocation42_spill] sm:$0xff]  ;;  %v11518_v55 = vpop.f32.mrf.mxu0 }
 0x48c   : > { %v11630_v39 = vpop.f32.mrf.mxu1  ;;  %v11516_v48 = vadd.f32 %v11515_v42, %v11514_v24  ;;  %v8485_v11 = vadd.f32 %v11507_v16, %v14271_v5  ;;  %v14276_v42 = vld [vmem:[#allocation21_spill] sm:$0xff] }
 0x48d   : > { %8793 = vst [vmem:[%s13896_s19 + $0x90] sm:$0xff] %v8761_v27  ;;  %v8759_v26 = vmax.f32 %v8727_v53, 0.0  ;;  %v8730_v44 = vadd.f32 %v13871_v17, %v8691_v18  ;;  %v8689_v54 = vmul.f32 %v13866_v56, %v8606_v63  ;;  %v8627_v13 = vadd.f32 %v11630_v39, %v8466_v47  ;;  %v14272_v27 = vld [vmem:[#allocation20_spill] sm:$0xff]  ;;  %v14275_v39 = vld [vmem:[#allocation41_spill] sm:$0xff] }
 0x48e   : > { %v8618_v4 = vpop.f32.mrf.mxu1  ;;  %v8337_v53 = vadd.f32 %v11404_v22, %v14272_v27  ;;  %v11510_v18 = vadd.f32 %v13960_v20, %v13946_v58  ;;  %v14273_v63 = vld [vmem:[#allocation16_spill] sm:$0xff]  ;;  %v8477_v36 = vadd.f32 %v11501_v14, %v14275_v39 }
 0x48f   : > { %8791 = vst [vmem:[%s13896_s19 + $0x80] sm:$0xff] %v8759_v26  ;;  %v8762_v59 = vmax.f32 %v8730_v44, 0.0  ;;  %v8728_v38 = vadd.f32 %v13871_v17, %v8689_v54  ;;  %v8694_v57 = vmul.f32 %v13866_v56, %v8627_v13  ;;  %v8619_v6 = vadd.f32 %v8618_v4, %v8458_v41 }
 0x490   : > { %v11631_v1 = vpop.f32.mrf.mxu1  ;;  %v11407_v24 = vadd.f32 %v14274_v62, %v14273_v63  ;;  %v11519_v13 = vadd.f32 %v11518_v55, %v11517_v52  ;;  %v8498_v4 = vadd.f32 %v11516_v48, %v8337_v53 }
 0x491   : > { %8794 = vst [vmem:[%s13896_s19 + $0x98] sm:$0xff] %v8762_v59  ;;  %v8760_v40 = vmax.f32 %v8728_v38, 0.0  ;;  %v8733_v0 = vadd.f32 %v13871_v17, %v8694_v57  ;;  %v8692_v9 = vmul.f32 %v13866_v56, %v8619_v6  ;;  %v8630_v8 = vadd.f32 %v11631_v1, %v8469_v49  ;;  %v14277_v6 = vld [vmem:[#allocation19_spill] sm:$0xff] }
 0x492   : > { %v8621_v35 = vpop.f32.mrf.mxu1  ;;  %v8340_v59 = vadd.f32 %v11407_v24, %v14276_v42  ;;  %v11513_v38 = vadd.f32 %v13988_v43, %v13974_v60  ;;  %v8490_v25 = vadd.f32 %v11510_v18, %v14277_v6 }
 0x493   : > { %8792 = vst [vmem:[%s13896_s19 + $0x88] sm:$0xff] %v8760_v40  ;;  %v8765_v37 = vmax.f32 %v8733_v0, 0.0  ;;  %v8731_v51 = vadd.f32 %v13871_v17, %v8692_v9  ;;  %v8695_v15 = vmul.f32 %v13866_v56, %v8630_v8  ;;  %v8622_v12 = vadd.f32 %v8621_v35, %v8461_v50 }
 0x494   : > { %v11634_v19 = vpop.f32.mrf.mxu1  ;;  %v8501_v9 = vadd.f32 %v11519_v13, %v8340_v59 }
 0x495   : > { %8797 = vst [vmem:[%s13896_s19 + $0xb0] sm:$0xff] %v8765_v37  ;;  %v8763_v45 = vmax.f32 %v8731_v51, 0.0  ;;  %v8734_v23 = vadd.f32 %v13871_v17, %v8695_v15  ;;  %v8693_v32 = vmul.f32 %v13866_v56, %v8622_v12  ;;  %v8643_v7 = vadd.f32 %v11634_v19, %v8482_v33  ;;  %v14278_v33 = vld [vmem:[#allocation46_spill] sm:$0xff] }
 0x496   : > { %v8634_v29 = vpop.f32.mrf.mxu1  ;;  %v8493_v52 = vadd.f32 %v11513_v38, %v14278_v33 }
 0x497   : > { %8795 = vst [vmem:[%s13896_s19 + $0xa0] sm:$0xff] %v8763_v45  ;;  %v8766_v61 = vmax.f32 %v8734_v23, 0.0  ;;  %v8732_v30 = vadd.f32 %v13871_v17, %v8693_v32  ;;  %v8698_v28 = vmul.f32 %v13866_v56, %v8643_v7  ;;  %v8635_v47 = vadd.f32 %v8634_v29, %v8474_v2 }
 0x498   : > { %v11635_v10 = vpop.f32.mrf.mxu1 }
 0x499   : > { %8798 = vst [vmem:[%s13896_s19 + $0xb8] sm:$0xff] %v8766_v61  ;;  %v8764_v41 = vmax.f32 %v8732_v30, 0.0  ;;  %v8737_v26 = vadd.f32 %v13871_v17, %v8698_v28  ;;  %v8696_v44 = vmul.f32 %v13866_v56, %v8635_v47  ;;  %v8646_v54 = vadd.f32 %v11635_v10, %v8485_v11 }
 0x49a   : > { %v8637_v34 = vpop.f32.mrf.mxu1 }
 0x49b   : > { %8796 = vst [vmem:[%s13896_s19 + $0xa8] sm:$0xff] %v8764_v41  ;;  %v8769_v58 = vmax.f32 %v8737_v26, 0.0  ;;  %v8735_v20 = vadd.f32 %v13871_v17, %v8696_v44  ;;  %v8699_v46 = vmul.f32 %v13866_v56, %v8646_v54  ;;  %v8638_v49 = vadd.f32 %v8637_v34, %v8477_v36 }
 0x49c   : > { %v11638_v57 = vpop.f32.mrf.mxu1 }
 0x49d   : > { %8801 = vst [vmem:[%s13896_s19 + $0xd0] sm:$0xff] %v8769_v58  ;;  %v8767_v1 = vmax.f32 %v8735_v20, 0.0  ;;  %v8738_v3 = vadd.f32 %v13871_v17, %v8699_v46  ;;  %v8697_v50 = vmul.f32 %v13866_v56, %v8638_v49  ;;  %v8659_v40 = vadd.f32 %v11638_v57, %v8498_v4 }
 0x49e   : > { %v8650_v0 = vpop.f32.mrf.mxu1 }
 0x49f   : > { %8799 = vst [vmem:[%s13896_s19 + $0xc0] sm:$0xff] %v8767_v1  ;;  %v8770_v8 = vmax.f32 %v8738_v3, 0.0  ;;  %v8736_v16 = vadd.f32 %v13871_v17, %v8697_v50  ;;  %v8702_v60 = vmul.f32 %v13866_v56, %v8659_v40  ;;  %v8651_v43 = vadd.f32 %v8650_v0, %v8490_v25 }
 0x4a0   : > { %v11639_v35 = vpop.f32.mrf.mxu1 }
 0x4a1   : > { %8802 = vst [vmem:[%s13896_s19 + $0xd8] sm:$0xff] %v8770_v8  ;;  %v8768_v37 = vmax.f32 %v8736_v16, 0.0  ;;  %v8741_v51 = vadd.f32 %v13871_v17, %v8702_v60  ;;  %v8700_v15 = vmul.f32 %v13866_v56, %v8651_v43  ;;  %v8662_v12 = vadd.f32 %v11639_v35, %v8501_v9 }
 0x4a2   : > { %v8653_v14 = vpop.f32.mrf.mxu1 }
 0x4a3   : > { %8800 = vst [vmem:[%s13896_s19 + $0xc8] sm:$0xff] %v8768_v37  ;;  %v8773_v31 = vmax.f32 %v8741_v51, 0.0  ;;  %v8739_v22 = vadd.f32 %v13871_v17, %v8700_v15  ;;  %v8703_v19 = vmul.f32 %v13866_v56, %v8662_v12  ;;  %v8654_v21 = vadd.f32 %v8653_v14, %v8493_v52 }
 0x4a5   : > { %8805 = vst [vmem:[%s13896_s19 + $0xf0] sm:$0xff] %v8773_v31  ;;  %v8771_v2 = vmax.f32 %v8739_v22, 0.0  ;;  %v8742_v45 = vadd.f32 %v13871_v17, %v8703_v19  ;;  %v8701_v23 = vmul.f32 %v13866_v56, %v8654_v21 }
 0x4a7   : > { %8803 = vst [vmem:[%s13896_s19 + $0xe0] sm:$0xff] %v8771_v2  ;;  %v8774_v32 = vmax.f32 %v8742_v45, 0.0  ;;  %v8740_v7 = vadd.f32 %v13871_v17, %v8701_v23 }
 0x4a9   : > { %8806 = vst [vmem:[%s13896_s19 + $0xf8] sm:$0xff] %v8774_v32  ;;  %v8772_v48 = vmax.f32 %v8740_v7, 0.0 }
 0x4ab   : > { %8804 = vst [vmem:[%s13896_s19 + $0xe8] sm:$0xff] %v8772_v48 }
 0x4ac   : > { %12392 = shalt.err (!%p12389_p3)
}
 0x4ad   : > { %s12393_s16 = scalar_lea.hbm %s14080_s10, 4096  ;;  %s12397_s15 = scalar_lea.hbm %s14134_s7, 8192 }
 0x4ae   : > { %p12394_p11 = scmp.ne.s32.totalorder %s14080_s10, %s12393_s16  ;;  %p12398_p4 = scmp.lt.s32.totalorder %s14080_s10, %s14134_s7 }
 0x4af   : > { %p12399_p6 = scmp.lt.s32.totalorder %s12397_s15, %s12393_s16 }
 0x4b0   : > { %p12395_p9 = pnand %p12394_p11, %p14279_p2 }
 0x4b1   : > { %p12400_p8 = por %p12399_p6, %p12398_p4 }
 0x4b2   : > { %p12396_p1 = pneg %p12395_p9 }
 0x4b4   : > { %p12401_p5 = pnand %p12400_p8, %p12396_p1 }
 0x4b6   : > { %12404 = shalt.err (!%p12401_p5)
}
 0x4b7   : > { %s12457_s20 = smov 128   ;;  %s12458_s22 = smov 8  }
 0x4b8   : > { %11650 = dma.vmem_to_hbm [thread:$0]  (%p14279_p2), %s14082_s9, 4096, %s14080_s10, %s8808_s29, %s12457_s20, %s12457_s20, %s12458_s22  }
 0x4b9 PF: > { %s8836_s28 = sand.u32 1, %s12435_s24   ;;  %p14280_p7 = scmp.ne.s32.totalorder %s14143_s8, 0 }
 0x4ba   : > { %p14281_p12 = scmp.ge.s32.totalorder %s12447_s27, 2  ;;  %s8837_s21 = scalar_lea.sflag [#allocation8], %s8836_s28 }
 0x4bc   : > { %p11664_p13 = pnand %p14281_p12, %p14280_p7 }
 0x4be   : > { %p11665_p0 = pneg %p11664_p13 }
 0x4c0   : > { %12430 = dma.done.wait (%p11665_p0), %s8837_s21, 4096  }
 0x4c1   : > { %12432 = vsyncadd (%p11665_p0), %s8837_s21, 4294963200  ;;  %p21_p10 = scmp.ge.s32.totalorder %s12577_s23, 4   ;;  %s14282_s24 = smov %s12439_s25 }
 0x4c2   : > { %s14283_s25 = smov %s12443_s26  ;;  %s14284_s26 = smov %s12593_s12 }
 0x4c3   : > { %s14285_s27 = smov %s12577_s23  ;;  %23 = sbr.rel (!%p21_p10) target bundleno = 8 (0x8), region = 107 }
 0x4c8   :  { %8842 = vsyncpa [#allocation7], 1 }
 0x4c9   :  { %8844 = vsyncpa [#allocation7 + $0x1], 1 }
 0x4ca   :  { %8845 = vsyncpa [#allocation10], 1 }
 0x4cb   :  { %8846 = vsyncpa [#allocation8], 1 }
 0x4cc   :  { %8848 = vsyncpa [#allocation8 + $0x1], 1 }

</bundles_post_ra>
